<compile_context>
chip_gen: v7x
topology: tpu7x:2x2x1
jax: 0.10.0
libtpu: 0.0.40
codegen_flags: <defaults>
</compile_context>

<pallas_src>
import functools

import jax
import jax.numpy as jnp
from jax.experimental import pallas as pl
from jax.experimental.pallas import tpu as pltpu

LEAKY_SLOPE = 0.2
IN_EPS = 1e-5


def _round_up(x, m):
    return (x + m - 1) // m * m


def _conv_block_kernel(a_ref, b_ref, bias_ref, o_ref, *, norm, act):
    """out = leaky_relu(instance_norm(A @ B + bias))   (norm/act optional).

    a_ref:    [1, spatial, K]     bf16   (one image's im2col patches)
    b_ref:    [K, Cout_pad]       bf16   (zero-padded to a 128 lane multiple)
    bias_ref: [1, Cout_pad]       f32
    o_ref:    [1, spatial, Cout_pad]
    """
    x = jnp.dot(a_ref[0], b_ref[...], preferred_element_type=jnp.float32)
    x = x + bias_ref[...]                                 # [spatial, Cout_pad]

    if norm:
        # One image per grid step -> plain per-channel spatial reductions.
        # Two-pass variance (numerically safe), f32 throughout.
        mu = jnp.mean(x, axis=0, keepdims=True)           # [1, Cout_pad]
        diff = x - mu
        var = jnp.mean(diff * diff, axis=0, keepdims=True)
        x = diff * jax.lax.rsqrt(var + IN_EPS)

    if act:
        x = jnp.maximum(x, LEAKY_SLOPE * x)

    o_ref[0] = x.astype(o_ref.dtype)


def conv3x3_block(x_nhwc, w, b, *, stride, norm, act, out_dtype):
    """x_nhwc: [N, H, W, Cin]; w: [Cout, Cin, 3, 3]; b: [Cout] -> NHWC out."""
    N, H, W, Cin = x_nhwc.shape
    Cout = w.shape[0]
    Hout = (H + 2 - 3) // stride + 1
    Wout = (W + 2 - 3) // stride + 1
    spatial = Hout * Wout
    K = Cin * 9
    Cp = _round_up(Cout, 128)                 # lane-dense output channels

    # im2col (tiny XLA glue at these shapes -- see TODO at top of file).
    xp = jnp.pad(x_nhwc, ((0, 0), (1, 1), (1, 1), (0, 0)))
    taps = []
    for ky in range(3):
        for kx in range(3):
            taps.append(
                xp[:, ky:ky + (Hout - 1) * stride + 1:stride,
                      kx:kx + (Wout - 1) * stride + 1:stride, :])
    patches = jnp.stack(taps, axis=-1)                      # [N,Ho,Wo,Cin,9]
    a = patches.reshape(N, spatial, K).astype(jnp.bfloat16)

    bmat = w.reshape(Cout, K).T.astype(jnp.bfloat16)        # [K, Cout]
    bias = b.astype(jnp.float32)
    if Cp != Cout:
        bmat = jnp.pad(bmat, ((0, 0), (0, Cp - Cout)))
        bias = jnp.pad(bias, (0, Cp - Cout))
    bias = bias.reshape(1, Cp)

    # Explicit VMEM budget: double-buffered A/out blocks + resident B/bias,
    # plus headroom; clamped to stay within v7x's 64 MiB physical VMEM.
    out_itemsize = jnp.dtype(out_dtype).itemsize
    a_blk = spatial * K * 2
    o_blk = spatial * Cp * out_itemsize
    b_bytes = K * Cp * 2 + Cp * 4
    vmem_bytes = 2 * (a_blk + o_blk + b_bytes) + (2 << 20)
    vmem_bytes = int(min(max(vmem_bytes, 8 << 20), 64 << 20))

    out = pl.pallas_call(
        functools.partial(_conv_block_kernel, norm=norm, act=act),
        out_shape=jax.ShapeDtypeStruct((N, spatial, Cp), out_dtype),
        grid=(N,),
        in_specs=[
            pl.BlockSpec((1, spatial, K), lambda n: (n, 0, 0)),
            pl.BlockSpec((K, Cp), lambda n: (0, 0)),
            pl.BlockSpec((1, Cp), lambda n: (0, 0)),
        ],
        out_specs=pl.BlockSpec((1, spatial, Cp), lambda n: (n, 0, 0)),
        compiler_params=pltpu.CompilerParams(
            dimension_semantics=("parallel",),
            vmem_limit_bytes=vmem_bytes),
    )(a, bmat, bias)

    out = out.reshape(N, Hout, Wout, Cp)
    if Cp != Cout:
        out = out[..., :Cout]
    return out


# (out_filters, stride, normalize) for the five discriminator blocks; the
# final 3x3 stride-1 conv to 1 channel (no norm, no activation) is appended
# separately, mirroring the PyTorch module.
DISC_CFG = [
    (64, 2, False),
    (128, 2, True),
    (256, 2, True),
    (256, 2, True),
    (512, 1, True),
]


def init_discriminator_params(key, in_channels):
    """Deterministic params using PyTorch Conv2d default-init bounds."""
    params = []
    cin = in_channels
    for cout, _, _ in DISC_CFG + [(1, 1, False)]:
        key, wk, bk = jax.random.split(key, 3)
        bound = 1.0 / (cin * 9) ** 0.5
        w = jax.random.uniform(wk, (cout, cin, 3, 3), jnp.float32,
                               -bound, bound)
        bb = jax.random.uniform(bk, (cout,), jnp.float32, -bound, bound)
        params.append((w, bb))
        cin = cout
    return params


def discriminator_forward(x_nchw, params):
    """Replicates Discriminator.forward: [N,C,H,W] -> [N,1,H//16,W//16]."""
    # NOTE: bf16 matmul operands deviate from the f32 PyTorch reference at
    # the ~1e-2 relative level (intentional: MXU-native precision).
    x = jnp.transpose(x_nchw, (0, 2, 3, 1)).astype(jnp.bfloat16)   # NHWC
    for (_, stride, norm), (w, b) in zip(DISC_CFG, params[:-1]):
        x = conv3x3_block(x, w, b, stride=stride, norm=norm, act=True,
                          out_dtype=jnp.bfloat16)
    w, b = params[-1]
    y = conv3x3_block(x, w, b, stride=1, norm=False, act=False,
                      out_dtype=jnp.float32)
    return jnp.transpose(y, (0, 3, 1, 2))                           # NCHW


if __name__ == "__main__":
    key = jax.random.PRNGKey(0)
    kx, kp = jax.random.split(key)
    # input_shape = (3, 32, 32)  -> PatchGAN output_shape (1, 2, 2)
    x = jax.random.uniform(kx, (2, 3, 32, 32), jnp.float32)
    params = init_discriminator_params(kp, in_channels=3)

    out = jax.jit(discriminator_forward)(x, params)
    jax.block_until_ready(out)
    assert out.shape == (2, 1, 2, 2), out.shape
    assert bool(jnp.all(jnp.isfinite(out))), "non-finite output"
    print("KERNEL_OK")
</pallas_src>

<mosaic_0001>
module attributes {stable_mosaic.version = 11 : i64} {
  func.func @_conv_block_kernel(%arg0: i32, %arg1: memref<1x256x27xbf16, #tpu.memory_space<vmem>>, %arg2: memref<27x128xbf16, #tpu.memory_space<vmem>>, %arg3: memref<1x128xf32, #tpu.memory_space<vmem>>, %arg4: memref<1x256x128xbf16, #tpu.memory_space<vmem>>) attributes {dimension_semantics = [#tpu.dimension_semantics<parallel>], iteration_bounds = array<i64: 2>, scalar_prefetch = 0 : i64, scratch_operands = 0 : i64, tpu.core_type = #tpu.core_type<tc>, window_params = [{transform_indices = @transform_0, window_bounds = array<i64: 1, 256, 27>}, {pipeline_mode = #tpu.pipeline_mode<synchronous>, transform_indices = @transform_1, window_bounds = array<i64: 27, 128>}, {pipeline_mode = #tpu.pipeline_mode<synchronous>, transform_indices = @transform_2, window_bounds = array<i64: 1, 128>}, {transform_indices = @transform_3, window_bounds = array<i64: 1, 256, 128>}]} {
    %c0 = arith.constant 0 : index
    %c0_0 = arith.constant 0 : index
    %c0_1 = arith.constant 0 : index
    %0 = vector.load %arg1[%c0, %c0_0, %c0_1] : memref<1x256x27xbf16, #tpu.memory_space<vmem>>, vector<1x256x27xbf16>
    %1 = vector.shape_cast %0 : vector<1x256x27xbf16> to vector<256x27xbf16>
    %c0_2 = arith.constant 0 : index
    %c0_3 = arith.constant 0 : index
    %2 = vector.load %arg2[%c0_2, %c0_3] : memref<27x128xbf16, #tpu.memory_space<vmem>>, vector<27x128xbf16>
    %cst = arith.constant dense<0.000000e+00> : vector<256x128xf32>
    %3 = tpu.matmul %1, %2, %cst {dimension_numbers = #tpu.dot_dimension_numbers<[1], [0], [0], [1], [0, 0, 1, 1], [], []>} : vector<256x27xbf16>, vector<27x128xbf16>, vector<256x128xf32> -> vector<256x128xf32>
    %c0_4 = arith.constant 0 : index
    %c0_5 = arith.constant 0 : index
    %4 = vector.load %arg3[%c0_4, %c0_5] : memref<1x128xf32, #tpu.memory_space<vmem>>, vector<1x128xf32>
    %5 = vector.broadcast %4 : vector<1x128xf32> to vector<256x128xf32>
    %6 = arith.addf %3, %5 : vector<256x128xf32>
    %cst_6 = arith.constant 2.000000e-01 : f32
    %7 = vector.broadcast %cst_6 : f32 to vector<256x128xf32>
    %8 = arith.mulf %7, %6 : vector<256x128xf32>
    %9 = arith.maximumf %6, %8 : vector<256x128xf32>
    %10 = arith.truncf %9 : vector<256x128xf32> to vector<256x128xbf16>
    %c0_7 = arith.constant 0 : index
    %c0_8 = arith.constant 0 : index
    %c0_9 = arith.constant 0 : index
    %11 = vector.load %arg4[%c0_7, %c0_8, %c0_9] : memref<1x256x128xbf16, #tpu.memory_space<vmem>>, vector<1x256x128xbf16>
    %12 = vector.shape_cast %11 : vector<1x256x128xbf16> to vector<256x128xbf16>
    %13 = vector.shape_cast %10 : vector<256x128xbf16> to vector<1x256x128xbf16>
    tpu.vector_store %arg4[%c0_7, %c0_8, %c0_9], %13 {strides = array<i32>} : memref<1x256x128xbf16, #tpu.memory_space<vmem>>, vector<1x256x128xbf16>,
    return
  }
  func.func @transform_0(%arg0: i32) -> (i32, i32, i32) {
    %c0_i32 = arith.constant 0 : i32
    %c0_i32_0 = arith.constant 0 : i32
    %c0_i32_1 = arith.constant 0 : i32
    return %arg0, %c0_i32, %c0_i32_0 : i32, i32, i32
  }
  func.func @transform_1(%arg0: i32) -> (i32, i32) {
    %c0_i32 = arith.constant 0 : i32
    %c0_i32_0 = arith.constant 0 : i32
    %c0_i32_1 = arith.constant 0 : i32
    return %c0_i32, %c0_i32_0 : i32, i32
  }
  func.func @transform_2(%arg0: i32) -> (i32, i32) {
    %c0_i32 = arith.constant 0 : i32
    %c0_i32_0 = arith.constant 0 : i32
    %c0_i32_1 = arith.constant 0 : i32
    return %c0_i32, %c0_i32_0 : i32, i32
  }
  func.func @transform_3(%arg0: i32) -> (i32, i32, i32) {
    %c0_i32 = arith.constant 0 : i32
    %c0_i32_0 = arith.constant 0 : i32
    %c0_i32_1 = arith.constant 0 : i32
    return %arg0, %c0_i32, %c0_i32_0 : i32, i32, i32
  }
}

module attributes {stable_mosaic.version = 11 : i64} {
  func.func @_conv_block_kernel(%arg0: i32, %arg1: memref<1x64x576xbf16, #tpu.memory_space<vmem>>, %arg2: memref<576x128xbf16, #tpu.memory_space<vmem>>, %arg3: memref<1x128xf32, #tpu.memory_space<vmem>>, %arg4: memref<1x64x128xbf16, #tpu.memory_space<vmem>>) attributes {dimension_semantics = [#tpu.dimension_semantics<parallel>], iteration_bounds = array<i64: 2>, scalar_prefetch = 0 : i64, scratch_operands = 0 : i64, tpu.core_type = #tpu.core_type<tc>, window_params = [{transform_indices = @transform_0, window_bounds = array<i64: 1, 64, 576>}, {pipeline_mode = #tpu.pipeline_mode<synchronous>, transform_indices = @transform_1, window_bounds = array<i64: 576, 128>}, {pipeline_mode = #tpu.pipeline_mode<synchronous>, transform_indices = @transform_2, window_bounds = array<i64: 1, 128>}, {transform_indices = @transform_3, window_bounds = array<i64: 1, 64, 128>}]} {
    %c0 = arith.constant 0 : index
    %c0_0 = arith.constant 0 : index
    %c0_1 = arith.constant 0 : index
    %0 = vector.load %arg1[%c0, %c0_0, %c0_1] : memref<1x64x576xbf16, #tpu.memory_space<vmem>>, vector<1x64x576xbf16>
    %1 = vector.shape_cast %0 : vector<1x64x576xbf16> to vector<64x576xbf16>
    %c0_2 = arith.constant 0 : index
    %c0_3 = arith.constant 0 : index
    %2 = vector.load %arg2[%c0_2, %c0_3] : memref<576x128xbf16, #tpu.memory_space<vmem>>, vector<576x128xbf16>
    %cst = arith.constant dense<0.000000e+00> : vector<64x128xf32>
    %3 = tpu.matmul %1, %2, %cst {dimension_numbers = #tpu.dot_dimension_numbers<[1], [0], [0], [1], [0, 0, 1, 1], [], []>} : vector<64x576xbf16>, vector<576x128xbf16>, vector<64x128xf32> -> vector<64x128xf32>
    %c0_4 = arith.constant 0 : index
    %c0_5 = arith.constant 0 : index
    %4 = vector.load %arg3[%c0_4, %c0_5] : memref<1x128xf32, #tpu.memory_space<vmem>>, vector<1x128xf32>
    %5 = vector.broadcast %4 : vector<1x128xf32> to vector<64x128xf32>
    %6 = arith.addf %3, %5 : vector<64x128xf32>
    %cst_6 = arith.constant dense<0.000000e+00> : vector<128xf32>
    %7 = vector.multi_reduction <add>, %6, %cst_6 [0] : vector<64x128xf32> to vector<128xf32>
    %8 = vector.shape_cast %7 : vector<128xf32> to vector<1x128xf32>
    %cst_7 = arith.constant 6.400000e+01 : f32
    %9 = vector.broadcast %cst_7 : f32 to vector<1x128xf32>
    %10 = arith.divf %8, %9 : vector<1x128xf32>
    %11 = vector.broadcast %10 : vector<1x128xf32> to vector<64x128xf32>
    %12 = arith.subf %6, %11 : vector<64x128xf32>
    %13 = arith.mulf %12, %12 : vector<64x128xf32>
    %cst_8 = arith.constant dense<0.000000e+00> : vector<128xf32>
    %14 = vector.multi_reduction <add>, %13, %cst_8 [0] : vector<64x128xf32> to vector<128xf32>
    %15 = vector.shape_cast %14 : vector<128xf32> to vector<1x128xf32>
    %cst_9 = arith.constant 6.400000e+01 : f32
    %16 = vector.broadcast %cst_9 : f32 to vector<1x128xf32>
    %17 = arith.divf %15, %16 : vector<1x128xf32>
    %cst_10 = arith.constant 9.99999974E-6 : f32
    %18 = vector.broadcast %cst_10 : f32 to vector<1x128xf32>
    %19 = arith.addf %17, %18 : vector<1x128xf32>
    %20 = math.rsqrt %19 : vector<1x128xf32>
    %21 = vector.broadcast %20 : vector<1x128xf32> to vector<64x128xf32>
    %22 = arith.mulf %12, %21 : vector<64x128xf32>
    %cst_11 = arith.constant 2.000000e-01 : f32
    %23 = vector.broadcast %cst_11 : f32 to vector<64x128xf32>
    %24 = arith.mulf %23, %22 : vector<64x128xf32>
    %25 = arith.maximumf %22, %24 : vector<64x128xf32>
    %26 = arith.truncf %25 : vector<64x128xf32> to vector<64x128xbf16>
    %c0_12 = arith.constant 0 : index
    %c0_13 = arith.constant 0 : index
    %c0_14 = arith.constant 0 : index
    %27 = vector.load %arg4[%c0_12, %c0_13, %c0_14] : memref<1x64x128xbf16, #tpu.memory_space<vmem>>, vector<1x64x128xbf16>
    %28 = vector.shape_cast %27 : vector<1x64x128xbf16> to vector<64x128xbf16>
    %29 = vector.shape_cast %26 : vector<64x128xbf16> to vector<1x64x128xbf16>
    tpu.vector_store %arg4[%c0_12, %c0_13, %c0_14], %29 {strides = array<i32>} : memref<1x64x128xbf16, #tpu.memory_space<vmem>>, vector<1x64x128xbf16>,
    return
  }
  func.func @transform_0(%arg0: i32) -> (i32, i32, i32) {
    %c0_i32 = arith.constant 0 : i32
    %c0_i32_0 = arith.constant 0 : i32
    %c0_i32_1 = arith.constant 0 : i32
    return %arg0, %c0_i32, %c0_i32_0 : i32, i32, i32
  }
  func.func @transform_1(%arg0: i32) -> (i32, i32) {
    %c0_i32 = arith.constant 0 : i32
    %c0_i32_0 = arith.constant 0 : i32
    %c0_i32_1 = arith.constant 0 : i32
    return %c0_i32, %c0_i32_0 : i32, i32
  }
  func.func @transform_2(%arg0: i32) -> (i32, i32) {
    %c0_i32 = arith.constant 0 : i32
    %c0_i32_0 = arith.constant 0 : i32
    %c0_i32_1 = arith.constant 0 : i32
    return %c0_i32, %c0_i32_0 : i32, i32
  }
  func.func @transform_3(%arg0: i32) -> (i32, i32, i32) {
    %c0_i32 = arith.constant 0 : i32
    %c0_i32_0 = arith.constant 0 : i32
    %c0_i32_1 = arith.constant 0 : i32
    return %arg0, %c0_i32, %c0_i32_0 : i32, i32, i32
  }
}

module attributes {stable_mosaic.version = 11 : i64} {
  func.func @_conv_block_kernel(%arg0: i32, %arg1: memref<1x16x1152xbf16, #tpu.memory_space<vmem>>, %arg2: memref<1152x256xbf16, #tpu.memory_space<vmem>>, %arg3: memref<1x256xf32, #tpu.memory_space<vmem>>, %arg4: memref<1x16x256xbf16, #tpu.memory_space<vmem>>) attributes {dimension_semantics = [#tpu.dimension_semantics<parallel>], iteration_bounds = array<i64: 2>, scalar_prefetch = 0 : i64, scratch_operands = 0 : i64, tpu.core_type = #tpu.core_type<tc>, window_params = [{transform_indices = @transform_0, window_bounds = array<i64: 1, 16, 1152>}, {pipeline_mode = #tpu.pipeline_mode<synchronous>, transform_indices = @transform_1, window_bounds = array<i64: 1152, 256>}, {pipeline_mode = #tpu.pipeline_mode<synchronous>, transform_indices = @transform_2, window_bounds = array<i64: 1, 256>}, {transform_indices = @transform_3, window_bounds = array<i64: 1, 16, 256>}]} {
    %c0 = arith.constant 0 : index
    %c0_0 = arith.constant 0 : index
    %c0_1 = arith.constant 0 : index
    %0 = vector.load %arg1[%c0, %c0_0, %c0_1] : memref<1x16x1152xbf16, #tpu.memory_space<vmem>>, vector<1x16x1152xbf16>
    %1 = vector.shape_cast %0 : vector<1x16x1152xbf16> to vector<16x1152xbf16>
    %c0_2 = arith.constant 0 : index
    %c0_3 = arith.constant 0 : index
    %2 = vector.load %arg2[%c0_2, %c0_3] : memref<1152x256xbf16, #tpu.memory_space<vmem>>, vector<1152x256xbf16>
    %cst = arith.constant dense<0.000000e+00> : vector<16x256xf32>
    %3 = tpu.matmul %1, %2, %cst {dimension_numbers = #tpu.dot_dimension_numbers<[1], [0], [0], [1], [0, 0, 1, 1], [], []>} : vector<16x1152xbf16>, vector<1152x256xbf16>, vector<16x256xf32> -> vector<16x256xf32>
    %c0_4 = arith.constant 0 : index
    %c0_5 = arith.constant 0 : index
    %4 = vector.load %arg3[%c0_4, %c0_5] : memref<1x256xf32, #tpu.memory_space<vmem>>, vector<1x256xf32>
    %5 = vector.broadcast %4 : vector<1x256xf32> to vector<16x256xf32>
    %6 = arith.addf %3, %5 : vector<16x256xf32>
    %cst_6 = arith.constant dense<0.000000e+00> : vector<256xf32>
    %7 = vector.multi_reduction <add>, %6, %cst_6 [0] : vector<16x256xf32> to vector<256xf32>
    %8 = vector.shape_cast %7 : vector<256xf32> to vector<1x256xf32>
    %cst_7 = arith.constant 1.600000e+01 : f32
    %9 = vector.broadcast %cst_7 : f32 to vector<1x256xf32>
    %10 = arith.divf %8, %9 : vector<1x256xf32>
    %11 = vector.broadcast %10 : vector<1x256xf32> to vector<16x256xf32>
    %12 = arith.subf %6, %11 : vector<16x256xf32>
    %13 = arith.mulf %12, %12 : vector<16x256xf32>
    %cst_8 = arith.constant dense<0.000000e+00> : vector<256xf32>
    %14 = vector.multi_reduction <add>, %13, %cst_8 [0] : vector<16x256xf32> to vector<256xf32>
    %15 = vector.shape_cast %14 : vector<256xf32> to vector<1x256xf32>
    %cst_9 = arith.constant 1.600000e+01 : f32
    %16 = vector.broadcast %cst_9 : f32 to vector<1x256xf32>
    %17 = arith.divf %15, %16 : vector<1x256xf32>
    %cst_10 = arith.constant 9.99999974E-6 : f32
    %18 = vector.broadcast %cst_10 : f32 to vector<1x256xf32>
    %19 = arith.addf %17, %18 : vector<1x256xf32>
    %20 = math.rsqrt %19 : vector<1x256xf32>
    %21 = vector.broadcast %20 : vector<1x256xf32> to vector<16x256xf32>
    %22 = arith.mulf %12, %21 : vector<16x256xf32>
    %cst_11 = arith.constant 2.000000e-01 : f32
    %23 = vector.broadcast %cst_11 : f32 to vector<16x256xf32>
    %24 = arith.mulf %23, %22 : vector<16x256xf32>
    %25 = arith.maximumf %22, %24 : vector<16x256xf32>
    %26 = arith.truncf %25 : vector<16x256xf32> to vector<16x256xbf16>
    %c0_12 = arith.constant 0 : index
    %c0_13 = arith.constant 0 : index
    %c0_14 = arith.constant 0 : index
    %27 = vector.load %arg4[%c0_12, %c0_13, %c0_14] : memref<1x16x256xbf16, #tpu.memory_space<vmem>>, vector<1x16x256xbf16>
    %28 = vector.shape_cast %27 : vector<1x16x256xbf16> to vector<16x256xbf16>
    %29 = vector.shape_cast %26 : vector<16x256xbf16> to vector<1x16x256xbf16>
    tpu.vector_store %arg4[%c0_12, %c0_13, %c0_14], %29 {strides = array<i32>} : memref<1x16x256xbf16, #tpu.memory_space<vmem>>, vector<1x16x256xbf16>,
    return
  }
  func.func @transform_0(%arg0: i32) -> (i32, i32, i32) {
    %c0_i32 = arith.constant 0 : i32
    %c0_i32_0 = arith.constant 0 : i32
    %c0_i32_1 = arith.constant 0 : i32
    return %arg0, %c0_i32, %c0_i32_0 : i32, i32, i32
  }
  func.func @transform_1(%arg0: i32) -> (i32, i32) {
    %c0_i32 = arith.constant 0 : i32
    %c0_i32_0 = arith.constant 0 : i32
    %c0_i32_1 = arith.constant 0 : i32
    return %c0_i32, %c0_i32_0 : i32, i32
  }
  func.func @transform_2(%arg0: i32) -> (i32, i32) {
    %c0_i32 = arith.constant 0 : i32
    %c0_i32_0 = arith.constant 0 : i32
    %c0_i32_1 = arith.constant 0 : i32
    return %c0_i32, %c0_i32_0 : i32, i32
  }
  func.func @transform_3(%arg0: i32) -> (i32, i32, i32) {
    %c0_i32 = arith.constant 0 : i32
    %c0_i32_0 = arith.constant 0 : i32
    %c0_i32_1 = arith.constant 0 : i32
    return %arg0, %c0_i32, %c0_i32_0 : i32, i32, i32
  }
}

module attributes {stable_mosaic.version = 11 : i64} {
  func.func @_conv_block_kernel(%arg0: i32, %arg1: memref<1x4x2304xbf16, #tpu.memory_space<vmem>>, %arg2: memref<2304x256xbf16, #tpu.memory_space<vmem>>, %arg3: memref<1x256xf32, #tpu.memory_space<vmem>>, %arg4: memref<1x4x256xbf16, #tpu.memory_space<vmem>>) attributes {dimension_semantics = [#tpu.dimension_semantics<parallel>], iteration_bounds = array<i64: 2>, scalar_prefetch = 0 : i64, scratch_operands = 0 : i64, tpu.core_type = #tpu.core_type<tc>, window_params = [{transform_indices = @transform_0, window_bounds = array<i64: 1, 4, 2304>}, {pipeline_mode = #tpu.pipeline_mode<synchronous>, transform_indices = @transform_1, window_bounds = array<i64: 2304, 256>}, {pipeline_mode = #tpu.pipeline_mode<synchronous>, transform_indices = @transform_2, window_bounds = array<i64: 1, 256>}, {transform_indices = @transform_3, window_bounds = array<i64: 1, 4, 256>}]} {
    %c0 = arith.constant 0 : index
    %c0_0 = arith.constant 0 : index
    %c0_1 = arith.constant 0 : index
    %0 = vector.load %arg1[%c0, %c0_0, %c0_1] : memref<1x4x2304xbf16, #tpu.memory_space<vmem>>, vector<1x4x2304xbf16>
    %1 = vector.shape_cast %0 : vector<1x4x2304xbf16> to vector<4x2304xbf16>
    %c0_2 = arith.constant 0 : index
    %c0_3 = arith.constant 0 : index
    %2 = vector.load %arg2[%c0_2, %c0_3] : memref<2304x256xbf16, #tpu.memory_space<vmem>>, vector<2304x256xbf16>
    %cst = arith.constant dense<0.000000e+00> : vector<4x256xf32>
    %3 = tpu.matmul %1, %2, %cst {dimension_numbers = #tpu.dot_dimension_numbers<[1], [0], [0], [1], [0, 0, 1, 1], [], []>} : vector<4x2304xbf16>, vector<2304x256xbf16>, vector<4x256xf32> -> vector<4x256xf32>
    %c0_4 = arith.constant 0 : index
    %c0_5 = arith.constant 0 : index
    %4 = vector.load %arg3[%c0_4, %c0_5] : memref<1x256xf32, #tpu.memory_space<vmem>>, vector<1x256xf32>
    %5 = vector.broadcast %4 : vector<1x256xf32> to vector<4x256xf32>
    %6 = arith.addf %3, %5 : vector<4x256xf32>
    %cst_6 = arith.constant dense<0.000000e+00> : vector<256xf32>
    %7 = vector.multi_reduction <add>, %6, %cst_6 [0] : vector<4x256xf32> to vector<256xf32>
    %8 = vector.shape_cast %7 : vector<256xf32> to vector<1x256xf32>
    %cst_7 = arith.constant 4.000000e+00 : f32
    %9 = vector.broadcast %cst_7 : f32 to vector<1x256xf32>
    %10 = arith.divf %8, %9 : vector<1x256xf32>
    %11 = vector.broadcast %10 : vector<1x256xf32> to vector<4x256xf32>
    %12 = arith.subf %6, %11 : vector<4x256xf32>
    %13 = arith.mulf %12, %12 : vector<4x256xf32>
    %cst_8 = arith.constant dense<0.000000e+00> : vector<256xf32>
    %14 = vector.multi_reduction <add>, %13, %cst_8 [0] : vector<4x256xf32> to vector<256xf32>
    %15 = vector.shape_cast %14 : vector<256xf32> to vector<1x256xf32>
    %cst_9 = arith.constant 4.000000e+00 : f32
    %16 = vector.broadcast %cst_9 : f32 to vector<1x256xf32>
    %17 = arith.divf %15, %16 : vector<1x256xf32>
    %cst_10 = arith.constant 9.99999974E-6 : f32
    %18 = vector.broadcast %cst_10 : f32 to vector<1x256xf32>
    %19 = arith.addf %17, %18 : vector<1x256xf32>
    %20 = math.rsqrt %19 : vector<1x256xf32>
    %21 = vector.broadcast %20 : vector<1x256xf32> to vector<4x256xf32>
    %22 = arith.mulf %12, %21 : vector<4x256xf32>
    %cst_11 = arith.constant 2.000000e-01 : f32
    %23 = vector.broadcast %cst_11 : f32 to vector<4x256xf32>
    %24 = arith.mulf %23, %22 : vector<4x256xf32>
    %25 = arith.maximumf %22, %24 : vector<4x256xf32>
    %26 = arith.truncf %25 : vector<4x256xf32> to vector<4x256xbf16>
    %c0_12 = arith.constant 0 : index
    %c0_13 = arith.constant 0 : index
    %c0_14 = arith.constant 0 : index
    %27 = vector.load %arg4[%c0_12, %c0_13, %c0_14] : memref<1x4x256xbf16, #tpu.memory_space<vmem>>, vector<1x4x256xbf16>
    %28 = vector.shape_cast %27 : vector<1x4x256xbf16> to vector<4x256xbf16>
    %29 = vector.shape_cast %26 : vector<4x256xbf16> to vector<1x4x256xbf16>
    tpu.vector_store %arg4[%c0_12, %c0_13, %c0_14], %29 {strides = array<i32>} : memref<1x4x256xbf16, #tpu.memory_space<vmem>>, vector<1x4x256xbf16>,
    return
  }
  func.func @transform_0(%arg0: i32) -> (i32, i32, i32) {
    %c0_i32 = arith.constant 0 : i32
    %c0_i32_0 = arith.constant 0 : i32
    %c0_i32_1 = arith.constant 0 : i32
    return %arg0, %c0_i32, %c0_i32_0 : i32, i32, i32
  }
  func.func @transform_1(%arg0: i32) -> (i32, i32) {
    %c0_i32 = arith.constant 0 : i32
    %c0_i32_0 = arith.constant 0 : i32
    %c0_i32_1 = arith.constant 0 : i32
    return %c0_i32, %c0_i32_0 : i32, i32
  }
  func.func @transform_2(%arg0: i32) -> (i32, i32) {
    %c0_i32 = arith.constant 0 : i32
    %c0_i32_0 = arith.constant 0 : i32
    %c0_i32_1 = arith.constant 0 : i32
    return %c0_i32, %c0_i32_0 : i32, i32
  }
  func.func @transform_3(%arg0: i32) -> (i32, i32, i32) {
    %c0_i32 = arith.constant 0 : i32
    %c0_i32_0 = arith.constant 0 : i32
    %c0_i32_1 = arith.constant 0 : i32
    return %arg0, %c0_i32, %c0_i32_0 : i32, i32, i32
  }
}

module attributes {stable_mosaic.version = 11 : i64} {
  func.func @_conv_block_kernel(%arg0: i32, %arg1: memref<1x4x2304xbf16, #tpu.memory_space<vmem>>, %arg2: memref<2304x512xbf16, #tpu.memory_space<vmem>>, %arg3: memref<1x512xf32, #tpu.memory_space<vmem>>, %arg4: memref<1x4x512xbf16, #tpu.memory_space<vmem>>) attributes {dimension_semantics = [#tpu.dimension_semantics<parallel>], iteration_bounds = array<i64: 2>, scalar_prefetch = 0 : i64, scratch_operands = 0 : i64, tpu.core_type = #tpu.core_type<tc>, window_params = [{transform_indices = @transform_0, window_bounds = array<i64: 1, 4, 2304>}, {pipeline_mode = #tpu.pipeline_mode<synchronous>, transform_indices = @transform_1, window_bounds = array<i64: 2304, 512>}, {pipeline_mode = #tpu.pipeline_mode<synchronous>, transform_indices = @transform_2, window_bounds = array<i64: 1, 512>}, {transform_indices = @transform_3, window_bounds = array<i64: 1, 4, 512>}]} {
    %c0 = arith.constant 0 : index
    %c0_0 = arith.constant 0 : index
    %c0_1 = arith.constant 0 : index
    %0 = vector.load %arg1[%c0, %c0_0, %c0_1] : memref<1x4x2304xbf16, #tpu.memory_space<vmem>>, vector<1x4x2304xbf16>
    %1 = vector.shape_cast %0 : vector<1x4x2304xbf16> to vector<4x2304xbf16>
    %c0_2 = arith.constant 0 : index
    %c0_3 = arith.constant 0 : index
    %2 = vector.load %arg2[%c0_2, %c0_3] : memref<2304x512xbf16, #tpu.memory_space<vmem>>, vector<2304x512xbf16>
    %cst = arith.constant dense<0.000000e+00> : vector<4x512xf32>
    %3 = tpu.matmul %1, %2, %cst {dimension_numbers = #tpu.dot_dimension_numbers<[1], [0], [0], [1], [0, 0, 1, 1], [], []>} : vector<4x2304xbf16>, vector<2304x512xbf16>, vector<4x512xf32> -> vector<4x512xf32>
    %c0_4 = arith.constant 0 : index
    %c0_5 = arith.constant 0 : index
    %4 = vector.load %arg3[%c0_4, %c0_5] : memref<1x512xf32, #tpu.memory_space<vmem>>, vector<1x512xf32>
    %5 = vector.broadcast %4 : vector<1x512xf32> to vector<4x512xf32>
    %6 = arith.addf %3, %5 : vector<4x512xf32>
    %cst_6 = arith.constant dense<0.000000e+00> : vector<512xf32>
    %7 = vector.multi_reduction <add>, %6, %cst_6 [0] : vector<4x512xf32> to vector<512xf32>
    %8 = vector.shape_cast %7 : vector<512xf32> to vector<1x512xf32>
    %cst_7 = arith.constant 4.000000e+00 : f32
    %9 = vector.broadcast %cst_7 : f32 to vector<1x512xf32>
    %10 = arith.divf %8, %9 : vector<1x512xf32>
    %11 = vector.broadcast %10 : vector<1x512xf32> to vector<4x512xf32>
    %12 = arith.subf %6, %11 : vector<4x512xf32>
    %13 = arith.mulf %12, %12 : vector<4x512xf32>
    %cst_8 = arith.constant dense<0.000000e+00> : vector<512xf32>
    %14 = vector.multi_reduction <add>, %13, %cst_8 [0] : vector<4x512xf32> to vector<512xf32>
    %15 = vector.shape_cast %14 : vector<512xf32> to vector<1x512xf32>
    %cst_9 = arith.constant 4.000000e+00 : f32
    %16 = vector.broadcast %cst_9 : f32 to vector<1x512xf32>
    %17 = arith.divf %15, %16 : vector<1x512xf32>
    %cst_10 = arith.constant 9.99999974E-6 : f32
    %18 = vector.broadcast %cst_10 : f32 to vector<1x512xf32>
    %19 = arith.addf %17, %18 : vector<1x512xf32>
    %20 = math.rsqrt %19 : vector<1x512xf32>
    %21 = vector.broadcast %20 : vector<1x512xf32> to vector<4x512xf32>
    %22 = arith.mulf %12, %21 : vector<4x512xf32>
    %cst_11 = arith.constant 2.000000e-01 : f32
    %23 = vector.broadcast %cst_11 : f32 to vector<4x512xf32>
    %24 = arith.mulf %23, %22 : vector<4x512xf32>
    %25 = arith.maximumf %22, %24 : vector<4x512xf32>
    %26 = arith.truncf %25 : vector<4x512xf32> to vector<4x512xbf16>
    %c0_12 = arith.constant 0 : index
    %c0_13 = arith.constant 0 : index
    %c0_14 = arith.constant 0 : index
    %27 = vector.load %arg4[%c0_12, %c0_13, %c0_14] : memref<1x4x512xbf16, #tpu.memory_space<vmem>>, vector<1x4x512xbf16>
    %28 = vector.shape_cast %27 : vector<1x4x512xbf16> to vector<4x512xbf16>
    %29 = vector.shape_cast %26 : vector<4x512xbf16> to vector<1x4x512xbf16>
    tpu.vector_store %arg4[%c0_12, %c0_13, %c0_14], %29 {strides = array<i32>} : memref<1x4x512xbf16, #tpu.memory_space<vmem>>, vector<1x4x512xbf16>,
    return
  }
  func.func @transform_0(%arg0: i32) -> (i32, i32, i32) {
    %c0_i32 = arith.constant 0 : i32
    %c0_i32_0 = arith.constant 0 : i32
    %c0_i32_1 = arith.constant 0 : i32
    return %arg0, %c0_i32, %c0_i32_0 : i32, i32, i32
  }
  func.func @transform_1(%arg0: i32) -> (i32, i32) {
    %c0_i32 = arith.constant 0 : i32
    %c0_i32_0 = arith.constant 0 : i32
    %c0_i32_1 = arith.constant 0 : i32
    return %c0_i32, %c0_i32_0 : i32, i32
  }
  func.func @transform_2(%arg0: i32) -> (i32, i32) {
    %c0_i32 = arith.constant 0 : i32
    %c0_i32_0 = arith.constant 0 : i32
    %c0_i32_1 = arith.constant 0 : i32
    return %c0_i32, %c0_i32_0 : i32, i32
  }
  func.func @transform_3(%arg0: i32) -> (i32, i32, i32) {
    %c0_i32 = arith.constant 0 : i32
    %c0_i32_0 = arith.constant 0 : i32
    %c0_i32_1 = arith.constant 0 : i32
    return %arg0, %c0_i32, %c0_i32_0 : i32, i32, i32
  }
}

module attributes {stable_mosaic.version = 11 : i64} {
  func.func @_conv_block_kernel(%arg0: i32, %arg1: memref<1x4x4608xbf16, #tpu.memory_space<vmem>>, %arg2: memref<4608x128xbf16, #tpu.memory_space<vmem>>, %arg3: memref<1x128xf32, #tpu.memory_space<vmem>>, %arg4: memref<1x4x128xf32, #tpu.memory_space<vmem>>) attributes {dimension_semantics = [#tpu.dimension_semantics<parallel>], iteration_bounds = array<i64: 2>, scalar_prefetch = 0 : i64, scratch_operands = 0 : i64, tpu.core_type = #tpu.core_type<tc>, window_params = [{transform_indices = @transform_0, window_bounds = array<i64: 1, 4, 4608>}, {pipeline_mode = #tpu.pipeline_mode<synchronous>, transform_indices = @transform_1, window_bounds = array<i64: 4608, 128>}, {pipeline_mode = #tpu.pipeline_mode<synchronous>, transform_indices = @transform_2, window_bounds = array<i64: 1, 128>}, {transform_indices = @transform_3, window_bounds = array<i64: 1, 4, 128>}]} {
    %c0 = arith.constant 0 : index
    %c0_0 = arith.constant 0 : index
    %c0_1 = arith.constant 0 : index
    %0 = vector.load %arg1[%c0, %c0_0, %c0_1] : memref<1x4x4608xbf16, #tpu.memory_space<vmem>>, vector<1x4x4608xbf16>
    %1 = vector.shape_cast %0 : vector<1x4x4608xbf16> to vector<4x4608xbf16>
    %c0_2 = arith.constant 0 : index
    %c0_3 = arith.constant 0 : index
    %2 = vector.load %arg2[%c0_2, %c0_3] : memref<4608x128xbf16, #tpu.memory_space<vmem>>, vector<4608x128xbf16>
    %cst = arith.constant dense<0.000000e+00> : vector<4x128xf32>
    %3 = tpu.matmul %1, %2, %cst {dimension_numbers = #tpu.dot_dimension_numbers<[1], [0], [0], [1], [0, 0, 1, 1], [], []>} : vector<4x4608xbf16>, vector<4608x128xbf16>, vector<4x128xf32> -> vector<4x128xf32>
    %c0_4 = arith.constant 0 : index
    %c0_5 = arith.constant 0 : index
    %4 = vector.load %arg3[%c0_4, %c0_5] : memref<1x128xf32, #tpu.memory_space<vmem>>, vector<1x128xf32>
    %5 = vector.broadcast %4 : vector<1x128xf32> to vector<4x128xf32>
    %6 = arith.addf %3, %5 : vector<4x128xf32>
    %c0_6 = arith.constant 0 : index
    %c0_7 = arith.constant 0 : index
    %c0_8 = arith.constant 0 : index
    %7 = vector.load %arg4[%c0_6, %c0_7, %c0_8] : memref<1x4x128xf32, #tpu.memory_space<vmem>>, vector<1x4x128xf32>
    %8 = vector.shape_cast %7 : vector<1x4x128xf32> to vector<4x128xf32>
    %9 = vector.shape_cast %6 : vector<4x128xf32> to vector<1x4x128xf32>
    tpu.vector_store %arg4[%c0_6, %c0_7, %c0_8], %9 {strides = array<i32>} : memref<1x4x128xf32, #tpu.memory_space<vmem>>, vector<1x4x128xf32>,
    return
  }
  func.func @transform_0(%arg0: i32) -> (i32, i32, i32) {
    %c0_i32 = arith.constant 0 : i32
    %c0_i32_0 = arith.constant 0 : i32
    %c0_i32_1 = arith.constant 0 : i32
    return %arg0, %c0_i32, %c0_i32_0 : i32, i32, i32
  }
  func.func @transform_1(%arg0: i32) -> (i32, i32) {
    %c0_i32 = arith.constant 0 : i32
    %c0_i32_0 = arith.constant 0 : i32
    %c0_i32_1 = arith.constant 0 : i32
    return %c0_i32, %c0_i32_0 : i32, i32
  }
  func.func @transform_2(%arg0: i32) -> (i32, i32) {
    %c0_i32 = arith.constant 0 : i32
    %c0_i32_0 = arith.constant 0 : i32
    %c0_i32_1 = arith.constant 0 : i32
    return %c0_i32, %c0_i32_0 : i32, i32
  }
  func.func @transform_3(%arg0: i32) -> (i32, i32, i32) {
    %c0_i32 = arith.constant 0 : i32
    %c0_i32_0 = arith.constant 0 : i32
    %c0_i32_1 = arith.constant 0 : i32
    return %arg0, %c0_i32, %c0_i32_0 : i32, i32, i32
  }
}

</mosaic_0001>

<bundles_post_ra>
// kernel: discriminator_forward.6
= control target key start
LH: loop header
LB: loop body
LE: loop exit
PB: predicated region body
PF: predicated region fallthrough
CT: control target
= control target key end

     0   :  { %s1123_s12 = smov 0   ;;  %s1242_s0 = inlined_call_operand.vmem [shape: bf16[2,256,27], index: 0, kind: input, shape index: {}]   ;;  %s1243_s1 = inlined_call_operand.vmem [shape: bf16[27,128], index: 1, kind: input, shape index: {}]   ;;  %s1244_s2 = inlined_call_operand.vmem [shape: f32[1,128], index: 2, kind: input, shape index: {}]   ;;  %s1245_s3 = inlined_call_operand.vmem [shape: bf16[2,256,128], index: 3, kind: output, shape index: {}]  }
   0x1 LB: > { %s802_s13 = sadd.s32 4294967295, %s1100_s12   ;;  %p806_p0 = scmp.ge.s32.totalorder %s1100_s12, 1  ;;  %s1100_s12 = sphi %s1123_s12, %s13_s12  }
   0x2   : > { %p137_p1 = scmp.lt.s32.totalorder %s1100_s12, 3 }
   0x4   : > { %p138_p2 = pnand %p806_p0, %p137_p1 }
   0x5   : > { %v1076_v0 = vld [vmem:[%s1243_s1] sm:$0xff] (!%p138_p2)   ;;  %vm355_vm0 = vcmask (!%p138_p2), 1044480   ;;  %v1077_v1 = vld [vmem:[%s1243_s1 + $0x8] sm:$0x3f] (!%p138_p2)   ;;  %vm356_vm1 = vcmask (!%p138_p2), 1045504   ;;  %p161_p3 = scmp.lt.s32.totalorder (!%p138_p2), %s802_s13, 1 }
   0x6   : > { %141 = sbr.rel (%p138_p2) target bundleno = 267 (0x10b), region = 32  ;;  %1027 = vmatprep.subr.bf16.mxu0 (!%p138_p2), %v1076_v0  ;;  %1063 = vmatprep.subr.bf16.mxu1 (!%p138_p2), %v1076_v0  ;;  %v1102_v2 = vmov (!%p138_p2), 65535   ;;  %vm306_vm2 = vcmask (!%p138_p2), 220160   ;;  %v1182_v22 = vld [vmem:[%s1244_s2] ss:$0 sm:$0xff] (!%p138_p2) }
   0x7   : > { %1028 = vmatpush3.bf16.msra.mxu0 (!%p138_p2), %v1076_v0  ;;  %1065 = vmatpush3.bf16.msra.mxu1 (!%p138_p2), %v1076_v0  ;;  %v357_v3 = vsel (!%p138_p2), %vm355_vm0, 4294967295, %v1102_v2 }
   0x8   : > { %v358_v4 = vsel (!%p138_p2), %vm356_vm1, %v357_v3, 0 }
   0x9   : > { %v360_v5 = vand.u32 (!%p138_p2), %v1077_v1, %v358_v4 }
   0xb   : > { %1029 = vmatprep.subr.bf16.mxu0 (!%p138_p2), %v360_v5  ;;  %1064 = vmatprep.subr.bf16.mxu1 (!%p138_p2), %v360_v5 }
   0xc   : > { %1030 = vmatpush3.bf16.msra.mxu0 (!%p138_p2), %v360_v5  ;;  %1066 = vmatpush3.bf16.msra.mxu1 (!%p138_p2), %v360_v5 }
   0xd   : > { %s1247_s13 = smov (!%p161_p3, %s802_s13), 1 }
   0xe   : > { %s880_s18 = sshll.u32 %s1247_s13, 7 }
   0xf   : > { %s1145_s21 = scalar_lea.vmem %s1242_s0, %s880_s18  ;;  %s1197_s26 = scalar_lea.vmem %s1245_s3, %s880_s18 }
  0x10   : > { %v1078_v6 = vld [vmem:[%s1145_s21] sm:$0xff]   ;;  %v1080_v8 = vld [vmem:[%s1145_s21 + $0x8] sm:$0xff]   ;;  %v1082_v10 = vld [vmem:[%s1145_s21 + $0x10] sm:$0xff]  }
  0x11   : > { %v1079_v7 = vld [vmem:[%s1145_s21 + $0x40] sm:$0xff]   ;;  %1031 = vmatprep.mubr.msk.bf16.mxu0 %vm306_vm2, %v1078_v6  ;;  %v1081_v9 = vld [vmem:[%s1145_s21 + $0x48] sm:$0xff]   ;;  %v1083_v11 = vld [vmem:[%s1145_s21 + $0x50] sm:$0xff]  }
  0x12   : > { %1047 = vmatprep.mubr.msk.bf16.mxu1 %vm306_vm2, %v1079_v7  ;;  %1032 = vmatmul.mubr.msk.bf16.vlgmr.msra.gmra.mrb[0].mxu0 %vm306_vm2, %v1080_v8  ;;  %v1084_v12 = vld [vmem:[%s1145_s21 + $0x18] sm:$0xff]   ;;  %v1086_v14 = vld [vmem:[%s1145_s21 + $0x20] sm:$0xff]   ;;  %v1088_v16 = vld [vmem:[%s1145_s21 + $0x28] sm:$0xff]  }
  0x13   : > { %1048 = vmatmul.mubr.msk.bf16.vlgmr.msra.gmra.mrb[0].mxu1 %vm306_vm2, %v1081_v9  ;;  %1035 = vmatprep.mubr.msk.bf16.mxu0 %vm306_vm2, %v1082_v10  ;;  %v1085_v13 = vld [vmem:[%s1145_s21 + $0x58] sm:$0xff]   ;;  %v1087_v15 = vld [vmem:[%s1145_s21 + $0x60] sm:$0xff]   ;;  %v1089_v17 = vld [vmem:[%s1145_s21 + $0x68] sm:$0xff]  }
  0x14   : > { %1051 = vmatprep.mubr.msk.bf16.mxu1 %vm306_vm2, %v1083_v11  ;;  %v1090_v18 = vld [vmem:[%s1145_s21 + $0x30] sm:$0xff]   ;;  %v1092_v20 = vld [vmem:[%s1145_s21 + $0x38] sm:$0xff]  }
  0x15   : > { %v1091_v19 = vld [vmem:[%s1145_s21 + $0x70] sm:$0xff]   ;;  %v1093_v21 = vld [vmem:[%s1145_s21 + $0x78] sm:$0xff]  }
  0x1a   : > { %1036 = vmatmul.mubr.msk.bf16.gmra.mrb[4].mxu0 %vm306_vm2, %v1084_v12 }
  0x1b   : > { %1052 = vmatmul.mubr.msk.bf16.gmra.mrb[4].mxu1 %vm306_vm2, %v1085_v13  ;;  %1039 = vmatprep.mubr.msk.bf16.mxu0 %vm306_vm2, %v1086_v14 }
  0x1c   : > { %1055 = vmatprep.mubr.msk.bf16.mxu1 %vm306_vm2, %v1087_v15 }
  0x22   : > { %1040 = vmatmul.mubr.msk.bf16.gmra.mrb[8].mxu0 %vm306_vm2, %v1088_v16 }
  0x23   : > { %1056 = vmatmul.mubr.msk.bf16.gmra.mrb[8].mxu1 %vm306_vm2, %v1089_v17  ;;  %1043 = vmatprep.mubr.msk.bf16.mxu0 %vm306_vm2, %v1090_v18 }
  0x24   : > { %1059 = vmatprep.mubr.msk.bf16.mxu1 %vm306_vm2, %v1091_v19 }
  0x2a   : > { %1044 = vmatmul.mubr.msk.bf16.gmra.mrb[12].mxu0 %vm306_vm2, %v1092_v20 }
  0x2b   : > { %1060 = vmatmul.mubr.msk.bf16.gmra.mrb[12].mxu1 %vm306_vm2, %v1093_v21 }
  0xe5   : > { %v1033_v23 = vpop.f32.mrb[0].mxu0 }
  0xe6   : > { %v405_v24 = vadd.f32 %v1033_v23, %v1182_v22  ;;  %v1049_v25 = vpop.f32.mrb[0].mxu1  ;;  %v396_v26 = vpop.f32.mrb[1].mxu0 }
  0xe7   : > { %v469_v27 = vadd.f32 %v1049_v25, %v1182_v22  ;;  %v397_v28 = vadd.f32 %v1182_v22, %v396_v26  ;;  %v460_v29 = vpop.f32.mrb[1].mxu1  ;;  %v1034_v30 = vpop.f32.mrb[2].mxu0 }
  0xe8   : > { %v525_v31 = vmul.f32 0.2, %v405_v24  ;;  %v461_v32 = vadd.f32 %v1182_v22, %v460_v29  ;;  %v408_v33 = vadd.f32 %v1034_v30, %v1182_v22  ;;  %v1050_v34 = vpop.f32.mrb[2].mxu1  ;;  %v399_v35 = vpop.f32.mrb[3].mxu0 }
  0xe9   : > { %v541_v36 = vmul.f32 0.2, %v469_v27  ;;  %v523_v37 = vmul.f32 0.2, %v397_v28  ;;  %v472_v38 = vadd.f32 %v1050_v34, %v1182_v22  ;;  %v400_v39 = vadd.f32 %v1182_v22, %v399_v35  ;;  %v463_v40 = vpop.f32.mrb[3].mxu1 }
  0xea   : > { %v539_v41 = vmul.f32 0.2, %v461_v32  ;;  %v526_v42 = vmul.f32 0.2, %v408_v33  ;;  %v464_v43 = vadd.f32 %v1182_v22, %v463_v40  ;;  %v557_v46 = vmax.f32 %v405_v24, %v525_v31 }
  0xeb   : > { %v542_v44 = vmul.f32 0.2, %v472_v38  ;;  %v524_v45 = vmul.f32 0.2, %v400_v39  ;;  %v573_v49 = vmax.f32 %v469_v27, %v541_v36  ;;  %v555_v50 = vmax.f32 %v397_v28, %v523_v37 }
  0xec   : > { %v558_v47 = vmax.f32 %v408_v33, %v526_v42  ;;  %v540_v48 = vmul.f32 0.2, %v464_v43  ;;  %v571_v54 = vmax.f32 %v461_v32, %v539_v41 }
  0xed   : > { %v574_v51 = vmax.f32 %v472_v38, %v542_v44  ;;  %v556_v52 = vmax.f32 %v400_v39, %v524_v45  ;;  %v1037_v53 = vpop.f32.mrb[4].mxu0 }
  0xee   : > { %v922_v55 = vpack.c.bf16 %v558_v47, %v557_v46  ;;  %v572_v56 = vmax.f32 %v464_v43, %v540_v48  ;;  %v421_v57 = vadd.f32 %v1037_v53, %v1182_v22  ;;  %v1053_v58 = vpop.f32.mrb[4].mxu1  ;;  %v412_v59 = vpop.f32.mrb[5].mxu0 }
  0xef   : > { %v962_v60 = vpack.c.bf16 %v574_v51, %v573_v49  ;;  %v917_v61 = vpack.c.bf16 %v556_v52, %v555_v50  ;;  %v485_v62 = vadd.f32 %v1053_v58, %v1182_v22  ;;  %v413_v63 = vadd.f32 %v1182_v22, %v412_v59  ;;  %v476_v0 = vpop.f32.mrb[5].mxu1  ;;  %v1038_v1 = vpop.f32.mrb[6].mxu0 }
  0xf0   : > { %994 = vst [vmem:[%s1197_s26 + $0x8] sm:$0xff] %v922_v55   ;;  %v957_v2 = vpack.c.bf16 %v572_v56, %v571_v54  ;;  %v529_v3 = vmul.f32 0.2, %v421_v57  ;;  %v477_v4 = vadd.f32 %v1182_v22, %v476_v0  ;;  %v424_v5 = vadd.f32 %v1038_v1, %v1182_v22  ;;  %v1054_v6 = vpop.f32.mrb[6].mxu1  ;;  %v415_v7 = vpop.f32.mrb[7].mxu0 }
  0xf1   : > { %1002 = vst [vmem:[%s1197_s26 + $0x48] sm:$0xff] %v962_v60   ;;  %918 = vst [vmem:[%s1197_s26] sm:$0xff] %v917_v61   ;;  %v545_v8 = vmul.f32 0.2, %v485_v62  ;;  %v527_v9 = vmul.f32 0.2, %v413_v63  ;;  %v488_v10 = vadd.f32 %v1054_v6, %v1182_v22  ;;  %v416_v11 = vadd.f32 %v1182_v22, %v415_v7  ;;  %v479_v12 = vpop.f32.mrb[7].mxu1 }
  0xf2   : > { %1001 = vst [vmem:[%s1197_s26 + $0x40] sm:$0xff] %v957_v2   ;;  %v543_v13 = vmul.f32 0.2, %v477_v4  ;;  %v530_v14 = vmul.f32 0.2, %v424_v5  ;;  %v480_v15 = vadd.f32 %v1182_v22, %v479_v12  ;;  %v561_v18 = vmax.f32 %v421_v57, %v529_v3 }
  0xf3   : > { %v546_v16 = vmul.f32 0.2, %v488_v10  ;;  %v528_v17 = vmul.f32 0.2, %v416_v11  ;;  %v577_v21 = vmax.f32 %v485_v62, %v545_v8  ;;  %v559_v23 = vmax.f32 %v413_v63, %v527_v9 }
  0xf4   : > { %v562_v19 = vmax.f32 %v424_v5, %v530_v14  ;;  %v544_v20 = vmul.f32 0.2, %v480_v15  ;;  %v575_v27 = vmax.f32 %v477_v4, %v543_v13 }
  0xf5   : > { %v578_v24 = vmax.f32 %v488_v10, %v546_v16  ;;  %v560_v25 = vmax.f32 %v416_v11, %v528_v17  ;;  %v1041_v26 = vpop.f32.mrb[8].mxu0 }
  0xf6   : > { %v932_v28 = vpack.c.bf16 %v562_v19, %v561_v18  ;;  %v576_v29 = vmax.f32 %v480_v15, %v544_v20  ;;  %v437_v30 = vadd.f32 %v1041_v26, %v1182_v22  ;;  %v1057_v31 = vpop.f32.mrb[8].mxu1  ;;  %v428_v32 = vpop.f32.mrb[9].mxu0 }
  0xf7   : > { %v972_v33 = vpack.c.bf16 %v578_v24, %v577_v21  ;;  %v927_v34 = vpack.c.bf16 %v560_v25, %v559_v23  ;;  %v501_v35 = vadd.f32 %v1057_v31, %v1182_v22  ;;  %v429_v36 = vadd.f32 %v1182_v22, %v428_v32  ;;  %v492_v37 = vpop.f32.mrb[9].mxu1  ;;  %v1042_v38 = vpop.f32.mrb[10].mxu0 }
  0xf8   : > { %996 = vst [vmem:[%s1197_s26 + $0x18] sm:$0xff] %v932_v28   ;;  %v967_v39 = vpack.c.bf16 %v576_v29, %v575_v27  ;;  %v533_v40 = vmul.f32 0.2, %v437_v30  ;;  %v493_v41 = vadd.f32 %v1182_v22, %v492_v37  ;;  %v440_v42 = vadd.f32 %v1042_v38, %v1182_v22  ;;  %v1058_v43 = vpop.f32.mrb[10].mxu1  ;;  %v431_v44 = vpop.f32.mrb[11].mxu0 }
  0xf9   : > { %1004 = vst [vmem:[%s1197_s26 + $0x58] sm:$0xff] %v972_v33   ;;  %995 = vst [vmem:[%s1197_s26 + $0x10] sm:$0xff] %v927_v34   ;;  %v549_v45 = vmul.f32 0.2, %v501_v35  ;;  %v531_v46 = vmul.f32 0.2, %v429_v36  ;;  %v504_v47 = vadd.f32 %v1058_v43, %v1182_v22  ;;  %v432_v48 = vadd.f32 %v1182_v22, %v431_v44 }
  0xfa   : > { %v495_v49 = vpop.f32.mrb[11].mxu1  ;;  %1003 = vst [vmem:[%s1197_s26 + $0x50] sm:$0xff] %v967_v39   ;;  %v547_v50 = vmul.f32 0.2, %v493_v41  ;;  %v534_v51 = vmul.f32 0.2, %v440_v42  ;;  %v565_v55 = vmax.f32 %v437_v30, %v533_v40 }
  0xfb   : > { %v496_v52 = vadd.f32 %v1182_v22, %v495_v49  ;;  %v550_v53 = vmul.f32 0.2, %v504_v47  ;;  %v532_v54 = vmul.f32 0.2, %v432_v48  ;;  %v581_v58 = vmax.f32 %v501_v35, %v549_v45 }
  0xfc   : > { %v566_v56 = vmax.f32 %v440_v42, %v534_v51  ;;  %v563_v59 = vmax.f32 %v429_v36, %v531_v46  ;;  %v579_v63 = vmax.f32 %v493_v41, %v547_v50 }
  0xfd   : > { %v548_v57 = vmul.f32 0.2, %v496_v52  ;;  %v582_v60 = vmax.f32 %v504_v47, %v550_v53  ;;  %v564_v61 = vmax.f32 %v432_v48, %v532_v54  ;;  %v1045_v62 = vpop.f32.mrb[12].mxu0 }
  0xfe   : > { %v942_v0 = vpack.c.bf16 %v566_v56, %v565_v55  ;;  %v453_v2 = vadd.f32 %v1045_v62, %v1182_v22  ;;  %v1061_v3 = vpop.f32.mrb[12].mxu1  ;;  %v444_v4 = vpop.f32.mrb[13].mxu0 }
  0xff   : > { %v580_v1 = vmax.f32 %v496_v52, %v548_v57  ;;  %v982_v5 = vpack.c.bf16 %v582_v60, %v581_v58  ;;  %v937_v6 = vpack.c.bf16 %v564_v61, %v563_v59  ;;  %v517_v7 = vadd.f32 %v1061_v3, %v1182_v22  ;;  %v508_v9 = vpop.f32.mrb[13].mxu1  ;;  %v1046_v10 = vpop.f32.mrb[14].mxu0 }
 0x100   : > { %v445_v8 = vadd.f32 %v1182_v22, %v444_v4  ;;  %998 = vst [vmem:[%s1197_s26 + $0x28] sm:$0xff] %v942_v0   ;;  %v537_v12 = vmul.f32 0.2, %v453_v2  ;;  %v509_v13 = vadd.f32 %v1182_v22, %v508_v9  ;;  %v456_v14 = vadd.f32 %v1046_v10, %v1182_v22  ;;  %v1062_v15 = vpop.f32.mrb[14].mxu1  ;;  %v447_v16 = vpop.f32.mrb[15].mxu0 }
 0x101   : > { %v977_v11 = vpack.c.bf16 %v580_v1, %v579_v63  ;;  %1006 = vst [vmem:[%s1197_s26 + $0x68] sm:$0xff] %v982_v5   ;;  %997 = vst [vmem:[%s1197_s26 + $0x20] sm:$0xff] %v937_v6   ;;  %v553_v17 = vmul.f32 0.2, %v517_v7  ;;  %v520_v19 = vadd.f32 %v1062_v15, %v1182_v22  ;;  %v448_v20 = vadd.f32 %v1182_v22, %v447_v16  ;;  %v511_v21 = vpop.f32.mrb[15].mxu1 }
 0x102   : > { %v535_v18 = vmul.f32 0.2, %v445_v8  ;;  %v551_v23 = vmul.f32 0.2, %v509_v13  ;;  %v538_v24 = vmul.f32 0.2, %v456_v14  ;;  %v512_v25 = vadd.f32 %v1182_v22, %v511_v21 }
 0x103   : > { %1005 = vst [vmem:[%s1197_s26 + $0x60] sm:$0xff] %v977_v11   ;;  %v554_v26 = vmul.f32 0.2, %v520_v19  ;;  %v536_v27 = vmul.f32 0.2, %v448_v20  ;;  %v569_v28 = vmax.f32 %v453_v2, %v537_v12  ;;  %v585_v31 = vmax.f32 %v517_v7, %v553_v17 }
 0x104   : > { %v570_v29 = vmax.f32 %v456_v14, %v538_v24  ;;  %v552_v30 = vmul.f32 0.2, %v512_v25  ;;  %v567_v32 = vmax.f32 %v445_v8, %v535_v18  ;;  %v583_v35 = vmax.f32 %v509_v13, %v551_v23 }
 0x105   : > { %v586_v33 = vmax.f32 %v520_v19, %v554_v26  ;;  %v568_v34 = vmax.f32 %v448_v20, %v536_v27 }
 0x106   : > { %v952_v36 = vpack.c.bf16 %v570_v29, %v569_v28  ;;  %v584_v37 = vmax.f32 %v512_v25, %v552_v30 }
 0x107   : > { %v992_v38 = vpack.c.bf16 %v586_v33, %v585_v31  ;;  %v947_v39 = vpack.c.bf16 %v568_v34, %v567_v32 }
 0x108   : > { %1000 = vst [vmem:[%s1197_s26 + $0x38] sm:$0xff] %v952_v36   ;;  %v987_v40 = vpack.c.bf16 %v584_v37, %v583_v35 }
 0x109   : > { %1008 = vst [vmem:[%s1197_s26 + $0x78] sm:$0xff] %v992_v38   ;;  %999 = vst [vmem:[%s1197_s26 + $0x30] sm:$0xff] %v947_v39  }
 0x10a   : > { %1007 = vst [vmem:[%s1197_s26 + $0x70] sm:$0xff] %v987_v40  }
 0x10b PF: > { %s13_s12 = sadd.s32 1, %s1100_s12  }
 0x10c   : > { %p10_p4 = scmp.ge.s32.totalorder %s13_s12, 4  }
 0x10e   :  { %12 = sbr.rel (!%p10_p4) target bundleno = 1 (0x1), region = 62 }

// kernel: discriminator_forward.7
= control target key start
LH: loop header
LB: loop body
LE: loop exit
PB: predicated region body
PF: predicated region fallthrough
CT: control target
= control target key end

     0   :  { %s1291_s12 = smov 0   ;;  %s1449_s0 = inlined_call_operand.vmem [shape: bf16[2,64,576], index: 0, kind: input, shape index: {}]   ;;  %s1450_s1 = inlined_call_operand.vmem [shape: bf16[576,128], index: 1, kind: input, shape index: {}]   ;;  %s1451_s2 = inlined_call_operand.vmem [shape: f32[1,128], index: 2, kind: input, shape index: {}]   ;;  %s1452_s3 = inlined_call_operand.vmem [shape: bf16[2,64,128], index: 3, kind: output, shape index: {}]  }
   0x1 LB: > { %s965_s13 = sadd.s32 4294967295, %s1269_s12   ;;  %p969_p0 = scmp.ge.s32.totalorder %s1269_s12, 1  ;;  %s1269_s12 = sphi %s1291_s12, %s13_s12  }
   0x2   : > { %p137_p1 = scmp.lt.s32.totalorder %s1269_s12, 3 }
   0x4   : > { %p138_p2 = pnand %p969_p0, %p137_p1 }
   0x5   : > { %v1197_v0 = vld [vmem:[%s1450_s1 + $0x40] sm:$0xff] (!%p138_p2)   ;;  %v1201_v4 = vld [vmem:[%s1450_s1 + $0x48] sm:$0xff] (!%p138_p2)   ;;  %v1205_v8 = vld [vmem:[%s1450_s1 + $0x50] sm:$0xff] (!%p138_p2)   ;;  %p161_p3 = scmp.lt.s32.totalorder (!%p138_p2), %s965_s13, 1  ;;  %vm591_vm0 = vcmask (!%p138_p2), 523264  }
   0x6   : > { %141 = sbr.rel (%p138_p2) target bundleno = 372 (0x174), region = 32  ;;  %v1198_v1 = vld [vmem:[%s1450_s1 + $0xc0] sm:$0xff] (!%p138_p2)   ;;  %1076 = vmatprep.subr.bf16.mxu0 (!%p138_p2), %v1197_v0  ;;  %v1202_v5 = vld [vmem:[%s1450_s1 + $0xc8] sm:$0xff] (!%p138_p2)   ;;  %v1206_v9 = vld [vmem:[%s1450_s1 + $0xd0] sm:$0xff] (!%p138_p2)  }
   0x7   : > { %v1199_v2 = vld [vmem:[%s1450_s1] sm:$0xff] (!%p138_p2)   ;;  %1116 = vmatprep.subr.bf16.mxu1 (!%p138_p2), %v1198_v1  ;;  %v1203_v6 = vld [vmem:[%s1450_s1 + $0x8] sm:$0xff] (!%p138_p2)   ;;  %v1207_v10 = vld [vmem:[%s1450_s1 + $0x10] sm:$0xff] (!%p138_p2)  }
   0x8   : > { %v1200_v3 = vld [vmem:[%s1450_s1 + $0x80] sm:$0xff] (!%p138_p2)   ;;  %1077 = vmatpush3.bf16.msra.mxu0 (!%p138_p2), %v1199_v2  ;;  %v1204_v7 = vld [vmem:[%s1450_s1 + $0x88] sm:$0xff] (!%p138_p2)   ;;  %v1208_v11 = vld [vmem:[%s1450_s1 + $0x90] sm:$0xff] (!%p138_p2)  }
   0x9   : > { %1117 = vmatpush3.bf16.msra.mxu1 (!%p138_p2), %v1200_v3  ;;  %1078 = vmatprep.subr.bf16.mxu0 (!%p138_p2), %v1201_v4  ;;  %v1209_v12 = vld [vmem:[%s1450_s1 + $0x58] sm:$0xff] (!%p138_p2)   ;;  %v1213_v16 = vld [vmem:[%s1450_s1 + $0x60] sm:$0xff] (!%p138_p2)   ;;  %v1217_v20 = vld [vmem:[%s1450_s1 + $0x68] sm:$0xff] (!%p138_p2)  }
   0xa   : > { %1118 = vmatprep.subr.bf16.mxu1 (!%p138_p2), %v1202_v5  ;;  %v1210_v13 = vld [vmem:[%s1450_s1 + $0xd8] sm:$0xff] (!%p138_p2)   ;;  %v1214_v17 = vld [vmem:[%s1450_s1 + $0xe0] sm:$0xff] (!%p138_p2)   ;;  %v1218_v21 = vld [vmem:[%s1450_s1 + $0xe8] sm:$0xff] (!%p138_p2)  }
   0xb   : > { %v1211_v14 = vld [vmem:[%s1450_s1 + $0x18] sm:$0xff] (!%p138_p2)   ;;  %v1215_v18 = vld [vmem:[%s1450_s1 + $0x20] sm:$0xff] (!%p138_p2)   ;;  %v1219_v22 = vld [vmem:[%s1450_s1 + $0x28] sm:$0xff] (!%p138_p2)  }
   0xc   : > { %1079 = vmatpush3.bf16.msra.mxu0 (!%p138_p2), %v1203_v6  ;;  %v1212_v15 = vld [vmem:[%s1450_s1 + $0x98] sm:$0xff] (!%p138_p2)   ;;  %v1216_v19 = vld [vmem:[%s1450_s1 + $0xa0] sm:$0xff] (!%p138_p2)   ;;  %v1220_v23 = vld [vmem:[%s1450_s1 + $0xa8] sm:$0xff] (!%p138_p2)  }
   0xd   : > { %1119 = vmatpush3.bf16.msra.mxu1 %v1204_v7  ;;  %1080 = vmatprep.subr.bf16.mxu0 %v1205_v8  ;;  %s1454_s13 = smov (!%p161_p3, %s965_s13), 1  ;;  %v1221_v24 = vld [vmem:[%s1450_s1 + $0x70] sm:$0xff]   ;;  %v1225_v28 = vld [vmem:[%s1450_s1 + $0x78] sm:$0xff]   ;;  %v1235_v36 = vld [vmem:[%s1450_s1 + $0x100] sm:$0xff]  }
   0xe   : > { %1120 = vmatprep.subr.bf16.mxu1 %v1206_v9  ;;  %v1222_v25 = vld [vmem:[%s1450_s1 + $0xf0] sm:$0xff]   ;;  %s1188_s16 = smul.u32 160, %s1454_s13  ;;  %v1226_v29 = vld [vmem:[%s1450_s1 + $0xf8] sm:$0xff]   ;;  %v1242_v39 = vld [vmem:[%s1450_s1 + $0x108] sm:$0xff]   ;;  %s1044_s17 = sshll.u32 %s1454_s13, 5 }
   0xf   : > { %v1223_v26 = vld [vmem:[%s1450_s1 + $0x30] sm:$0xff]   ;;  %v1227_v30 = vld [vmem:[%s1450_s1 + $0x38] sm:$0xff]   ;;  %v973_v57 = vld [vmem:[%s1451_s2] ss:$0 sm:$0xff]  ;;  %s170_s20 = scalar_lea.vmem %s1452_s3, %s1044_s17 }
  0x10   : > { %1081 = vmatpush3.bf16.msra.mxu0 %v1207_v10  ;;  %v1224_v27 = vld [vmem:[%s1450_s1 + $0xb0] sm:$0xff]   ;;  %s1399_s27 = scalar_lea.vmem %s1449_s0, %s1188_s16  ;;  %v1228_v31 = vld [vmem:[%s1450_s1 + $0xb8] sm:$0xff]  }
  0x11   : > { %1121 = vmatpush3.bf16.msra.mxu1 %v1208_v11  ;;  %1082 = vmatprep.subr.bf16.mxu0 %v1209_v12  ;;  %v1229_v32 = vld [vmem:[%s1399_s27] ss:$20 sps:$4 sm:$0xff]   ;;  %v1231_v33 = vld [vmem:[%s1399_s27 + $0x4] ss:$20 sps:$4 sm:$0xff]   ;;  %v1232_v34 = vld [vmem:[%s1399_s27 + $0x8] ss:$20 sps:$4 sm:$0xff]  }
  0x12   : > { %1122 = vmatprep.subr.bf16.mxu1 %v1210_v13  ;;  %v1234_v35 = vld [vmem:[%s1399_s27 + $0xc] ss:$20 sps:$4 sm:$0xff]   ;;  %636 = vmatprep.mubr.bf16.mxu0 %v1231_v33  ;;  %v1238_v38 = vld [vmem:[%s1399_s27 + $0x34] ss:$20 sps:$4 sm:$0xff]   ;;  %v1241_v41 = vld [vmem:[%s1399_s27 + $0x30] ss:$20 sps:$4 sm:$0xff]  }
  0x13   : > { %701 = vmatprep.mubr.bf16.mxu1 %v1234_v35  ;;  %v1236_v37 = vld [vmem:[%s1399_s27 + $0x2c] ss:$20 sps:$4 sm:$0xff]   ;;  %v1240_v40 = vld [vmem:[%s1399_s27 + $0x28] ss:$20 sps:$4 sm:$0xff]   ;;  %v1249_v44 = vld [vmem:[%s1450_s1 + $0x110] sm:$0xff]  }
  0x14   : > { %1083 = vmatpush3.bf16.msra.mxu0 %v1211_v14  ;;  %v1243_v42 = vld [vmem:[%s1399_s27 + $0x54] ss:$20 sps:$4 sm:$0xff]   ;;  %v1245_v43 = vld [vmem:[%s1399_s27 + $0x5c] ss:$20 sps:$4 sm:$0xff]   ;;  %v1248_v47 = vld [vmem:[%s1399_s27 + $0x58] ss:$20 sps:$4 sm:$0xff]  }
  0x15   : > { %1123 = vmatpush3.bf16.msra.mxu1 %v1212_v15  ;;  %1084 = vmatprep.subr.bf16.mxu0 %v1213_v16  ;;  %v1256_v45 = vld [vmem:[%s1450_s1 + $0x118] sm:$0xff]   ;;  %v1247_v46 = vld [vmem:[%s1399_s27 + $0x50] ss:$20 sps:$4 sm:$0xff]   ;;  %v1255_v51 = vld [vmem:[%s1399_s27 + $0x80] ss:$20 sps:$4 sm:$0xff]  }
  0x16   : > { %1124 = vmatprep.subr.bf16.mxu1 %v1214_v17  ;;  %v1250_v48 = vld [vmem:[%s1399_s27 + $0x7c] ss:$20 sps:$4 sm:$0xff]   ;;  %v1252_v49 = vld [vmem:[%s1399_s27 + $0x84] ss:$20 sps:$4 sm:$0xff]   ;;  %v1258_v53 = vld [vmem:[%s1399_s27 + $0x60] ss:$20 sps:$4 sm:$0xff]  }
  0x17   : > { %v1254_v50 = vld [vmem:[%s1399_s27 + $0x78] ss:$20 sps:$4 sm:$0xff]   ;;  %v1257_v52 = vld [vmem:[%s1399_s27 + $0x10] ss:$20 sps:$4 sm:$0xff]   ;;  %v1260_v55 = vld [vmem:[%s1399_s27 + $0x88] ss:$20 sps:$4 sm:$0xff]  }
  0x18   : > { %1085 = vmatpush3.bf16.msra.mxu0 %v1215_v18  ;;  %v1259_v54 = vld [vmem:[%s1399_s27 + $0x38] ss:$20 sps:$4 sm:$0xff]  }
  0x19   : > { %1125 = vmatpush3.bf16.msra.mxu1 %v1216_v19  ;;  %1086 = vmatprep.subr.bf16.mxu0 %v1217_v20 }
  0x1a   : > { %1126 = vmatprep.subr.bf16.mxu1 %v1218_v21 }
  0x1c   : > { %1087 = vmatpush3.bf16.msra.mxu0 %v1219_v22 }
  0x1d   : > { %1127 = vmatpush3.bf16.msra.mxu1 %v1220_v23  ;;  %1088 = vmatprep.subr.bf16.mxu0 %v1221_v24 }
  0x1e   : > { %1128 = vmatprep.subr.bf16.mxu1 %v1222_v25 }
  0x20   : > { %1089 = vmatpush3.bf16.msra.mxu0 %v1223_v26 }
  0x21   : > { %1129 = vmatpush3.bf16.msra.mxu1 %v1224_v27  ;;  %1090 = vmatprep.subr.bf16.mxu0 %v1225_v28 }
  0x22   : > { %1130 = vmatprep.subr.bf16.mxu1 %v1226_v29 }
  0x24   : > { %1091 = vmatpush3.bf16.msra.mxu0 %v1227_v30 }
  0x25   : > { %1131 = vmatpush3.bf16.msra.mxu1 %v1228_v31  ;;  %1164 = vmatprep.subr.bf16.mxu0 %v1235_v36 }
  0x26   : > { %1180 = vmatprep.subr.bf16.mxu1 %v1235_v36 }
  0x27   : > { %637 = vmatmul.mubr.bf16.vlgmr.msra.gmra.mrb[0].mxu0 %v1229_v32 }
  0x28   : > { %702 = vmatmul.mubr.bf16.vlgmr.msra.gmra.mrb[0].mxu1 %v1232_v34  ;;  %1165 = vmatpush3.bf16.msra.mxu0 %v1235_v36 }
  0x29   : > { %644 = vmatprep.mubr.bf16.mxu0 %v1236_v37  ;;  %709 = vmatprep.mubr.bf16.mxu1 %v1238_v38 }
  0x2a   : > { %1184 = vmatpush3.bf16.msra.mxu1 %v1235_v36  ;;  %1166 = vmatprep.subr.bf16.mxu0 %v1242_v39 }
  0x2b   : > { %1181 = vmatprep.subr.bf16.mxu1 %v1242_v39 }
  0x2c   : > { %1167 = vmatpush3.bf16.msra.mxu0 %v1242_v39 }
  0x2d   : > { %1168 = vmatprep.subr.bf16.mxu0 %v1249_v44 }
  0x2e   : > { %1185 = vmatpush3.bf16.msra.mxu1 %v1242_v39 }
  0x2f   : > { %645 = vmatmul.mubr.bf16.gmra.mrb[4].mxu0 %v1240_v40  ;;  %1182 = vmatprep.subr.bf16.mxu1 %v1249_v44 }
  0x30   : > { %710 = vmatmul.mubr.bf16.gmra.mrb[4].mxu1 %v1241_v41  ;;  %652 = vmatprep.mubr.bf16.mxu0 %v1243_v42 }
  0x31   : > { %717 = vmatprep.mubr.bf16.mxu1 %v1245_v43  ;;  %1169 = vmatpush3.bf16.msra.mxu0 %v1249_v44 }
  0x32   : > { %1170 = vmatprep.subr.bf16.mxu0 %v1256_v45  ;;  %1186 = vmatpush3.bf16.msra.mxu1 %v1249_v44 }
  0x33   : > { %1183 = vmatprep.subr.bf16.mxu1 %v1256_v45 }
  0x35   : > { %1171 = vmatpush3.bf16.msra.mxu0 %v1256_v45 }
  0x36   : > { %1187 = vmatpush3.bf16.msra.mxu1 %v1256_v45 }
  0x37   : > { %653 = vmatmul.mubr.bf16.gmra.mrb[8].mxu0 %v1247_v46 }
  0x38   : > { %718 = vmatmul.mubr.bf16.gmra.mrb[8].mxu1 %v1248_v47  ;;  %660 = vmatprep.mubr.bf16.mxu0 %v1250_v48 }
  0x39   : > { %725 = vmatprep.mubr.bf16.mxu1 %v1252_v49 }
  0x3f   : > { %661 = vmatmul.mubr.bf16.gmra.mrb[12].mxu0 %v1254_v50 }
  0x40   : > { %726 = vmatmul.mubr.bf16.gmra.mrb[12].mxu1 %v1255_v51  ;;  %1172 = vmatprep.mubr.msk.bf16.mxu0 %vm591_vm0, %v1257_v52 }
  0x41   : > { %1176 = vmatprep.mubr.msk.bf16.mxu1 %vm591_vm0, %v1258_v53 }
  0x47   : > { %1173 = vmatmul.mubr.msk.bf16.vlgmr.msra.gmra.mrb[16].mxu0 %vm591_vm0, %v1259_v54 }
  0x48   : > { %1177 = vmatmul.mubr.msk.bf16.vlgmr.msra.gmra.mrb[16].mxu1 %vm591_vm0, %v1260_v55 }
  0xfa   : > { %v1092_v56 = vpop.f32.mrb[0].mxu0 }
  0xfb   : > { %v1093_v58 = vpop.f32.mrb[1].mxu0  ;;  %v1132_v59 = vpop.f32.mrb[0].mxu1 }
  0xfc   : > { %v1094_v60 = vadd.f32 %v1093_v58, %v1092_v56  ;;  %v1095_v61 = vpop.f32.mrb[2].mxu0  ;;  %v1133_v62 = vpop.f32.mrb[1].mxu1 }
  0xfd   : > { %v1096_v63 = vpop.f32.mrb[3].mxu0  ;;  %v1134_v0 = vadd.f32 %v1133_v62, %v1132_v59  ;;  %v1135_v1 = vpop.f32.mrb[2].mxu1 }
  0xfe   : > { %v639_v2 = vadd.f32 %v1094_v60, %v973_v57  ;;  %v1097_v3 = vadd.f32 %v1096_v63, %v1095_v61  ;;  %v1136_v4 = vpop.f32.mrb[3].mxu1 }
  0xff   : > { %v1137_v5 = vadd.f32 %v1136_v4, %v1135_v1 }
 0x100   : > { %v642_v6 = vadd.f32 %v1097_v3, %v973_v57  ;;  %v704_v7 = vadd.f32 %v1134_v0, %v639_v2 }
 0x102   : > { %v1098_v8 = vpop.f32.mrb[4].mxu0  ;;  %v707_v9 = vadd.f32 %v1137_v5, %v642_v6 }
 0x103   : > { %v1099_v10 = vpop.f32.mrb[5].mxu0  ;;  %v1138_v11 = vpop.f32.mrb[4].mxu1 }
 0x104   : > { %v1100_v12 = vadd.f32 %v1099_v10, %v1098_v8  ;;  %v1101_v13 = vpop.f32.mrb[6].mxu0  ;;  %v1139_v14 = vpop.f32.mrb[5].mxu1 }
 0x105   : > { %v1102_v15 = vpop.f32.mrb[7].mxu0  ;;  %v1140_v16 = vadd.f32 %v1139_v14, %v1138_v11  ;;  %v1141_v17 = vpop.f32.mrb[6].mxu1 }
 0x106   : > { %v647_v18 = vadd.f32 %v1100_v12, %v973_v57  ;;  %v1103_v19 = vadd.f32 %v1102_v15, %v1101_v13  ;;  %v1142_v20 = vpop.f32.mrb[7].mxu1 }
 0x107   : > { %v1143_v21 = vadd.f32 %v1142_v20, %v1141_v17 }
 0x108   : > { %v650_v22 = vadd.f32 %v1103_v19, %v973_v57  ;;  %v712_v23 = vadd.f32 %v1140_v16, %v647_v18 }
 0x10a   : > { %v1104_v24 = vpop.f32.mrb[8].mxu0  ;;  %v715_v25 = vadd.f32 %v1143_v21, %v650_v22 }
 0x10b   : > { %v1105_v26 = vpop.f32.mrb[9].mxu0  ;;  %v1144_v27 = vpop.f32.mrb[8].mxu1 }
 0x10c   : > { %v1106_v28 = vadd.f32 %v1105_v26, %v1104_v24  ;;  %v1107_v29 = vpop.f32.mrb[10].mxu0  ;;  %v1145_v30 = vpop.f32.mrb[9].mxu1 }
 0x10d   : > { %v1108_v31 = vpop.f32.mrb[11].mxu0  ;;  %v1146_v32 = vadd.f32 %v1145_v30, %v1144_v27  ;;  %v1147_v33 = vpop.f32.mrb[10].mxu1 }
 0x10e   : > { %v655_v34 = vadd.f32 %v1106_v28, %v973_v57  ;;  %v1109_v35 = vadd.f32 %v1108_v31, %v1107_v29  ;;  %v1148_v36 = vpop.f32.mrb[11].mxu1 }
 0x10f   : > { %v1149_v37 = vadd.f32 %v1148_v36, %v1147_v33 }
 0x110   : > { %v658_v38 = vadd.f32 %v1109_v35, %v973_v57  ;;  %v720_v39 = vadd.f32 %v1146_v32, %v655_v34 }
 0x112   : > { %v1110_v40 = vpop.f32.mrb[12].mxu0  ;;  %v723_v41 = vadd.f32 %v1149_v37, %v658_v38 }
 0x113   : > { %v1111_v42 = vpop.f32.mrb[13].mxu0  ;;  %v1150_v43 = vpop.f32.mrb[12].mxu1 }
 0x114   : > { %v1112_v44 = vadd.f32 %v1111_v42, %v1110_v40  ;;  %v1113_v45 = vpop.f32.mrb[14].mxu0  ;;  %v1151_v46 = vpop.f32.mrb[13].mxu1 }
 0x115   : > { %v1114_v47 = vpop.f32.mrb[15].mxu0  ;;  %v1152_v48 = vadd.f32 %v1151_v46, %v1150_v43  ;;  %v1153_v49 = vpop.f32.mrb[14].mxu1 }
 0x116   : > { %v663_v50 = vadd.f32 %v1112_v44, %v973_v57  ;;  %v1115_v51 = vadd.f32 %v1114_v47, %v1113_v45  ;;  %v1154_v52 = vpop.f32.mrb[15].mxu1 }
 0x117   : > { %v1155_v53 = vadd.f32 %v1154_v52, %v1153_v49 }
 0x118   : > { %v666_v54 = vadd.f32 %v1115_v51, %v973_v57  ;;  %v728_v55 = vadd.f32 %v1152_v48, %v663_v50 }
 0x11a   : > { %v1174_v56 = vpop.f32.mrb[16].mxu0  ;;  %v731_v58 = vadd.f32 %v1155_v53, %v666_v54 }
 0x11b   : > { %v777_v59 = vadd.f32 %v1174_v56, %v712_v23  ;;  %v1178_v60 = vpop.f32.mrb[16].mxu1  ;;  %v768_v61 = vpop.f32.mrb[17].mxu0 }
 0x11c   : > { %v793_v62 = vadd.f32 %v1178_v60, %v728_v55  ;;  %v769_v63 = vadd.f32 %v768_v61, %v704_v7  ;;  %v784_v0 = vpop.f32.mrb[17].mxu1  ;;  %v1175_v1 = vpop.f32.mrb[18].mxu0 }
 0x11d   : > { %v785_v2 = vadd.f32 %v784_v0, %v720_v39  ;;  %v780_v3 = vadd.f32 %v1175_v1, %v715_v25  ;;  %v1179_v4 = vpop.f32.mrb[18].mxu1  ;;  %v771_v5 = vpop.f32.mrb[19].mxu0 }
 0x11e   : > { %v796_v6 = vadd.f32 %v1179_v4, %v731_v58  ;;  %v772_v8 = vadd.f32 %v771_v5, %v707_v9  ;;  %v787_v10 = vpop.f32.mrb[19].mxu1 }
 0x11f   : > { %v788_v11 = vadd.f32 %v787_v10, %v723_v41 }
 0x120   : > { %v799_v12 = vadd.f32 %v772_v8, %v769_v63 }
 0x122   : > { %v800_v57 = vadd.f32 %v799_v12, %v777_v59 }
 0x124   : > { %v801_v13 = vadd.f32 %v800_v57, %v780_v3 }
 0x126   : > { %v802_v14 = vadd.f32 %v801_v13, %v785_v2 }
 0x128   : > { %v803_v15 = vadd.f32 %v802_v14, %v788_v11 }
 0x12a   : > { %v804_v16 = vadd.f32 %v803_v15, %v793_v62 }
 0x12c   : > { %v805_v17 = vadd.f32 %v804_v16, %v796_v6 }
 0x12e   : > { %v806_v18 = vrot.slane %v805_v17, 4 }
 0x130   : > { %v807_v19 = vadd.f32 %v806_v18, %v805_v17 }
 0x132   : > { %v808_v7 = vrot.slane %v807_v19, 2 }
 0x134   : > { %v809_v20 = vadd.f32 %v808_v7, %v807_v19 }
 0x136   : > { %v810_v21 = vrot.slane %v809_v20, 1 }
 0x138   : > { %v811_v22 = vadd.f32 %v810_v21, %v809_v20 }
 0x13a   : > { %v813_v23 = vmul.f32 0.015625, %v811_v22 }
 0x13c   : > { %v814_v24 = vsub.f32 %v769_v63, %v813_v23  ;;  %v815_v25 = vsub.f32 %v772_v8, %v813_v23  ;;  %v816_v26 = vsub.f32 %v777_v59, %v813_v23  ;;  %v817_v9 = vsub.f32 %v780_v3, %v813_v23 }
 0x13d   : > { %v818_v27 = vsub.f32 %v785_v2, %v813_v23  ;;  %v819_v28 = vsub.f32 %v788_v11, %v813_v23  ;;  %v820_v29 = vsub.f32 %v793_v62, %v813_v23  ;;  %v821_v30 = vsub.f32 %v796_v6, %v813_v23 }
 0x13e   : > { %v822_v31 = vmul.f32 %v814_v24, %v814_v24  ;;  %v823_v32 = vmul.f32 %v815_v25, %v815_v25  ;;  %v824_v33 = vmul.f32 %v816_v26, %v816_v26  ;;  %v825_v35 = vmul.f32 %v817_v9, %v817_v9 }
 0x13f   : > { %v826_v37 = vmul.f32 %v818_v27, %v818_v27  ;;  %v827_v39 = vmul.f32 %v819_v28, %v819_v28  ;;  %v828_v41 = vmul.f32 %v820_v29, %v820_v29  ;;  %v829_v43 = vmul.f32 %v821_v30, %v821_v30 }
 0x140   : > { %v830_v34 = vadd.f32 %v823_v32, %v822_v31 }
 0x142   : > { %v831_v36 = vadd.f32 %v830_v34, %v824_v33 }
 0x144   : > { %v832_v38 = vadd.f32 %v831_v36, %v825_v35 }
 0x146   : > { %v833_v40 = vadd.f32 %v832_v38, %v826_v37 }
 0x148   : > { %v834_v42 = vadd.f32 %v833_v40, %v827_v39 }
 0x14a   : > { %v835_v44 = vadd.f32 %v834_v42, %v828_v41 }
 0x14c   : > { %v836_v45 = vadd.f32 %v835_v44, %v829_v43 }
 0x14e   : > { %v837_v46 = vrot.slane %v836_v45, 4 }
 0x150   : > { %v838_v47 = vadd.f32 %v837_v46, %v836_v45 }
 0x152   : > { %v839_v48 = vrot.slane %v838_v47, 2 }
 0x154   : > { %v840_v49 = vadd.f32 %v839_v48, %v838_v47 }
 0x156   : > { %v841_v50 = vrot.slane %v840_v49, 1 }
 0x158   : > { %v842_v51 = vadd.f32 %v841_v50, %v840_v49 }
 0x15a   : > { %v843_v52 = vmul.f32 0.015625, %v842_v51 }
 0x15c   : > { %v844_v53 = vadd.f32 1e-05, %v843_v52 }
 0x15e   : > { %1261 = vrsqrt.f32 %v844_v53 }
 0x168   : > { %v1262_v54 = vpop.eup %1261 }
 0x169   : > { %v846_v55 = vmul.f32 %v1262_v54, %v814_v24  ;;  %v847_v56 = vmul.f32 %v1262_v54, %v815_v25  ;;  %v848_v58 = vmul.f32 %v1262_v54, %v816_v26  ;;  %v849_v59 = vmul.f32 %v1262_v54, %v817_v9 }
 0x16a   : > { %v850_v60 = vmul.f32 %v1262_v54, %v818_v27  ;;  %v851_v61 = vmul.f32 %v1262_v54, %v819_v28  ;;  %v852_v62 = vmul.f32 %v1262_v54, %v820_v29  ;;  %v853_v63 = vmul.f32 %v1262_v54, %v821_v30 }
 0x16b   : > { %v854_v0 = vmul.f32 0.2, %v846_v55  ;;  %v855_v1 = vmul.f32 0.2, %v847_v56  ;;  %v856_v2 = vmul.f32 0.2, %v848_v58 }
 0x16c   : > { %v857_v3 = vmul.f32 0.2, %v849_v59  ;;  %v858_v4 = vmul.f32 0.2, %v850_v60  ;;  %v859_v5 = vmul.f32 0.2, %v851_v61 }
 0x16d   : > { %v860_v6 = vmul.f32 0.2, %v852_v62  ;;  %v861_v8 = vmul.f32 0.2, %v853_v63  ;;  %v862_v10 = vmax.f32 %v846_v55, %v854_v0  ;;  %v863_v11 = vmax.f32 %v847_v56, %v855_v1 }
 0x16e   : > { %v864_v12 = vmax.f32 %v848_v58, %v856_v2  ;;  %v865_v57 = vmax.f32 %v849_v59, %v857_v3  ;;  %v866_v13 = vmax.f32 %v850_v60, %v858_v4  ;;  %v867_v14 = vmax.f32 %v851_v61, %v859_v5 }
 0x16f   : > { %v868_v15 = vmax.f32 %v852_v62, %v860_v6  ;;  %v869_v16 = vmax.f32 %v853_v63, %v861_v8  ;;  %v1056_v17 = vpack.c.bf16 %v863_v11, %v862_v10 }
 0x170   : > { %v1061_v18 = vpack.c.bf16 %v865_v57, %v864_v12  ;;  %v1066_v19 = vpack.c.bf16 %v867_v14, %v866_v13 }
 0x171   : > { %1057 = vst [vmem:[%s170_s20] sm:$0xff] %v1056_v17   ;;  %v1071_v7 = vpack.c.bf16 %v869_v16, %v868_v15 }
 0x172   : > { %1073 = vst [vmem:[%s170_s20 + $0x8] sm:$0xff] %v1061_v18   ;;  %1074 = vst [vmem:[%s170_s20 + $0x10] sm:$0xff] %v1066_v19  }
 0x173   : > { %1075 = vst [vmem:[%s170_s20 + $0x18] sm:$0xff] %v1071_v7  }
 0x174 PF: > { %s13_s12 = sadd.s32 1, %s1269_s12  }
 0x175   : > { %p10_p4 = scmp.ge.s32.totalorder %s13_s12, 4  }
 0x177   :  { %12 = sbr.rel (!%p10_p4) target bundleno = 1 (0x1), region = 62 }

// kernel: discriminator_forward.8
= control target key start
LH: loop header
LB: loop body
LE: loop exit
PB: predicated region body
PF: predicated region fallthrough
CT: control target
= control target key end

     0   :  { %s1905_s12 = smov 0   ;;  %s2376_s0 = inlined_call_operand.vmem [shape: bf16[2,16,1152], index: 0, kind: input, shape index: {}]   ;;  %s2377_s1 = inlined_call_operand.vmem [shape: bf16[1152,256], index: 1, kind: input, shape index: {}]   ;;  %s2378_s2 = inlined_call_operand.vmem [shape: f32[1,256], index: 2, kind: input, shape index: {}]   ;;  %s2379_s3 = inlined_call_operand.vmem [shape: bf16[2,16,256], index: 3, kind: output, shape index: {}]  }
   0x1 LB: > { %s1445_s13 = sadd.s32 4294967295, %s1882_s12   ;;  %p1449_p0 = scmp.ge.s32.totalorder %s1882_s12, 1  ;;  %s1882_s12 = sphi %s1905_s12, %s13_s12  }
   0x2   : > { %p137_p1 = scmp.lt.s32.totalorder %s1882_s12, 3 }
   0x4   : > { %p138_p2 = pnand %p1449_p0, %p137_p1 }
   0x5   : > { %v1643_v0 = vld [vmem:[%s2377_s1 + $0x4] ss:$8 sps:$4 sm:$0xff] (!%p138_p2)   ;;  %v1647_v2 = vld [vmem:[%s2377_s1] ss:$8 sps:$4 sm:$0xff] (!%p138_p2)   ;;  %v1649_v4 = vld [vmem:[%s2377_s1 + $0x14] ss:$8 sps:$4 sm:$0xff] (!%p138_p2)  }
   0x6   : > { %141 = sbr.rel (%p138_p2) target bundleno = 442 (0x1ba), region = 32  ;;  %v1645_v1 = vld [vmem:[%s2377_s1 + $0x204] ss:$8 sps:$4 sm:$0xff] (!%p138_p2)   ;;  %1104 = vmatprep.subr.bf16.mxu1 (!%p138_p2), %v1643_v0  ;;  %v1648_v3 = vld [vmem:[%s2377_s1 + $0x200] ss:$8 sps:$4 sm:$0xff] (!%p138_p2)   ;;  %p161_p3 = scmp.lt.s32.totalorder (!%p138_p2), %s1445_s13, 1 }
   0x7   : > { %1190 = vmatprep.subr.bf16.mxu0 (!%p138_p2), %v1645_v1  ;;  %1105 = vmatpush1.bf16.msra.mxu1 (!%p138_p2), %v1647_v2  ;;  %v1651_v5 = vld [vmem:[%s2377_s1 + $0x214] ss:$8 sps:$4 sm:$0xff] (!%p138_p2)   ;;  %v1653_v6 = vld [vmem:[%s2377_s1 + $0x10] ss:$8 sps:$4 sm:$0xff] (!%p138_p2)   ;;  %v1655_v8 = vld [vmem:[%s2377_s1 + $0x24] ss:$8 sps:$4 sm:$0xff] (!%p138_p2)  }
   0x8   : > { %1191 = vmatpush1.bf16.msra.mxu0 (!%p138_p2), %v1648_v3  ;;  %1106 = vmatprep.subr.bf16.mxu1 (!%p138_p2), %v1649_v4  ;;  %v1654_v7 = vld [vmem:[%s2377_s1 + $0x210] ss:$8 sps:$4 sm:$0xff] (!%p138_p2)   ;;  %v1657_v9 = vld [vmem:[%s2377_s1 + $0x224] ss:$8 sps:$4 sm:$0xff] (!%p138_p2)   ;;  %v1659_v10 = vld [vmem:[%s2377_s1 + $0x20] ss:$8 sps:$4 sm:$0xff] (!%p138_p2)  }
   0x9   : > { %1192 = vmatprep.subr.bf16.mxu0 (!%p138_p2), %v1651_v5  ;;  %v1660_v11 = vld [vmem:[%s2377_s1 + $0x220] ss:$8 sps:$4 sm:$0xff] (!%p138_p2)   ;;  %v1661_v12 = vld [vmem:[%s2377_s1 + $0x34] ss:$8 sps:$4 sm:$0xff] (!%p138_p2)   ;;  %v1665_v14 = vld [vmem:[%s2377_s1 + $0x30] ss:$8 sps:$4 sm:$0xff] (!%p138_p2)  }
   0xa   : > { %v1663_v13 = vld [vmem:[%s2377_s1 + $0x234] ss:$8 sps:$4 sm:$0xff] (!%p138_p2)   ;;  %v1666_v15 = vld [vmem:[%s2377_s1 + $0x230] ss:$8 sps:$4 sm:$0xff] (!%p138_p2)   ;;  %v1667_v16 = vld [vmem:[%s2377_s1 + $0x44] ss:$8 sps:$4 sm:$0xff] (!%p138_p2)  }
   0xb   : > { %1107 = vmatpush1.bf16.msra.mxu1 (!%p138_p2), %v1653_v6  ;;  %v1669_v17 = vld [vmem:[%s2377_s1 + $0x244] ss:$8 sps:$4 sm:$0xff] (!%p138_p2)   ;;  %v1671_v18 = vld [vmem:[%s2377_s1 + $0x40] ss:$8 sps:$4 sm:$0xff] (!%p138_p2)   ;;  %v1673_v20 = vld [vmem:[%s2377_s1 + $0x54] ss:$8 sps:$4 sm:$0xff] (!%p138_p2)  }
   0xc   : > { %1193 = vmatpush1.bf16.msra.mxu0 (!%p138_p2), %v1654_v7  ;;  %1108 = vmatprep.subr.bf16.mxu1 (!%p138_p2), %v1655_v8  ;;  %v1672_v19 = vld [vmem:[%s2377_s1 + $0x240] ss:$8 sps:$4 sm:$0xff] (!%p138_p2)   ;;  %v1675_v21 = vld [vmem:[%s2377_s1 + $0x254] ss:$8 sps:$4 sm:$0xff] (!%p138_p2)   ;;  %v1677_v22 = vld [vmem:[%s2377_s1 + $0x50] ss:$8 sps:$4 sm:$0xff] (!%p138_p2)  }
   0xd   : > { %1194 = vmatprep.subr.bf16.mxu0 %v1657_v9  ;;  %v1678_v23 = vld [vmem:[%s2377_s1 + $0x250] ss:$8 sps:$4 sm:$0xff]   ;;  %v1679_v24 = vld [vmem:[%s2377_s1 + $0x64] ss:$8 sps:$4 sm:$0xff]   ;;  %v1683_v26 = vld [vmem:[%s2377_s1 + $0x60] ss:$8 sps:$4 sm:$0xff]  }
   0xe   : > { %v1681_v25 = vld [vmem:[%s2377_s1 + $0x264] ss:$8 sps:$4 sm:$0xff]   ;;  %v1684_v27 = vld [vmem:[%s2377_s1 + $0x260] ss:$8 sps:$4 sm:$0xff]   ;;  %v1685_v28 = vld [vmem:[%s2377_s1 + $0x74] ss:$8 sps:$4 sm:$0xff]  }
   0xf   : > { %1109 = vmatpush1.bf16.msra.mxu1 %v1659_v10  ;;  %v1687_v29 = vld [vmem:[%s2377_s1 + $0x274] ss:$8 sps:$4 sm:$0xff]   ;;  %v1689_v30 = vld [vmem:[%s2377_s1 + $0x70] ss:$8 sps:$4 sm:$0xff]   ;;  %v1691_v32 = vld [vmem:[%s2377_s1 + $0x84] ss:$8 sps:$4 sm:$0xff]  }
  0x10   : > { %1195 = vmatpush1.bf16.msra.mxu0 %v1660_v11  ;;  %1110 = vmatprep.subr.bf16.mxu1 %v1661_v12  ;;  %v1690_v31 = vld [vmem:[%s2377_s1 + $0x270] ss:$8 sps:$4 sm:$0xff]   ;;  %v1693_v33 = vld [vmem:[%s2377_s1 + $0x284] ss:$8 sps:$4 sm:$0xff]   ;;  %v1695_v34 = vld [vmem:[%s2377_s1 + $0x80] ss:$8 sps:$4 sm:$0xff]  }
  0x11   : > { %1196 = vmatprep.subr.bf16.mxu0 %v1663_v13  ;;  %v1696_v35 = vld [vmem:[%s2377_s1 + $0x280] ss:$8 sps:$4 sm:$0xff]   ;;  %v1697_v36 = vld [vmem:[%s2377_s1 + $0x94] ss:$8 sps:$4 sm:$0xff]   ;;  %s2381_s13 = smov (!%p161_p3, %s1445_s13), 1 }
  0x12   : > { %v1699_v37 = vld [vmem:[%s2377_s1 + $0x294] ss:$8 sps:$4 sm:$0xff]   ;;  %v1701_v38 = vld [vmem:[%s2377_s1 + $0x90] ss:$8 sps:$4 sm:$0xff]   ;;  %v1703_v40 = vld [vmem:[%s2377_s1 + $0xa4] ss:$8 sps:$4 sm:$0xff]  }
  0x13   : > { %1111 = vmatpush1.bf16.msra.mxu1 %v1665_v14  ;;  %v1702_v39 = vld [vmem:[%s2377_s1 + $0x290] ss:$8 sps:$4 sm:$0xff]   ;;  %s1633_s21 = smul.u32 72, %s2381_s13  ;;  %v1705_v41 = vld [vmem:[%s2377_s1 + $0x2a4] ss:$8 sps:$4 sm:$0xff]  }
  0x14   : > { %1197 = vmatpush1.bf16.msra.mxu0 %v1666_v15  ;;  %1112 = vmatprep.subr.bf16.mxu1 %v1667_v16  ;;  %v1707_v42 = vld [vmem:[%s2377_s1 + $0xa0] ss:$8 sps:$4 sm:$0xff]   ;;  %v1709_v44 = vld [vmem:[%s2377_s1 + $0xb4] ss:$8 sps:$4 sm:$0xff]   ;;  %v1713_v46 = vld [vmem:[%s2377_s1 + $0xb0] ss:$8 sps:$4 sm:$0xff]  }
  0x15   : > { %1198 = vmatprep.subr.bf16.mxu0 %v1669_v17  ;;  %v1708_v43 = vld [vmem:[%s2377_s1 + $0x2a0] ss:$8 sps:$4 sm:$0xff]   ;;  %s2058_s5 = scalar_lea.vmem %s2376_s0, %s1633_s21  ;;  %v1711_v45 = vld [vmem:[%s2377_s1 + $0x2b4] ss:$8 sps:$4 sm:$0xff]   ;;  %v1714_v47 = vld [vmem:[%s2377_s1 + $0x2b0] ss:$8 sps:$4 sm:$0xff]  }
  0x16   : > { %v1741_v48 = vld [vmem:[%s2058_s5 + $0x4] ss:$36 sps:$4 sm:$0xff]   ;;  %v1747_v51 = vld [vmem:[%s2058_s5 + $0x14] ss:$36 sps:$4 sm:$0xff]  }
  0x17   : > { %1113 = vmatpush1.bf16.msra.mxu1 %v1671_v18  ;;  %v1715_v49 = vld [vmem:[%s2377_s1 + $0xc4] ss:$8 sps:$4 sm:$0xff]   ;;  %1136 = vmatprep.mubr.bf16.mxu1 %v1741_v48  ;;  %v1719_v52 = vld [vmem:[%s2377_s1 + $0xc0] ss:$8 sps:$4 sm:$0xff]   ;;  %v1721_v54 = vld [vmem:[%s2377_s1 + $0xd4] ss:$8 sps:$4 sm:$0xff]  }
  0x18   : > { %1199 = vmatpush1.bf16.msra.mxu0 %v1672_v19  ;;  %1114 = vmatprep.subr.bf16.mxu1 %v1673_v20  ;;  %v1717_v50 = vld [vmem:[%s2377_s1 + $0x2c4] ss:$8 sps:$4 sm:$0xff]   ;;  %v1720_v53 = vld [vmem:[%s2377_s1 + $0x2c0] ss:$8 sps:$4 sm:$0xff]   ;;  %v1723_v55 = vld [vmem:[%s2377_s1 + $0x2d4] ss:$8 sps:$4 sm:$0xff]  }
  0x19   : > { %1200 = vmatprep.subr.bf16.mxu0 %v1675_v21  ;;  %1222 = vmatprep.mubr.bf16.mxu0 %v1747_v51  ;;  %v1725_v56 = vld [vmem:[%s2377_s1 + $0xd0] ss:$8 sps:$4 sm:$0xff]   ;;  %v1727_v58 = vld [vmem:[%s2377_s1 + $0xe4] ss:$8 sps:$4 sm:$0xff]   ;;  %v1731_v60 = vld [vmem:[%s2377_s1 + $0xe0] ss:$8 sps:$4 sm:$0xff]  }
  0x1a   : > { %v1726_v57 = vld [vmem:[%s2377_s1 + $0x2d0] ss:$8 sps:$4 sm:$0xff]   ;;  %v1729_v59 = vld [vmem:[%s2377_s1 + $0x2e4] ss:$8 sps:$4 sm:$0xff]   ;;  %v1732_v61 = vld [vmem:[%s2377_s1 + $0x2e0] ss:$8 sps:$4 sm:$0xff]  }
  0x1b   : > { %1115 = vmatpush1.bf16.msra.mxu1 %v1677_v22  ;;  %v1733_v62 = vld [vmem:[%s2377_s1 + $0xf4] ss:$8 sps:$4 sm:$0xff]   ;;  %v1737_v0 = vld [vmem:[%s2377_s1 + $0xf0] ss:$8 sps:$4 sm:$0xff]   ;;  %v1744_v2 = vld [vmem:[%s2377_s1 + $0x104] ss:$8 sps:$4 sm:$0xff]  }
  0x1c   : > { %1201 = vmatpush1.bf16.msra.mxu0 %v1678_v23  ;;  %1116 = vmatprep.subr.bf16.mxu1 %v1679_v24  ;;  %v1735_v63 = vld [vmem:[%s2377_s1 + $0x2f4] ss:$8 sps:$4 sm:$0xff]   ;;  %v1738_v1 = vld [vmem:[%s2377_s1 + $0x2f0] ss:$8 sps:$4 sm:$0xff]   ;;  %v1750_v3 = vld [vmem:[%s2377_s1 + $0x304] ss:$8 sps:$4 sm:$0xff]  }
  0x1d   : > { %1202 = vmatprep.subr.bf16.mxu0 %v1681_v25  ;;  %v1739_v4 = vld [vmem:[%s2058_s5] ss:$36 sps:$4 sm:$0xff]   ;;  %v1745_v6 = vld [vmem:[%s2058_s5 + $0x10] ss:$36 sps:$4 sm:$0xff]  }
  0x1e   : > { %v1742_v5 = vld [vmem:[%s2377_s1 + $0x100] ss:$8 sps:$4 sm:$0xff]   ;;  %v1753_v8 = vld [vmem:[%s2377_s1 + $0x114] ss:$8 sps:$4 sm:$0xff]   ;;  %v1751_v10 = vld [vmem:[%s2377_s1 + $0x110] ss:$8 sps:$4 sm:$0xff]  }
  0x1f   : > { %1117 = vmatpush1.bf16.msra.mxu1 %v1683_v26  ;;  %v1748_v7 = vld [vmem:[%s2377_s1 + $0x300] ss:$8 sps:$4 sm:$0xff]   ;;  %v1756_v9 = vld [vmem:[%s2377_s1 + $0x314] ss:$8 sps:$4 sm:$0xff]   ;;  %v1754_v11 = vld [vmem:[%s2377_s1 + $0x310] ss:$8 sps:$4 sm:$0xff]  }
  0x20   : > { %1203 = vmatpush1.bf16.msra.mxu0 %v1684_v27  ;;  %1118 = vmatprep.subr.bf16.mxu1 %v1685_v28  ;;  %v1759_v12 = vld [vmem:[%s2377_s1 + $0x124] ss:$8 sps:$4 sm:$0xff]   ;;  %v1757_v14 = vld [vmem:[%s2377_s1 + $0x120] ss:$8 sps:$4 sm:$0xff]   ;;  %v1765_v16 = vld [vmem:[%s2377_s1 + $0x134] ss:$8 sps:$4 sm:$0xff]  }
  0x21   : > { %1204 = vmatprep.subr.bf16.mxu0 %v1687_v29  ;;  %v1762_v13 = vld [vmem:[%s2377_s1 + $0x324] ss:$8 sps:$4 sm:$0xff]   ;;  %v1760_v15 = vld [vmem:[%s2377_s1 + $0x320] ss:$8 sps:$4 sm:$0xff]   ;;  %v1768_v17 = vld [vmem:[%s2377_s1 + $0x334] ss:$8 sps:$4 sm:$0xff]  }
  0x22   : > { %v1763_v18 = vld [vmem:[%s2377_s1 + $0x130] ss:$8 sps:$4 sm:$0xff]   ;;  %v1771_v20 = vld [vmem:[%s2377_s1 + $0x144] ss:$8 sps:$4 sm:$0xff]   ;;  %v1769_v22 = vld [vmem:[%s2377_s1 + $0x140] ss:$8 sps:$4 sm:$0xff]  }
  0x23   : > { %1119 = vmatpush1.bf16.msra.mxu1 %v1689_v30  ;;  %v1766_v19 = vld [vmem:[%s2377_s1 + $0x330] ss:$8 sps:$4 sm:$0xff]   ;;  %v1774_v21 = vld [vmem:[%s2377_s1 + $0x344] ss:$8 sps:$4 sm:$0xff]   ;;  %v1772_v23 = vld [vmem:[%s2377_s1 + $0x340] ss:$8 sps:$4 sm:$0xff]  }
  0x24   : > { %1205 = vmatpush1.bf16.msra.mxu0 %v1690_v31  ;;  %1120 = vmatprep.subr.bf16.mxu1 %v1691_v32  ;;  %v1777_v24 = vld [vmem:[%s2377_s1 + $0x154] ss:$8 sps:$4 sm:$0xff]   ;;  %v1775_v26 = vld [vmem:[%s2377_s1 + $0x150] ss:$8 sps:$4 sm:$0xff]   ;;  %v1783_v28 = vld [vmem:[%s2377_s1 + $0x164] ss:$8 sps:$4 sm:$0xff]  }
  0x25   : > { %1206 = vmatprep.subr.bf16.mxu0 %v1693_v33  ;;  %v1780_v25 = vld [vmem:[%s2377_s1 + $0x354] ss:$8 sps:$4 sm:$0xff]   ;;  %v1778_v27 = vld [vmem:[%s2377_s1 + $0x350] ss:$8 sps:$4 sm:$0xff]   ;;  %v1786_v29 = vld [vmem:[%s2377_s1 + $0x364] ss:$8 sps:$4 sm:$0xff]  }
  0x26   : > { %v1781_v30 = vld [vmem:[%s2377_s1 + $0x160] ss:$8 sps:$4 sm:$0xff]   ;;  %v1789_v32 = vld [vmem:[%s2377_s1 + $0x174] ss:$8 sps:$4 sm:$0xff]  }
  0x27   : > { %1121 = vmatpush1.bf16.msra.mxu1 %v1695_v34  ;;  %v1784_v31 = vld [vmem:[%s2377_s1 + $0x360] ss:$8 sps:$4 sm:$0xff]   ;;  %v1792_v33 = vld [vmem:[%s2377_s1 + $0x374] ss:$8 sps:$4 sm:$0xff]   ;;  %v1843_v34 = vld [vmem:[%s2058_s5 + $0xc] ss:$36 sps:$4 sm:$0xff]  }
  0x28   : > { %1207 = vmatpush1.bf16.msra.mxu0 %v1696_v35  ;;  %1122 = vmatprep.subr.bf16.mxu1 %v1697_v36  ;;  %v1846_v35 = vld [vmem:[%s2058_s5 + $0x1c] ss:$36 sps:$4 sm:$0xff]   ;;  %v1787_v36 = vld [vmem:[%s2377_s1 + $0x170] ss:$8 sps:$4 sm:$0xff]  }
  0x29   : > { %1208 = vmatprep.subr.bf16.mxu0 %v1699_v37  ;;  %v1790_v37 = vld [vmem:[%s2377_s1 + $0x370] ss:$8 sps:$4 sm:$0xff]   ;;  %v1805_v48 = vld [vmem:[%s2377_s1 + $0x1a0] ss:$8 sps:$4 sm:$0xff]   ;;  %v1816_v51 = vld [vmem:[%s2377_s1 + $0x3b4] ss:$8 sps:$4 sm:$0xff]  }
  0x2b   : > { %1123 = vmatpush1.bf16.msra.mxu1 %v1701_v38  ;;  %v1795_v38 = vld [vmem:[%s2377_s1 + $0x184] ss:$8 sps:$4 sm:$0xff]  }
  0x2c   : > { %1209 = vmatpush1.bf16.msra.mxu0 %v1702_v39  ;;  %1124 = vmatprep.subr.bf16.mxu1 %v1703_v40  ;;  %v1798_v39 = vld [vmem:[%s2377_s1 + $0x384] ss:$8 sps:$4 sm:$0xff]   ;;  %v1793_v40 = vld [vmem:[%s2377_s1 + $0x180] ss:$8 sps:$4 sm:$0xff]  }
  0x2d   : > { %1210 = vmatprep.subr.bf16.mxu0 %v1705_v41  ;;  %v1796_v41 = vld [vmem:[%s2377_s1 + $0x380] ss:$8 sps:$4 sm:$0xff]  }
  0x2f   : > { %1125 = vmatpush1.bf16.msra.mxu1 %v1707_v42  ;;  %v1801_v42 = vld [vmem:[%s2377_s1 + $0x194] ss:$8 sps:$4 sm:$0xff]  }
  0x30   : > { %1211 = vmatpush1.bf16.msra.mxu0 %v1708_v43  ;;  %1126 = vmatprep.subr.bf16.mxu1 %v1709_v44  ;;  %v1804_v43 = vld [vmem:[%s2377_s1 + $0x394] ss:$8 sps:$4 sm:$0xff]   ;;  %v1799_v44 = vld [vmem:[%s2377_s1 + $0x190] ss:$8 sps:$4 sm:$0xff]  }
  0x31   : > { %1212 = vmatprep.subr.bf16.mxu0 %v1711_v45  ;;  %v1802_v45 = vld [vmem:[%s2377_s1 + $0x390] ss:$8 sps:$4 sm:$0xff]  }
  0x33   : > { %1127 = vmatpush1.bf16.msra.mxu1 %v1713_v46  ;;  %v1807_v46 = vld [vmem:[%s2377_s1 + $0x1a4] ss:$8 sps:$4 sm:$0xff]  }
  0x34   : > { %1213 = vmatpush1.bf16.msra.mxu0 %v1714_v47  ;;  %1128 = vmatprep.subr.bf16.mxu1 %v1715_v49  ;;  %v1810_v47 = vld [vmem:[%s2377_s1 + $0x3a4] ss:$8 sps:$4 sm:$0xff]   ;;  %v1808_v49 = vld [vmem:[%s2377_s1 + $0x3a0] ss:$8 sps:$4 sm:$0xff]  }
  0x35   : > { %1214 = vmatprep.subr.bf16.mxu0 %v1717_v50  ;;  %v1813_v50 = vld [vmem:[%s2377_s1 + $0x1b4] ss:$8 sps:$4 sm:$0xff]  }
  0x37   : > { %1129 = vmatpush1.bf16.msra.mxu1 %v1719_v52  ;;  %v1811_v52 = vld [vmem:[%s2377_s1 + $0x1b0] ss:$8 sps:$4 sm:$0xff]  }
  0x38   : > { %1215 = vmatpush1.bf16.msra.mxu0 %v1720_v53  ;;  %1130 = vmatprep.subr.bf16.mxu1 %v1721_v54  ;;  %v1814_v53 = vld [vmem:[%s2377_s1 + $0x3b0] ss:$8 sps:$4 sm:$0xff]   ;;  %v1819_v54 = vld [vmem:[%s2377_s1 + $0x1c4] ss:$8 sps:$4 sm:$0xff]  }
  0x39   : > { %1216 = vmatprep.subr.bf16.mxu0 %v1723_v55  ;;  %v1822_v55 = vld [vmem:[%s2377_s1 + $0x3c4] ss:$8 sps:$4 sm:$0xff]  }
  0x3b   : > { %1131 = vmatpush1.bf16.msra.mxu1 %v1725_v56  ;;  %v1817_v56 = vld [vmem:[%s2377_s1 + $0x1c0] ss:$8 sps:$4 sm:$0xff]  }
  0x3c   : > { %1217 = vmatpush1.bf16.msra.mxu0 %v1726_v57  ;;  %1132 = vmatprep.subr.bf16.mxu1 %v1727_v58  ;;  %v1820_v57 = vld [vmem:[%s2377_s1 + $0x3c0] ss:$8 sps:$4 sm:$0xff]   ;;  %v1825_v58 = vld [vmem:[%s2377_s1 + $0x1d4] ss:$8 sps:$4 sm:$0xff]  }
  0x3d   : > { %1218 = vmatprep.subr.bf16.mxu0 %v1729_v59  ;;  %v1828_v59 = vld [vmem:[%s2377_s1 + $0x3d4] ss:$8 sps:$4 sm:$0xff]  }
  0x3f   : > { %1133 = vmatpush1.bf16.msra.mxu1 %v1731_v60  ;;  %v1823_v60 = vld [vmem:[%s2377_s1 + $0x1d0] ss:$8 sps:$4 sm:$0xff]  }
  0x40   : > { %1219 = vmatpush1.bf16.msra.mxu0 %v1732_v61  ;;  %1134 = vmatprep.subr.bf16.mxu1 %v1733_v62  ;;  %v1826_v61 = vld [vmem:[%s2377_s1 + $0x3d0] ss:$8 sps:$4 sm:$0xff]   ;;  %v1831_v62 = vld [vmem:[%s2377_s1 + $0x1e4] ss:$8 sps:$4 sm:$0xff]  }
  0x41   : > { %1220 = vmatprep.subr.bf16.mxu0 %v1735_v63  ;;  %v1834_v63 = vld [vmem:[%s2377_s1 + $0x3e4] ss:$8 sps:$4 sm:$0xff]  }
  0x43   : > { %1135 = vmatpush1.bf16.msra.mxu1 %v1737_v0  ;;  %v1829_v0 = vld [vmem:[%s2377_s1 + $0x1e0] ss:$8 sps:$4 sm:$0xff]  }
  0x44   : > { %1221 = vmatpush1.bf16.msra.mxu0 %v1738_v1  ;;  %1147 = vmatprep.subr.bf16.mxu1 %v1744_v2  ;;  %v1832_v1 = vld [vmem:[%s2377_s1 + $0x3e0] ss:$8 sps:$4 sm:$0xff]   ;;  %v1837_v2 = vld [vmem:[%s2377_s1 + $0x1f4] ss:$8 sps:$4 sm:$0xff]  }
  0x45   : > { %1233 = vmatprep.subr.bf16.mxu0 %v1750_v3  ;;  %v1840_v3 = vld [vmem:[%s2377_s1 + $0x3f4] ss:$8 sps:$4 sm:$0xff]  }
  0x46   : > { %1137 = vmatmul.mubr.bf16.vlgmr.msra.gmra.mrb[0].mxu1 %v1739_v4  ;;  %v1835_v4 = vld [vmem:[%s2377_s1 + $0x1f0] ss:$8 sps:$4 sm:$0xff]  }
  0x47   : > { %1223 = vmatmul.mubr.bf16.vlgmr.msra.gmra.mrb[0].mxu0 %v1745_v6  ;;  %1148 = vmatpush1.bf16.msra.mxu1 %v1742_v5  ;;  %v1838_v5 = vld [vmem:[%s2377_s1 + $0x3f0] ss:$8 sps:$4 sm:$0xff]   ;;  %v1849_v6 = vld [vmem:[%s2377_s1 + $0x404] ss:$8 sps:$4 sm:$0xff]  }
  0x48   : > { %1234 = vmatpush1.bf16.msra.mxu0 %v1748_v7  ;;  %1149 = vmatprep.subr.bf16.mxu1 %v1753_v8  ;;  %v1841_v7 = vld [vmem:[%s2058_s5 + $0x8] ss:$36 sps:$4 sm:$0xff]   ;;  %v1844_v8 = vld [vmem:[%s2058_s5 + $0x18] ss:$36 sps:$4 sm:$0xff]  }
  0x49   : > { %1235 = vmatprep.subr.bf16.mxu0 %v1756_v9  ;;  %1179 = vmatprep.mubr.bf16.mxu1 %v1843_v34  ;;  %v1847_v9 = vld [vmem:[%s2377_s1 + $0x400] ss:$8 sps:$4 sm:$0xff]  }
  0x4a   : > { %1265 = vmatprep.mubr.bf16.mxu0 %v1846_v35 }
  0x4b   : > { %1150 = vmatpush1.bf16.msra.mxu1 %v1751_v10  ;;  %v1852_v10 = vld [vmem:[%s2377_s1 + $0x414] ss:$8 sps:$4 sm:$0xff]  }
  0x4c   : > { %1236 = vmatpush1.bf16.msra.mxu0 %v1754_v11  ;;  %1151 = vmatprep.subr.bf16.mxu1 %v1759_v12  ;;  %v1850_v11 = vld [vmem:[%s2377_s1 + $0x410] ss:$8 sps:$4 sm:$0xff]   ;;  %v1884_v12 = vmov 0  }
  0x4d   : > { %1237 = vmatprep.subr.bf16.mxu0 %v1762_v13  ;;  %v1855_v13 = vld [vmem:[%s2377_s1 + $0x424] ss:$8 sps:$4 sm:$0xff]  }
  0x4f   : > { %1152 = vmatpush1.bf16.msra.mxu1 %v1757_v14  ;;  %v1853_v14 = vld [vmem:[%s2377_s1 + $0x420] ss:$8 sps:$4 sm:$0xff]  }
  0x50   : > { %1238 = vmatpush1.bf16.msra.mxu0 %v1760_v15  ;;  %1153 = vmatprep.subr.bf16.mxu1 %v1765_v16  ;;  %v1858_v15 = vld [vmem:[%s2377_s1 + $0x434] ss:$8 sps:$4 sm:$0xff]   ;;  %v1856_v16 = vld [vmem:[%s2377_s1 + $0x430] ss:$8 sps:$4 sm:$0xff]  }
  0x51   : > { %1239 = vmatprep.subr.bf16.mxu0 %v1768_v17  ;;  %v1861_v17 = vld [vmem:[%s2377_s1 + $0x444] ss:$8 sps:$4 sm:$0xff]  }
  0x53   : > { %1154 = vmatpush1.bf16.msra.mxu1 %v1763_v18  ;;  %v1859_v18 = vld [vmem:[%s2377_s1 + $0x440] ss:$8 sps:$4 sm:$0xff]  }
  0x54   : > { %1240 = vmatpush1.bf16.msra.mxu0 %v1766_v19  ;;  %1155 = vmatprep.subr.bf16.mxu1 %v1771_v20  ;;  %v1864_v19 = vld [vmem:[%s2377_s1 + $0x454] ss:$8 sps:$4 sm:$0xff]   ;;  %v1862_v20 = vld [vmem:[%s2377_s1 + $0x450] ss:$8 sps:$4 sm:$0xff]  }
  0x55   : > { %1241 = vmatprep.subr.bf16.mxu0 %v1774_v21  ;;  %v1867_v21 = vld [vmem:[%s2377_s1 + $0x464] ss:$8 sps:$4 sm:$0xff]  }
  0x57   : > { %1156 = vmatpush1.bf16.msra.mxu1 %v1769_v22  ;;  %v1865_v22 = vld [vmem:[%s2377_s1 + $0x460] ss:$8 sps:$4 sm:$0xff]  }
  0x58   : > { %1242 = vmatpush1.bf16.msra.mxu0 %v1772_v23  ;;  %1157 = vmatprep.subr.bf16.mxu1 %v1777_v24  ;;  %v1870_v23 = vld [vmem:[%s2377_s1 + $0x474] ss:$8 sps:$4 sm:$0xff]   ;;  %v1868_v24 = vld [vmem:[%s2377_s1 + $0x470] ss:$8 sps:$4 sm:$0xff]  }
  0x59   : > { %1243 = vmatprep.subr.bf16.mxu0 %v1780_v25  ;;  %v1871_v25 = vld [vmem:[%s2058_s5 + $0x20] ss:$36 sps:$4 sm:$0xff]   ;;  %s1610_s5 = sshll.u32 %s2381_s13, 4 }
  0x5a   : > { %s170_s18 = scalar_lea.vmem %s2379_s3, %s1610_s5 }
  0x5b   : > { %1158 = vmatpush1.bf16.msra.mxu1 %v1775_v26 }
  0x5c   : > { %1244 = vmatpush1.bf16.msra.mxu0 %v1778_v27  ;;  %1159 = vmatprep.subr.bf16.mxu1 %v1783_v28 }
  0x5d   : > { %1245 = vmatprep.subr.bf16.mxu0 %v1786_v29 }
  0x5f   : > { %1160 = vmatpush1.bf16.msra.mxu1 %v1781_v30  ;;  %v328_v30 = vlaneseq }
  0x60   : > { %1246 = vmatpush1.bf16.msra.mxu0 %v1784_v31  ;;  %1161 = vmatprep.subr.bf16.mxu1 %v1789_v32 }
  0x61   : > { %1247 = vmatprep.subr.bf16.mxu0 %v1792_v33  ;;  %v329_v31 = vshrl.u32 %v328_v30, 7  ;;  %v326_v33 = vld [vmem:[%s2378_s2] sm:$0x3] }
  0x63   : > { %1162 = vmatpush1.bf16.msra.mxu1 %v1787_v36  ;;  %v330_v32 = vsub.s32 0, %v329_v31  ;;  %v334_v34 = vsub.s32 1, %v329_v31 }
  0x64   : > { %1248 = vmatpush1.bf16.msra.mxu0 %v1790_v37  ;;  %1163 = vmatprep.subr.bf16.mxu1 %v1795_v38 }
  0x65   : > { %1249 = vmatprep.subr.bf16.mxu0 %v1798_v39  ;;  %v331_v35 = vrot.slane %v326_v33, %v330_v32  ;;  %v335_v36 = vrot.slane %v326_v33, %v334_v34 }
  0x67   : > { %1164 = vmatpush1.bf16.msra.mxu1 %v1793_v40 }
  0x68   : > { %1250 = vmatpush1.bf16.msra.mxu0 %v1796_v41  ;;  %1165 = vmatprep.subr.bf16.mxu1 %v1801_v42 }
  0x69   : > { %1251 = vmatprep.subr.bf16.mxu0 %v1804_v43 }
  0x6b   : > { %1166 = vmatpush1.bf16.msra.mxu1 %v1799_v44 }
  0x6c   : > { %1252 = vmatpush1.bf16.msra.mxu0 %v1802_v45  ;;  %1167 = vmatprep.subr.bf16.mxu1 %v1807_v46 }
  0x6d   : > { %1253 = vmatprep.subr.bf16.mxu0 %v1810_v47 }
  0x6f   : > { %1168 = vmatpush1.bf16.msra.mxu1 %v1805_v48 }
  0x70   : > { %1254 = vmatpush1.bf16.msra.mxu0 %v1808_v49  ;;  %1169 = vmatprep.subr.bf16.mxu1 %v1813_v50 }
  0x71   : > { %1255 = vmatprep.subr.bf16.mxu0 %v1816_v51 }
  0x73   : > { %1170 = vmatpush1.bf16.msra.mxu1 %v1811_v52 }
  0x74   : > { %1256 = vmatpush1.bf16.msra.mxu0 %v1814_v53  ;;  %1171 = vmatprep.subr.bf16.mxu1 %v1819_v54 }
  0x75   : > { %1257 = vmatprep.subr.bf16.mxu0 %v1822_v55 }
  0x77   : > { %1172 = vmatpush1.bf16.msra.mxu1 %v1817_v56 }
  0x78   : > { %1258 = vmatpush1.bf16.msra.mxu0 %v1820_v57  ;;  %1173 = vmatprep.subr.bf16.mxu1 %v1825_v58 }
  0x79   : > { %1259 = vmatprep.subr.bf16.mxu0 %v1828_v59 }
  0x7b   : > { %1174 = vmatpush1.bf16.msra.mxu1 %v1823_v60 }
  0x7c   : > { %1260 = vmatpush1.bf16.msra.mxu0 %v1826_v61  ;;  %1175 = vmatprep.subr.bf16.mxu1 %v1831_v62 }
  0x7d   : > { %1261 = vmatprep.subr.bf16.mxu0 %v1834_v63 }
  0x7f   : > { %1176 = vmatpush1.bf16.msra.mxu1 %v1829_v0 }
  0x80   : > { %1262 = vmatpush1.bf16.msra.mxu0 %v1832_v1  ;;  %1177 = vmatprep.subr.bf16.mxu1 %v1837_v2 }
  0x81   : > { %1263 = vmatprep.subr.bf16.mxu0 %v1840_v3 }
  0x83   : > { %1178 = vmatpush1.bf16.msra.mxu1 %v1835_v4 }
  0x84   : > { %1264 = vmatpush1.bf16.msra.mxu0 %v1838_v5 }
  0x85   : > { %1276 = vmatprep.subr.bf16.mxu0 %v1849_v6 }
  0x86   : > { %1180 = vmatmul.mubr.bf16.vlgmr.msra.gmra.mrb[0].mxu1 %v1841_v7 }
  0x87   : > { %1266 = vmatmul.mubr.bf16.vlgmr.msra.gmra.mrb[0].mxu0 %v1844_v8 }
  0x88   : > { %1277 = vmatpush1.bf16.msra.mxu0 %v1847_v9  ;;  %1308 = vmatprep.mubr.bf16.mxu0 %v1884_v12 }
  0x89   : > { %1278 = vmatprep.subr.bf16.mxu0 %v1852_v10 }
  0x8c   : > { %1279 = vmatpush1.bf16.msra.mxu0 %v1850_v11 }
  0x8d   : > { %1280 = vmatprep.subr.bf16.mxu0 %v1855_v13 }
  0x90   : > { %1281 = vmatpush1.bf16.msra.mxu0 %v1853_v14 }
  0x91   : > { %1282 = vmatprep.subr.bf16.mxu0 %v1858_v15 }
  0x94   : > { %1283 = vmatpush1.bf16.msra.mxu0 %v1856_v16 }
  0x95   : > { %1284 = vmatprep.subr.bf16.mxu0 %v1861_v17 }
  0x98   : > { %1285 = vmatpush1.bf16.msra.mxu0 %v1859_v18 }
  0x99   : > { %1286 = vmatprep.subr.bf16.mxu0 %v1864_v19 }
  0x9c   : > { %1287 = vmatpush1.bf16.msra.mxu0 %v1862_v20 }
  0x9d   : > { %1288 = vmatprep.subr.bf16.mxu0 %v1867_v21 }
  0xa0   : > { %1289 = vmatpush1.bf16.msra.mxu0 %v1865_v22 }
  0xa1   : > { %1290 = vmatprep.subr.bf16.mxu0 %v1870_v23 }
  0xa4   : > { %1291 = vmatpush1.bf16.msra.mxu0 %v1868_v24 }
  0xa7   : > { %1309 = vmatmul.mubr.bf16.vlgmr.msra.gmra.mrb[0].mxu0 %v1871_v25 }
 0x159   : > { %v1181_v26 = vpop.f32.mrb[0].mxu1 }
 0x15a   : > { %v1183_v27 = vpop.f32.mrb[1].mxu1  ;;  %v1613_v37 = vadd.f32 %v1181_v26, %v331_v35 }
 0x15b   : > { %v1185_v28 = vpop.f32.mrb[2].mxu1  ;;  %v1615_v38 = vadd.f32 %v1183_v27, %v335_v36 }
 0x15c   : > { %v1187_v29 = vpop.f32.mrb[3].mxu1  ;;  %v1617_v40 = vadd.f32 %v1185_v28, %v331_v35 }
 0x15d   : > { %v1619_v43 = vadd.f32 %v1187_v29, %v335_v36 }
 0x17a   : > { %v1310_v39 = vpop.f32.mrb[0].mxu0 }
 0x17b   : > { %v1614_v41 = vadd.f32 %v1613_v37, %v1310_v39  ;;  %v1312_v42 = vpop.f32.mrb[1].mxu0 }
 0x17c   : > { %v1616_v44 = vadd.f32 %v1615_v38, %v1312_v42  ;;  %v1314_v45 = vpop.f32.mrb[2].mxu0 }
 0x17d   : > { %v1618_v46 = vadd.f32 %v1617_v40, %v1314_v45  ;;  %v1316_v47 = vpop.f32.mrb[3].mxu0 }
 0x17e   : > { %v1620_v48 = vadd.f32 %v1619_v43, %v1316_v47 }
 0x17f   : > { %v1319_v49 = vadd.f32 %v1618_v46, %v1614_v41 }
 0x180   : > { %v1326_v50 = vadd.f32 %v1620_v48, %v1616_v44 }
 0x181   : > { %v1320_v51 = vrot.slane %v1319_v49, 4 }
 0x182   : > { %v1327_v52 = vrot.slane %v1326_v50, 4 }
 0x183   : > { %v1321_v53 = vadd.f32 %v1320_v51, %v1319_v49 }
 0x184   : > { %v1328_v54 = vadd.f32 %v1327_v52, %v1326_v50 }
 0x185   : > { %v1322_v55 = vrot.slane %v1321_v53, 2 }
 0x186   : > { %v1329_v56 = vrot.slane %v1328_v54, 2 }
 0x187   : > { %v1323_v57 = vadd.f32 %v1322_v55, %v1321_v53 }
 0x188   : > { %v1330_v58 = vadd.f32 %v1329_v56, %v1328_v54 }
 0x189   : > { %v1324_v59 = vrot.slane %v1323_v57, 1 }
 0x18a   : > { %v1331_v60 = vrot.slane %v1330_v58, 1 }
 0x18b   : > { %v1325_v61 = vadd.f32 %v1324_v59, %v1323_v57 }
 0x18c   : > { %v1332_v62 = vadd.f32 %v1331_v60, %v1330_v58 }
 0x18d   : > { %v1334_v63 = vmul.f32 0.0625, %v1325_v61 }
 0x18e   : > { %v1335_v0 = vmul.f32 0.0625, %v1332_v62 }
 0x18f   : > { %v1336_v1 = vsub.f32 %v1614_v41, %v1334_v63  ;;  %v1338_v2 = vsub.f32 %v1618_v46, %v1334_v63 }
 0x190   : > { %v1337_v3 = vsub.f32 %v1616_v44, %v1335_v0  ;;  %v1339_v4 = vsub.f32 %v1620_v48, %v1335_v0 }
 0x191   : > { %v1340_v5 = vmul.f32 %v1336_v1, %v1336_v1  ;;  %v1342_v6 = vmul.f32 %v1338_v2, %v1338_v2 }
 0x192   : > { %v1341_v7 = vmul.f32 %v1337_v3, %v1337_v3  ;;  %v1343_v8 = vmul.f32 %v1339_v4, %v1339_v4 }
 0x193   : > { %v1344_v9 = vadd.f32 %v1342_v6, %v1340_v5 }
 0x194   : > { %v1351_v10 = vadd.f32 %v1343_v8, %v1341_v7 }
 0x195   : > { %v1345_v11 = vrot.slane %v1344_v9, 4 }
 0x196   : > { %v1352_v12 = vrot.slane %v1351_v10, 4 }
 0x197   : > { %v1346_v13 = vadd.f32 %v1345_v11, %v1344_v9 }
 0x198   : > { %v1353_v14 = vadd.f32 %v1352_v12, %v1351_v10 }
 0x199   : > { %v1347_v15 = vrot.slane %v1346_v13, 2 }
 0x19a   : > { %v1354_v16 = vrot.slane %v1353_v14, 2 }
 0x19b   : > { %v1348_v17 = vadd.f32 %v1347_v15, %v1346_v13 }
 0x19c   : > { %v1355_v18 = vadd.f32 %v1354_v16, %v1353_v14 }
 0x19d   : > { %v1349_v19 = vrot.slane %v1348_v17, 1 }
 0x19e   : > { %v1356_v20 = vrot.slane %v1355_v18, 1 }
 0x19f   : > { %v1350_v21 = vadd.f32 %v1349_v19, %v1348_v17 }
 0x1a0   : > { %v1357_v22 = vadd.f32 %v1356_v20, %v1355_v18 }
 0x1a1   : > { %v1358_v23 = vmul.f32 0.0625, %v1350_v21 }
 0x1a2   : > { %v1359_v24 = vmul.f32 0.0625, %v1357_v22 }
 0x1a3   : > { %v1360_v25 = vadd.f32 1e-05, %v1358_v23 }
 0x1a4   : > { %v1361_v26 = vadd.f32 1e-05, %v1359_v24 }
 0x1a5   : > { %1872 = vrsqrt.f32 %v1360_v25 }
 0x1a6   : > { %1874 = vrsqrt.f32 %v1361_v26 }
 0x1af   : > { %v1873_v27 = vpop.eup %1872 }
 0x1b0   : > { %v1875_v28 = vpop.eup %1874  ;;  %v1364_v29 = vmul.f32 %v1873_v27, %v1336_v1  ;;  %v1366_v30 = vmul.f32 %v1873_v27, %v1338_v2 }
 0x1b1   : > { %v1365_v31 = vmul.f32 %v1875_v28, %v1337_v3  ;;  %v1367_v32 = vmul.f32 %v1875_v28, %v1339_v4 }
 0x1b2   : > { %v1368_v33 = vmul.f32 0.2, %v1364_v29  ;;  %v1370_v34 = vmul.f32 0.2, %v1366_v30 }
 0x1b3   : > { %v1369_v35 = vmul.f32 0.2, %v1365_v31  ;;  %v1371_v36 = vmul.f32 0.2, %v1367_v32 }
 0x1b4   : > { %v1372_v37 = vmax.f32 %v1364_v29, %v1368_v33  ;;  %v1374_v38 = vmax.f32 %v1366_v30, %v1370_v34 }
 0x1b5   : > { %v1373_v39 = vmax.f32 %v1365_v31, %v1369_v35  ;;  %v1375_v40 = vmax.f32 %v1367_v32, %v1371_v36 }
 0x1b7   : > { %v1611_v41 = vpack.c.bf16 %v1373_v39, %v1372_v37  ;;  %v1612_v42 = vpack.c.bf16 %v1375_v40, %v1374_v38 }
 0x1b9   : > { %1388 = vst [vmem:[%s170_s18] sm:$0xff] %v1611_v41  ;;  %1389 = vst [vmem:[%s170_s18 + $0x8] sm:$0xff] %v1612_v42 }
 0x1ba PF: > { %s13_s12 = sadd.s32 1, %s1882_s12  }
 0x1bb   : > { %p10_p4 = scmp.ge.s32.totalorder %s13_s12, 4  }
 0x1bd   :  { %12 = sbr.rel (!%p10_p4) target bundleno = 1 (0x1), region = 62 }

// kernel: discriminator_forward.9
= control target key start
LH: loop header
LB: loop body
LE: loop exit
PB: predicated region body
PF: predicated region fallthrough
CT: control target
= control target key end

     0   :  { %s3314_s12 = smov 0   ;;  %s4277_s0 = inlined_call_operand.vmem [shape: bf16[2,4,2304], index: 0, kind: input, shape index: {}]   ;;  %s4278_s1 = inlined_call_operand.vmem [shape: bf16[2304,256], index: 1, kind: input, shape index: {}]   ;;  %s4279_s2 = inlined_call_operand.vmem [shape: f32[1,256], index: 2, kind: input, shape index: {}]   ;;  %s4280_s3 = inlined_call_operand.vmem [shape: bf16[2,4,256], index: 3, kind: output, shape index: {}]  }
   0x1 LB: > { %s2501_s13 = sadd.s32 4294967295, %s3291_s12   ;;  %p2505_p0 = scmp.ge.s32.totalorder %s3291_s12, 1  ;;  %s3291_s12 = sphi %s3314_s12, %s13_s12  }
   0x2   : > { %p137_p1 = scmp.lt.s32.totalorder %s3291_s12, 3 }
   0x4   : > { %p138_p2 = pnand %p2505_p0, %p137_p1 }
   0x5   : > { %v2845_v0 = vld [vmem:[%s4278_s1 + $0x4] ss:$8 sps:$4 sm:$0xff] (!%p138_p2)   ;;  %v2849_v2 = vld [vmem:[%s4278_s1] ss:$8 sps:$4 sm:$0xff] (!%p138_p2)   ;;  %v2851_v4 = vld [vmem:[%s4278_s1 + $0x14] ss:$8 sps:$4 sm:$0xff] (!%p138_p2)   ;;  %v466_v36 = vlaneseq (!%p138_p2) }
   0x6   : > { %141 = sbr.rel (%p138_p2) target bundleno = 598 (0x256), region = 32  ;;  %v2847_v1 = vld [vmem:[%s4278_s1 + $0x404] ss:$8 sps:$4 sm:$0xff] (!%p138_p2)   ;;  %2015 = vmatprep.subr.bf16.mxu1 (!%p138_p2), %v2845_v0  ;;  %v2850_v3 = vld [vmem:[%s4278_s1 + $0x400] ss:$8 sps:$4 sm:$0xff] (!%p138_p2)   ;;  %p161_p3 = scmp.lt.s32.totalorder (!%p138_p2), %s2501_s13, 1 }
   0x7   : > { %2179 = vmatprep.subr.bf16.mxu0 (!%p138_p2), %v2847_v1  ;;  %2016 = vmatpush1.bf16.msra.mxu1 (!%p138_p2), %v2849_v2  ;;  %v2853_v5 = vld [vmem:[%s4278_s1 + $0x414] ss:$8 sps:$4 sm:$0xff] (!%p138_p2)   ;;  %v2855_v6 = vld [vmem:[%s4278_s1 + $0x10] ss:$8 sps:$4 sm:$0xff] (!%p138_p2)   ;;  %v2857_v8 = vld [vmem:[%s4278_s1 + $0x24] ss:$8 sps:$4 sm:$0xff] (!%p138_p2)  }
   0x8   : > { %2180 = vmatpush1.bf16.msra.mxu0 (!%p138_p2), %v2850_v3  ;;  %2017 = vmatprep.subr.bf16.mxu1 (!%p138_p2), %v2851_v4  ;;  %v2856_v7 = vld [vmem:[%s4278_s1 + $0x410] ss:$8 sps:$4 sm:$0xff] (!%p138_p2)   ;;  %v2859_v9 = vld [vmem:[%s4278_s1 + $0x424] ss:$8 sps:$4 sm:$0xff] (!%p138_p2)   ;;  %v2861_v10 = vld [vmem:[%s4278_s1 + $0x20] ss:$8 sps:$4 sm:$0xff] (!%p138_p2)  }
   0x9   : > { %2181 = vmatprep.subr.bf16.mxu0 (!%p138_p2), %v2853_v5  ;;  %v2862_v11 = vld [vmem:[%s4278_s1 + $0x420] ss:$8 sps:$4 sm:$0xff] (!%p138_p2)   ;;  %v2863_v12 = vld [vmem:[%s4278_s1 + $0x34] ss:$8 sps:$4 sm:$0xff] (!%p138_p2)   ;;  %v2867_v14 = vld [vmem:[%s4278_s1 + $0x30] ss:$8 sps:$4 sm:$0xff] (!%p138_p2)  }
   0xa   : > { %v2865_v13 = vld [vmem:[%s4278_s1 + $0x434] ss:$8 sps:$4 sm:$0xff] (!%p138_p2)   ;;  %v2868_v15 = vld [vmem:[%s4278_s1 + $0x430] ss:$8 sps:$4 sm:$0xff] (!%p138_p2)   ;;  %v2869_v16 = vld [vmem:[%s4278_s1 + $0x44] ss:$8 sps:$4 sm:$0xff] (!%p138_p2)  }
   0xb   : > { %2018 = vmatpush1.bf16.msra.mxu1 (!%p138_p2), %v2855_v6  ;;  %v2871_v17 = vld [vmem:[%s4278_s1 + $0x444] ss:$8 sps:$4 sm:$0xff] (!%p138_p2)   ;;  %v2873_v18 = vld [vmem:[%s4278_s1 + $0x40] ss:$8 sps:$4 sm:$0xff] (!%p138_p2)   ;;  %v2875_v20 = vld [vmem:[%s4278_s1 + $0x54] ss:$8 sps:$4 sm:$0xff] (!%p138_p2)  }
   0xc   : > { %2182 = vmatpush1.bf16.msra.mxu0 (!%p138_p2), %v2856_v7  ;;  %2019 = vmatprep.subr.bf16.mxu1 (!%p138_p2), %v2857_v8  ;;  %v2874_v19 = vld [vmem:[%s4278_s1 + $0x440] ss:$8 sps:$4 sm:$0xff] (!%p138_p2)   ;;  %v2877_v21 = vld [vmem:[%s4278_s1 + $0x454] ss:$8 sps:$4 sm:$0xff] (!%p138_p2)   ;;  %v2879_v22 = vld [vmem:[%s4278_s1 + $0x50] ss:$8 sps:$4 sm:$0xff] (!%p138_p2)  }
   0xd   : > { %2183 = vmatprep.subr.bf16.mxu0 %v2859_v9  ;;  %v2880_v23 = vld [vmem:[%s4278_s1 + $0x450] ss:$8 sps:$4 sm:$0xff]   ;;  %v2881_v24 = vld [vmem:[%s4278_s1 + $0x64] ss:$8 sps:$4 sm:$0xff]   ;;  %v2885_v26 = vld [vmem:[%s4278_s1 + $0x60] ss:$8 sps:$4 sm:$0xff]  }
   0xe   : > { %v2883_v25 = vld [vmem:[%s4278_s1 + $0x464] ss:$8 sps:$4 sm:$0xff]   ;;  %v2886_v27 = vld [vmem:[%s4278_s1 + $0x460] ss:$8 sps:$4 sm:$0xff]   ;;  %v2887_v28 = vld [vmem:[%s4278_s1 + $0x74] ss:$8 sps:$4 sm:$0xff]  }
   0xf   : > { %2020 = vmatpush1.bf16.msra.mxu1 %v2861_v10  ;;  %v2889_v29 = vld [vmem:[%s4278_s1 + $0x474] ss:$8 sps:$4 sm:$0xff]   ;;  %v2891_v30 = vld [vmem:[%s4278_s1 + $0x70] ss:$8 sps:$4 sm:$0xff]   ;;  %v2893_v32 = vld [vmem:[%s4278_s1 + $0x84] ss:$8 sps:$4 sm:$0xff]  }
  0x10   : > { %2184 = vmatpush1.bf16.msra.mxu0 %v2862_v11  ;;  %2021 = vmatprep.subr.bf16.mxu1 %v2863_v12  ;;  %v2892_v31 = vld [vmem:[%s4278_s1 + $0x470] ss:$8 sps:$4 sm:$0xff]   ;;  %v2895_v33 = vld [vmem:[%s4278_s1 + $0x484] ss:$8 sps:$4 sm:$0xff]   ;;  %v2897_v34 = vld [vmem:[%s4278_s1 + $0x80] ss:$8 sps:$4 sm:$0xff]  }
  0x11   : > { %2185 = vmatprep.subr.bf16.mxu0 %v2865_v13  ;;  %v2898_v35 = vld [vmem:[%s4278_s1 + $0x480] ss:$8 sps:$4 sm:$0xff]   ;;  %s4282_s13 = smov (!%p161_p3, %s2501_s13), 1  ;;  %v3293_v37 = vmov 1983009808   ;;  %v3446_v42 = vshrl.u32 %v466_v36, 7 }
  0x12   : > { %v483_v38 = vunpack.c.l.s4 %v3293_v37  ;;  %v2899_v39 = vld [vmem:[%s4278_s1 + $0x94] ss:$8 sps:$4 sm:$0xff]   ;;  %v2903_v41 = vld [vmem:[%s4278_s1 + $0x90] ss:$8 sps:$4 sm:$0xff]   ;;  %s2835_s17 = smul.u32 36, %s4282_s13  ;;  %vm2384_vm0 = vcmask 1043456  }
  0x13   : > { %2022 = vmatpush1.bf16.msra.mxu1 %v2867_v14  ;;  %v2901_v40 = vld [vmem:[%s4278_s1 + $0x494] ss:$8 sps:$4 sm:$0xff]   ;;  %v2904_v44 = vld [vmem:[%s4278_s1 + $0x490] ss:$8 sps:$4 sm:$0xff]   ;;  %v2905_v45 = vld [vmem:[%s4278_s1 + $0xa4] ss:$8 sps:$4 sm:$0xff]  }
  0x14   : > { %2186 = vmatpush1.bf16.msra.mxu0 %v2868_v15  ;;  %2023 = vmatprep.subr.bf16.mxu1 %v2869_v16  ;;  %v484_v43 = vunpack.c.0.s8 %v483_v38  ;;  %v2907_v46 = vld [vmem:[%s4278_s1 + $0x4a4] ss:$8 sps:$4 sm:$0xff]   ;;  %v2909_v47 = vld [vmem:[%s4278_s1 + $0xa0] ss:$8 sps:$4 sm:$0xff]   ;;  %s3466_s30 = scalar_lea.vmem %s4277_s0, %s2835_s17  ;;  %v2911_v50 = vld [vmem:[%s4278_s1 + $0xb4] ss:$8 sps:$4 sm:$0xff]  }
  0x15   : > { %2187 = vmatprep.subr.bf16.mxu0 %v2871_v17  ;;  %v2910_v48 = vld [vmem:[%s4278_s1 + $0x4a0] ss:$8 sps:$4 sm:$0xff]   ;;  %v2913_v51 = vld [vmem:[%s4278_s1 + $0x4b4] ss:$8 sps:$4 sm:$0xff]   ;;  %v2915_v53 = vld [vmem:[%s4278_s1 + $0xb0] ss:$8 sps:$4 sm:$0xff]  }
  0x16   : > { %v3469_v49 = vsub.s32 %v484_v43, %v3446_v42  ;;  %v171_v52 = vld [vmem:[%s3466_s30] sm:$0xff]  ;;  %v2916_v55 = vld [vmem:[%s4278_s1 + $0x4b0] ss:$8 sps:$4 sm:$0xff]   ;;  %v2923_v0 = vld [vmem:[%s4278_s1 + $0xd4] ss:$8 sps:$4 sm:$0xff]   ;;  %s2802_s11 = sshll.u32 %s4282_s13, 2 }
  0x17   : > { %2024 = vmatpush1.bf16.msra.mxu1 %v2873_v18  ;;  %v173_v56 = vld [vmem:[%s3466_s30 + $0x10] sm:$0xff]  ;;  %v2917_v57 = vld [vmem:[%s4278_s1 + $0xc4] ss:$8 sps:$4 sm:$0xff]   ;;  %v2921_v62 = vld [vmem:[%s4278_s1 + $0xc0] ss:$8 sps:$4 sm:$0xff]   ;;  %v481_v10 = vcombine.high %v171_v52, %v171_v52  ;;  %s170_s16 = scalar_lea.vmem %s4280_s3, %s2802_s11 }
  0x18   : > { %2188 = vmatpush1.bf16.msra.mxu0 %v2874_v19  ;;  %2025 = vmatprep.subr.bf16.mxu1 %v2875_v20  ;;  %v488_v54 = vrot.slane %v171_v52, %v3469_v49  ;;  %v2919_v58 = vld [vmem:[%s4278_s1 + $0x4c4] ss:$8 sps:$4 sm:$0xff]   ;;  %v522_v60 = vrot.slane %v173_v56, %v3469_v49  ;;  %v2922_v63 = vld [vmem:[%s4278_s1 + $0x4c0] ss:$8 sps:$4 sm:$0xff]   ;;  %v2925_v1 = vld [vmem:[%s4278_s1 + $0x4d4] ss:$8 sps:$4 sm:$0xff]   ;;  %v515_v11 = vcombine.high %v173_v56, %v173_v56 }
  0x19   : > { %2189 = vmatprep.subr.bf16.mxu0 %v2877_v21  ;;  %v2927_v2 = vld [vmem:[%s4278_s1 + $0xd0] ss:$8 sps:$4 sm:$0xff]   ;;  %v2929_v4 = vld [vmem:[%s4278_s1 + $0xe4] ss:$8 sps:$4 sm:$0xff]   ;;  %v2933_v6 = vld [vmem:[%s4278_s1 + $0xe0] ss:$8 sps:$4 sm:$0xff]   ;;  %v3542_v16 = vrot.slane %v481_v10, %v3469_v49 }
  0x1a   : > { %v496_v59 = vcombine.high %v488_v54, %v488_v54  ;;  %v530_v61 = vcombine.high %v522_v60, %v522_v60  ;;  %v2928_v3 = vld [vmem:[%s4278_s1 + $0x4d0] ss:$8 sps:$4 sm:$0xff]   ;;  %v2931_v5 = vld [vmem:[%s4278_s1 + $0x4e4] ss:$8 sps:$4 sm:$0xff]   ;;  %v2934_v7 = vld [vmem:[%s4278_s1 + $0x4e0] ss:$8 sps:$4 sm:$0xff]   ;;  %v3545_v17 = vrot.slane %v515_v11, %v3469_v49 }
  0x1b   : > { %2026 = vmatpush1.bf16.msra.mxu1 %v2879_v22  ;;  %v2935_v8 = vld [vmem:[%s4278_s1 + $0xf4] ss:$8 sps:$4 sm:$0xff]   ;;  %v2939_v12 = vld [vmem:[%s4278_s1 + $0xf0] ss:$8 sps:$4 sm:$0xff]   ;;  %v2944_v14 = vld [vmem:[%s4278_s1 + $0x104] ss:$8 sps:$4 sm:$0xff]   ;;  %v497_v22 = vcombine.high %v3542_v16, %v3542_v16 }
  0x1c   : > { %2190 = vmatpush1.bf16.msra.mxu0 %v2880_v23  ;;  %2027 = vmatprep.subr.bf16.mxu1 %v2881_v24  ;;  %v2937_v9 = vld [vmem:[%s4278_s1 + $0x4f4] ss:$8 sps:$4 sm:$0xff]   ;;  %v2940_v13 = vld [vmem:[%s4278_s1 + $0x4f0] ss:$8 sps:$4 sm:$0xff]   ;;  %v2948_v15 = vld [vmem:[%s4278_s1 + $0x504] ss:$8 sps:$4 sm:$0xff]   ;;  %v531_v23 = vcombine.high %v3545_v17, %v3545_v17 }
  0x1d   : > { %2191 = vmatprep.subr.bf16.mxu0 %v2883_v25  ;;  %2047 = vmatprep.mubr.bf16.mxu1 %v496_v59  ;;  %v2942_v18 = vld [vmem:[%s4278_s1 + $0x100] ss:$8 sps:$4 sm:$0xff]   ;;  %v2951_v20 = vld [vmem:[%s4278_s1 + $0x114] ss:$8 sps:$4 sm:$0xff]   ;;  %v2949_v24 = vld [vmem:[%s4278_s1 + $0x110] ss:$8 sps:$4 sm:$0xff]  }
  0x1e   : > { %2211 = vmatprep.mubr.bf16.mxu0 %v530_v61  ;;  %v2946_v19 = vld [vmem:[%s4278_s1 + $0x500] ss:$8 sps:$4 sm:$0xff]   ;;  %v2954_v21 = vld [vmem:[%s4278_s1 + $0x514] ss:$8 sps:$4 sm:$0xff]   ;;  %v2952_v25 = vld [vmem:[%s4278_s1 + $0x510] ss:$8 sps:$4 sm:$0xff]  }
  0x1f   : > { %2028 = vmatpush1.bf16.msra.mxu1 %v2885_v26  ;;  %v2957_v26 = vld [vmem:[%s4278_s1 + $0x124] ss:$8 sps:$4 sm:$0xff]   ;;  %v2967_v36 = vld [vmem:[%s4278_s1 + $0x140] ss:$8 sps:$4 sm:$0xff]   ;;  %v2975_v38 = vld [vmem:[%s4278_s1 + $0x154] ss:$8 sps:$4 sm:$0xff]  }
  0x20   : > { %2192 = vmatpush1.bf16.msra.mxu0 %v2886_v27  ;;  %2029 = vmatprep.subr.bf16.mxu1 %v2887_v28  ;;  %v2960_v27 = vld [vmem:[%s4278_s1 + $0x524] ss:$8 sps:$4 sm:$0xff]   ;;  %v2955_v28 = vld [vmem:[%s4278_s1 + $0x120] ss:$8 sps:$4 sm:$0xff]   ;;  %v2999_v56 = vld [vmem:[%s4278_s1 + $0x194] ss:$8 sps:$4 sm:$0xff]  }
  0x21   : > { %2193 = vmatprep.subr.bf16.mxu0 %v2889_v29  ;;  %v2958_v29 = vld [vmem:[%s4278_s1 + $0x520] ss:$8 sps:$4 sm:$0xff]   ;;  %v2981_v43 = vld [vmem:[%s4278_s1 + $0x164] ss:$8 sps:$4 sm:$0xff]   ;;  %v3000_v59 = vld [vmem:[%s4278_s1 + $0x590] ss:$8 sps:$4 sm:$0xff]  }
  0x22   : > { %v2970_v37 = vld [vmem:[%s4278_s1 + $0x540] ss:$8 sps:$4 sm:$0xff]   ;;  %v2993_v52 = vld [vmem:[%s4278_s1 + $0x184] ss:$8 sps:$4 sm:$0xff]   ;;  %v3021_v10 = vld [vmem:[%s4278_s1 + $0x1d0] ss:$8 sps:$4 sm:$0xff]  }
  0x23   : > { %2030 = vmatpush1.bf16.msra.mxu1 %v2891_v30  ;;  %v2963_v30 = vld [vmem:[%s4278_s1 + $0x134] ss:$8 sps:$4 sm:$0xff]   ;;  %v3008_v61 = vld [vmem:[%s4278_s1 + $0x5a4] ss:$8 sps:$4 sm:$0xff]   ;;  %v3024_v11 = vld [vmem:[%s4278_s1 + $0x5d0] ss:$8 sps:$4 sm:$0xff]  }
  0x24   : > { %2194 = vmatpush1.bf16.msra.mxu0 %v2892_v31  ;;  %2031 = vmatprep.subr.bf16.mxu1 %v2893_v32  ;;  %v2966_v31 = vld [vmem:[%s4278_s1 + $0x534] ss:$8 sps:$4 sm:$0xff]   ;;  %v2961_v32 = vld [vmem:[%s4278_s1 + $0x130] ss:$8 sps:$4 sm:$0xff]  }
  0x25   : > { %2195 = vmatprep.subr.bf16.mxu0 %v2895_v33  ;;  %v2964_v33 = vld [vmem:[%s4278_s1 + $0x530] ss:$8 sps:$4 sm:$0xff]  }
  0x27   : > { %2032 = vmatpush1.bf16.msra.mxu1 %v2897_v34  ;;  %v2969_v34 = vld [vmem:[%s4278_s1 + $0x144] ss:$8 sps:$4 sm:$0xff]  }
  0x28   : > { %2196 = vmatpush1.bf16.msra.mxu0 %v2898_v35  ;;  %2033 = vmatprep.subr.bf16.mxu1 %v2899_v39  ;;  %v2972_v35 = vld [vmem:[%s4278_s1 + $0x544] ss:$8 sps:$4 sm:$0xff]   ;;  %v2978_v39 = vld [vmem:[%s4278_s1 + $0x554] ss:$8 sps:$4 sm:$0xff]  }
  0x29   : > { %2197 = vmatprep.subr.bf16.mxu0 %v2901_v40  ;;  %v2973_v40 = vld [vmem:[%s4278_s1 + $0x150] ss:$8 sps:$4 sm:$0xff]  }
  0x2b   : > { %2034 = vmatpush1.bf16.msra.mxu1 %v2903_v41  ;;  %v2976_v41 = vld [vmem:[%s4278_s1 + $0x550] ss:$8 sps:$4 sm:$0xff]  }
  0x2c   : > { %2198 = vmatpush1.bf16.msra.mxu0 %v2904_v44  ;;  %2035 = vmatprep.subr.bf16.mxu1 %v2905_v45  ;;  %v2984_v44 = vld [vmem:[%s4278_s1 + $0x564] ss:$8 sps:$4 sm:$0xff]   ;;  %v2979_v45 = vld [vmem:[%s4278_s1 + $0x160] ss:$8 sps:$4 sm:$0xff]  }
  0x2d   : > { %2199 = vmatprep.subr.bf16.mxu0 %v2907_v46  ;;  %v2982_v46 = vld [vmem:[%s4278_s1 + $0x560] ss:$8 sps:$4 sm:$0xff]  }
  0x2f   : > { %2036 = vmatpush1.bf16.msra.mxu1 %v2909_v47  ;;  %v2987_v47 = vld [vmem:[%s4278_s1 + $0x174] ss:$8 sps:$4 sm:$0xff]  }
  0x30   : > { %2200 = vmatpush1.bf16.msra.mxu0 %v2910_v48  ;;  %2037 = vmatprep.subr.bf16.mxu1 %v2911_v50  ;;  %v2990_v48 = vld [vmem:[%s4278_s1 + $0x574] ss:$8 sps:$4 sm:$0xff]   ;;  %v2985_v50 = vld [vmem:[%s4278_s1 + $0x170] ss:$8 sps:$4 sm:$0xff]  }
  0x31   : > { %2201 = vmatprep.subr.bf16.mxu0 %v2913_v51  ;;  %v2988_v51 = vld [vmem:[%s4278_s1 + $0x570] ss:$8 sps:$4 sm:$0xff]  }
  0x33   : > { %2038 = vmatpush1.bf16.msra.mxu1 %v2915_v53  ;;  %v2996_v53 = vld [vmem:[%s4278_s1 + $0x584] ss:$8 sps:$4 sm:$0xff]  }
  0x34   : > { %2202 = vmatpush1.bf16.msra.mxu0 %v2916_v55  ;;  %2039 = vmatprep.subr.bf16.mxu1 %v2917_v57  ;;  %v2994_v55 = vld [vmem:[%s4278_s1 + $0x580] ss:$8 sps:$4 sm:$0xff]   ;;  %v3002_v57 = vld [vmem:[%s4278_s1 + $0x594] ss:$8 sps:$4 sm:$0xff]  }
  0x35   : > { %2203 = vmatprep.subr.bf16.mxu0 %v2919_v58  ;;  %v2997_v58 = vld [vmem:[%s4278_s1 + $0x190] ss:$8 sps:$4 sm:$0xff]  }
  0x37   : > { %2040 = vmatpush1.bf16.msra.mxu1 %v2921_v62  ;;  %v3003_v62 = vld [vmem:[%s4278_s1 + $0x1a0] ss:$8 sps:$4 sm:$0xff]  }
  0x38   : > { %2204 = vmatpush1.bf16.msra.mxu0 %v2922_v63  ;;  %2041 = vmatprep.subr.bf16.mxu1 %v2923_v0  ;;  %v3006_v63 = vld [vmem:[%s4278_s1 + $0x5a0] ss:$8 sps:$4 sm:$0xff]   ;;  %v3011_v0 = vld [vmem:[%s4278_s1 + $0x1b4] ss:$8 sps:$4 sm:$0xff]  }
  0x39   : > { %2205 = vmatprep.subr.bf16.mxu0 %v2925_v1  ;;  %v3014_v1 = vld [vmem:[%s4278_s1 + $0x5b4] ss:$8 sps:$4 sm:$0xff]  }
  0x3b   : > { %2042 = vmatpush1.bf16.msra.mxu1 %v2927_v2  ;;  %v3009_v2 = vld [vmem:[%s4278_s1 + $0x1b0] ss:$8 sps:$4 sm:$0xff]  }
  0x3c   : > { %2206 = vmatpush1.bf16.msra.mxu0 %v2928_v3  ;;  %2043 = vmatprep.subr.bf16.mxu1 %v2929_v4  ;;  %v3012_v3 = vld [vmem:[%s4278_s1 + $0x5b0] ss:$8 sps:$4 sm:$0xff]   ;;  %v3017_v4 = vld [vmem:[%s4278_s1 + $0x1c4] ss:$8 sps:$4 sm:$0xff]  }
  0x3d   : > { %2207 = vmatprep.subr.bf16.mxu0 %v2931_v5  ;;  %v3020_v5 = vld [vmem:[%s4278_s1 + $0x5c4] ss:$8 sps:$4 sm:$0xff]  }
  0x3f   : > { %2044 = vmatpush1.bf16.msra.mxu1 %v2933_v6  ;;  %v3015_v6 = vld [vmem:[%s4278_s1 + $0x1c0] ss:$8 sps:$4 sm:$0xff]  }
  0x40   : > { %2208 = vmatpush1.bf16.msra.mxu0 %v2934_v7  ;;  %2045 = vmatprep.subr.bf16.mxu1 %v2935_v8  ;;  %v3018_v7 = vld [vmem:[%s4278_s1 + $0x5c0] ss:$8 sps:$4 sm:$0xff]   ;;  %v3023_v8 = vld [vmem:[%s4278_s1 + $0x1d4] ss:$8 sps:$4 sm:$0xff]  }
  0x41   : > { %2209 = vmatprep.subr.bf16.mxu0 %v2937_v9  ;;  %v3026_v9 = vld [vmem:[%s4278_s1 + $0x5d4] ss:$8 sps:$4 sm:$0xff]  }
  0x43   : > { %2046 = vmatpush1.bf16.msra.mxu1 %v2939_v12  ;;  %v3029_v12 = vld [vmem:[%s4278_s1 + $0x1e4] ss:$8 sps:$4 sm:$0xff]  }
  0x44   : > { %2210 = vmatpush1.bf16.msra.mxu0 %v2940_v13  ;;  %2056 = vmatprep.subr.bf16.mxu1 %v2944_v14  ;;  %v3032_v13 = vld [vmem:[%s4278_s1 + $0x5e4] ss:$8 sps:$4 sm:$0xff]   ;;  %v3027_v14 = vld [vmem:[%s4278_s1 + $0x1e0] ss:$8 sps:$4 sm:$0xff]  }
  0x45   : > { %2220 = vmatprep.subr.bf16.mxu0 %v2948_v15  ;;  %v3030_v15 = vld [vmem:[%s4278_s1 + $0x5e0] ss:$8 sps:$4 sm:$0xff]  }
  0x46   : > { %2048 = vmatmul.mubr.bf16.vlgmr.msra.gmra.mrb[0].mxu1 %v488_v54  ;;  %v2991_v54 = vld [vmem:[%s4278_s1 + $0x180] ss:$8 sps:$4 sm:$0xff]  }
  0x47   : > { %2212 = vmatmul.mubr.bf16.vlgmr.msra.gmra.mrb[0].mxu0 %v522_v60  ;;  %2057 = vmatpush1.bf16.msra.mxu1 %v2942_v18  ;;  %v3005_v60 = vld [vmem:[%s4278_s1 + $0x1a4] ss:$8 sps:$4 sm:$0xff]   ;;  %v3035_v18 = vld [vmem:[%s4278_s1 + $0x1f4] ss:$8 sps:$4 sm:$0xff]  }
  0x48   : > { %2221 = vmatpush1.bf16.msra.mxu0 %v2946_v19  ;;  %2058 = vmatprep.subr.bf16.mxu1 %v2951_v20  ;;  %v3038_v19 = vld [vmem:[%s4278_s1 + $0x5f4] ss:$8 sps:$4 sm:$0xff]   ;;  %v3033_v20 = vld [vmem:[%s4278_s1 + $0x1f0] ss:$8 sps:$4 sm:$0xff]  }
  0x49   : > { %2222 = vmatprep.subr.bf16.mxu0 %v2954_v21  ;;  %2088 = vmatprep.mubr.bf16.mxu1 %v497_v22  ;;  %v3036_v21 = vld [vmem:[%s4278_s1 + $0x5f0] ss:$8 sps:$4 sm:$0xff]   ;;  %v3041_v22 = vld [vmem:[%s4278_s1 + $0x204] ss:$8 sps:$4 sm:$0xff]  }
  0x4a   : > { %2252 = vmatprep.mubr.bf16.mxu0 %v531_v23  ;;  %v3044_v23 = vld [vmem:[%s4278_s1 + $0x604] ss:$8 sps:$4 sm:$0xff]  }
  0x4b   : > { %2059 = vmatpush1.bf16.msra.mxu1 %v2949_v24  ;;  %v3039_v24 = vld [vmem:[%s4278_s1 + $0x200] ss:$8 sps:$4 sm:$0xff]  }
  0x4c   : > { %2223 = vmatpush1.bf16.msra.mxu0 %v2952_v25  ;;  %2060 = vmatprep.subr.bf16.mxu1 %v2957_v26  ;;  %v3042_v25 = vld [vmem:[%s4278_s1 + $0x600] ss:$8 sps:$4 sm:$0xff]   ;;  %v3047_v26 = vld [vmem:[%s4278_s1 + $0x214] ss:$8 sps:$4 sm:$0xff]  }
  0x4d   : > { %2224 = vmatprep.subr.bf16.mxu0 %v2960_v27  ;;  %v3753_v27 = vld [vmem:[%s3466_s30 + $0x8] sm:$0xff] }
  0x4f   : > { %2061 = vmatpush1.bf16.msra.mxu1 %v2955_v28  ;;  %v3050_v28 = vld [vmem:[%s4278_s1 + $0x614] ss:$8 sps:$4 sm:$0xff]  }
  0x50   : > { %2225 = vmatpush1.bf16.msra.mxu0 %v2958_v29  ;;  %2062 = vmatprep.subr.bf16.mxu1 %v2963_v30  ;;  %v3760_v29 = vrot.slane %v3753_v27, %v3469_v49  ;;  %v3763_v30 = vld [vmem:[%s3466_s30 + $0x18] sm:$0xff] }
  0x51   : > { %2226 = vmatprep.subr.bf16.mxu0 %v2966_v31  ;;  %v3045_v31 = vld [vmem:[%s4278_s1 + $0x210] ss:$8 sps:$4 sm:$0xff]  }
  0x53   : > { %2063 = vmatpush1.bf16.msra.mxu1 %v2961_v32  ;;  %v3048_v32 = vld [vmem:[%s4278_s1 + $0x610] ss:$8 sps:$4 sm:$0xff]  }
  0x54   : > { %2227 = vmatpush1.bf16.msra.mxu0 %v2964_v33  ;;  %2064 = vmatprep.subr.bf16.mxu1 %v2969_v34  ;;  %v513_v33 = vcombine.high %v3760_v29, %v3760_v29  ;;  %v3777_v34 = vrot.slane %v3763_v30, %v3469_v49 }
  0x55   : > { %2228 = vmatprep.subr.bf16.mxu0 %v2972_v35 }
  0x56   : > { %v547_v35 = vcombine.high %v3777_v34, %v3777_v34 }
  0x57   : > { %2065 = vmatpush1.bf16.msra.mxu1 %v2967_v36  ;;  %v3051_v36 = vld [vmem:[%s4278_s1 + $0x220] ss:$8 sps:$4 sm:$0xff]  }
  0x58   : > { %2229 = vmatpush1.bf16.msra.mxu0 %v2970_v37  ;;  %2066 = vmatprep.subr.bf16.mxu1 %v2975_v38  ;;  %v3054_v37 = vld [vmem:[%s4278_s1 + $0x620] ss:$8 sps:$4 sm:$0xff]   ;;  %v3059_v38 = vld [vmem:[%s4278_s1 + $0x234] ss:$8 sps:$4 sm:$0xff]  }
  0x59   : > { %2230 = vmatprep.subr.bf16.mxu0 %v2978_v39  ;;  %v3062_v39 = vld [vmem:[%s4278_s1 + $0x634] ss:$8 sps:$4 sm:$0xff]  }
  0x5b   : > { %2067 = vmatpush1.bf16.msra.mxu1 %v2973_v40  ;;  %v3057_v40 = vld [vmem:[%s4278_s1 + $0x230] ss:$8 sps:$4 sm:$0xff]  }
  0x5c   : > { %2231 = vmatpush1.bf16.msra.mxu0 %v2976_v41  ;;  %2068 = vmatprep.subr.bf16.mxu1 %v2981_v43  ;;  %v3060_v41 = vld [vmem:[%s4278_s1 + $0x630] ss:$8 sps:$4 sm:$0xff]   ;;  %v3065_v43 = vld [vmem:[%s4278_s1 + $0x244] ss:$8 sps:$4 sm:$0xff]  }
  0x5d   : > { %2232 = vmatprep.subr.bf16.mxu0 %v2984_v44  ;;  %v3068_v44 = vld [vmem:[%s4278_s1 + $0x644] ss:$8 sps:$4 sm:$0xff]  }
  0x5f   : > { %2069 = vmatpush1.bf16.msra.mxu1 %v2979_v45  ;;  %v3063_v45 = vld [vmem:[%s4278_s1 + $0x240] ss:$8 sps:$4 sm:$0xff]  }
  0x60   : > { %2233 = vmatpush1.bf16.msra.mxu0 %v2982_v46  ;;  %2070 = vmatprep.subr.bf16.mxu1 %v2987_v47  ;;  %v3066_v46 = vld [vmem:[%s4278_s1 + $0x640] ss:$8 sps:$4 sm:$0xff]   ;;  %v3071_v47 = vld [vmem:[%s4278_s1 + $0x254] ss:$8 sps:$4 sm:$0xff]  }
  0x61   : > { %2234 = vmatprep.subr.bf16.mxu0 %v2990_v48  ;;  %v3074_v48 = vld [vmem:[%s4278_s1 + $0x654] ss:$8 sps:$4 sm:$0xff]  }
  0x63   : > { %2071 = vmatpush1.bf16.msra.mxu1 %v2985_v50  ;;  %v3069_v50 = vld [vmem:[%s4278_s1 + $0x250] ss:$8 sps:$4 sm:$0xff]  }
  0x64   : > { %2235 = vmatpush1.bf16.msra.mxu0 %v2988_v51  ;;  %2072 = vmatprep.subr.bf16.mxu1 %v2993_v52  ;;  %v3072_v51 = vld [vmem:[%s4278_s1 + $0x650] ss:$8 sps:$4 sm:$0xff]   ;;  %v3077_v52 = vld [vmem:[%s4278_s1 + $0x264] ss:$8 sps:$4 sm:$0xff]  }
  0x65   : > { %2236 = vmatprep.subr.bf16.mxu0 %v2996_v53  ;;  %v3080_v53 = vld [vmem:[%s4278_s1 + $0x664] ss:$8 sps:$4 sm:$0xff]  }
  0x67   : > { %2073 = vmatpush1.bf16.msra.mxu1 %v2991_v54  ;;  %v3075_v54 = vld [vmem:[%s4278_s1 + $0x260] ss:$8 sps:$4 sm:$0xff]  }
  0x68   : > { %2237 = vmatpush1.bf16.msra.mxu0 %v2994_v55  ;;  %2074 = vmatprep.subr.bf16.mxu1 %v2999_v56  ;;  %v3078_v55 = vld [vmem:[%s4278_s1 + $0x660] ss:$8 sps:$4 sm:$0xff]   ;;  %v3083_v56 = vld [vmem:[%s4278_s1 + $0x274] ss:$8 sps:$4 sm:$0xff]  }
  0x69   : > { %2238 = vmatprep.subr.bf16.mxu0 %v3002_v57  ;;  %v3086_v57 = vld [vmem:[%s4278_s1 + $0x674] ss:$8 sps:$4 sm:$0xff]  }
  0x6b   : > { %2075 = vmatpush1.bf16.msra.mxu1 %v2997_v58  ;;  %v3081_v58 = vld [vmem:[%s4278_s1 + $0x270] ss:$8 sps:$4 sm:$0xff]  }
  0x6c   : > { %2239 = vmatpush1.bf16.msra.mxu0 %v3000_v59  ;;  %2076 = vmatprep.subr.bf16.mxu1 %v3005_v60  ;;  %v3084_v59 = vld [vmem:[%s4278_s1 + $0x670] ss:$8 sps:$4 sm:$0xff]   ;;  %v3089_v60 = vld [vmem:[%s4278_s1 + $0x284] ss:$8 sps:$4 sm:$0xff]  }
  0x6d   : > { %2240 = vmatprep.subr.bf16.mxu0 %v3008_v61  ;;  %v3092_v61 = vld [vmem:[%s4278_s1 + $0x684] ss:$8 sps:$4 sm:$0xff]  }
  0x6f   : > { %2077 = vmatpush1.bf16.msra.mxu1 %v3003_v62  ;;  %v3087_v62 = vld [vmem:[%s4278_s1 + $0x280] ss:$8 sps:$4 sm:$0xff]  }
  0x70   : > { %2241 = vmatpush1.bf16.msra.mxu0 %v3006_v63  ;;  %2078 = vmatprep.subr.bf16.mxu1 %v3011_v0  ;;  %v3090_v63 = vld [vmem:[%s4278_s1 + $0x680] ss:$8 sps:$4 sm:$0xff]   ;;  %v3095_v0 = vld [vmem:[%s4278_s1 + $0x294] ss:$8 sps:$4 sm:$0xff]  }
  0x71   : > { %2242 = vmatprep.subr.bf16.mxu0 %v3014_v1  ;;  %v3098_v1 = vld [vmem:[%s4278_s1 + $0x694] ss:$8 sps:$4 sm:$0xff]  }
  0x73   : > { %2079 = vmatpush1.bf16.msra.mxu1 %v3009_v2  ;;  %v3093_v2 = vld [vmem:[%s4278_s1 + $0x290] ss:$8 sps:$4 sm:$0xff]  }
  0x74   : > { %2243 = vmatpush1.bf16.msra.mxu0 %v3012_v3  ;;  %2080 = vmatprep.subr.bf16.mxu1 %v3017_v4  ;;  %v3096_v3 = vld [vmem:[%s4278_s1 + $0x690] ss:$8 sps:$4 sm:$0xff]   ;;  %v3101_v4 = vld [vmem:[%s4278_s1 + $0x2a4] ss:$8 sps:$4 sm:$0xff]  }
  0x75   : > { %2244 = vmatprep.subr.bf16.mxu0 %v3020_v5  ;;  %v3104_v5 = vld [vmem:[%s4278_s1 + $0x6a4] ss:$8 sps:$4 sm:$0xff]  }
  0x77   : > { %2081 = vmatpush1.bf16.msra.mxu1 %v3015_v6  ;;  %v3099_v6 = vld [vmem:[%s4278_s1 + $0x2a0] ss:$8 sps:$4 sm:$0xff]  }
  0x78   : > { %2245 = vmatpush1.bf16.msra.mxu0 %v3018_v7  ;;  %2082 = vmatprep.subr.bf16.mxu1 %v3023_v8  ;;  %v3102_v7 = vld [vmem:[%s4278_s1 + $0x6a0] ss:$8 sps:$4 sm:$0xff]   ;;  %v3107_v8 = vld [vmem:[%s4278_s1 + $0x2b4] ss:$8 sps:$4 sm:$0xff]  }
  0x79   : > { %2246 = vmatprep.subr.bf16.mxu0 %v3026_v9  ;;  %v3110_v9 = vld [vmem:[%s4278_s1 + $0x6b4] ss:$8 sps:$4 sm:$0xff]  }
  0x7b   : > { %2083 = vmatpush1.bf16.msra.mxu1 %v3021_v10  ;;  %v3105_v10 = vld [vmem:[%s4278_s1 + $0x2b0] ss:$8 sps:$4 sm:$0xff]  }
  0x7c   : > { %2247 = vmatpush1.bf16.msra.mxu0 %v3024_v11  ;;  %2084 = vmatprep.subr.bf16.mxu1 %v3029_v12  ;;  %v3108_v11 = vld [vmem:[%s4278_s1 + $0x6b0] ss:$8 sps:$4 sm:$0xff]   ;;  %v3113_v12 = vld [vmem:[%s4278_s1 + $0x2c4] ss:$8 sps:$4 sm:$0xff]  }
  0x7d   : > { %2248 = vmatprep.subr.bf16.mxu0 %v3032_v13  ;;  %v3116_v13 = vld [vmem:[%s4278_s1 + $0x6c4] ss:$8 sps:$4 sm:$0xff]  }
  0x7f   : > { %2085 = vmatpush1.bf16.msra.mxu1 %v3027_v14  ;;  %v3111_v14 = vld [vmem:[%s4278_s1 + $0x2c0] ss:$8 sps:$4 sm:$0xff]  }
  0x80   : > { %2249 = vmatpush1.bf16.msra.mxu0 %v3030_v15  ;;  %2086 = vmatprep.subr.bf16.mxu1 %v3035_v18  ;;  %v3114_v15 = vld [vmem:[%s4278_s1 + $0x6c0] ss:$8 sps:$4 sm:$0xff]   ;;  %v3119_v18 = vld [vmem:[%s4278_s1 + $0x2d4] ss:$8 sps:$4 sm:$0xff]  }
  0x81   : > { %2250 = vmatprep.subr.bf16.mxu0 %v3038_v19  ;;  %v3122_v19 = vld [vmem:[%s4278_s1 + $0x6d4] ss:$8 sps:$4 sm:$0xff]  }
  0x83   : > { %2087 = vmatpush1.bf16.msra.mxu1 %v3033_v20  ;;  %v3117_v20 = vld [vmem:[%s4278_s1 + $0x2d0] ss:$8 sps:$4 sm:$0xff]  }
  0x84   : > { %2251 = vmatpush1.bf16.msra.mxu0 %v3036_v21  ;;  %2097 = vmatprep.subr.bf16.mxu1 %v3041_v22  ;;  %v3120_v21 = vld [vmem:[%s4278_s1 + $0x6d0] ss:$8 sps:$4 sm:$0xff]   ;;  %v3125_v22 = vld [vmem:[%s4278_s1 + $0x2e4] ss:$8 sps:$4 sm:$0xff]  }
  0x85   : > { %2261 = vmatprep.subr.bf16.mxu0 %v3044_v23  ;;  %v3128_v23 = vld [vmem:[%s4278_s1 + $0x6e4] ss:$8 sps:$4 sm:$0xff]  }
  0x86   : > { %2089 = vmatmul.mubr.bf16.vlgmr.msra.gmra.mrb[0].mxu1 %v3542_v16  ;;  %v3053_v16 = vld [vmem:[%s4278_s1 + $0x224] ss:$8 sps:$4 sm:$0xff]  }
  0x87   : > { %2253 = vmatmul.mubr.bf16.vlgmr.msra.gmra.mrb[0].mxu0 %v3545_v17  ;;  %2098 = vmatpush1.bf16.msra.mxu1 %v3039_v24  ;;  %v3056_v17 = vld [vmem:[%s4278_s1 + $0x624] ss:$8 sps:$4 sm:$0xff]   ;;  %v3123_v24 = vld [vmem:[%s4278_s1 + $0x2e0] ss:$8 sps:$4 sm:$0xff]  }
  0x88   : > { %2262 = vmatpush1.bf16.msra.mxu0 %v3042_v25  ;;  %2099 = vmatprep.subr.bf16.mxu1 %v3047_v26  ;;  %v3126_v25 = vld [vmem:[%s4278_s1 + $0x6e0] ss:$8 sps:$4 sm:$0xff]   ;;  %v3131_v26 = vld [vmem:[%s4278_s1 + $0x2f4] ss:$8 sps:$4 sm:$0xff]  }
  0x89   : > { %2263 = vmatprep.subr.bf16.mxu0 %v3050_v28  ;;  %2129 = vmatprep.mubr.bf16.mxu1 %v513_v33  ;;  %v3134_v28 = vld [vmem:[%s4278_s1 + $0x6f4] ss:$8 sps:$4 sm:$0xff]   ;;  %v3129_v33 = vld [vmem:[%s4278_s1 + $0x2f0] ss:$8 sps:$4 sm:$0xff]  }
  0x8a   : > { %2293 = vmatprep.mubr.bf16.mxu0 %v547_v35 }
  0x8b   : > { %2100 = vmatpush1.bf16.msra.mxu1 %v3045_v31  ;;  %v498_v31 = vcombine.high %v3753_v27, %v3753_v27  ;;  %v3140_v27 = vld [vmem:[%s4278_s1 + $0x704] ss:$8 sps:$4 sm:$0xff]  }
  0x8c   : > { %2264 = vmatpush1.bf16.msra.mxu0 %v3048_v32  ;;  %2101 = vmatprep.subr.bf16.mxu1 %v3053_v16  ;;  %v532_v32 = vcombine.high %v3763_v30, %v3763_v30  ;;  %v3132_v16 = vld [vmem:[%s4278_s1 + $0x6f0] ss:$8 sps:$4 sm:$0xff]  }
  0x8d   : > { %2265 = vmatprep.subr.bf16.mxu0 %v3056_v17  ;;  %v3137_v17 = vld [vmem:[%s4278_s1 + $0x304] ss:$8 sps:$4 sm:$0xff]   ;;  %v3960_v30 = vrot.slane %v498_v31, %v3469_v49  ;;  %v3216_v31 = vld [vmem:[%s4278_s1 + $0x7d0] ss:$8 sps:$4 sm:$0xff]  }
  0x8e   : > { %v3963_v35 = vrot.slane %v532_v32, %v3469_v49  ;;  %v3146_v49 = vld [vmem:[%s4278_s1 + $0x714] ss:$8 sps:$4 sm:$0xff]   ;;  %v3221_v32 = vld [vmem:[%s4278_s1 + $0x3e4] ss:$8 sps:$4 sm:$0xff]  }
  0x8f   : > { %2102 = vmatpush1.bf16.msra.mxu1 %v3051_v36  ;;  %v3135_v36 = vld [vmem:[%s4278_s1 + $0x300] ss:$8 sps:$4 sm:$0xff]  }
  0x90   : > { %2266 = vmatpush1.bf16.msra.mxu0 %v3054_v37  ;;  %2103 = vmatprep.subr.bf16.mxu1 %v3059_v38  ;;  %v3138_v37 = vld [vmem:[%s4278_s1 + $0x700] ss:$8 sps:$4 sm:$0xff]   ;;  %v3143_v38 = vld [vmem:[%s4278_s1 + $0x314] ss:$8 sps:$4 sm:$0xff]  }
  0x91   : > { %2267 = vmatprep.subr.bf16.mxu0 %v3062_v39  ;;  %v514_v39 = vcombine.high %v3960_v30, %v3960_v30 }
  0x93   : > { %2104 = vmatpush1.bf16.msra.mxu1 %v3057_v40  ;;  %v548_v40 = vcombine.high %v3963_v35, %v3963_v35 }
  0x94   : > { %2268 = vmatpush1.bf16.msra.mxu0 %v3060_v41  ;;  %2105 = vmatprep.subr.bf16.mxu1 %v3065_v43  ;;  %v3141_v41 = vld [vmem:[%s4278_s1 + $0x310] ss:$8 sps:$4 sm:$0xff]  }
  0x95   : > { %2269 = vmatprep.subr.bf16.mxu0 %v3068_v44  ;;  %v3144_v43 = vld [vmem:[%s4278_s1 + $0x710] ss:$8 sps:$4 sm:$0xff]   ;;  %v3149_v44 = vld [vmem:[%s4278_s1 + $0x324] ss:$8 sps:$4 sm:$0xff]  }
  0x97   : > { %2106 = vmatpush1.bf16.msra.mxu1 %v3063_v45  ;;  %v3150_v45 = vld [vmem:[%s4278_s1 + $0x720] ss:$8 sps:$4 sm:$0xff]  }
  0x98   : > { %2270 = vmatpush1.bf16.msra.mxu0 %v3066_v46  ;;  %2107 = vmatprep.subr.bf16.mxu1 %v3071_v47  ;;  %v3155_v46 = vld [vmem:[%s4278_s1 + $0x334] ss:$8 sps:$4 sm:$0xff]  }
  0x99   : > { %2271 = vmatprep.subr.bf16.mxu0 %v3074_v48  ;;  %v3158_v47 = vld [vmem:[%s4278_s1 + $0x734] ss:$8 sps:$4 sm:$0xff]   ;;  %v3153_v48 = vld [vmem:[%s4278_s1 + $0x330] ss:$8 sps:$4 sm:$0xff]  }
  0x9b   : > { %2108 = vmatpush1.bf16.msra.mxu1 %v3069_v50  ;;  %v3156_v50 = vld [vmem:[%s4278_s1 + $0x730] ss:$8 sps:$4 sm:$0xff]  }
  0x9c   : > { %2272 = vmatpush1.bf16.msra.mxu0 %v3072_v51  ;;  %2109 = vmatprep.subr.bf16.mxu1 %v3077_v52  ;;  %v3161_v51 = vld [vmem:[%s4278_s1 + $0x344] ss:$8 sps:$4 sm:$0xff]  }
  0x9d   : > { %2273 = vmatprep.subr.bf16.mxu0 %v3080_v53  ;;  %v3164_v52 = vld [vmem:[%s4278_s1 + $0x744] ss:$8 sps:$4 sm:$0xff]   ;;  %v3159_v53 = vld [vmem:[%s4278_s1 + $0x340] ss:$8 sps:$4 sm:$0xff]  }
  0x9f   : > { %2110 = vmatpush1.bf16.msra.mxu1 %v3075_v54  ;;  %v3162_v54 = vld [vmem:[%s4278_s1 + $0x740] ss:$8 sps:$4 sm:$0xff]  }
  0xa0   : > { %2274 = vmatpush1.bf16.msra.mxu0 %v3078_v55  ;;  %2111 = vmatprep.subr.bf16.mxu1 %v3083_v56  ;;  %v3167_v55 = vld [vmem:[%s4278_s1 + $0x354] ss:$8 sps:$4 sm:$0xff]  }
  0xa1   : > { %2275 = vmatprep.subr.bf16.mxu0 %v3086_v57  ;;  %v3170_v56 = vld [vmem:[%s4278_s1 + $0x754] ss:$8 sps:$4 sm:$0xff]   ;;  %v3165_v57 = vld [vmem:[%s4278_s1 + $0x350] ss:$8 sps:$4 sm:$0xff]  }
  0xa3   : > { %2112 = vmatpush1.bf16.msra.mxu1 %v3081_v58  ;;  %v3168_v58 = vld [vmem:[%s4278_s1 + $0x750] ss:$8 sps:$4 sm:$0xff]  }
  0xa4   : > { %2276 = vmatpush1.bf16.msra.mxu0 %v3084_v59  ;;  %2113 = vmatprep.subr.bf16.mxu1 %v3089_v60  ;;  %v3173_v59 = vld [vmem:[%s4278_s1 + $0x364] ss:$8 sps:$4 sm:$0xff]  }
  0xa5   : > { %2277 = vmatprep.subr.bf16.mxu0 %v3092_v61  ;;  %v3176_v60 = vld [vmem:[%s4278_s1 + $0x764] ss:$8 sps:$4 sm:$0xff]   ;;  %v3171_v61 = vld [vmem:[%s4278_s1 + $0x360] ss:$8 sps:$4 sm:$0xff]  }
  0xa7   : > { %2114 = vmatpush1.bf16.msra.mxu1 %v3087_v62  ;;  %v3174_v62 = vld [vmem:[%s4278_s1 + $0x760] ss:$8 sps:$4 sm:$0xff]  }
  0xa8   : > { %2278 = vmatpush1.bf16.msra.mxu0 %v3090_v63  ;;  %2115 = vmatprep.subr.bf16.mxu1 %v3095_v0  ;;  %v3179_v63 = vld [vmem:[%s4278_s1 + $0x374] ss:$8 sps:$4 sm:$0xff]  }
  0xa9   : > { %2279 = vmatprep.subr.bf16.mxu0 %v3098_v1  ;;  %v3182_v0 = vld [vmem:[%s4278_s1 + $0x774] ss:$8 sps:$4 sm:$0xff]   ;;  %v3177_v1 = vld [vmem:[%s4278_s1 + $0x370] ss:$8 sps:$4 sm:$0xff]  }
  0xab   : > { %2116 = vmatpush1.bf16.msra.mxu1 %v3093_v2  ;;  %v3180_v2 = vld [vmem:[%s4278_s1 + $0x770] ss:$8 sps:$4 sm:$0xff]  }
  0xac   : > { %2280 = vmatpush1.bf16.msra.mxu0 %v3096_v3  ;;  %2117 = vmatprep.subr.bf16.mxu1 %v3101_v4  ;;  %v3185_v3 = vld [vmem:[%s4278_s1 + $0x384] ss:$8 sps:$4 sm:$0xff]  }
  0xad   : > { %2281 = vmatprep.subr.bf16.mxu0 %v3104_v5  ;;  %v3188_v4 = vld [vmem:[%s4278_s1 + $0x784] ss:$8 sps:$4 sm:$0xff]   ;;  %v3183_v5 = vld [vmem:[%s4278_s1 + $0x380] ss:$8 sps:$4 sm:$0xff]  }
  0xaf   : > { %2118 = vmatpush1.bf16.msra.mxu1 %v3099_v6  ;;  %v3186_v6 = vld [vmem:[%s4278_s1 + $0x780] ss:$8 sps:$4 sm:$0xff]  }
  0xb0   : > { %2282 = vmatpush1.bf16.msra.mxu0 %v3102_v7  ;;  %2119 = vmatprep.subr.bf16.mxu1 %v3107_v8  ;;  %v3191_v7 = vld [vmem:[%s4278_s1 + $0x394] ss:$8 sps:$4 sm:$0xff]  }
  0xb1   : > { %2283 = vmatprep.subr.bf16.mxu0 %v3110_v9  ;;  %v3194_v8 = vld [vmem:[%s4278_s1 + $0x794] ss:$8 sps:$4 sm:$0xff]   ;;  %v3189_v9 = vld [vmem:[%s4278_s1 + $0x390] ss:$8 sps:$4 sm:$0xff]  }
  0xb3   : > { %2120 = vmatpush1.bf16.msra.mxu1 %v3105_v10  ;;  %v3192_v10 = vld [vmem:[%s4278_s1 + $0x790] ss:$8 sps:$4 sm:$0xff]  }
  0xb4   : > { %2284 = vmatpush1.bf16.msra.mxu0 %v3108_v11  ;;  %2121 = vmatprep.subr.bf16.mxu1 %v3113_v12  ;;  %v3197_v11 = vld [vmem:[%s4278_s1 + $0x3a4] ss:$8 sps:$4 sm:$0xff]  }
  0xb5   : > { %2285 = vmatprep.subr.bf16.mxu0 %v3116_v13  ;;  %v3200_v12 = vld [vmem:[%s4278_s1 + $0x7a4] ss:$8 sps:$4 sm:$0xff]   ;;  %v3195_v13 = vld [vmem:[%s4278_s1 + $0x3a0] ss:$8 sps:$4 sm:$0xff]  }
  0xb7   : > { %2122 = vmatpush1.bf16.msra.mxu1 %v3111_v14  ;;  %v3198_v14 = vld [vmem:[%s4278_s1 + $0x7a0] ss:$8 sps:$4 sm:$0xff]  }
  0xb8   : > { %2286 = vmatpush1.bf16.msra.mxu0 %v3114_v15  ;;  %2123 = vmatprep.subr.bf16.mxu1 %v3119_v18  ;;  %v3203_v15 = vld [vmem:[%s4278_s1 + $0x3b4] ss:$8 sps:$4 sm:$0xff]  }
  0xb9   : > { %2287 = vmatprep.subr.bf16.mxu0 %v3122_v19  ;;  %v3206_v18 = vld [vmem:[%s4278_s1 + $0x7b4] ss:$8 sps:$4 sm:$0xff]   ;;  %v3201_v19 = vld [vmem:[%s4278_s1 + $0x3b0] ss:$8 sps:$4 sm:$0xff]  }
  0xbb   : > { %2124 = vmatpush1.bf16.msra.mxu1 %v3117_v20  ;;  %v3204_v20 = vld [vmem:[%s4278_s1 + $0x7b0] ss:$8 sps:$4 sm:$0xff]  }
  0xbc   : > { %2288 = vmatpush1.bf16.msra.mxu0 %v3120_v21  ;;  %2125 = vmatprep.subr.bf16.mxu1 %v3125_v22  ;;  %v3209_v21 = vld [vmem:[%s4278_s1 + $0x3c4] ss:$8 sps:$4 sm:$0xff]  }
  0xbd   : > { %2289 = vmatprep.subr.bf16.mxu0 %v3128_v23  ;;  %v3212_v22 = vld [vmem:[%s4278_s1 + $0x7c4] ss:$8 sps:$4 sm:$0xff]   ;;  %v3207_v23 = vld [vmem:[%s4278_s1 + $0x3c0] ss:$8 sps:$4 sm:$0xff]  }
  0xbf   : > { %2126 = vmatpush1.bf16.msra.mxu1 %v3123_v24  ;;  %v3210_v24 = vld [vmem:[%s4278_s1 + $0x7c0] ss:$8 sps:$4 sm:$0xff]  }
  0xc0   : > { %2290 = vmatpush1.bf16.msra.mxu0 %v3126_v25  ;;  %2127 = vmatprep.subr.bf16.mxu1 %v3131_v26  ;;  %v3215_v25 = vld [vmem:[%s4278_s1 + $0x3d4] ss:$8 sps:$4 sm:$0xff]  }
  0xc1   : > { %2291 = vmatprep.subr.bf16.mxu0 %v3134_v28  ;;  %v3218_v26 = vld [vmem:[%s4278_s1 + $0x7d4] ss:$8 sps:$4 sm:$0xff]   ;;  %v3213_v28 = vld [vmem:[%s4278_s1 + $0x3d0] ss:$8 sps:$4 sm:$0xff]  }
  0xc3   : > { %2128 = vmatpush1.bf16.msra.mxu1 %v3129_v33  ;;  %v3224_v33 = vld [vmem:[%s4278_s1 + $0x7e4] ss:$8 sps:$4 sm:$0xff]  }
  0xc4   : > { %2292 = vmatpush1.bf16.msra.mxu0 %v3132_v16  ;;  %2138 = vmatprep.subr.bf16.mxu1 %v3137_v17  ;;  %v3219_v16 = vld [vmem:[%s4278_s1 + $0x3e0] ss:$8 sps:$4 sm:$0xff]  }
  0xc5   : > { %2302 = vmatprep.subr.bf16.mxu0 %v3140_v27  ;;  %v3222_v17 = vld [vmem:[%s4278_s1 + $0x7e0] ss:$8 sps:$4 sm:$0xff]   ;;  %v3227_v27 = vld [vmem:[%s4278_s1 + $0x3f4] ss:$8 sps:$4 sm:$0xff]  }
  0xc6   : > { %2130 = vmatmul.mubr.bf16.vlgmr.msra.gmra.mrb[0].mxu1 %v3760_v29  ;;  %v3152_v29 = vld [vmem:[%s4278_s1 + $0x724] ss:$8 sps:$4 sm:$0xff]  }
  0xc7   : > { %2294 = vmatmul.mubr.bf16.vlgmr.msra.gmra.mrb[0].mxu0 %v3777_v34  ;;  %2139 = vmatpush1.bf16.msra.mxu1 %v3135_v36  ;;  %v3147_v34 = vld [vmem:[%s4278_s1 + $0x320] ss:$8 sps:$4 sm:$0xff]   ;;  %v3230_v36 = vld [vmem:[%s4278_s1 + $0x7f4] ss:$8 sps:$4 sm:$0xff]  }
  0xc8   : > { %2303 = vmatpush1.bf16.msra.mxu0 %v3138_v37  ;;  %2140 = vmatprep.subr.bf16.mxu1 %v3143_v38  ;;  %v3225_v37 = vld [vmem:[%s4278_s1 + $0x3f0] ss:$8 sps:$4 sm:$0xff]  }
  0xc9   : > { %2304 = vmatprep.subr.bf16.mxu0 %v3146_v49  ;;  %2170 = vmatprep.mubr.bf16.mxu1 %v514_v39  ;;  %v3228_v38 = vld [vmem:[%s4278_s1 + $0x7f0] ss:$8 sps:$4 sm:$0xff]   ;;  %v3235_v49 = vld [vmem:[%s4278_s1 + $0x804] ss:$8 sps:$4 sm:$0xff]  }
  0xca   : > { %2334 = vmatprep.mubr.bf16.mxu0 %v548_v40  ;;  %v4161_v39 = vld.sshfl [vmem:[%s3466_s30 + $0x20] sm:$0x33 pattern:$0x76325410] }
  0xcb   : > { %2141 = vmatpush1.bf16.msra.mxu1 %v3141_v41  ;;  %v3233_v40 = vld [vmem:[%s4278_s1 + $0x800] ss:$8 sps:$4 sm:$0xff]   ;;  %v556_v41 = vcombine.high %v4161_v39, %v4161_v39 }
  0xcc   : > { %2305 = vmatpush1.bf16.msra.mxu0 %v3144_v43  ;;  %2142 = vmatprep.subr.bf16.mxu1 %v3149_v44  ;;  %v3238_v43 = vld [vmem:[%s4278_s1 + $0x814] ss:$8 sps:$4 sm:$0xff]   ;;  %v3236_v44 = vld [vmem:[%s4278_s1 + $0x810] ss:$8 sps:$4 sm:$0xff]  }
  0xcd   : > { %2306 = vmatprep.subr.bf16.mxu0 %v3152_v29  ;;  %v3241_v29 = vld [vmem:[%s4278_s1 + $0x824] ss:$8 sps:$4 sm:$0xff]  }
  0xcf   : > { %2143 = vmatpush1.bf16.msra.mxu1 %v3147_v34  ;;  %v3239_v34 = vld [vmem:[%s4278_s1 + $0x820] ss:$8 sps:$4 sm:$0xff]  }
  0xd0   : > { %2307 = vmatpush1.bf16.msra.mxu0 %v3150_v45  ;;  %2144 = vmatprep.subr.bf16.mxu1 %v3155_v46  ;;  %v3247_v45 = vld [vmem:[%s4278_s1 + $0x844] ss:$8 sps:$4 sm:$0xff]   ;;  %v3245_v46 = vld [vmem:[%s4278_s1 + $0x840] ss:$8 sps:$4 sm:$0xff]  }
  0xd1   : > { %2308 = vmatprep.subr.bf16.mxu0 %v3158_v47  ;;  %v3250_v47 = vld [vmem:[%s4278_s1 + $0x854] ss:$8 sps:$4 sm:$0xff]  }
  0xd3   : > { %2145 = vmatpush1.bf16.msra.mxu1 %v3153_v48  ;;  %v3248_v48 = vld [vmem:[%s4278_s1 + $0x850] ss:$8 sps:$4 sm:$0xff]  }
  0xd4   : > { %2309 = vmatpush1.bf16.msra.mxu0 %v3156_v50  ;;  %2146 = vmatprep.subr.bf16.mxu1 %v3161_v51  ;;  %v3253_v50 = vld [vmem:[%s4278_s1 + $0x864] ss:$8 sps:$4 sm:$0xff]   ;;  %v3251_v51 = vld [vmem:[%s4278_s1 + $0x860] ss:$8 sps:$4 sm:$0xff]  }
  0xd5   : > { %2310 = vmatprep.subr.bf16.mxu0 %v3164_v52  ;;  %v3256_v52 = vld [vmem:[%s4278_s1 + $0x874] ss:$8 sps:$4 sm:$0xff]  }
  0xd7   : > { %2147 = vmatpush1.bf16.msra.mxu1 %v3159_v53  ;;  %v3254_v53 = vld [vmem:[%s4278_s1 + $0x870] ss:$8 sps:$4 sm:$0xff]  }
  0xd8   : > { %2311 = vmatpush1.bf16.msra.mxu0 %v3162_v54  ;;  %2148 = vmatprep.subr.bf16.mxu1 %v3167_v55  ;;  %v3259_v54 = vld [vmem:[%s4278_s1 + $0x884] ss:$8 sps:$4 sm:$0xff]   ;;  %v3257_v55 = vld [vmem:[%s4278_s1 + $0x880] ss:$8 sps:$4 sm:$0xff]  }
  0xd9   : > { %2312 = vmatprep.subr.bf16.mxu0 %v3170_v56  ;;  %v3262_v56 = vld [vmem:[%s4278_s1 + $0x894] ss:$8 sps:$4 sm:$0xff]  }
  0xdb   : > { %2149 = vmatpush1.bf16.msra.mxu1 %v3165_v57  ;;  %v3260_v57 = vld [vmem:[%s4278_s1 + $0x890] ss:$8 sps:$4 sm:$0xff]  }
  0xdc   : > { %2313 = vmatpush1.bf16.msra.mxu0 %v3168_v58  ;;  %2150 = vmatprep.subr.bf16.mxu1 %v3173_v59  ;;  %v3265_v58 = vld [vmem:[%s4278_s1 + $0x8a4] ss:$8 sps:$4 sm:$0xff]   ;;  %v3263_v59 = vld [vmem:[%s4278_s1 + $0x8a0] ss:$8 sps:$4 sm:$0xff]  }
  0xdd   : > { %2314 = vmatprep.subr.bf16.mxu0 %v3176_v60  ;;  %v3268_v60 = vld [vmem:[%s4278_s1 + $0x8b4] ss:$8 sps:$4 sm:$0xff]  }
  0xdf   : > { %2151 = vmatpush1.bf16.msra.mxu1 %v3171_v61  ;;  %v3266_v61 = vld [vmem:[%s4278_s1 + $0x8b0] ss:$8 sps:$4 sm:$0xff]  }
  0xe0   : > { %2315 = vmatpush1.bf16.msra.mxu0 %v3174_v62  ;;  %2152 = vmatprep.subr.bf16.mxu1 %v3179_v63  ;;  %v3271_v62 = vld [vmem:[%s4278_s1 + $0x8c4] ss:$8 sps:$4 sm:$0xff]   ;;  %v3269_v63 = vld [vmem:[%s4278_s1 + $0x8c0] ss:$8 sps:$4 sm:$0xff]  }
  0xe1   : > { %2316 = vmatprep.subr.bf16.mxu0 %v3182_v0  ;;  %v3274_v0 = vld [vmem:[%s4278_s1 + $0x8d4] ss:$8 sps:$4 sm:$0xff]  }
  0xe3   : > { %2153 = vmatpush1.bf16.msra.mxu1 %v3177_v1  ;;  %v3272_v1 = vld [vmem:[%s4278_s1 + $0x8d0] ss:$8 sps:$4 sm:$0xff]  }
  0xe4   : > { %2317 = vmatpush1.bf16.msra.mxu0 %v3180_v2  ;;  %2154 = vmatprep.subr.bf16.mxu1 %v3185_v3  ;;  %v3277_v2 = vld [vmem:[%s4278_s1 + $0x8e4] ss:$8 sps:$4 sm:$0xff]   ;;  %v3275_v3 = vld [vmem:[%s4278_s1 + $0x8e0] ss:$8 sps:$4 sm:$0xff]  }
  0xe5   : > { %2318 = vmatprep.subr.bf16.mxu0 %v3188_v4  ;;  %v3280_v4 = vld [vmem:[%s4278_s1 + $0x8f4] ss:$8 sps:$4 sm:$0xff]  }
  0xe7   : > { %2155 = vmatpush1.bf16.msra.mxu1 %v3183_v5  ;;  %v3278_v5 = vld [vmem:[%s4278_s1 + $0x8f0] ss:$8 sps:$4 sm:$0xff]  }
  0xe8   : > { %2319 = vmatpush1.bf16.msra.mxu0 %v3186_v6  ;;  %2156 = vmatprep.subr.bf16.mxu1 %v3191_v7 }
  0xe9   : > { %2320 = vmatprep.subr.bf16.mxu0 %v3194_v8 }
  0xeb   : > { %2157 = vmatpush1.bf16.msra.mxu1 %v3189_v9 }
  0xec   : > { %2321 = vmatpush1.bf16.msra.mxu0 %v3192_v10  ;;  %2158 = vmatprep.subr.bf16.mxu1 %v3197_v11  ;;  %v468_v10 = vsub.s32 0, %v3446_v42  ;;  %v464_v11 = vld [vmem:[%s4279_s2] sm:$0x3] }
  0xed   : > { %2322 = vmatprep.subr.bf16.mxu0 %v3200_v12  ;;  %v472_v12 = vsub.s32 1, %v3446_v42 }
  0xef   : > { %2159 = vmatpush1.bf16.msra.mxu1 %v3195_v13  ;;  %v469_v13 = vrot.slane %v464_v11, %v468_v10 }
  0xf0   : > { %2323 = vmatpush1.bf16.msra.mxu0 %v3198_v14  ;;  %2160 = vmatprep.subr.bf16.mxu1 %v3203_v15  ;;  %v473_v14 = vrot.slane %v464_v11, %v472_v12 }
  0xf1   : > { %2324 = vmatprep.subr.bf16.mxu0 %v3206_v18 }
  0xf3   : > { %2161 = vmatpush1.bf16.msra.mxu1 %v3201_v19 }
  0xf4   : > { %2325 = vmatpush1.bf16.msra.mxu0 %v3204_v20  ;;  %2162 = vmatprep.subr.bf16.mxu1 %v3209_v21 }
  0xf5   : > { %2326 = vmatprep.subr.bf16.mxu0 %v3212_v22 }
  0xf7   : > { %2163 = vmatpush1.bf16.msra.mxu1 %v3207_v23 }
  0xf8   : > { %2327 = vmatpush1.bf16.msra.mxu0 %v3210_v24  ;;  %2164 = vmatprep.subr.bf16.mxu1 %v3215_v25 }
  0xf9   : > { %2328 = vmatprep.subr.bf16.mxu0 %v3218_v26 }
  0xfb   : > { %2165 = vmatpush1.bf16.msra.mxu1 %v3213_v28 }
  0xfc   : > { %2329 = vmatpush1.bf16.msra.mxu0 %v3216_v31  ;;  %2166 = vmatprep.subr.bf16.mxu1 %v3221_v32 }
  0xfd   : > { %2330 = vmatprep.subr.bf16.mxu0 %v3224_v33 }
  0xff   : > { %2167 = vmatpush1.bf16.msra.mxu1 %v3219_v16 }
 0x100   : > { %2331 = vmatpush1.bf16.msra.mxu0 %v3222_v17  ;;  %2168 = vmatprep.subr.bf16.mxu1 %v3227_v27 }
 0x101   : > { %2332 = vmatprep.subr.bf16.mxu0 %v3230_v36 }
 0x103   : > { %2169 = vmatpush1.bf16.msra.mxu1 %v3225_v37 }
 0x104   : > { %2333 = vmatpush1.bf16.msra.mxu0 %v3228_v38 }
 0x105   : > { %2343 = vmatprep.subr.bf16.mxu0 %v3235_v49 }
 0x106   : > { %2171 = vmatmul.mubr.bf16.vlgmr.msra.gmra.mrb[0].mxu1 %v3960_v30  ;;  %v3244_v30 = vld [vmem:[%s4278_s1 + $0x834] ss:$8 sps:$4 sm:$0xff]  }
 0x107   : > { %2335 = vmatmul.mubr.bf16.vlgmr.msra.gmra.mrb[0].mxu0 %v3963_v35  ;;  %v3242_v35 = vld [vmem:[%s4278_s1 + $0x830] ss:$8 sps:$4 sm:$0xff]  }
 0x108   : > { %2344 = vmatpush1.bf16.msra.mxu0 %v3233_v40  ;;  %2375 = vmatprep.mubr.bf16.mxu0 %v556_v41 }
 0x109   : > { %2345 = vmatprep.subr.bf16.mxu0 %v3238_v43 }
 0x10c   : > { %2346 = vmatpush1.bf16.msra.mxu0 %v3236_v44 }
 0x10d   : > { %2347 = vmatprep.subr.bf16.mxu0 %v3241_v29 }
 0x110   : > { %2348 = vmatpush1.bf16.msra.mxu0 %v3239_v34 }
 0x111   : > { %2349 = vmatprep.subr.bf16.mxu0 %v3244_v30 }
 0x114   : > { %2350 = vmatpush1.bf16.msra.mxu0 %v3242_v35 }
 0x115   : > { %2351 = vmatprep.subr.bf16.mxu0 %v3247_v45 }
 0x118   : > { %2352 = vmatpush1.bf16.msra.mxu0 %v3245_v46 }
 0x119   : > { %2353 = vmatprep.subr.bf16.mxu0 %v3250_v47 }
 0x11c   : > { %2354 = vmatpush1.bf16.msra.mxu0 %v3248_v48 }
 0x11d   : > { %2355 = vmatprep.subr.bf16.mxu0 %v3253_v50 }
 0x120   : > { %2356 = vmatpush1.bf16.msra.mxu0 %v3251_v51 }
 0x121   : > { %2357 = vmatprep.subr.bf16.mxu0 %v3256_v52 }
 0x124   : > { %2358 = vmatpush1.bf16.msra.mxu0 %v3254_v53 }
 0x125   : > { %2359 = vmatprep.subr.bf16.mxu0 %v3259_v54 }
 0x128   : > { %2360 = vmatpush1.bf16.msra.mxu0 %v3257_v55 }
 0x129   : > { %2361 = vmatprep.subr.bf16.mxu0 %v3262_v56 }
 0x12c   : > { %2362 = vmatpush1.bf16.msra.mxu0 %v3260_v57 }
 0x12d   : > { %2363 = vmatprep.subr.bf16.mxu0 %v3265_v58 }
 0x130   : > { %2364 = vmatpush1.bf16.msra.mxu0 %v3263_v59 }
 0x131   : > { %2365 = vmatprep.subr.bf16.mxu0 %v3268_v60 }
 0x134   : > { %2366 = vmatpush1.bf16.msra.mxu0 %v3266_v61 }
 0x135   : > { %2367 = vmatprep.subr.bf16.mxu0 %v3271_v62 }
 0x138   : > { %2368 = vmatpush1.bf16.msra.mxu0 %v3269_v63 }
 0x139   : > { %2369 = vmatprep.subr.bf16.mxu0 %v3274_v0 }
 0x13c   : > { %2370 = vmatpush1.bf16.msra.mxu0 %v3272_v1 }
 0x13d   : > { %2371 = vmatprep.subr.bf16.mxu0 %v3277_v2 }
 0x140   : > { %2372 = vmatpush1.bf16.msra.mxu0 %v3275_v3 }
 0x141   : > { %2373 = vmatprep.subr.bf16.mxu0 %v3280_v4 }
 0x144   : > { %2374 = vmatpush1.bf16.msra.mxu0 %v3278_v5 }
 0x147   : > { %2376 = vmatmul.mubr.bf16.vlgmr.msra.gmra.mrb[0].mxu0 %v4161_v39 }
 0x1d9   : > { %v2172_v6 = vpop.f32.mrb[0].mxu1 }
 0x1da   : > { %v2174_v7 = vpop.f32.mrb[1].mxu1  ;;  %v2803_v15 = vadd.f32 %v2172_v6, %v469_v13 }
 0x1db   : > { %v2176_v8 = vpop.f32.mrb[2].mxu1  ;;  %v2805_v18 = vadd.f32 %v2174_v7, %v473_v14 }
 0x1dc   : > { %v2177_v9 = vpop.f32.mrb[3].mxu1 }
 0x21a   : > { %v2377_v19 = vpop.f32.mrb[0].mxu0 }
 0x21b   : > { %v2804_v20 = vadd.f32 %v2803_v15, %v2377_v19  ;;  %v2379_v21 = vpop.f32.mrb[1].mxu0 }
 0x21c   : > { %v2806_v22 = vadd.f32 %v2805_v18, %v2379_v21  ;;  %v2381_v23 = vpop.f32.mrb[2].mxu0 }
 0x21d   : > { %v2385_v24 = vsel %vm2384_vm0, %v2804_v20, 0.0  ;;  %v2382_v25 = vpop.f32.mrb[3].mxu0 }
 0x21e   : > { %v2386_v26 = vrot.slane %v2385_v24, 4  ;;  %v2392_v28 = vsel %vm2384_vm0, %v2806_v22, 0.0 }
 0x21f   : > { %v2393_v31 = vrot.slane %v2392_v28, 4 }
 0x220   : > { %v2387_v32 = vadd.f32 %v2386_v26, %v2385_v24 }
 0x221   : > { %v2394_v33 = vadd.f32 %v2393_v31, %v2392_v28 }
 0x222   : > { %v2388_v42 = vrot.slane %v2387_v32, 2 }
 0x223   : > { %v2395_v16 = vrot.slane %v2394_v33, 2 }
 0x224   : > { %v2389_v17 = vadd.f32 %v2388_v42, %v2387_v32 }
 0x225   : > { %v2396_v27 = vadd.f32 %v2395_v16, %v2394_v33 }
 0x226   : > { %v2390_v36 = vrot.slane %v2389_v17, 1 }
 0x227   : > { %v2397_v37 = vrot.slane %v2396_v27, 1 }
 0x228   : > { %v2391_v38 = vadd.f32 %v2390_v36, %v2389_v17 }
 0x229   : > { %v2398_v49 = vadd.f32 %v2397_v37, %v2396_v27 }
 0x22a   : > { %v2400_v39 = vmul.f32 0.25, %v2391_v38 }
 0x22b   : > { %v2401_v40 = vmul.f32 0.25, %v2398_v49 }
 0x22c   : > { %v2402_v41 = vsub.f32 %v2804_v20, %v2400_v39 }
 0x22d   : > { %v2403_v43 = vsub.f32 %v2806_v22, %v2401_v40 }
 0x22e   : > { %v2404_v44 = vmul.f32 %v2402_v41, %v2402_v41 }
 0x22f   : > { %v2405_v29 = vmul.f32 %v2403_v43, %v2403_v43 }
 0x230   : > { %v2406_v34 = vsel %vm2384_vm0, %v2404_v44, 0.0 }
 0x231   : > { %v2407_v30 = vrot.slane %v2406_v34, 4  ;;  %v2413_v35 = vsel %vm2384_vm0, %v2405_v29, 0.0 }
 0x232   : > { %v2414_v45 = vrot.slane %v2413_v35, 4 }
 0x233   : > { %v2408_v46 = vadd.f32 %v2407_v30, %v2406_v34 }
 0x234   : > { %v2415_v47 = vadd.f32 %v2414_v45, %v2413_v35 }
 0x235   : > { %v2409_v48 = vrot.slane %v2408_v46, 2 }
 0x236   : > { %v2416_v50 = vrot.slane %v2415_v47, 2 }
 0x237   : > { %v2410_v51 = vadd.f32 %v2409_v48, %v2408_v46 }
 0x238   : > { %v2417_v52 = vadd.f32 %v2416_v50, %v2415_v47 }
 0x239   : > { %v2411_v53 = vrot.slane %v2410_v51, 1 }
 0x23a   : > { %v2418_v54 = vrot.slane %v2417_v52, 1 }
 0x23b   : > { %v2412_v55 = vadd.f32 %v2411_v53, %v2410_v51 }
 0x23c   : > { %v2419_v56 = vadd.f32 %v2418_v54, %v2417_v52 }
 0x23d   : > { %v2420_v57 = vmul.f32 0.25, %v2412_v55 }
 0x23e   : > { %v2421_v58 = vmul.f32 0.25, %v2419_v56 }
 0x23f   : > { %v2422_v59 = vadd.f32 1e-05, %v2420_v57 }
 0x240   : > { %v2423_v60 = vadd.f32 1e-05, %v2421_v58 }
 0x241   : > { %3281 = vrsqrt.f32 %v2422_v59 }
 0x242   : > { %3283 = vrsqrt.f32 %v2423_v60 }
 0x24b   : > { %v3282_v61 = vpop.eup %3281 }
 0x24c   : > { %v3284_v62 = vpop.eup %3283  ;;  %v2426_v63 = vmul.f32 %v3282_v61, %v2402_v41 }
 0x24d   : > { %v2427_v0 = vmul.f32 %v3284_v62, %v2403_v43 }
 0x24e   : > { %v2428_v1 = vmul.f32 0.2, %v2426_v63 }
 0x24f   : > { %v2429_v2 = vmul.f32 0.2, %v2427_v0 }
 0x250   : > { %v2430_v3 = vmax.f32 %v2426_v63, %v2428_v1 }
 0x251   : > { %v2431_v4 = vmax.f32 %v2427_v0, %v2429_v2 }
 0x253   : > { %v2798_v5 = vpack.c.bf16 %v2431_v4, %v2430_v3 }
 0x255   : > { %2799 = vst.sshfl [vmem:[%s170_s16] sm:$0x33 pattern:$0x76325410] %v2798_v5 }
 0x256 PF: > { %s13_s12 = sadd.s32 1, %s3291_s12  }
 0x257   : > { %p10_p4 = scmp.ge.s32.totalorder %s13_s12, 4  }
 0x259   :  { %12 = sbr.rel (!%p10_p4) target bundleno = 1 (0x1), region = 62 }

// kernel: discriminator_forward.10
= control target key start
LH: loop header
LB: loop body
LE: loop exit
PB: predicated region body
PF: predicated region fallthrough
CT: control target
= control target key end

     0   :  { %s6240_s12 = smov 0   ;;  %s8093_s0 = inlined_call_operand.vmem [shape: bf16[2,4,2304], index: 0, kind: input, shape index: {}]   ;;  %s8094_s1 = inlined_call_operand.vmem [shape: bf16[2304,512], index: 1, kind: input, shape index: {}]   ;;  %s8095_s2 = inlined_call_operand.vmem [shape: f32[1,512], index: 2, kind: input, shape index: {}]   ;;  %s8096_s3 = inlined_call_operand.vmem [shape: bf16[2,4,512], index: 3, kind: output, shape index: {}]  }
   0x1 LB: > { %s4667_s13 = sadd.s32 4294967295, %s6217_s12   ;;  %p4671_p0 = scmp.ge.s32.totalorder %s6217_s12, 1  ;;  %s6217_s12 = sphi %s6240_s12, %s13_s12  }
   0x2   : > { %p137_p1 = scmp.lt.s32.totalorder %s6217_s12, 3 }
   0x4   : > { %p138_p2 = pnand %p4671_p0, %p137_p1 }
   0x5   : > { %v5335_v0 = vld [vmem:[%s8094_s1 + $0x4] ss:$16 sps:$4 sm:$0xff] (!%p138_p2)   ;;  %v5337_v1 = vld [vmem:[%s8094_s1 + $0xc] ss:$16 sps:$4 sm:$0xff] (!%p138_p2)   ;;  %v5339_v2 = vld [vmem:[%s8094_s1] ss:$16 sps:$4 sm:$0xff] (!%p138_p2)   ;;  %v754_v36 = vlaneseq (!%p138_p2) }
   0x6   : > { %141 = sbr.rel (%p138_p2) target bundleno = 859 (0x35b), region = 32  ;;  %3753 = vmatprep.subr.bf16.mxu0 (!%p138_p2), %v5335_v0  ;;  %v5340_v3 = vld [vmem:[%s8094_s1 + $0x8] ss:$16 sps:$4 sm:$0xff] (!%p138_p2)   ;;  %4122 = vmatprep.subr.bf16.mxu1 (!%p138_p2), %v5337_v1  ;;  %v5341_v4 = vld [vmem:[%s8094_s1 + $0x24] ss:$16 sps:$4 sm:$0xff] (!%p138_p2)   ;;  %p161_p3 = scmp.lt.s32.totalorder (!%p138_p2), %s4667_s13, 1 }
   0x7   : > { %3754 = vmatpush1.bf16.msra.mxu0 (!%p138_p2), %v5339_v2  ;;  %4123 = vmatpush1.bf16.msra.mxu1 (!%p138_p2), %v5340_v3  ;;  %v5343_v5 = vld [vmem:[%s8094_s1 + $0x2c] ss:$16 sps:$4 sm:$0xff] (!%p138_p2)   ;;  %v5345_v6 = vld [vmem:[%s8094_s1 + $0x20] ss:$16 sps:$4 sm:$0xff] (!%p138_p2)   ;;  %v5346_v7 = vld [vmem:[%s8094_s1 + $0x28] ss:$16 sps:$4 sm:$0xff] (!%p138_p2)  }
   0x8   : > { %3755 = vmatprep.subr.bf16.mxu0 (!%p138_p2), %v5341_v4  ;;  %4124 = vmatprep.subr.bf16.mxu1 (!%p138_p2), %v5343_v5  ;;  %v5347_v8 = vld [vmem:[%s8094_s1 + $0x44] ss:$16 sps:$4 sm:$0xff] (!%p138_p2)   ;;  %v5349_v9 = vld [vmem:[%s8094_s1 + $0x4c] ss:$16 sps:$4 sm:$0xff] (!%p138_p2)   ;;  %v5351_v10 = vld [vmem:[%s8094_s1 + $0x40] ss:$16 sps:$4 sm:$0xff] (!%p138_p2)  }
   0x9   : > { %v5352_v11 = vld [vmem:[%s8094_s1 + $0x48] ss:$16 sps:$4 sm:$0xff] (!%p138_p2)   ;;  %v5353_v12 = vld [vmem:[%s8094_s1 + $0x64] ss:$16 sps:$4 sm:$0xff] (!%p138_p2)   ;;  %v5355_v13 = vld [vmem:[%s8094_s1 + $0x6c] ss:$16 sps:$4 sm:$0xff] (!%p138_p2)  }
   0xa   : > { %v5357_v14 = vld [vmem:[%s8094_s1 + $0x60] ss:$16 sps:$4 sm:$0xff] (!%p138_p2)   ;;  %v5358_v15 = vld [vmem:[%s8094_s1 + $0x68] ss:$16 sps:$4 sm:$0xff] (!%p138_p2)   ;;  %v5359_v16 = vld [vmem:[%s8094_s1 + $0x84] ss:$16 sps:$4 sm:$0xff] (!%p138_p2)  }
   0xb   : > { %3756 = vmatpush1.bf16.msra.mxu0 (!%p138_p2), %v5345_v6  ;;  %4125 = vmatpush1.bf16.msra.mxu1 (!%p138_p2), %v5346_v7  ;;  %v5361_v17 = vld [vmem:[%s8094_s1 + $0x8c] ss:$16 sps:$4 sm:$0xff] (!%p138_p2)   ;;  %v5363_v18 = vld [vmem:[%s8094_s1 + $0x80] ss:$16 sps:$4 sm:$0xff] (!%p138_p2)   ;;  %v5364_v19 = vld [vmem:[%s8094_s1 + $0x88] ss:$16 sps:$4 sm:$0xff] (!%p138_p2)  }
   0xc   : > { %3757 = vmatprep.subr.bf16.mxu0 (!%p138_p2), %v5347_v8  ;;  %4126 = vmatprep.subr.bf16.mxu1 (!%p138_p2), %v5349_v9  ;;  %v5365_v20 = vld [vmem:[%s8094_s1 + $0xa4] ss:$16 sps:$4 sm:$0xff] (!%p138_p2)   ;;  %v5367_v21 = vld [vmem:[%s8094_s1 + $0xac] ss:$16 sps:$4 sm:$0xff] (!%p138_p2)   ;;  %v5369_v22 = vld [vmem:[%s8094_s1 + $0xa0] ss:$16 sps:$4 sm:$0xff] (!%p138_p2)  }
   0xd   : > { %v5370_v23 = vld [vmem:[%s8094_s1 + $0xa8] ss:$16 sps:$4 sm:$0xff]   ;;  %v5371_v24 = vld [vmem:[%s8094_s1 + $0xc4] ss:$16 sps:$4 sm:$0xff]   ;;  %v5373_v25 = vld [vmem:[%s8094_s1 + $0xcc] ss:$16 sps:$4 sm:$0xff]  }
   0xe   : > { %v5375_v26 = vld [vmem:[%s8094_s1 + $0xc0] ss:$16 sps:$4 sm:$0xff]   ;;  %v5376_v27 = vld [vmem:[%s8094_s1 + $0xc8] ss:$16 sps:$4 sm:$0xff]   ;;  %v5377_v28 = vld [vmem:[%s8094_s1 + $0xe4] ss:$16 sps:$4 sm:$0xff]  }
   0xf   : > { %3758 = vmatpush1.bf16.msra.mxu0 %v5351_v10  ;;  %4127 = vmatpush1.bf16.msra.mxu1 %v5352_v11  ;;  %v5379_v29 = vld [vmem:[%s8094_s1 + $0xec] ss:$16 sps:$4 sm:$0xff]   ;;  %v5381_v30 = vld [vmem:[%s8094_s1 + $0xe0] ss:$16 sps:$4 sm:$0xff]   ;;  %v5382_v31 = vld [vmem:[%s8094_s1 + $0xe8] ss:$16 sps:$4 sm:$0xff]  }
  0x10   : > { %3759 = vmatprep.subr.bf16.mxu0 %v5353_v12  ;;  %4128 = vmatprep.subr.bf16.mxu1 %v5355_v13  ;;  %v5383_v32 = vld [vmem:[%s8094_s1 + $0x104] ss:$16 sps:$4 sm:$0xff]   ;;  %v5385_v33 = vld [vmem:[%s8094_s1 + $0x10c] ss:$16 sps:$4 sm:$0xff]   ;;  %v5387_v34 = vld [vmem:[%s8094_s1 + $0x100] ss:$16 sps:$4 sm:$0xff]  }
  0x11   : > { %v5388_v35 = vld [vmem:[%s8094_s1 + $0x108] ss:$16 sps:$4 sm:$0xff]   ;;  %s8098_s13 = smov (!%p161_p3, %s4667_s13), 1  ;;  %v6219_v37 = vmov 1983009808   ;;  %v6372_v42 = vshrl.u32 %v754_v36, 7 }
  0x12   : > { %v781_v38 = vunpack.c.l.s4 %v6219_v37  ;;  %v5389_v39 = vld [vmem:[%s8094_s1 + $0x124] ss:$16 sps:$4 sm:$0xff]   ;;  %v5391_v40 = vld [vmem:[%s8094_s1 + $0x12c] ss:$16 sps:$4 sm:$0xff]   ;;  %v5393_v41 = vld [vmem:[%s8094_s1 + $0x120] ss:$16 sps:$4 sm:$0xff]  }
  0x13   : > { %3760 = vmatpush1.bf16.msra.mxu0 %v5357_v14  ;;  %4129 = vmatpush1.bf16.msra.mxu1 %v5358_v15  ;;  %s5325_s17 = smul.u32 36, %s8098_s13  ;;  %v5394_v44 = vld [vmem:[%s8094_s1 + $0x128] ss:$16 sps:$4 sm:$0xff]   ;;  %v5395_v45 = vld [vmem:[%s8094_s1 + $0x144] ss:$16 sps:$4 sm:$0xff]   ;;  %vm4491_vm0 = vcmask 1043456  }
  0x14   : > { %3761 = vmatprep.subr.bf16.mxu0 %v5359_v16  ;;  %4130 = vmatprep.subr.bf16.mxu1 %v5361_v17  ;;  %v782_v43 = vunpack.c.0.s8 %v781_v38  ;;  %v5397_v46 = vld [vmem:[%s8094_s1 + $0x14c] ss:$16 sps:$4 sm:$0xff]   ;;  %v5399_v47 = vld [vmem:[%s8094_s1 + $0x140] ss:$16 sps:$4 sm:$0xff]   ;;  %v5400_v48 = vld [vmem:[%s8094_s1 + $0x148] ss:$16 sps:$4 sm:$0xff]  }
  0x15   : > { %s6392_s30 = scalar_lea.vmem %s8093_s0, %s5325_s17  ;;  %v5401_v50 = vld [vmem:[%s8094_s1 + $0x164] ss:$16 sps:$4 sm:$0xff]   ;;  %v5403_v51 = vld [vmem:[%s8094_s1 + $0x16c] ss:$16 sps:$4 sm:$0xff]   ;;  %v5405_v53 = vld [vmem:[%s8094_s1 + $0x160] ss:$16 sps:$4 sm:$0xff]  }
  0x16   : > { %v6395_v49 = vsub.s32 %v782_v43, %v6372_v42  ;;  %v171_v52 = vld [vmem:[%s6392_s30] sm:$0xff]  ;;  %v5406_v55 = vld [vmem:[%s8094_s1 + $0x168] ss:$16 sps:$4 sm:$0xff]   ;;  %v5409_v57 = vld [vmem:[%s8094_s1 + $0x18c] ss:$16 sps:$4 sm:$0xff]   ;;  %s5256_s9 = sshll.u32 %s8098_s13, 3 }
  0x17   : > { %3762 = vmatpush1.bf16.msra.mxu0 %v5363_v18  ;;  %4131 = vmatpush1.bf16.msra.mxu1 %v5364_v19  ;;  %v5407_v56 = vld [vmem:[%s8094_s1 + $0x184] ss:$16 sps:$4 sm:$0xff]   ;;  %v5411_v59 = vld [vmem:[%s8094_s1 + $0x180] ss:$16 sps:$4 sm:$0xff]   ;;  %v5412_v60 = vld [vmem:[%s8094_s1 + $0x188] ss:$16 sps:$4 sm:$0xff]   ;;  %v779_v7 = vcombine.high %v171_v52, %v171_v52  ;;  %s170_s14 = scalar_lea.vmem %s8096_s3, %s5256_s9 }
  0x18   : > { %3763 = vmatprep.subr.bf16.mxu0 %v5365_v20  ;;  %4132 = vmatprep.subr.bf16.mxu1 %v5367_v21  ;;  %v786_v54 = vrot.slane %v171_v52, %v6395_v49  ;;  %v5413_v61 = vld [vmem:[%s8094_s1 + $0x1a4] ss:$16 sps:$4 sm:$0xff]   ;;  %v5415_v62 = vld [vmem:[%s8094_s1 + $0x1ac] ss:$16 sps:$4 sm:$0xff]   ;;  %v5417_v63 = vld [vmem:[%s8094_s1 + $0x1a0] ss:$16 sps:$4 sm:$0xff]  }
  0x19   : > { %v5418_v0 = vld [vmem:[%s8094_s1 + $0x1a8] ss:$16 sps:$4 sm:$0xff]   ;;  %v5419_v1 = vld [vmem:[%s8094_s1 + $0x1c4] ss:$16 sps:$4 sm:$0xff]   ;;  %v5421_v2 = vld [vmem:[%s8094_s1 + $0x1cc] ss:$16 sps:$4 sm:$0xff]   ;;  %v6466_v12 = vrot.slane %v779_v7, %v6395_v49 }
  0x1a   : > { %v794_v58 = vcombine.high %v786_v54, %v786_v54  ;;  %v5423_v3 = vld [vmem:[%s8094_s1 + $0x1c0] ss:$16 sps:$4 sm:$0xff]   ;;  %v5424_v4 = vld [vmem:[%s8094_s1 + $0x1c8] ss:$16 sps:$4 sm:$0xff]   ;;  %v5425_v5 = vld [vmem:[%s8094_s1 + $0x1e4] ss:$16 sps:$4 sm:$0xff]  }
  0x1b   : > { %3764 = vmatpush1.bf16.msra.mxu0 %v5369_v22  ;;  %4133 = vmatpush1.bf16.msra.mxu1 %v5370_v23  ;;  %v5427_v6 = vld [vmem:[%s8094_s1 + $0x1ec] ss:$16 sps:$4 sm:$0xff]   ;;  %v5429_v8 = vld [vmem:[%s8094_s1 + $0x1e0] ss:$16 sps:$4 sm:$0xff]   ;;  %v5430_v9 = vld [vmem:[%s8094_s1 + $0x1e8] ss:$16 sps:$4 sm:$0xff]   ;;  %v795_v17 = vcombine.high %v6466_v12, %v6466_v12 }
  0x1c   : > { %3765 = vmatprep.subr.bf16.mxu0 %v5371_v24  ;;  %4134 = vmatprep.subr.bf16.mxu1 %v5373_v25  ;;  %v5434_v10 = vld [vmem:[%s8094_s1 + $0x204] ss:$16 sps:$4 sm:$0xff]   ;;  %v5437_v11 = vld [vmem:[%s8094_s1 + $0x20c] ss:$16 sps:$4 sm:$0xff]   ;;  %v5432_v13 = vld [vmem:[%s8094_s1 + $0x200] ss:$16 sps:$4 sm:$0xff]  }
  0x1d   : > { %3785 = vmatprep.mubr.bf16.mxu0 %v794_v58  ;;  %4154 = vmatprep.mubr.bf16.mxu1 %v794_v58  ;;  %v5435_v14 = vld [vmem:[%s8094_s1 + $0x208] ss:$16 sps:$4 sm:$0xff]   ;;  %v5440_v15 = vld [vmem:[%s8094_s1 + $0x224] ss:$16 sps:$4 sm:$0xff]   ;;  %v5443_v16 = vld [vmem:[%s8094_s1 + $0x22c] ss:$16 sps:$4 sm:$0xff]  }
  0x1e   : > { %v5438_v18 = vld [vmem:[%s8094_s1 + $0x220] ss:$16 sps:$4 sm:$0xff]   ;;  %v5441_v19 = vld [vmem:[%s8094_s1 + $0x228] ss:$16 sps:$4 sm:$0xff]   ;;  %v5446_v20 = vld [vmem:[%s8094_s1 + $0x244] ss:$16 sps:$4 sm:$0xff]  }
  0x1f   : > { %3766 = vmatpush1.bf16.msra.mxu0 %v5375_v26  ;;  %4135 = vmatpush1.bf16.msra.mxu1 %v5376_v27  ;;  %v5449_v21 = vld [vmem:[%s8094_s1 + $0x24c] ss:$16 sps:$4 sm:$0xff]   ;;  %v5444_v22 = vld [vmem:[%s8094_s1 + $0x240] ss:$16 sps:$4 sm:$0xff]   ;;  %v5447_v23 = vld [vmem:[%s8094_s1 + $0x248] ss:$16 sps:$4 sm:$0xff]  }
  0x20   : > { %3767 = vmatprep.subr.bf16.mxu0 %v5377_v28  ;;  %4136 = vmatprep.subr.bf16.mxu1 %v5379_v29  ;;  %v5452_v24 = vld [vmem:[%s8094_s1 + $0x264] ss:$16 sps:$4 sm:$0xff]   ;;  %v5455_v25 = vld [vmem:[%s8094_s1 + $0x26c] ss:$16 sps:$4 sm:$0xff]   ;;  %v5450_v26 = vld [vmem:[%s8094_s1 + $0x260] ss:$16 sps:$4 sm:$0xff]  }
  0x21   : > { %v5453_v27 = vld [vmem:[%s8094_s1 + $0x268] ss:$16 sps:$4 sm:$0xff]   ;;  %v5458_v28 = vld [vmem:[%s8094_s1 + $0x284] ss:$16 sps:$4 sm:$0xff]   ;;  %v5461_v29 = vld [vmem:[%s8094_s1 + $0x28c] ss:$16 sps:$4 sm:$0xff]  }
  0x22   : > { %v5470_v36 = vld [vmem:[%s8094_s1 + $0x2c4] ss:$16 sps:$4 sm:$0xff]   ;;  %v5473_v37 = vld [vmem:[%s8094_s1 + $0x2cc] ss:$16 sps:$4 sm:$0xff]   ;;  %v5468_v38 = vld [vmem:[%s8094_s1 + $0x2c0] ss:$16 sps:$4 sm:$0xff]  }
  0x23   : > { %3768 = vmatpush1.bf16.msra.mxu0 %v5381_v30  ;;  %4137 = vmatpush1.bf16.msra.mxu1 %v5382_v31  ;;  %v5456_v30 = vld [vmem:[%s8094_s1 + $0x280] ss:$16 sps:$4 sm:$0xff]   ;;  %v5459_v31 = vld [vmem:[%s8094_s1 + $0x288] ss:$16 sps:$4 sm:$0xff]   ;;  %v5500_v58 = vld [vmem:[%s8094_s1 + $0x364] ss:$16 sps:$4 sm:$0xff]  }
  0x24   : > { %3769 = vmatprep.subr.bf16.mxu0 %v5383_v32  ;;  %4138 = vmatprep.subr.bf16.mxu1 %v5385_v33  ;;  %v5464_v32 = vld [vmem:[%s8094_s1 + $0x2a4] ss:$16 sps:$4 sm:$0xff]   ;;  %v5467_v33 = vld [vmem:[%s8094_s1 + $0x2ac] ss:$16 sps:$4 sm:$0xff]   ;;  %v5474_v43 = vld [vmem:[%s8094_s1 + $0x2e0] ss:$16 sps:$4 sm:$0xff]  }
  0x25   : > { %v5486_v52 = vld [vmem:[%s8094_s1 + $0x320] ss:$16 sps:$4 sm:$0xff]   ;;  %v5521_v7 = vld [vmem:[%s8094_s1 + $0x3cc] ss:$16 sps:$4 sm:$0xff]  }
  0x27   : > { %3770 = vmatpush1.bf16.msra.mxu0 %v5387_v34  ;;  %4139 = vmatpush1.bf16.msra.mxu1 %v5388_v35  ;;  %v5462_v34 = vld [vmem:[%s8094_s1 + $0x2a0] ss:$16 sps:$4 sm:$0xff]   ;;  %v5465_v35 = vld [vmem:[%s8094_s1 + $0x2a8] ss:$16 sps:$4 sm:$0xff]  }
  0x28   : > { %3771 = vmatprep.subr.bf16.mxu0 %v5389_v39  ;;  %4140 = vmatprep.subr.bf16.mxu1 %v5391_v40  ;;  %v5471_v39 = vld [vmem:[%s8094_s1 + $0x2c8] ss:$16 sps:$4 sm:$0xff]   ;;  %v5476_v40 = vld [vmem:[%s8094_s1 + $0x2e4] ss:$16 sps:$4 sm:$0xff]  }
  0x2b   : > { %3772 = vmatpush1.bf16.msra.mxu0 %v5393_v41  ;;  %4141 = vmatpush1.bf16.msra.mxu1 %v5394_v44  ;;  %v5479_v41 = vld [vmem:[%s8094_s1 + $0x2ec] ss:$16 sps:$4 sm:$0xff]   ;;  %v5477_v44 = vld [vmem:[%s8094_s1 + $0x2e8] ss:$16 sps:$4 sm:$0xff]  }
  0x2c   : > { %3773 = vmatprep.subr.bf16.mxu0 %v5395_v45  ;;  %4142 = vmatprep.subr.bf16.mxu1 %v5397_v46  ;;  %v5482_v45 = vld [vmem:[%s8094_s1 + $0x304] ss:$16 sps:$4 sm:$0xff]   ;;  %v5485_v46 = vld [vmem:[%s8094_s1 + $0x30c] ss:$16 sps:$4 sm:$0xff]  }
  0x2f   : > { %3774 = vmatpush1.bf16.msra.mxu0 %v5399_v47  ;;  %4143 = vmatpush1.bf16.msra.mxu1 %v5400_v48  ;;  %v5480_v47 = vld [vmem:[%s8094_s1 + $0x300] ss:$16 sps:$4 sm:$0xff]   ;;  %v5483_v48 = vld [vmem:[%s8094_s1 + $0x308] ss:$16 sps:$4 sm:$0xff]  }
  0x30   : > { %3775 = vmatprep.subr.bf16.mxu0 %v5401_v50  ;;  %4144 = vmatprep.subr.bf16.mxu1 %v5403_v51  ;;  %v5488_v50 = vld [vmem:[%s8094_s1 + $0x324] ss:$16 sps:$4 sm:$0xff]   ;;  %v5491_v51 = vld [vmem:[%s8094_s1 + $0x32c] ss:$16 sps:$4 sm:$0xff]  }
  0x33   : > { %3776 = vmatpush1.bf16.msra.mxu0 %v5405_v53  ;;  %4145 = vmatpush1.bf16.msra.mxu1 %v5406_v55  ;;  %v5489_v53 = vld [vmem:[%s8094_s1 + $0x328] ss:$16 sps:$4 sm:$0xff]   ;;  %v5497_v55 = vld [vmem:[%s8094_s1 + $0x34c] ss:$16 sps:$4 sm:$0xff]  }
  0x34   : > { %3777 = vmatprep.subr.bf16.mxu0 %v5407_v56  ;;  %4146 = vmatprep.subr.bf16.mxu1 %v5409_v57  ;;  %v5492_v56 = vld [vmem:[%s8094_s1 + $0x340] ss:$16 sps:$4 sm:$0xff]   ;;  %v5495_v57 = vld [vmem:[%s8094_s1 + $0x348] ss:$16 sps:$4 sm:$0xff]  }
  0x37   : > { %3778 = vmatpush1.bf16.msra.mxu0 %v5411_v59  ;;  %4147 = vmatpush1.bf16.msra.mxu1 %v5412_v60  ;;  %v5503_v59 = vld [vmem:[%s8094_s1 + $0x36c] ss:$16 sps:$4 sm:$0xff]   ;;  %v5498_v60 = vld [vmem:[%s8094_s1 + $0x360] ss:$16 sps:$4 sm:$0xff]  }
  0x38   : > { %3779 = vmatprep.subr.bf16.mxu0 %v5413_v61  ;;  %4148 = vmatprep.subr.bf16.mxu1 %v5415_v62  ;;  %v5501_v61 = vld [vmem:[%s8094_s1 + $0x368] ss:$16 sps:$4 sm:$0xff]   ;;  %v5506_v62 = vld [vmem:[%s8094_s1 + $0x384] ss:$16 sps:$4 sm:$0xff]  }
  0x3b   : > { %3780 = vmatpush1.bf16.msra.mxu0 %v5417_v63  ;;  %4149 = vmatpush1.bf16.msra.mxu1 %v5418_v0  ;;  %v5509_v63 = vld [vmem:[%s8094_s1 + $0x38c] ss:$16 sps:$4 sm:$0xff]   ;;  %v5504_v0 = vld [vmem:[%s8094_s1 + $0x380] ss:$16 sps:$4 sm:$0xff]  }
  0x3c   : > { %3781 = vmatprep.subr.bf16.mxu0 %v5419_v1  ;;  %4150 = vmatprep.subr.bf16.mxu1 %v5421_v2  ;;  %v5507_v1 = vld [vmem:[%s8094_s1 + $0x388] ss:$16 sps:$4 sm:$0xff]   ;;  %v5512_v2 = vld [vmem:[%s8094_s1 + $0x3a4] ss:$16 sps:$4 sm:$0xff]  }
  0x3f   : > { %3782 = vmatpush1.bf16.msra.mxu0 %v5423_v3  ;;  %4151 = vmatpush1.bf16.msra.mxu1 %v5424_v4  ;;  %v5515_v3 = vld [vmem:[%s8094_s1 + $0x3ac] ss:$16 sps:$4 sm:$0xff]   ;;  %v5510_v4 = vld [vmem:[%s8094_s1 + $0x3a0] ss:$16 sps:$4 sm:$0xff]  }
  0x40   : > { %3783 = vmatprep.subr.bf16.mxu0 %v5425_v5  ;;  %4152 = vmatprep.subr.bf16.mxu1 %v5427_v6  ;;  %v5513_v5 = vld [vmem:[%s8094_s1 + $0x3a8] ss:$16 sps:$4 sm:$0xff]   ;;  %v5518_v6 = vld [vmem:[%s8094_s1 + $0x3c4] ss:$16 sps:$4 sm:$0xff]  }
  0x43   : > { %3784 = vmatpush1.bf16.msra.mxu0 %v5429_v8  ;;  %4153 = vmatpush1.bf16.msra.mxu1 %v5430_v9  ;;  %v5516_v8 = vld [vmem:[%s8094_s1 + $0x3c0] ss:$16 sps:$4 sm:$0xff]   ;;  %v5519_v9 = vld [vmem:[%s8094_s1 + $0x3c8] ss:$16 sps:$4 sm:$0xff]  }
  0x44   : > { %3794 = vmatprep.subr.bf16.mxu0 %v5434_v10  ;;  %4163 = vmatprep.subr.bf16.mxu1 %v5437_v11  ;;  %v5524_v10 = vld [vmem:[%s8094_s1 + $0x3e4] ss:$16 sps:$4 sm:$0xff]   ;;  %v5527_v11 = vld [vmem:[%s8094_s1 + $0x3ec] ss:$16 sps:$4 sm:$0xff]  }
  0x46   : > { %3786 = vmatmul.mubr.bf16.vlgmr.msra.gmra.mrb[0].mxu0 %v786_v54  ;;  %4155 = vmatmul.mubr.bf16.vlgmr.msra.gmra.mrb[0].mxu1 %v786_v54  ;;  %v5494_v54 = vld [vmem:[%s8094_s1 + $0x344] ss:$16 sps:$4 sm:$0xff]  }
  0x47   : > { %3795 = vmatpush1.bf16.msra.mxu0 %v5432_v13  ;;  %4164 = vmatpush1.bf16.msra.mxu1 %v5435_v14  ;;  %v5522_v13 = vld [vmem:[%s8094_s1 + $0x3e0] ss:$16 sps:$4 sm:$0xff]   ;;  %v5525_v14 = vld [vmem:[%s8094_s1 + $0x3e8] ss:$16 sps:$4 sm:$0xff]  }
  0x48   : > { %3796 = vmatprep.subr.bf16.mxu0 %v5440_v15  ;;  %4165 = vmatprep.subr.bf16.mxu1 %v5443_v16  ;;  %v5530_v15 = vld [vmem:[%s8094_s1 + $0x404] ss:$16 sps:$4 sm:$0xff]   ;;  %v5533_v16 = vld [vmem:[%s8094_s1 + $0x40c] ss:$16 sps:$4 sm:$0xff]  }
  0x49   : > { %3826 = vmatprep.mubr.bf16.mxu0 %v795_v17  ;;  %4195 = vmatprep.mubr.bf16.mxu1 %v795_v17  ;;  %v5528_v17 = vld [vmem:[%s8094_s1 + $0x400] ss:$16 sps:$4 sm:$0xff]  }
  0x4b   : > { %3797 = vmatpush1.bf16.msra.mxu0 %v5438_v18  ;;  %4166 = vmatpush1.bf16.msra.mxu1 %v5441_v19  ;;  %v5531_v18 = vld [vmem:[%s8094_s1 + $0x408] ss:$16 sps:$4 sm:$0xff]  }
  0x4c   : > { %3798 = vmatprep.subr.bf16.mxu0 %v5446_v20  ;;  %4167 = vmatprep.subr.bf16.mxu1 %v5449_v21  ;;  %v6669_v19 = vld [vmem:[%s6392_s30 + $0x8] sm:$0xff]  ;;  %v5536_v20 = vld [vmem:[%s8094_s1 + $0x424] ss:$16 sps:$4 sm:$0xff]  }
  0x4d   : > { %v5539_v21 = vld [vmem:[%s8094_s1 + $0x42c] ss:$16 sps:$4 sm:$0xff]  }
  0x4f   : > { %3799 = vmatpush1.bf16.msra.mxu0 %v5444_v22  ;;  %4168 = vmatpush1.bf16.msra.mxu1 %v5447_v23  ;;  %v6679_v22 = vrot.slane %v6669_v19, %v6395_v49 }
  0x50   : > { %3800 = vmatprep.subr.bf16.mxu0 %v5452_v24  ;;  %4169 = vmatprep.subr.bf16.mxu1 %v5455_v25  ;;  %v5534_v24 = vld [vmem:[%s8094_s1 + $0x420] ss:$16 sps:$4 sm:$0xff]   ;;  %v5537_v25 = vld [vmem:[%s8094_s1 + $0x428] ss:$16 sps:$4 sm:$0xff]  }
  0x51   : > { %v811_v23 = vcombine.high %v6679_v22, %v6679_v22 }
  0x53   : > { %3801 = vmatpush1.bf16.msra.mxu0 %v5450_v26  ;;  %4170 = vmatpush1.bf16.msra.mxu1 %v5453_v27  ;;  %v5542_v26 = vld [vmem:[%s8094_s1 + $0x444] ss:$16 sps:$4 sm:$0xff]   ;;  %v5540_v27 = vld [vmem:[%s8094_s1 + $0x440] ss:$16 sps:$4 sm:$0xff]  }
  0x54   : > { %3802 = vmatprep.subr.bf16.mxu0 %v5458_v28  ;;  %4171 = vmatprep.subr.bf16.mxu1 %v5461_v29  ;;  %v5543_v28 = vld [vmem:[%s8094_s1 + $0x448] ss:$16 sps:$4 sm:$0xff]   ;;  %v5548_v29 = vld [vmem:[%s8094_s1 + $0x464] ss:$16 sps:$4 sm:$0xff]  }
  0x57   : > { %3803 = vmatpush1.bf16.msra.mxu0 %v5456_v30  ;;  %4172 = vmatpush1.bf16.msra.mxu1 %v5459_v31  ;;  %v5551_v30 = vld [vmem:[%s8094_s1 + $0x46c] ss:$16 sps:$4 sm:$0xff]   ;;  %v5546_v31 = vld [vmem:[%s8094_s1 + $0x460] ss:$16 sps:$4 sm:$0xff]  }
  0x58   : > { %3804 = vmatprep.subr.bf16.mxu0 %v5464_v32  ;;  %4173 = vmatprep.subr.bf16.mxu1 %v5467_v33  ;;  %v5549_v32 = vld [vmem:[%s8094_s1 + $0x468] ss:$16 sps:$4 sm:$0xff]   ;;  %v5554_v33 = vld [vmem:[%s8094_s1 + $0x484] ss:$16 sps:$4 sm:$0xff]  }
  0x5b   : > { %3805 = vmatpush1.bf16.msra.mxu0 %v5462_v34  ;;  %4174 = vmatpush1.bf16.msra.mxu1 %v5465_v35  ;;  %v5557_v34 = vld [vmem:[%s8094_s1 + $0x48c] ss:$16 sps:$4 sm:$0xff]   ;;  %v5552_v35 = vld [vmem:[%s8094_s1 + $0x480] ss:$16 sps:$4 sm:$0xff]  }
  0x5c   : > { %3806 = vmatprep.subr.bf16.mxu0 %v5470_v36  ;;  %4175 = vmatprep.subr.bf16.mxu1 %v5473_v37  ;;  %v5555_v36 = vld [vmem:[%s8094_s1 + $0x488] ss:$16 sps:$4 sm:$0xff]   ;;  %v5560_v37 = vld [vmem:[%s8094_s1 + $0x4a4] ss:$16 sps:$4 sm:$0xff]  }
  0x5f   : > { %3807 = vmatpush1.bf16.msra.mxu0 %v5468_v38  ;;  %4176 = vmatpush1.bf16.msra.mxu1 %v5471_v39  ;;  %v5563_v38 = vld [vmem:[%s8094_s1 + $0x4ac] ss:$16 sps:$4 sm:$0xff]   ;;  %v5558_v39 = vld [vmem:[%s8094_s1 + $0x4a0] ss:$16 sps:$4 sm:$0xff]  }
  0x60   : > { %3808 = vmatprep.subr.bf16.mxu0 %v5476_v40  ;;  %4177 = vmatprep.subr.bf16.mxu1 %v5479_v41  ;;  %v5561_v40 = vld [vmem:[%s8094_s1 + $0x4a8] ss:$16 sps:$4 sm:$0xff]   ;;  %v5566_v41 = vld [vmem:[%s8094_s1 + $0x4c4] ss:$16 sps:$4 sm:$0xff]  }
  0x63   : > { %3809 = vmatpush1.bf16.msra.mxu0 %v5474_v43  ;;  %4178 = vmatpush1.bf16.msra.mxu1 %v5477_v44  ;;  %v5569_v43 = vld [vmem:[%s8094_s1 + $0x4cc] ss:$16 sps:$4 sm:$0xff]   ;;  %v5564_v44 = vld [vmem:[%s8094_s1 + $0x4c0] ss:$16 sps:$4 sm:$0xff]  }
  0x64   : > { %3810 = vmatprep.subr.bf16.mxu0 %v5482_v45  ;;  %4179 = vmatprep.subr.bf16.mxu1 %v5485_v46  ;;  %v5567_v45 = vld [vmem:[%s8094_s1 + $0x4c8] ss:$16 sps:$4 sm:$0xff]   ;;  %v5572_v46 = vld [vmem:[%s8094_s1 + $0x4e4] ss:$16 sps:$4 sm:$0xff]  }
  0x67   : > { %3811 = vmatpush1.bf16.msra.mxu0 %v5480_v47  ;;  %4180 = vmatpush1.bf16.msra.mxu1 %v5483_v48  ;;  %v5575_v47 = vld [vmem:[%s8094_s1 + $0x4ec] ss:$16 sps:$4 sm:$0xff]   ;;  %v5570_v48 = vld [vmem:[%s8094_s1 + $0x4e0] ss:$16 sps:$4 sm:$0xff]  }
  0x68   : > { %3812 = vmatprep.subr.bf16.mxu0 %v5488_v50  ;;  %4181 = vmatprep.subr.bf16.mxu1 %v5491_v51  ;;  %v5573_v50 = vld [vmem:[%s8094_s1 + $0x4e8] ss:$16 sps:$4 sm:$0xff]   ;;  %v5578_v51 = vld [vmem:[%s8094_s1 + $0x504] ss:$16 sps:$4 sm:$0xff]  }
  0x6b   : > { %3813 = vmatpush1.bf16.msra.mxu0 %v5486_v52  ;;  %4182 = vmatpush1.bf16.msra.mxu1 %v5489_v53  ;;  %v5581_v52 = vld [vmem:[%s8094_s1 + $0x50c] ss:$16 sps:$4 sm:$0xff]   ;;  %v5576_v53 = vld [vmem:[%s8094_s1 + $0x500] ss:$16 sps:$4 sm:$0xff]  }
  0x6c   : > { %3814 = vmatprep.subr.bf16.mxu0 %v5494_v54  ;;  %4183 = vmatprep.subr.bf16.mxu1 %v5497_v55  ;;  %v5579_v54 = vld [vmem:[%s8094_s1 + $0x508] ss:$16 sps:$4 sm:$0xff]   ;;  %v5584_v55 = vld [vmem:[%s8094_s1 + $0x524] ss:$16 sps:$4 sm:$0xff]  }
  0x6f   : > { %3815 = vmatpush1.bf16.msra.mxu0 %v5492_v56  ;;  %4184 = vmatpush1.bf16.msra.mxu1 %v5495_v57  ;;  %v5587_v56 = vld [vmem:[%s8094_s1 + $0x52c] ss:$16 sps:$4 sm:$0xff]   ;;  %v5582_v57 = vld [vmem:[%s8094_s1 + $0x520] ss:$16 sps:$4 sm:$0xff]  }
  0x70   : > { %3816 = vmatprep.subr.bf16.mxu0 %v5500_v58  ;;  %4185 = vmatprep.subr.bf16.mxu1 %v5503_v59  ;;  %v5585_v58 = vld [vmem:[%s8094_s1 + $0x528] ss:$16 sps:$4 sm:$0xff]   ;;  %v5590_v59 = vld [vmem:[%s8094_s1 + $0x544] ss:$16 sps:$4 sm:$0xff]  }
  0x73   : > { %3817 = vmatpush1.bf16.msra.mxu0 %v5498_v60  ;;  %4186 = vmatpush1.bf16.msra.mxu1 %v5501_v61  ;;  %v5593_v60 = vld [vmem:[%s8094_s1 + $0x54c] ss:$16 sps:$4 sm:$0xff]   ;;  %v5588_v61 = vld [vmem:[%s8094_s1 + $0x540] ss:$16 sps:$4 sm:$0xff]  }
  0x74   : > { %3818 = vmatprep.subr.bf16.mxu0 %v5506_v62  ;;  %4187 = vmatprep.subr.bf16.mxu1 %v5509_v63  ;;  %v5591_v62 = vld [vmem:[%s8094_s1 + $0x548] ss:$16 sps:$4 sm:$0xff]   ;;  %v5596_v63 = vld [vmem:[%s8094_s1 + $0x564] ss:$16 sps:$4 sm:$0xff]  }
  0x77   : > { %3819 = vmatpush1.bf16.msra.mxu0 %v5504_v0  ;;  %4188 = vmatpush1.bf16.msra.mxu1 %v5507_v1  ;;  %v5599_v0 = vld [vmem:[%s8094_s1 + $0x56c] ss:$16 sps:$4 sm:$0xff]   ;;  %v5594_v1 = vld [vmem:[%s8094_s1 + $0x560] ss:$16 sps:$4 sm:$0xff]  }
  0x78   : > { %3820 = vmatprep.subr.bf16.mxu0 %v5512_v2  ;;  %4189 = vmatprep.subr.bf16.mxu1 %v5515_v3  ;;  %v5597_v2 = vld [vmem:[%s8094_s1 + $0x568] ss:$16 sps:$4 sm:$0xff]   ;;  %v5602_v3 = vld [vmem:[%s8094_s1 + $0x584] ss:$16 sps:$4 sm:$0xff]  }
  0x7b   : > { %3821 = vmatpush1.bf16.msra.mxu0 %v5510_v4  ;;  %4190 = vmatpush1.bf16.msra.mxu1 %v5513_v5  ;;  %v5605_v4 = vld [vmem:[%s8094_s1 + $0x58c] ss:$16 sps:$4 sm:$0xff]   ;;  %v5600_v5 = vld [vmem:[%s8094_s1 + $0x580] ss:$16 sps:$4 sm:$0xff]  }
  0x7c   : > { %3822 = vmatprep.subr.bf16.mxu0 %v5518_v6  ;;  %4191 = vmatprep.subr.bf16.mxu1 %v5521_v7  ;;  %v5603_v6 = vld [vmem:[%s8094_s1 + $0x588] ss:$16 sps:$4 sm:$0xff]   ;;  %v5608_v7 = vld [vmem:[%s8094_s1 + $0x5a4] ss:$16 sps:$4 sm:$0xff]  }
  0x7f   : > { %3823 = vmatpush1.bf16.msra.mxu0 %v5516_v8  ;;  %4192 = vmatpush1.bf16.msra.mxu1 %v5519_v9  ;;  %v5611_v8 = vld [vmem:[%s8094_s1 + $0x5ac] ss:$16 sps:$4 sm:$0xff]   ;;  %v5606_v9 = vld [vmem:[%s8094_s1 + $0x5a0] ss:$16 sps:$4 sm:$0xff]  }
  0x80   : > { %3824 = vmatprep.subr.bf16.mxu0 %v5524_v10  ;;  %4193 = vmatprep.subr.bf16.mxu1 %v5527_v11  ;;  %v5609_v10 = vld [vmem:[%s8094_s1 + $0x5a8] ss:$16 sps:$4 sm:$0xff]   ;;  %v5614_v11 = vld [vmem:[%s8094_s1 + $0x5c4] ss:$16 sps:$4 sm:$0xff]  }
  0x83   : > { %3825 = vmatpush1.bf16.msra.mxu0 %v5522_v13  ;;  %4194 = vmatpush1.bf16.msra.mxu1 %v5525_v14  ;;  %v5617_v13 = vld [vmem:[%s8094_s1 + $0x5cc] ss:$16 sps:$4 sm:$0xff]   ;;  %v5612_v14 = vld [vmem:[%s8094_s1 + $0x5c0] ss:$16 sps:$4 sm:$0xff]  }
  0x84   : > { %3835 = vmatprep.subr.bf16.mxu0 %v5530_v15  ;;  %4204 = vmatprep.subr.bf16.mxu1 %v5533_v16  ;;  %v5615_v15 = vld [vmem:[%s8094_s1 + $0x5c8] ss:$16 sps:$4 sm:$0xff]   ;;  %v5620_v16 = vld [vmem:[%s8094_s1 + $0x5e4] ss:$16 sps:$4 sm:$0xff]  }
  0x86   : > { %3827 = vmatmul.mubr.bf16.vlgmr.msra.gmra.mrb[0].mxu0 %v6466_v12  ;;  %4196 = vmatmul.mubr.bf16.vlgmr.msra.gmra.mrb[0].mxu1 %v6466_v12  ;;  %v5545_v12 = vld [vmem:[%s8094_s1 + $0x44c] ss:$16 sps:$4 sm:$0xff]  }
  0x87   : > { %3836 = vmatpush1.bf16.msra.mxu0 %v5528_v17  ;;  %4205 = vmatpush1.bf16.msra.mxu1 %v5531_v18  ;;  %v5623_v17 = vld [vmem:[%s8094_s1 + $0x5ec] ss:$16 sps:$4 sm:$0xff]   ;;  %v796_v18 = vcombine.high %v6669_v19, %v6669_v19 }
  0x88   : > { %3837 = vmatprep.subr.bf16.mxu0 %v5536_v20  ;;  %4206 = vmatprep.subr.bf16.mxu1 %v5539_v21  ;;  %v5618_v20 = vld [vmem:[%s8094_s1 + $0x5e0] ss:$16 sps:$4 sm:$0xff]   ;;  %v5621_v21 = vld [vmem:[%s8094_s1 + $0x5e8] ss:$16 sps:$4 sm:$0xff]   ;;  %v5629_v19 = vld [vmem:[%s8094_s1 + $0x60c] ss:$16 sps:$4 sm:$0xff]  }
  0x89   : > { %3867 = vmatprep.mubr.bf16.mxu0 %v811_v23  ;;  %4236 = vmatprep.mubr.bf16.mxu1 %v811_v23  ;;  %v5626_v23 = vld [vmem:[%s8094_s1 + $0x604] ss:$16 sps:$4 sm:$0xff]  }
  0x8b   : > { %3838 = vmatpush1.bf16.msra.mxu0 %v5534_v24  ;;  %4207 = vmatpush1.bf16.msra.mxu1 %v5537_v25  ;;  %v6868_v24 = vrot.slane %v796_v18, %v6395_v49  ;;  %v5624_v25 = vld [vmem:[%s8094_s1 + $0x600] ss:$16 sps:$4 sm:$0xff]   ;;  %v5713_v18 = vld [vmem:[%s8094_s1 + $0x7cc] ss:$16 sps:$4 sm:$0xff]  }
  0x8c   : > { %3839 = vmatprep.subr.bf16.mxu0 %v5542_v26  ;;  %4208 = vmatprep.subr.bf16.mxu1 %v5545_v12  ;;  %v5627_v26 = vld [vmem:[%s8094_s1 + $0x608] ss:$16 sps:$4 sm:$0xff]   ;;  %v5632_v12 = vld [vmem:[%s8094_s1 + $0x624] ss:$16 sps:$4 sm:$0xff]  }
  0x8f   : > { %3840 = vmatpush1.bf16.msra.mxu0 %v5540_v27  ;;  %4209 = vmatpush1.bf16.msra.mxu1 %v5543_v28  ;;  %v5635_v27 = vld [vmem:[%s8094_s1 + $0x62c] ss:$16 sps:$4 sm:$0xff]   ;;  %v812_v28 = vcombine.high %v6868_v24, %v6868_v24 }
  0x90   : > { %3841 = vmatprep.subr.bf16.mxu0 %v5548_v29  ;;  %4210 = vmatprep.subr.bf16.mxu1 %v5551_v30  ;;  %v5630_v29 = vld [vmem:[%s8094_s1 + $0x620] ss:$16 sps:$4 sm:$0xff]   ;;  %v5633_v30 = vld [vmem:[%s8094_s1 + $0x628] ss:$16 sps:$4 sm:$0xff]  }
  0x93   : > { %3842 = vmatpush1.bf16.msra.mxu0 %v5546_v31  ;;  %4211 = vmatpush1.bf16.msra.mxu1 %v5549_v32  ;;  %v5638_v31 = vld [vmem:[%s8094_s1 + $0x644] ss:$16 sps:$4 sm:$0xff]   ;;  %v5636_v32 = vld [vmem:[%s8094_s1 + $0x640] ss:$16 sps:$4 sm:$0xff]  }
  0x94   : > { %3843 = vmatprep.subr.bf16.mxu0 %v5554_v33  ;;  %4212 = vmatprep.subr.bf16.mxu1 %v5557_v34  ;;  %v5639_v33 = vld [vmem:[%s8094_s1 + $0x648] ss:$16 sps:$4 sm:$0xff]   ;;  %v5644_v34 = vld [vmem:[%s8094_s1 + $0x664] ss:$16 sps:$4 sm:$0xff]  }
  0x97   : > { %3844 = vmatpush1.bf16.msra.mxu0 %v5552_v35  ;;  %4213 = vmatpush1.bf16.msra.mxu1 %v5555_v36  ;;  %v5647_v35 = vld [vmem:[%s8094_s1 + $0x66c] ss:$16 sps:$4 sm:$0xff]   ;;  %v5642_v36 = vld [vmem:[%s8094_s1 + $0x660] ss:$16 sps:$4 sm:$0xff]  }
  0x98   : > { %3845 = vmatprep.subr.bf16.mxu0 %v5560_v37  ;;  %4214 = vmatprep.subr.bf16.mxu1 %v5563_v38  ;;  %v5645_v37 = vld [vmem:[%s8094_s1 + $0x668] ss:$16 sps:$4 sm:$0xff]   ;;  %v5650_v38 = vld [vmem:[%s8094_s1 + $0x684] ss:$16 sps:$4 sm:$0xff]  }
  0x9b   : > { %3846 = vmatpush1.bf16.msra.mxu0 %v5558_v39  ;;  %4215 = vmatpush1.bf16.msra.mxu1 %v5561_v40  ;;  %v5653_v39 = vld [vmem:[%s8094_s1 + $0x68c] ss:$16 sps:$4 sm:$0xff]   ;;  %v5648_v40 = vld [vmem:[%s8094_s1 + $0x680] ss:$16 sps:$4 sm:$0xff]  }
  0x9c   : > { %3847 = vmatprep.subr.bf16.mxu0 %v5566_v41  ;;  %4216 = vmatprep.subr.bf16.mxu1 %v5569_v43  ;;  %v5651_v41 = vld [vmem:[%s8094_s1 + $0x688] ss:$16 sps:$4 sm:$0xff]   ;;  %v5656_v43 = vld [vmem:[%s8094_s1 + $0x6a4] ss:$16 sps:$4 sm:$0xff]  }
  0x9f   : > { %3848 = vmatpush1.bf16.msra.mxu0 %v5564_v44  ;;  %4217 = vmatpush1.bf16.msra.mxu1 %v5567_v45  ;;  %v5659_v44 = vld [vmem:[%s8094_s1 + $0x6ac] ss:$16 sps:$4 sm:$0xff]   ;;  %v5654_v45 = vld [vmem:[%s8094_s1 + $0x6a0] ss:$16 sps:$4 sm:$0xff]  }
  0xa0   : > { %3849 = vmatprep.subr.bf16.mxu0 %v5572_v46  ;;  %4218 = vmatprep.subr.bf16.mxu1 %v5575_v47  ;;  %v5657_v46 = vld [vmem:[%s8094_s1 + $0x6a8] ss:$16 sps:$4 sm:$0xff]   ;;  %v5662_v47 = vld [vmem:[%s8094_s1 + $0x6c4] ss:$16 sps:$4 sm:$0xff]  }
  0xa3   : > { %3850 = vmatpush1.bf16.msra.mxu0 %v5570_v48  ;;  %4219 = vmatpush1.bf16.msra.mxu1 %v5573_v50  ;;  %v5665_v48 = vld [vmem:[%s8094_s1 + $0x6cc] ss:$16 sps:$4 sm:$0xff]   ;;  %v5660_v50 = vld [vmem:[%s8094_s1 + $0x6c0] ss:$16 sps:$4 sm:$0xff]  }
  0xa4   : > { %3851 = vmatprep.subr.bf16.mxu0 %v5578_v51  ;;  %4220 = vmatprep.subr.bf16.mxu1 %v5581_v52  ;;  %v5663_v51 = vld [vmem:[%s8094_s1 + $0x6c8] ss:$16 sps:$4 sm:$0xff]   ;;  %v5668_v52 = vld [vmem:[%s8094_s1 + $0x6e4] ss:$16 sps:$4 sm:$0xff]  }
  0xa7   : > { %3852 = vmatpush1.bf16.msra.mxu0 %v5576_v53  ;;  %4221 = vmatpush1.bf16.msra.mxu1 %v5579_v54  ;;  %v5671_v53 = vld [vmem:[%s8094_s1 + $0x6ec] ss:$16 sps:$4 sm:$0xff]   ;;  %v5666_v54 = vld [vmem:[%s8094_s1 + $0x6e0] ss:$16 sps:$4 sm:$0xff]  }
  0xa8   : > { %3853 = vmatprep.subr.bf16.mxu0 %v5584_v55  ;;  %4222 = vmatprep.subr.bf16.mxu1 %v5587_v56  ;;  %v5669_v55 = vld [vmem:[%s8094_s1 + $0x6e8] ss:$16 sps:$4 sm:$0xff]   ;;  %v5674_v56 = vld [vmem:[%s8094_s1 + $0x704] ss:$16 sps:$4 sm:$0xff]  }
  0xab   : > { %3854 = vmatpush1.bf16.msra.mxu0 %v5582_v57  ;;  %4223 = vmatpush1.bf16.msra.mxu1 %v5585_v58  ;;  %v5677_v57 = vld [vmem:[%s8094_s1 + $0x70c] ss:$16 sps:$4 sm:$0xff]   ;;  %v5672_v58 = vld [vmem:[%s8094_s1 + $0x700] ss:$16 sps:$4 sm:$0xff]  }
  0xac   : > { %3855 = vmatprep.subr.bf16.mxu0 %v5590_v59  ;;  %4224 = vmatprep.subr.bf16.mxu1 %v5593_v60  ;;  %v5675_v59 = vld [vmem:[%s8094_s1 + $0x708] ss:$16 sps:$4 sm:$0xff]   ;;  %v5680_v60 = vld [vmem:[%s8094_s1 + $0x724] ss:$16 sps:$4 sm:$0xff]  }
  0xaf   : > { %3856 = vmatpush1.bf16.msra.mxu0 %v5588_v61  ;;  %4225 = vmatpush1.bf16.msra.mxu1 %v5591_v62  ;;  %v5683_v61 = vld [vmem:[%s8094_s1 + $0x72c] ss:$16 sps:$4 sm:$0xff]   ;;  %v5678_v62 = vld [vmem:[%s8094_s1 + $0x720] ss:$16 sps:$4 sm:$0xff]  }
  0xb0   : > { %3857 = vmatprep.subr.bf16.mxu0 %v5596_v63  ;;  %4226 = vmatprep.subr.bf16.mxu1 %v5599_v0  ;;  %v5681_v63 = vld [vmem:[%s8094_s1 + $0x728] ss:$16 sps:$4 sm:$0xff]   ;;  %v5686_v0 = vld [vmem:[%s8094_s1 + $0x744] ss:$16 sps:$4 sm:$0xff]  }
  0xb3   : > { %3858 = vmatpush1.bf16.msra.mxu0 %v5594_v1  ;;  %4227 = vmatpush1.bf16.msra.mxu1 %v5597_v2  ;;  %v5689_v1 = vld [vmem:[%s8094_s1 + $0x74c] ss:$16 sps:$4 sm:$0xff]   ;;  %v5684_v2 = vld [vmem:[%s8094_s1 + $0x740] ss:$16 sps:$4 sm:$0xff]  }
  0xb4   : > { %3859 = vmatprep.subr.bf16.mxu0 %v5602_v3  ;;  %4228 = vmatprep.subr.bf16.mxu1 %v5605_v4  ;;  %v5687_v3 = vld [vmem:[%s8094_s1 + $0x748] ss:$16 sps:$4 sm:$0xff]   ;;  %v5692_v4 = vld [vmem:[%s8094_s1 + $0x764] ss:$16 sps:$4 sm:$0xff]  }
  0xb7   : > { %3860 = vmatpush1.bf16.msra.mxu0 %v5600_v5  ;;  %4229 = vmatpush1.bf16.msra.mxu1 %v5603_v6  ;;  %v5695_v5 = vld [vmem:[%s8094_s1 + $0x76c] ss:$16 sps:$4 sm:$0xff]   ;;  %v5690_v6 = vld [vmem:[%s8094_s1 + $0x760] ss:$16 sps:$4 sm:$0xff]  }
  0xb8   : > { %3861 = vmatprep.subr.bf16.mxu0 %v5608_v7  ;;  %4230 = vmatprep.subr.bf16.mxu1 %v5611_v8  ;;  %v5693_v7 = vld [vmem:[%s8094_s1 + $0x768] ss:$16 sps:$4 sm:$0xff]   ;;  %v5698_v8 = vld [vmem:[%s8094_s1 + $0x784] ss:$16 sps:$4 sm:$0xff]  }
  0xbb   : > { %3862 = vmatpush1.bf16.msra.mxu0 %v5606_v9  ;;  %4231 = vmatpush1.bf16.msra.mxu1 %v5609_v10  ;;  %v5701_v9 = vld [vmem:[%s8094_s1 + $0x78c] ss:$16 sps:$4 sm:$0xff]   ;;  %v5696_v10 = vld [vmem:[%s8094_s1 + $0x780] ss:$16 sps:$4 sm:$0xff]  }
  0xbc   : > { %3863 = vmatprep.subr.bf16.mxu0 %v5614_v11  ;;  %4232 = vmatprep.subr.bf16.mxu1 %v5617_v13  ;;  %v5699_v11 = vld [vmem:[%s8094_s1 + $0x788] ss:$16 sps:$4 sm:$0xff]   ;;  %v5704_v13 = vld [vmem:[%s8094_s1 + $0x7a4] ss:$16 sps:$4 sm:$0xff]  }
  0xbf   : > { %3864 = vmatpush1.bf16.msra.mxu0 %v5612_v14  ;;  %4233 = vmatpush1.bf16.msra.mxu1 %v5615_v15  ;;  %v5707_v14 = vld [vmem:[%s8094_s1 + $0x7ac] ss:$16 sps:$4 sm:$0xff]   ;;  %v5702_v15 = vld [vmem:[%s8094_s1 + $0x7a0] ss:$16 sps:$4 sm:$0xff]  }
  0xc0   : > { %3865 = vmatprep.subr.bf16.mxu0 %v5620_v16  ;;  %4234 = vmatprep.subr.bf16.mxu1 %v5623_v17  ;;  %v5705_v16 = vld [vmem:[%s8094_s1 + $0x7a8] ss:$16 sps:$4 sm:$0xff]   ;;  %v5710_v17 = vld [vmem:[%s8094_s1 + $0x7c4] ss:$16 sps:$4 sm:$0xff]  }
  0xc3   : > { %3866 = vmatpush1.bf16.msra.mxu0 %v5618_v20  ;;  %4235 = vmatpush1.bf16.msra.mxu1 %v5621_v21  ;;  %v5708_v20 = vld [vmem:[%s8094_s1 + $0x7c0] ss:$16 sps:$4 sm:$0xff]   ;;  %v5711_v21 = vld [vmem:[%s8094_s1 + $0x7c8] ss:$16 sps:$4 sm:$0xff]  }
  0xc4   : > { %3876 = vmatprep.subr.bf16.mxu0 %v5626_v23  ;;  %4245 = vmatprep.subr.bf16.mxu1 %v5629_v19  ;;  %v5716_v23 = vld [vmem:[%s8094_s1 + $0x7e4] ss:$16 sps:$4 sm:$0xff]   ;;  %v5719_v19 = vld [vmem:[%s8094_s1 + $0x7ec] ss:$16 sps:$4 sm:$0xff]  }
  0xc6   : > { %3868 = vmatmul.mubr.bf16.vlgmr.msra.gmra.mrb[0].mxu0 %v6679_v22  ;;  %4237 = vmatmul.mubr.bf16.vlgmr.msra.gmra.mrb[0].mxu1 %v6679_v22  ;;  %v5641_v22 = vld [vmem:[%s8094_s1 + $0x64c] ss:$16 sps:$4 sm:$0xff]  }
  0xc7   : > { %3877 = vmatpush1.bf16.msra.mxu0 %v5624_v25  ;;  %4246 = vmatpush1.bf16.msra.mxu1 %v5627_v26  ;;  %v5714_v25 = vld [vmem:[%s8094_s1 + $0x7e0] ss:$16 sps:$4 sm:$0xff]  }
  0xc8   : > { %3878 = vmatprep.subr.bf16.mxu0 %v5632_v12  ;;  %4247 = vmatprep.subr.bf16.mxu1 %v5635_v27  ;;  %v7058_v26 = vld [vmem:[%s6392_s30 + $0x10] sm:$0xff]  ;;  %v5717_v12 = vld [vmem:[%s8094_s1 + $0x7e8] ss:$16 sps:$4 sm:$0xff]  }
  0xc9   : > { %3908 = vmatprep.mubr.bf16.mxu0 %v812_v28  ;;  %4277 = vmatprep.mubr.bf16.mxu1 %v812_v28  ;;  %v5723_v27 = vld [vmem:[%s8094_s1 + $0x804] ss:$16 sps:$4 sm:$0xff]   ;;  %v5726_v28 = vld [vmem:[%s8094_s1 + $0x80c] ss:$16 sps:$4 sm:$0xff]  }
  0xcb   : > { %3879 = vmatpush1.bf16.msra.mxu0 %v5630_v29  ;;  %4248 = vmatpush1.bf16.msra.mxu1 %v5633_v30  ;;  %v7071_v29 = vrot.slane %v7058_v26, %v6395_v49  ;;  %v5721_v30 = vld [vmem:[%s8094_s1 + $0x800] ss:$16 sps:$4 sm:$0xff]  }
  0xcc   : > { %3880 = vmatprep.subr.bf16.mxu0 %v5638_v31  ;;  %4249 = vmatprep.subr.bf16.mxu1 %v5641_v22  ;;  %v5724_v31 = vld [vmem:[%s8094_s1 + $0x808] ss:$16 sps:$4 sm:$0xff]   ;;  %v5729_v22 = vld [vmem:[%s8094_s1 + $0x824] ss:$16 sps:$4 sm:$0xff]  }
  0xcf   : > { %3881 = vmatpush1.bf16.msra.mxu0 %v5636_v32  ;;  %4250 = vmatpush1.bf16.msra.mxu1 %v5639_v33  ;;  %v5732_v32 = vld [vmem:[%s8094_s1 + $0x82c] ss:$16 sps:$4 sm:$0xff]   ;;  %v828_v33 = vcombine.high %v7071_v29, %v7071_v29 }
  0xd0   : > { %3882 = vmatprep.subr.bf16.mxu0 %v5644_v34  ;;  %4251 = vmatprep.subr.bf16.mxu1 %v5647_v35  ;;  %v5727_v34 = vld [vmem:[%s8094_s1 + $0x820] ss:$16 sps:$4 sm:$0xff]   ;;  %v5730_v35 = vld [vmem:[%s8094_s1 + $0x828] ss:$16 sps:$4 sm:$0xff]  }
  0xd3   : > { %3883 = vmatpush1.bf16.msra.mxu0 %v5642_v36  ;;  %4252 = vmatpush1.bf16.msra.mxu1 %v5645_v37  ;;  %v5735_v36 = vld [vmem:[%s8094_s1 + $0x844] ss:$16 sps:$4 sm:$0xff]   ;;  %v5733_v37 = vld [vmem:[%s8094_s1 + $0x840] ss:$16 sps:$4 sm:$0xff]  }
  0xd4   : > { %3884 = vmatprep.subr.bf16.mxu0 %v5650_v38  ;;  %4253 = vmatprep.subr.bf16.mxu1 %v5653_v39  ;;  %v5736_v38 = vld [vmem:[%s8094_s1 + $0x848] ss:$16 sps:$4 sm:$0xff]   ;;  %v5741_v39 = vld [vmem:[%s8094_s1 + $0x864] ss:$16 sps:$4 sm:$0xff]  }
  0xd7   : > { %3885 = vmatpush1.bf16.msra.mxu0 %v5648_v40  ;;  %4254 = vmatpush1.bf16.msra.mxu1 %v5651_v41  ;;  %v5744_v40 = vld [vmem:[%s8094_s1 + $0x86c] ss:$16 sps:$4 sm:$0xff]   ;;  %v5739_v41 = vld [vmem:[%s8094_s1 + $0x860] ss:$16 sps:$4 sm:$0xff]  }
  0xd8   : > { %3886 = vmatprep.subr.bf16.mxu0 %v5656_v43  ;;  %4255 = vmatprep.subr.bf16.mxu1 %v5659_v44  ;;  %v5742_v43 = vld [vmem:[%s8094_s1 + $0x868] ss:$16 sps:$4 sm:$0xff]   ;;  %v5747_v44 = vld [vmem:[%s8094_s1 + $0x884] ss:$16 sps:$4 sm:$0xff]  }
  0xdb   : > { %3887 = vmatpush1.bf16.msra.mxu0 %v5654_v45  ;;  %4256 = vmatpush1.bf16.msra.mxu1 %v5657_v46  ;;  %v5750_v45 = vld [vmem:[%s8094_s1 + $0x88c] ss:$16 sps:$4 sm:$0xff]   ;;  %v5745_v46 = vld [vmem:[%s8094_s1 + $0x880] ss:$16 sps:$4 sm:$0xff]  }
  0xdc   : > { %3888 = vmatprep.subr.bf16.mxu0 %v5662_v47  ;;  %4257 = vmatprep.subr.bf16.mxu1 %v5665_v48  ;;  %v5748_v47 = vld [vmem:[%s8094_s1 + $0x888] ss:$16 sps:$4 sm:$0xff]   ;;  %v5753_v48 = vld [vmem:[%s8094_s1 + $0x8a4] ss:$16 sps:$4 sm:$0xff]  }
  0xdf   : > { %3889 = vmatpush1.bf16.msra.mxu0 %v5660_v50  ;;  %4258 = vmatpush1.bf16.msra.mxu1 %v5663_v51  ;;  %v5756_v50 = vld [vmem:[%s8094_s1 + $0x8ac] ss:$16 sps:$4 sm:$0xff]   ;;  %v5751_v51 = vld [vmem:[%s8094_s1 + $0x8a0] ss:$16 sps:$4 sm:$0xff]  }
  0xe0   : > { %3890 = vmatprep.subr.bf16.mxu0 %v5668_v52  ;;  %4259 = vmatprep.subr.bf16.mxu1 %v5671_v53  ;;  %v5754_v52 = vld [vmem:[%s8094_s1 + $0x8a8] ss:$16 sps:$4 sm:$0xff]   ;;  %v5759_v53 = vld [vmem:[%s8094_s1 + $0x8c4] ss:$16 sps:$4 sm:$0xff]  }
  0xe3   : > { %3891 = vmatpush1.bf16.msra.mxu0 %v5666_v54  ;;  %4260 = vmatpush1.bf16.msra.mxu1 %v5669_v55  ;;  %v5762_v54 = vld [vmem:[%s8094_s1 + $0x8cc] ss:$16 sps:$4 sm:$0xff]   ;;  %v5757_v55 = vld [vmem:[%s8094_s1 + $0x8c0] ss:$16 sps:$4 sm:$0xff]  }
  0xe4   : > { %3892 = vmatprep.subr.bf16.mxu0 %v5674_v56  ;;  %4261 = vmatprep.subr.bf16.mxu1 %v5677_v57  ;;  %v5760_v56 = vld [vmem:[%s8094_s1 + $0x8c8] ss:$16 sps:$4 sm:$0xff]   ;;  %v5765_v57 = vld [vmem:[%s8094_s1 + $0x8e4] ss:$16 sps:$4 sm:$0xff]  }
  0xe7   : > { %3893 = vmatpush1.bf16.msra.mxu0 %v5672_v58  ;;  %4262 = vmatpush1.bf16.msra.mxu1 %v5675_v59  ;;  %v5768_v58 = vld [vmem:[%s8094_s1 + $0x8ec] ss:$16 sps:$4 sm:$0xff]   ;;  %v5763_v59 = vld [vmem:[%s8094_s1 + $0x8e0] ss:$16 sps:$4 sm:$0xff]  }
  0xe8   : > { %3894 = vmatprep.subr.bf16.mxu0 %v5680_v60  ;;  %4263 = vmatprep.subr.bf16.mxu1 %v5683_v61  ;;  %v5766_v60 = vld [vmem:[%s8094_s1 + $0x8e8] ss:$16 sps:$4 sm:$0xff]   ;;  %v5771_v61 = vld [vmem:[%s8094_s1 + $0x904] ss:$16 sps:$4 sm:$0xff]  }
  0xeb   : > { %3895 = vmatpush1.bf16.msra.mxu0 %v5678_v62  ;;  %4264 = vmatpush1.bf16.msra.mxu1 %v5681_v63  ;;  %v5774_v62 = vld [vmem:[%s8094_s1 + $0x90c] ss:$16 sps:$4 sm:$0xff]   ;;  %v5769_v63 = vld [vmem:[%s8094_s1 + $0x900] ss:$16 sps:$4 sm:$0xff]  }
  0xec   : > { %3896 = vmatprep.subr.bf16.mxu0 %v5686_v0  ;;  %4265 = vmatprep.subr.bf16.mxu1 %v5689_v1  ;;  %v5772_v0 = vld [vmem:[%s8094_s1 + $0x908] ss:$16 sps:$4 sm:$0xff]   ;;  %v5777_v1 = vld [vmem:[%s8094_s1 + $0x924] ss:$16 sps:$4 sm:$0xff]  }
  0xef   : > { %3897 = vmatpush1.bf16.msra.mxu0 %v5684_v2  ;;  %4266 = vmatpush1.bf16.msra.mxu1 %v5687_v3  ;;  %v5780_v2 = vld [vmem:[%s8094_s1 + $0x92c] ss:$16 sps:$4 sm:$0xff]   ;;  %v5775_v3 = vld [vmem:[%s8094_s1 + $0x920] ss:$16 sps:$4 sm:$0xff]  }
  0xf0   : > { %3898 = vmatprep.subr.bf16.mxu0 %v5692_v4  ;;  %4267 = vmatprep.subr.bf16.mxu1 %v5695_v5  ;;  %v5778_v4 = vld [vmem:[%s8094_s1 + $0x928] ss:$16 sps:$4 sm:$0xff]   ;;  %v5783_v5 = vld [vmem:[%s8094_s1 + $0x944] ss:$16 sps:$4 sm:$0xff]  }
  0xf3   : > { %3899 = vmatpush1.bf16.msra.mxu0 %v5690_v6  ;;  %4268 = vmatpush1.bf16.msra.mxu1 %v5693_v7  ;;  %v5786_v6 = vld [vmem:[%s8094_s1 + $0x94c] ss:$16 sps:$4 sm:$0xff]   ;;  %v5781_v7 = vld [vmem:[%s8094_s1 + $0x940] ss:$16 sps:$4 sm:$0xff]  }
  0xf4   : > { %3900 = vmatprep.subr.bf16.mxu0 %v5698_v8  ;;  %4269 = vmatprep.subr.bf16.mxu1 %v5701_v9  ;;  %v5784_v8 = vld [vmem:[%s8094_s1 + $0x948] ss:$16 sps:$4 sm:$0xff]   ;;  %v5789_v9 = vld [vmem:[%s8094_s1 + $0x964] ss:$16 sps:$4 sm:$0xff]  }
  0xf7   : > { %3901 = vmatpush1.bf16.msra.mxu0 %v5696_v10  ;;  %4270 = vmatpush1.bf16.msra.mxu1 %v5699_v11  ;;  %v5792_v10 = vld [vmem:[%s8094_s1 + $0x96c] ss:$16 sps:$4 sm:$0xff]   ;;  %v5787_v11 = vld [vmem:[%s8094_s1 + $0x960] ss:$16 sps:$4 sm:$0xff]  }
  0xf8   : > { %3902 = vmatprep.subr.bf16.mxu0 %v5704_v13  ;;  %4271 = vmatprep.subr.bf16.mxu1 %v5707_v14  ;;  %v5790_v13 = vld [vmem:[%s8094_s1 + $0x968] ss:$16 sps:$4 sm:$0xff]   ;;  %v5795_v14 = vld [vmem:[%s8094_s1 + $0x984] ss:$16 sps:$4 sm:$0xff]  }
  0xfb   : > { %3903 = vmatpush1.bf16.msra.mxu0 %v5702_v15  ;;  %4272 = vmatpush1.bf16.msra.mxu1 %v5705_v16  ;;  %v5798_v15 = vld [vmem:[%s8094_s1 + $0x98c] ss:$16 sps:$4 sm:$0xff]   ;;  %v5793_v16 = vld [vmem:[%s8094_s1 + $0x980] ss:$16 sps:$4 sm:$0xff]  }
  0xfc   : > { %3904 = vmatprep.subr.bf16.mxu0 %v5710_v17  ;;  %4273 = vmatprep.subr.bf16.mxu1 %v5713_v18  ;;  %v5796_v17 = vld [vmem:[%s8094_s1 + $0x988] ss:$16 sps:$4 sm:$0xff]   ;;  %v5801_v18 = vld [vmem:[%s8094_s1 + $0x9a4] ss:$16 sps:$4 sm:$0xff]  }
  0xff   : > { %3905 = vmatpush1.bf16.msra.mxu0 %v5708_v20  ;;  %4274 = vmatpush1.bf16.msra.mxu1 %v5711_v21  ;;  %v5804_v20 = vld [vmem:[%s8094_s1 + $0x9ac] ss:$16 sps:$4 sm:$0xff]   ;;  %v5799_v21 = vld [vmem:[%s8094_s1 + $0x9a0] ss:$16 sps:$4 sm:$0xff]  }
 0x100   : > { %3906 = vmatprep.subr.bf16.mxu0 %v5716_v23  ;;  %4275 = vmatprep.subr.bf16.mxu1 %v5719_v19  ;;  %v5802_v23 = vld [vmem:[%s8094_s1 + $0x9a8] ss:$16 sps:$4 sm:$0xff]   ;;  %v5807_v19 = vld [vmem:[%s8094_s1 + $0x9c4] ss:$16 sps:$4 sm:$0xff]  }
 0x103   : > { %3907 = vmatpush1.bf16.msra.mxu0 %v5714_v25  ;;  %4276 = vmatpush1.bf16.msra.mxu1 %v5717_v12  ;;  %v5810_v25 = vld [vmem:[%s8094_s1 + $0x9cc] ss:$16 sps:$4 sm:$0xff]   ;;  %v5805_v12 = vld [vmem:[%s8094_s1 + $0x9c0] ss:$16 sps:$4 sm:$0xff]  }
 0x104   : > { %3917 = vmatprep.subr.bf16.mxu0 %v5723_v27  ;;  %4286 = vmatprep.subr.bf16.mxu1 %v5726_v28  ;;  %v5808_v27 = vld [vmem:[%s8094_s1 + $0x9c8] ss:$16 sps:$4 sm:$0xff]   ;;  %v5813_v28 = vld [vmem:[%s8094_s1 + $0x9e4] ss:$16 sps:$4 sm:$0xff]  }
 0x106   : > { %3909 = vmatmul.mubr.bf16.vlgmr.msra.gmra.mrb[0].mxu0 %v6868_v24  ;;  %4278 = vmatmul.mubr.bf16.vlgmr.msra.gmra.mrb[0].mxu1 %v6868_v24  ;;  %v5738_v24 = vld [vmem:[%s8094_s1 + $0x84c] ss:$16 sps:$4 sm:$0xff]  }
 0x107   : > { %3918 = vmatpush1.bf16.msra.mxu0 %v5721_v30  ;;  %4287 = vmatpush1.bf16.msra.mxu1 %v5724_v31  ;;  %v5816_v30 = vld [vmem:[%s8094_s1 + $0x9ec] ss:$16 sps:$4 sm:$0xff]   ;;  %v813_v31 = vcombine.high %v7058_v26, %v7058_v26 }
 0x108   : > { %3919 = vmatprep.subr.bf16.mxu0 %v5729_v22  ;;  %4288 = vmatprep.subr.bf16.mxu1 %v5732_v32  ;;  %v5811_v22 = vld [vmem:[%s8094_s1 + $0x9e0] ss:$16 sps:$4 sm:$0xff]   ;;  %v5814_v32 = vld [vmem:[%s8094_s1 + $0x9e8] ss:$16 sps:$4 sm:$0xff]   ;;  %v5822_v26 = vld [vmem:[%s8094_s1 + $0xa0c] ss:$16 sps:$4 sm:$0xff]  }
 0x109   : > { %3949 = vmatprep.mubr.bf16.mxu0 %v828_v33  ;;  %4318 = vmatprep.mubr.bf16.mxu1 %v828_v33  ;;  %v5819_v33 = vld [vmem:[%s8094_s1 + $0xa04] ss:$16 sps:$4 sm:$0xff]  }
 0x10b   : > { %3920 = vmatpush1.bf16.msra.mxu0 %v5727_v34  ;;  %4289 = vmatpush1.bf16.msra.mxu1 %v5730_v35  ;;  %v7272_v34 = vrot.slane %v813_v31, %v6395_v49  ;;  %v5817_v35 = vld [vmem:[%s8094_s1 + $0xa00] ss:$16 sps:$4 sm:$0xff]   ;;  %v5906_v31 = vld [vmem:[%s8094_s1 + $0xbcc] ss:$16 sps:$4 sm:$0xff]  }
 0x10c   : > { %3921 = vmatprep.subr.bf16.mxu0 %v5735_v36  ;;  %4290 = vmatprep.subr.bf16.mxu1 %v5738_v24  ;;  %v5820_v36 = vld [vmem:[%s8094_s1 + $0xa08] ss:$16 sps:$4 sm:$0xff]   ;;  %v5825_v24 = vld [vmem:[%s8094_s1 + $0xa24] ss:$16 sps:$4 sm:$0xff]  }
 0x10f   : > { %3922 = vmatpush1.bf16.msra.mxu0 %v5733_v37  ;;  %4291 = vmatpush1.bf16.msra.mxu1 %v5736_v38  ;;  %v5828_v37 = vld [vmem:[%s8094_s1 + $0xa2c] ss:$16 sps:$4 sm:$0xff]   ;;  %v829_v38 = vcombine.high %v7272_v34, %v7272_v34 }
 0x110   : > { %3923 = vmatprep.subr.bf16.mxu0 %v5741_v39  ;;  %4292 = vmatprep.subr.bf16.mxu1 %v5744_v40  ;;  %v5823_v39 = vld [vmem:[%s8094_s1 + $0xa20] ss:$16 sps:$4 sm:$0xff]   ;;  %v5826_v40 = vld [vmem:[%s8094_s1 + $0xa28] ss:$16 sps:$4 sm:$0xff]  }
 0x113   : > { %3924 = vmatpush1.bf16.msra.mxu0 %v5739_v41  ;;  %4293 = vmatpush1.bf16.msra.mxu1 %v5742_v43  ;;  %v5831_v41 = vld [vmem:[%s8094_s1 + $0xa44] ss:$16 sps:$4 sm:$0xff]   ;;  %v5829_v43 = vld [vmem:[%s8094_s1 + $0xa40] ss:$16 sps:$4 sm:$0xff]  }
 0x114   : > { %3925 = vmatprep.subr.bf16.mxu0 %v5747_v44  ;;  %4294 = vmatprep.subr.bf16.mxu1 %v5750_v45  ;;  %v5832_v44 = vld [vmem:[%s8094_s1 + $0xa48] ss:$16 sps:$4 sm:$0xff]   ;;  %v5837_v45 = vld [vmem:[%s8094_s1 + $0xa64] ss:$16 sps:$4 sm:$0xff]  }
 0x117   : > { %3926 = vmatpush1.bf16.msra.mxu0 %v5745_v46  ;;  %4295 = vmatpush1.bf16.msra.mxu1 %v5748_v47  ;;  %v5840_v46 = vld [vmem:[%s8094_s1 + $0xa6c] ss:$16 sps:$4 sm:$0xff]   ;;  %v5835_v47 = vld [vmem:[%s8094_s1 + $0xa60] ss:$16 sps:$4 sm:$0xff]  }
 0x118   : > { %3927 = vmatprep.subr.bf16.mxu0 %v5753_v48  ;;  %4296 = vmatprep.subr.bf16.mxu1 %v5756_v50  ;;  %v5838_v48 = vld [vmem:[%s8094_s1 + $0xa68] ss:$16 sps:$4 sm:$0xff]   ;;  %v5843_v50 = vld [vmem:[%s8094_s1 + $0xa84] ss:$16 sps:$4 sm:$0xff]  }
 0x11b   : > { %3928 = vmatpush1.bf16.msra.mxu0 %v5751_v51  ;;  %4297 = vmatpush1.bf16.msra.mxu1 %v5754_v52  ;;  %v5846_v51 = vld [vmem:[%s8094_s1 + $0xa8c] ss:$16 sps:$4 sm:$0xff]   ;;  %v5841_v52 = vld [vmem:[%s8094_s1 + $0xa80] ss:$16 sps:$4 sm:$0xff]  }
 0x11c   : > { %3929 = vmatprep.subr.bf16.mxu0 %v5759_v53  ;;  %4298 = vmatprep.subr.bf16.mxu1 %v5762_v54  ;;  %v5844_v53 = vld [vmem:[%s8094_s1 + $0xa88] ss:$16 sps:$4 sm:$0xff]   ;;  %v5849_v54 = vld [vmem:[%s8094_s1 + $0xaa4] ss:$16 sps:$4 sm:$0xff]  }
 0x11f   : > { %3930 = vmatpush1.bf16.msra.mxu0 %v5757_v55  ;;  %4299 = vmatpush1.bf16.msra.mxu1 %v5760_v56  ;;  %v5852_v55 = vld [vmem:[%s8094_s1 + $0xaac] ss:$16 sps:$4 sm:$0xff]   ;;  %v5847_v56 = vld [vmem:[%s8094_s1 + $0xaa0] ss:$16 sps:$4 sm:$0xff]  }
 0x120   : > { %3931 = vmatprep.subr.bf16.mxu0 %v5765_v57  ;;  %4300 = vmatprep.subr.bf16.mxu1 %v5768_v58  ;;  %v5850_v57 = vld [vmem:[%s8094_s1 + $0xaa8] ss:$16 sps:$4 sm:$0xff]   ;;  %v5855_v58 = vld [vmem:[%s8094_s1 + $0xac4] ss:$16 sps:$4 sm:$0xff]  }
 0x123   : > { %3932 = vmatpush1.bf16.msra.mxu0 %v5763_v59  ;;  %4301 = vmatpush1.bf16.msra.mxu1 %v5766_v60  ;;  %v5858_v59 = vld [vmem:[%s8094_s1 + $0xacc] ss:$16 sps:$4 sm:$0xff]   ;;  %v5853_v60 = vld [vmem:[%s8094_s1 + $0xac0] ss:$16 sps:$4 sm:$0xff]  }
 0x124   : > { %3933 = vmatprep.subr.bf16.mxu0 %v5771_v61  ;;  %4302 = vmatprep.subr.bf16.mxu1 %v5774_v62  ;;  %v5856_v61 = vld [vmem:[%s8094_s1 + $0xac8] ss:$16 sps:$4 sm:$0xff]   ;;  %v5861_v62 = vld [vmem:[%s8094_s1 + $0xae4] ss:$16 sps:$4 sm:$0xff]  }
 0x127   : > { %3934 = vmatpush1.bf16.msra.mxu0 %v5769_v63  ;;  %4303 = vmatpush1.bf16.msra.mxu1 %v5772_v0  ;;  %v5864_v63 = vld [vmem:[%s8094_s1 + $0xaec] ss:$16 sps:$4 sm:$0xff]   ;;  %v5859_v0 = vld [vmem:[%s8094_s1 + $0xae0] ss:$16 sps:$4 sm:$0xff]  }
 0x128   : > { %3935 = vmatprep.subr.bf16.mxu0 %v5777_v1  ;;  %4304 = vmatprep.subr.bf16.mxu1 %v5780_v2  ;;  %v5862_v1 = vld [vmem:[%s8094_s1 + $0xae8] ss:$16 sps:$4 sm:$0xff]   ;;  %v5867_v2 = vld [vmem:[%s8094_s1 + $0xb04] ss:$16 sps:$4 sm:$0xff]  }
 0x12b   : > { %3936 = vmatpush1.bf16.msra.mxu0 %v5775_v3  ;;  %4305 = vmatpush1.bf16.msra.mxu1 %v5778_v4  ;;  %v5870_v3 = vld [vmem:[%s8094_s1 + $0xb0c] ss:$16 sps:$4 sm:$0xff]   ;;  %v5865_v4 = vld [vmem:[%s8094_s1 + $0xb00] ss:$16 sps:$4 sm:$0xff]  }
 0x12c   : > { %3937 = vmatprep.subr.bf16.mxu0 %v5783_v5  ;;  %4306 = vmatprep.subr.bf16.mxu1 %v5786_v6  ;;  %v5868_v5 = vld [vmem:[%s8094_s1 + $0xb08] ss:$16 sps:$4 sm:$0xff]   ;;  %v5873_v6 = vld [vmem:[%s8094_s1 + $0xb24] ss:$16 sps:$4 sm:$0xff]  }
 0x12f   : > { %3938 = vmatpush1.bf16.msra.mxu0 %v5781_v7  ;;  %4307 = vmatpush1.bf16.msra.mxu1 %v5784_v8  ;;  %v5876_v7 = vld [vmem:[%s8094_s1 + $0xb2c] ss:$16 sps:$4 sm:$0xff]   ;;  %v5871_v8 = vld [vmem:[%s8094_s1 + $0xb20] ss:$16 sps:$4 sm:$0xff]  }
 0x130   : > { %3939 = vmatprep.subr.bf16.mxu0 %v5789_v9  ;;  %4308 = vmatprep.subr.bf16.mxu1 %v5792_v10  ;;  %v5874_v9 = vld [vmem:[%s8094_s1 + $0xb28] ss:$16 sps:$4 sm:$0xff]   ;;  %v5879_v10 = vld [vmem:[%s8094_s1 + $0xb44] ss:$16 sps:$4 sm:$0xff]  }
 0x133   : > { %3940 = vmatpush1.bf16.msra.mxu0 %v5787_v11  ;;  %4309 = vmatpush1.bf16.msra.mxu1 %v5790_v13  ;;  %v5882_v11 = vld [vmem:[%s8094_s1 + $0xb4c] ss:$16 sps:$4 sm:$0xff]   ;;  %v5877_v13 = vld [vmem:[%s8094_s1 + $0xb40] ss:$16 sps:$4 sm:$0xff]  }
 0x134   : > { %3941 = vmatprep.subr.bf16.mxu0 %v5795_v14  ;;  %4310 = vmatprep.subr.bf16.mxu1 %v5798_v15  ;;  %v5880_v14 = vld [vmem:[%s8094_s1 + $0xb48] ss:$16 sps:$4 sm:$0xff]   ;;  %v5885_v15 = vld [vmem:[%s8094_s1 + $0xb64] ss:$16 sps:$4 sm:$0xff]  }
 0x137   : > { %3942 = vmatpush1.bf16.msra.mxu0 %v5793_v16  ;;  %4311 = vmatpush1.bf16.msra.mxu1 %v5796_v17  ;;  %v5888_v16 = vld [vmem:[%s8094_s1 + $0xb6c] ss:$16 sps:$4 sm:$0xff]   ;;  %v5883_v17 = vld [vmem:[%s8094_s1 + $0xb60] ss:$16 sps:$4 sm:$0xff]  }
 0x138   : > { %3943 = vmatprep.subr.bf16.mxu0 %v5801_v18  ;;  %4312 = vmatprep.subr.bf16.mxu1 %v5804_v20  ;;  %v5886_v18 = vld [vmem:[%s8094_s1 + $0xb68] ss:$16 sps:$4 sm:$0xff]   ;;  %v5891_v20 = vld [vmem:[%s8094_s1 + $0xb84] ss:$16 sps:$4 sm:$0xff]  }
 0x13b   : > { %3944 = vmatpush1.bf16.msra.mxu0 %v5799_v21  ;;  %4313 = vmatpush1.bf16.msra.mxu1 %v5802_v23  ;;  %v5894_v21 = vld [vmem:[%s8094_s1 + $0xb8c] ss:$16 sps:$4 sm:$0xff]   ;;  %v5889_v23 = vld [vmem:[%s8094_s1 + $0xb80] ss:$16 sps:$4 sm:$0xff]  }
 0x13c   : > { %3945 = vmatprep.subr.bf16.mxu0 %v5807_v19  ;;  %4314 = vmatprep.subr.bf16.mxu1 %v5810_v25  ;;  %v5892_v19 = vld [vmem:[%s8094_s1 + $0xb88] ss:$16 sps:$4 sm:$0xff]   ;;  %v5897_v25 = vld [vmem:[%s8094_s1 + $0xba4] ss:$16 sps:$4 sm:$0xff]  }
 0x13f   : > { %3946 = vmatpush1.bf16.msra.mxu0 %v5805_v12  ;;  %4315 = vmatpush1.bf16.msra.mxu1 %v5808_v27  ;;  %v5900_v12 = vld [vmem:[%s8094_s1 + $0xbac] ss:$16 sps:$4 sm:$0xff]   ;;  %v5895_v27 = vld [vmem:[%s8094_s1 + $0xba0] ss:$16 sps:$4 sm:$0xff]  }
 0x140   : > { %3947 = vmatprep.subr.bf16.mxu0 %v5813_v28  ;;  %4316 = vmatprep.subr.bf16.mxu1 %v5816_v30  ;;  %v5898_v28 = vld [vmem:[%s8094_s1 + $0xba8] ss:$16 sps:$4 sm:$0xff]   ;;  %v5903_v30 = vld [vmem:[%s8094_s1 + $0xbc4] ss:$16 sps:$4 sm:$0xff]  }
 0x143   : > { %3948 = vmatpush1.bf16.msra.mxu0 %v5811_v22  ;;  %4317 = vmatpush1.bf16.msra.mxu1 %v5814_v32  ;;  %v5901_v22 = vld [vmem:[%s8094_s1 + $0xbc0] ss:$16 sps:$4 sm:$0xff]   ;;  %v5904_v32 = vld [vmem:[%s8094_s1 + $0xbc8] ss:$16 sps:$4 sm:$0xff]  }
 0x144   : > { %3958 = vmatprep.subr.bf16.mxu0 %v5819_v33  ;;  %4327 = vmatprep.subr.bf16.mxu1 %v5822_v26  ;;  %v5909_v33 = vld [vmem:[%s8094_s1 + $0xbe4] ss:$16 sps:$4 sm:$0xff]   ;;  %v5912_v26 = vld [vmem:[%s8094_s1 + $0xbec] ss:$16 sps:$4 sm:$0xff]  }
 0x146   : > { %3950 = vmatmul.mubr.bf16.vlgmr.msra.gmra.mrb[0].mxu0 %v7071_v29  ;;  %4319 = vmatmul.mubr.bf16.vlgmr.msra.gmra.mrb[0].mxu1 %v7071_v29  ;;  %v5834_v29 = vld [vmem:[%s8094_s1 + $0xa4c] ss:$16 sps:$4 sm:$0xff]  }
 0x147   : > { %3959 = vmatpush1.bf16.msra.mxu0 %v5817_v35  ;;  %4328 = vmatpush1.bf16.msra.mxu1 %v5820_v36  ;;  %v7459_v35 = vld [vmem:[%s6392_s30 + $0x18] sm:$0xff]  ;;  %v5907_v36 = vld [vmem:[%s8094_s1 + $0xbe0] ss:$16 sps:$4 sm:$0xff]  }
 0x148   : > { %3960 = vmatprep.subr.bf16.mxu0 %v5825_v24  ;;  %4329 = vmatprep.subr.bf16.mxu1 %v5828_v37  ;;  %v5910_v24 = vld [vmem:[%s8094_s1 + $0xbe8] ss:$16 sps:$4 sm:$0xff]   ;;  %v5916_v37 = vld [vmem:[%s8094_s1 + $0xc04] ss:$16 sps:$4 sm:$0xff]  }
 0x149   : > { %3990 = vmatprep.mubr.bf16.mxu0 %v829_v38  ;;  %4359 = vmatprep.mubr.bf16.mxu1 %v829_v38  ;;  %v5919_v38 = vld [vmem:[%s8094_s1 + $0xc0c] ss:$16 sps:$4 sm:$0xff]  }
 0x14b   : > { %3961 = vmatpush1.bf16.msra.mxu0 %v5823_v39  ;;  %4330 = vmatpush1.bf16.msra.mxu1 %v5826_v40  ;;  %v7475_v39 = vrot.slane %v7459_v35, %v6395_v49  ;;  %v5914_v40 = vld [vmem:[%s8094_s1 + $0xc00] ss:$16 sps:$4 sm:$0xff]  }
 0x14c   : > { %3962 = vmatprep.subr.bf16.mxu0 %v5831_v41  ;;  %4331 = vmatprep.subr.bf16.mxu1 %v5834_v29  ;;  %v5917_v41 = vld [vmem:[%s8094_s1 + $0xc08] ss:$16 sps:$4 sm:$0xff]   ;;  %v5922_v29 = vld [vmem:[%s8094_s1 + $0xc24] ss:$16 sps:$4 sm:$0xff]  }
 0x14f   : > { %3963 = vmatpush1.bf16.msra.mxu0 %v5829_v43  ;;  %4332 = vmatpush1.bf16.msra.mxu1 %v5832_v44  ;;  %v5925_v43 = vld [vmem:[%s8094_s1 + $0xc2c] ss:$16 sps:$4 sm:$0xff]   ;;  %v845_v44 = vcombine.high %v7475_v39, %v7475_v39 }
 0x150   : > { %3964 = vmatprep.subr.bf16.mxu0 %v5837_v45  ;;  %4333 = vmatprep.subr.bf16.mxu1 %v5840_v46  ;;  %v5920_v45 = vld [vmem:[%s8094_s1 + $0xc20] ss:$16 sps:$4 sm:$0xff]   ;;  %v5923_v46 = vld [vmem:[%s8094_s1 + $0xc28] ss:$16 sps:$4 sm:$0xff]  }
 0x153   : > { %3965 = vmatpush1.bf16.msra.mxu0 %v5835_v47  ;;  %4334 = vmatpush1.bf16.msra.mxu1 %v5838_v48  ;;  %v5928_v47 = vld [vmem:[%s8094_s1 + $0xc44] ss:$16 sps:$4 sm:$0xff]   ;;  %v5926_v48 = vld [vmem:[%s8094_s1 + $0xc40] ss:$16 sps:$4 sm:$0xff]  }
 0x154   : > { %3966 = vmatprep.subr.bf16.mxu0 %v5843_v50  ;;  %4335 = vmatprep.subr.bf16.mxu1 %v5846_v51  ;;  %v5929_v50 = vld [vmem:[%s8094_s1 + $0xc48] ss:$16 sps:$4 sm:$0xff]   ;;  %v5934_v51 = vld [vmem:[%s8094_s1 + $0xc64] ss:$16 sps:$4 sm:$0xff]  }
 0x157   : > { %3967 = vmatpush1.bf16.msra.mxu0 %v5841_v52  ;;  %4336 = vmatpush1.bf16.msra.mxu1 %v5844_v53  ;;  %v5937_v52 = vld [vmem:[%s8094_s1 + $0xc6c] ss:$16 sps:$4 sm:$0xff]   ;;  %v5932_v53 = vld [vmem:[%s8094_s1 + $0xc60] ss:$16 sps:$4 sm:$0xff]  }
 0x158   : > { %3968 = vmatprep.subr.bf16.mxu0 %v5849_v54  ;;  %4337 = vmatprep.subr.bf16.mxu1 %v5852_v55  ;;  %v5935_v54 = vld [vmem:[%s8094_s1 + $0xc68] ss:$16 sps:$4 sm:$0xff]   ;;  %v5940_v55 = vld [vmem:[%s8094_s1 + $0xc84] ss:$16 sps:$4 sm:$0xff]  }
 0x15b   : > { %3969 = vmatpush1.bf16.msra.mxu0 %v5847_v56  ;;  %4338 = vmatpush1.bf16.msra.mxu1 %v5850_v57  ;;  %v5943_v56 = vld [vmem:[%s8094_s1 + $0xc8c] ss:$16 sps:$4 sm:$0xff]   ;;  %v5938_v57 = vld [vmem:[%s8094_s1 + $0xc80] ss:$16 sps:$4 sm:$0xff]  }
 0x15c   : > { %3970 = vmatprep.subr.bf16.mxu0 %v5855_v58  ;;  %4339 = vmatprep.subr.bf16.mxu1 %v5858_v59  ;;  %v5941_v58 = vld [vmem:[%s8094_s1 + $0xc88] ss:$16 sps:$4 sm:$0xff]   ;;  %v5946_v59 = vld [vmem:[%s8094_s1 + $0xca4] ss:$16 sps:$4 sm:$0xff]  }
 0x15f   : > { %3971 = vmatpush1.bf16.msra.mxu0 %v5853_v60  ;;  %4340 = vmatpush1.bf16.msra.mxu1 %v5856_v61  ;;  %v5949_v60 = vld [vmem:[%s8094_s1 + $0xcac] ss:$16 sps:$4 sm:$0xff]   ;;  %v5944_v61 = vld [vmem:[%s8094_s1 + $0xca0] ss:$16 sps:$4 sm:$0xff]  }
 0x160   : > { %3972 = vmatprep.subr.bf16.mxu0 %v5861_v62  ;;  %4341 = vmatprep.subr.bf16.mxu1 %v5864_v63  ;;  %v5947_v62 = vld [vmem:[%s8094_s1 + $0xca8] ss:$16 sps:$4 sm:$0xff]   ;;  %v5952_v63 = vld [vmem:[%s8094_s1 + $0xcc4] ss:$16 sps:$4 sm:$0xff]  }
 0x163   : > { %3973 = vmatpush1.bf16.msra.mxu0 %v5859_v0  ;;  %4342 = vmatpush1.bf16.msra.mxu1 %v5862_v1  ;;  %v5955_v0 = vld [vmem:[%s8094_s1 + $0xccc] ss:$16 sps:$4 sm:$0xff]   ;;  %v5950_v1 = vld [vmem:[%s8094_s1 + $0xcc0] ss:$16 sps:$4 sm:$0xff]  }
 0x164   : > { %3974 = vmatprep.subr.bf16.mxu0 %v5867_v2  ;;  %4343 = vmatprep.subr.bf16.mxu1 %v5870_v3  ;;  %v5953_v2 = vld [vmem:[%s8094_s1 + $0xcc8] ss:$16 sps:$4 sm:$0xff]   ;;  %v5958_v3 = vld [vmem:[%s8094_s1 + $0xce4] ss:$16 sps:$4 sm:$0xff]  }
 0x167   : > { %3975 = vmatpush1.bf16.msra.mxu0 %v5865_v4  ;;  %4344 = vmatpush1.bf16.msra.mxu1 %v5868_v5  ;;  %v5961_v4 = vld [vmem:[%s8094_s1 + $0xcec] ss:$16 sps:$4 sm:$0xff]   ;;  %v5956_v5 = vld [vmem:[%s8094_s1 + $0xce0] ss:$16 sps:$4 sm:$0xff]  }
 0x168   : > { %3976 = vmatprep.subr.bf16.mxu0 %v5873_v6  ;;  %4345 = vmatprep.subr.bf16.mxu1 %v5876_v7  ;;  %v5959_v6 = vld [vmem:[%s8094_s1 + $0xce8] ss:$16 sps:$4 sm:$0xff]   ;;  %v5964_v7 = vld [vmem:[%s8094_s1 + $0xd04] ss:$16 sps:$4 sm:$0xff]  }
 0x16b   : > { %3977 = vmatpush1.bf16.msra.mxu0 %v5871_v8  ;;  %4346 = vmatpush1.bf16.msra.mxu1 %v5874_v9  ;;  %v5967_v8 = vld [vmem:[%s8094_s1 + $0xd0c] ss:$16 sps:$4 sm:$0xff]   ;;  %v5962_v9 = vld [vmem:[%s8094_s1 + $0xd00] ss:$16 sps:$4 sm:$0xff]  }
 0x16c   : > { %3978 = vmatprep.subr.bf16.mxu0 %v5879_v10  ;;  %4347 = vmatprep.subr.bf16.mxu1 %v5882_v11  ;;  %v5965_v10 = vld [vmem:[%s8094_s1 + $0xd08] ss:$16 sps:$4 sm:$0xff]   ;;  %v5970_v11 = vld [vmem:[%s8094_s1 + $0xd24] ss:$16 sps:$4 sm:$0xff]  }
 0x16f   : > { %3979 = vmatpush1.bf16.msra.mxu0 %v5877_v13  ;;  %4348 = vmatpush1.bf16.msra.mxu1 %v5880_v14  ;;  %v5973_v13 = vld [vmem:[%s8094_s1 + $0xd2c] ss:$16 sps:$4 sm:$0xff]   ;;  %v5968_v14 = vld [vmem:[%s8094_s1 + $0xd20] ss:$16 sps:$4 sm:$0xff]  }
 0x170   : > { %3980 = vmatprep.subr.bf16.mxu0 %v5885_v15  ;;  %4349 = vmatprep.subr.bf16.mxu1 %v5888_v16  ;;  %v5971_v15 = vld [vmem:[%s8094_s1 + $0xd28] ss:$16 sps:$4 sm:$0xff]   ;;  %v5976_v16 = vld [vmem:[%s8094_s1 + $0xd44] ss:$16 sps:$4 sm:$0xff]  }
 0x173   : > { %3981 = vmatpush1.bf16.msra.mxu0 %v5883_v17  ;;  %4350 = vmatpush1.bf16.msra.mxu1 %v5886_v18  ;;  %v5979_v17 = vld [vmem:[%s8094_s1 + $0xd4c] ss:$16 sps:$4 sm:$0xff]   ;;  %v5974_v18 = vld [vmem:[%s8094_s1 + $0xd40] ss:$16 sps:$4 sm:$0xff]  }
 0x174   : > { %3982 = vmatprep.subr.bf16.mxu0 %v5891_v20  ;;  %4351 = vmatprep.subr.bf16.mxu1 %v5894_v21  ;;  %v5977_v20 = vld [vmem:[%s8094_s1 + $0xd48] ss:$16 sps:$4 sm:$0xff]   ;;  %v5982_v21 = vld [vmem:[%s8094_s1 + $0xd64] ss:$16 sps:$4 sm:$0xff]  }
 0x177   : > { %3983 = vmatpush1.bf16.msra.mxu0 %v5889_v23  ;;  %4352 = vmatpush1.bf16.msra.mxu1 %v5892_v19  ;;  %v5985_v23 = vld [vmem:[%s8094_s1 + $0xd6c] ss:$16 sps:$4 sm:$0xff]   ;;  %v5980_v19 = vld [vmem:[%s8094_s1 + $0xd60] ss:$16 sps:$4 sm:$0xff]  }
 0x178   : > { %3984 = vmatprep.subr.bf16.mxu0 %v5897_v25  ;;  %4353 = vmatprep.subr.bf16.mxu1 %v5900_v12  ;;  %v5983_v25 = vld [vmem:[%s8094_s1 + $0xd68] ss:$16 sps:$4 sm:$0xff]   ;;  %v5988_v12 = vld [vmem:[%s8094_s1 + $0xd84] ss:$16 sps:$4 sm:$0xff]  }
 0x17b   : > { %3985 = vmatpush1.bf16.msra.mxu0 %v5895_v27  ;;  %4354 = vmatpush1.bf16.msra.mxu1 %v5898_v28  ;;  %v5991_v27 = vld [vmem:[%s8094_s1 + $0xd8c] ss:$16 sps:$4 sm:$0xff]   ;;  %v5986_v28 = vld [vmem:[%s8094_s1 + $0xd80] ss:$16 sps:$4 sm:$0xff]  }
 0x17c   : > { %3986 = vmatprep.subr.bf16.mxu0 %v5903_v30  ;;  %4355 = vmatprep.subr.bf16.mxu1 %v5906_v31  ;;  %v5989_v30 = vld [vmem:[%s8094_s1 + $0xd88] ss:$16 sps:$4 sm:$0xff]   ;;  %v5994_v31 = vld [vmem:[%s8094_s1 + $0xda4] ss:$16 sps:$4 sm:$0xff]  }
 0x17f   : > { %3987 = vmatpush1.bf16.msra.mxu0 %v5901_v22  ;;  %4356 = vmatpush1.bf16.msra.mxu1 %v5904_v32  ;;  %v5997_v22 = vld [vmem:[%s8094_s1 + $0xdac] ss:$16 sps:$4 sm:$0xff]   ;;  %v5992_v32 = vld [vmem:[%s8094_s1 + $0xda0] ss:$16 sps:$4 sm:$0xff]  }
 0x180   : > { %3988 = vmatprep.subr.bf16.mxu0 %v5909_v33  ;;  %4357 = vmatprep.subr.bf16.mxu1 %v5912_v26  ;;  %v5995_v33 = vld [vmem:[%s8094_s1 + $0xda8] ss:$16 sps:$4 sm:$0xff]   ;;  %v6000_v26 = vld [vmem:[%s8094_s1 + $0xdc4] ss:$16 sps:$4 sm:$0xff]  }
 0x183   : > { %3989 = vmatpush1.bf16.msra.mxu0 %v5907_v36  ;;  %4358 = vmatpush1.bf16.msra.mxu1 %v5910_v24  ;;  %v6003_v36 = vld [vmem:[%s8094_s1 + $0xdcc] ss:$16 sps:$4 sm:$0xff]   ;;  %v5998_v24 = vld [vmem:[%s8094_s1 + $0xdc0] ss:$16 sps:$4 sm:$0xff]  }
 0x184   : > { %3999 = vmatprep.subr.bf16.mxu0 %v5916_v37  ;;  %4368 = vmatprep.subr.bf16.mxu1 %v5919_v38  ;;  %v6001_v37 = vld [vmem:[%s8094_s1 + $0xdc8] ss:$16 sps:$4 sm:$0xff]   ;;  %v6006_v38 = vld [vmem:[%s8094_s1 + $0xde4] ss:$16 sps:$4 sm:$0xff]  }
 0x186   : > { %3991 = vmatmul.mubr.bf16.vlgmr.msra.gmra.mrb[0].mxu0 %v7272_v34  ;;  %4360 = vmatmul.mubr.bf16.vlgmr.msra.gmra.mrb[0].mxu1 %v7272_v34  ;;  %v5931_v34 = vld [vmem:[%s8094_s1 + $0xc4c] ss:$16 sps:$4 sm:$0xff]  }
 0x187   : > { %4000 = vmatpush1.bf16.msra.mxu0 %v5914_v40  ;;  %4369 = vmatpush1.bf16.msra.mxu1 %v5917_v41  ;;  %v6009_v40 = vld [vmem:[%s8094_s1 + $0xdec] ss:$16 sps:$4 sm:$0xff]   ;;  %v830_v41 = vcombine.high %v7459_v35, %v7459_v35 }
 0x188   : > { %4001 = vmatprep.subr.bf16.mxu0 %v5922_v29  ;;  %4370 = vmatprep.subr.bf16.mxu1 %v5925_v43  ;;  %v6004_v29 = vld [vmem:[%s8094_s1 + $0xde0] ss:$16 sps:$4 sm:$0xff]   ;;  %v6007_v43 = vld [vmem:[%s8094_s1 + $0xde8] ss:$16 sps:$4 sm:$0xff]   ;;  %v6015_v35 = vld [vmem:[%s8094_s1 + $0xe0c] ss:$16 sps:$4 sm:$0xff]  }
 0x189   : > { %4031 = vmatprep.mubr.bf16.mxu0 %v845_v44  ;;  %4400 = vmatprep.mubr.bf16.mxu1 %v845_v44  ;;  %v6012_v44 = vld [vmem:[%s8094_s1 + $0xe04] ss:$16 sps:$4 sm:$0xff]  }
 0x18b   : > { %4002 = vmatpush1.bf16.msra.mxu0 %v5920_v45  ;;  %4371 = vmatpush1.bf16.msra.mxu1 %v5923_v46  ;;  %v7676_v45 = vrot.slane %v830_v41, %v6395_v49  ;;  %v6010_v46 = vld [vmem:[%s8094_s1 + $0xe00] ss:$16 sps:$4 sm:$0xff]   ;;  %v6099_v41 = vld [vmem:[%s8094_s1 + $0xfcc] ss:$16 sps:$4 sm:$0xff]  }
 0x18c   : > { %4003 = vmatprep.subr.bf16.mxu0 %v5928_v47  ;;  %4372 = vmatprep.subr.bf16.mxu1 %v5931_v34  ;;  %v6013_v47 = vld [vmem:[%s8094_s1 + $0xe08] ss:$16 sps:$4 sm:$0xff]   ;;  %v6018_v34 = vld [vmem:[%s8094_s1 + $0xe24] ss:$16 sps:$4 sm:$0xff]  }
 0x18f   : > { %4004 = vmatpush1.bf16.msra.mxu0 %v5926_v48  ;;  %4373 = vmatpush1.bf16.msra.mxu1 %v5929_v50  ;;  %v6021_v48 = vld [vmem:[%s8094_s1 + $0xe2c] ss:$16 sps:$4 sm:$0xff]   ;;  %v846_v50 = vcombine.high %v7676_v45, %v7676_v45 }
 0x190   : > { %4005 = vmatprep.subr.bf16.mxu0 %v5934_v51  ;;  %4374 = vmatprep.subr.bf16.mxu1 %v5937_v52  ;;  %v6016_v51 = vld [vmem:[%s8094_s1 + $0xe20] ss:$16 sps:$4 sm:$0xff]   ;;  %v6019_v52 = vld [vmem:[%s8094_s1 + $0xe28] ss:$16 sps:$4 sm:$0xff]  }
 0x193   : > { %4006 = vmatpush1.bf16.msra.mxu0 %v5932_v53  ;;  %4375 = vmatpush1.bf16.msra.mxu1 %v5935_v54  ;;  %v6024_v53 = vld [vmem:[%s8094_s1 + $0xe44] ss:$16 sps:$4 sm:$0xff]   ;;  %v6022_v54 = vld [vmem:[%s8094_s1 + $0xe40] ss:$16 sps:$4 sm:$0xff]  }
 0x194   : > { %4007 = vmatprep.subr.bf16.mxu0 %v5940_v55  ;;  %4376 = vmatprep.subr.bf16.mxu1 %v5943_v56  ;;  %v6025_v55 = vld [vmem:[%s8094_s1 + $0xe48] ss:$16 sps:$4 sm:$0xff]   ;;  %v6030_v56 = vld [vmem:[%s8094_s1 + $0xe64] ss:$16 sps:$4 sm:$0xff]  }
 0x197   : > { %4008 = vmatpush1.bf16.msra.mxu0 %v5938_v57  ;;  %4377 = vmatpush1.bf16.msra.mxu1 %v5941_v58  ;;  %v6033_v57 = vld [vmem:[%s8094_s1 + $0xe6c] ss:$16 sps:$4 sm:$0xff]   ;;  %v6028_v58 = vld [vmem:[%s8094_s1 + $0xe60] ss:$16 sps:$4 sm:$0xff]  }
 0x198   : > { %4009 = vmatprep.subr.bf16.mxu0 %v5946_v59  ;;  %4378 = vmatprep.subr.bf16.mxu1 %v5949_v60  ;;  %v6031_v59 = vld [vmem:[%s8094_s1 + $0xe68] ss:$16 sps:$4 sm:$0xff]   ;;  %v6036_v60 = vld [vmem:[%s8094_s1 + $0xe84] ss:$16 sps:$4 sm:$0xff]  }
 0x19b   : > { %4010 = vmatpush1.bf16.msra.mxu0 %v5944_v61  ;;  %4379 = vmatpush1.bf16.msra.mxu1 %v5947_v62  ;;  %v6039_v61 = vld [vmem:[%s8094_s1 + $0xe8c] ss:$16 sps:$4 sm:$0xff]   ;;  %v6034_v62 = vld [vmem:[%s8094_s1 + $0xe80] ss:$16 sps:$4 sm:$0xff]  }
 0x19c   : > { %4011 = vmatprep.subr.bf16.mxu0 %v5952_v63  ;;  %4380 = vmatprep.subr.bf16.mxu1 %v5955_v0  ;;  %v6037_v63 = vld [vmem:[%s8094_s1 + $0xe88] ss:$16 sps:$4 sm:$0xff]   ;;  %v6042_v0 = vld [vmem:[%s8094_s1 + $0xea4] ss:$16 sps:$4 sm:$0xff]  }
 0x19f   : > { %4012 = vmatpush1.bf16.msra.mxu0 %v5950_v1  ;;  %4381 = vmatpush1.bf16.msra.mxu1 %v5953_v2  ;;  %v6045_v1 = vld [vmem:[%s8094_s1 + $0xeac] ss:$16 sps:$4 sm:$0xff]   ;;  %v6040_v2 = vld [vmem:[%s8094_s1 + $0xea0] ss:$16 sps:$4 sm:$0xff]  }
 0x1a0   : > { %4013 = vmatprep.subr.bf16.mxu0 %v5958_v3  ;;  %4382 = vmatprep.subr.bf16.mxu1 %v5961_v4  ;;  %v6043_v3 = vld [vmem:[%s8094_s1 + $0xea8] ss:$16 sps:$4 sm:$0xff]   ;;  %v6048_v4 = vld [vmem:[%s8094_s1 + $0xec4] ss:$16 sps:$4 sm:$0xff]  }
 0x1a3   : > { %4014 = vmatpush1.bf16.msra.mxu0 %v5956_v5  ;;  %4383 = vmatpush1.bf16.msra.mxu1 %v5959_v6  ;;  %v6051_v5 = vld [vmem:[%s8094_s1 + $0xecc] ss:$16 sps:$4 sm:$0xff]   ;;  %v6046_v6 = vld [vmem:[%s8094_s1 + $0xec0] ss:$16 sps:$4 sm:$0xff]  }
 0x1a4   : > { %4015 = vmatprep.subr.bf16.mxu0 %v5964_v7  ;;  %4384 = vmatprep.subr.bf16.mxu1 %v5967_v8  ;;  %v6049_v7 = vld [vmem:[%s8094_s1 + $0xec8] ss:$16 sps:$4 sm:$0xff]   ;;  %v6054_v8 = vld [vmem:[%s8094_s1 + $0xee4] ss:$16 sps:$4 sm:$0xff]  }
 0x1a7   : > { %4016 = vmatpush1.bf16.msra.mxu0 %v5962_v9  ;;  %4385 = vmatpush1.bf16.msra.mxu1 %v5965_v10  ;;  %v6057_v9 = vld [vmem:[%s8094_s1 + $0xeec] ss:$16 sps:$4 sm:$0xff]   ;;  %v6052_v10 = vld [vmem:[%s8094_s1 + $0xee0] ss:$16 sps:$4 sm:$0xff]  }
 0x1a8   : > { %4017 = vmatprep.subr.bf16.mxu0 %v5970_v11  ;;  %4386 = vmatprep.subr.bf16.mxu1 %v5973_v13  ;;  %v6055_v11 = vld [vmem:[%s8094_s1 + $0xee8] ss:$16 sps:$4 sm:$0xff]   ;;  %v6060_v13 = vld [vmem:[%s8094_s1 + $0xf04] ss:$16 sps:$4 sm:$0xff]  }
 0x1ab   : > { %4018 = vmatpush1.bf16.msra.mxu0 %v5968_v14  ;;  %4387 = vmatpush1.bf16.msra.mxu1 %v5971_v15  ;;  %v6063_v14 = vld [vmem:[%s8094_s1 + $0xf0c] ss:$16 sps:$4 sm:$0xff]   ;;  %v6058_v15 = vld [vmem:[%s8094_s1 + $0xf00] ss:$16 sps:$4 sm:$0xff]  }
 0x1ac   : > { %4019 = vmatprep.subr.bf16.mxu0 %v5976_v16  ;;  %4388 = vmatprep.subr.bf16.mxu1 %v5979_v17  ;;  %v6061_v16 = vld [vmem:[%s8094_s1 + $0xf08] ss:$16 sps:$4 sm:$0xff]   ;;  %v6066_v17 = vld [vmem:[%s8094_s1 + $0xf24] ss:$16 sps:$4 sm:$0xff]  }
 0x1af   : > { %4020 = vmatpush1.bf16.msra.mxu0 %v5974_v18  ;;  %4389 = vmatpush1.bf16.msra.mxu1 %v5977_v20  ;;  %v6069_v18 = vld [vmem:[%s8094_s1 + $0xf2c] ss:$16 sps:$4 sm:$0xff]   ;;  %v6064_v20 = vld [vmem:[%s8094_s1 + $0xf20] ss:$16 sps:$4 sm:$0xff]  }
 0x1b0   : > { %4021 = vmatprep.subr.bf16.mxu0 %v5982_v21  ;;  %4390 = vmatprep.subr.bf16.mxu1 %v5985_v23  ;;  %v6067_v21 = vld [vmem:[%s8094_s1 + $0xf28] ss:$16 sps:$4 sm:$0xff]   ;;  %v6072_v23 = vld [vmem:[%s8094_s1 + $0xf44] ss:$16 sps:$4 sm:$0xff]  }
 0x1b3   : > { %4022 = vmatpush1.bf16.msra.mxu0 %v5980_v19  ;;  %4391 = vmatpush1.bf16.msra.mxu1 %v5983_v25  ;;  %v6075_v19 = vld [vmem:[%s8094_s1 + $0xf4c] ss:$16 sps:$4 sm:$0xff]   ;;  %v6070_v25 = vld [vmem:[%s8094_s1 + $0xf40] ss:$16 sps:$4 sm:$0xff]  }
 0x1b4   : > { %4023 = vmatprep.subr.bf16.mxu0 %v5988_v12  ;;  %4392 = vmatprep.subr.bf16.mxu1 %v5991_v27  ;;  %v6073_v12 = vld [vmem:[%s8094_s1 + $0xf48] ss:$16 sps:$4 sm:$0xff]   ;;  %v6078_v27 = vld [vmem:[%s8094_s1 + $0xf64] ss:$16 sps:$4 sm:$0xff]  }
 0x1b7   : > { %4024 = vmatpush1.bf16.msra.mxu0 %v5986_v28  ;;  %4393 = vmatpush1.bf16.msra.mxu1 %v5989_v30  ;;  %v6081_v28 = vld [vmem:[%s8094_s1 + $0xf6c] ss:$16 sps:$4 sm:$0xff]   ;;  %v6076_v30 = vld [vmem:[%s8094_s1 + $0xf60] ss:$16 sps:$4 sm:$0xff]  }
 0x1b8   : > { %4025 = vmatprep.subr.bf16.mxu0 %v5994_v31  ;;  %4394 = vmatprep.subr.bf16.mxu1 %v5997_v22  ;;  %v6079_v31 = vld [vmem:[%s8094_s1 + $0xf68] ss:$16 sps:$4 sm:$0xff]   ;;  %v6084_v22 = vld [vmem:[%s8094_s1 + $0xf84] ss:$16 sps:$4 sm:$0xff]  }
 0x1bb   : > { %4026 = vmatpush1.bf16.msra.mxu0 %v5992_v32  ;;  %4395 = vmatpush1.bf16.msra.mxu1 %v5995_v33  ;;  %v6087_v32 = vld [vmem:[%s8094_s1 + $0xf8c] ss:$16 sps:$4 sm:$0xff]   ;;  %v6082_v33 = vld [vmem:[%s8094_s1 + $0xf80] ss:$16 sps:$4 sm:$0xff]  }
 0x1bc   : > { %4027 = vmatprep.subr.bf16.mxu0 %v6000_v26  ;;  %4396 = vmatprep.subr.bf16.mxu1 %v6003_v36  ;;  %v6085_v26 = vld [vmem:[%s8094_s1 + $0xf88] ss:$16 sps:$4 sm:$0xff]   ;;  %v6090_v36 = vld [vmem:[%s8094_s1 + $0xfa4] ss:$16 sps:$4 sm:$0xff]  }
 0x1bf   : > { %4028 = vmatpush1.bf16.msra.mxu0 %v5998_v24  ;;  %4397 = vmatpush1.bf16.msra.mxu1 %v6001_v37  ;;  %v6093_v24 = vld [vmem:[%s8094_s1 + $0xfac] ss:$16 sps:$4 sm:$0xff]   ;;  %v6088_v37 = vld [vmem:[%s8094_s1 + $0xfa0] ss:$16 sps:$4 sm:$0xff]  }
 0x1c0   : > { %4029 = vmatprep.subr.bf16.mxu0 %v6006_v38  ;;  %4398 = vmatprep.subr.bf16.mxu1 %v6009_v40  ;;  %v6091_v38 = vld [vmem:[%s8094_s1 + $0xfa8] ss:$16 sps:$4 sm:$0xff]   ;;  %v6096_v40 = vld [vmem:[%s8094_s1 + $0xfc4] ss:$16 sps:$4 sm:$0xff]  }
 0x1c3   : > { %4030 = vmatpush1.bf16.msra.mxu0 %v6004_v29  ;;  %4399 = vmatpush1.bf16.msra.mxu1 %v6007_v43  ;;  %v6094_v29 = vld [vmem:[%s8094_s1 + $0xfc0] ss:$16 sps:$4 sm:$0xff]   ;;  %v6097_v43 = vld [vmem:[%s8094_s1 + $0xfc8] ss:$16 sps:$4 sm:$0xff]  }
 0x1c4   : > { %4040 = vmatprep.subr.bf16.mxu0 %v6012_v44  ;;  %4409 = vmatprep.subr.bf16.mxu1 %v6015_v35  ;;  %v6102_v44 = vld [vmem:[%s8094_s1 + $0xfe4] ss:$16 sps:$4 sm:$0xff]   ;;  %v6105_v35 = vld [vmem:[%s8094_s1 + $0xfec] ss:$16 sps:$4 sm:$0xff]  }
 0x1c6   : > { %4032 = vmatmul.mubr.bf16.vlgmr.msra.gmra.mrb[0].mxu0 %v7475_v39  ;;  %4401 = vmatmul.mubr.bf16.vlgmr.msra.gmra.mrb[0].mxu1 %v7475_v39  ;;  %v6027_v39 = vld [vmem:[%s8094_s1 + $0xe4c] ss:$16 sps:$4 sm:$0xff]  }
 0x1c7   : > { %4041 = vmatpush1.bf16.msra.mxu0 %v6010_v46  ;;  %4410 = vmatpush1.bf16.msra.mxu1 %v6013_v47  ;;  %v6100_v46 = vld [vmem:[%s8094_s1 + $0xfe0] ss:$16 sps:$4 sm:$0xff]   ;;  %v6103_v47 = vld [vmem:[%s8094_s1 + $0xfe8] ss:$16 sps:$4 sm:$0xff]  }
 0x1c8   : > { %4042 = vmatprep.subr.bf16.mxu0 %v6018_v34  ;;  %4411 = vmatprep.subr.bf16.mxu1 %v6021_v48  ;;  %v6109_v34 = vld [vmem:[%s8094_s1 + $0x1004] ss:$16 sps:$4 sm:$0xff]   ;;  %v6112_v48 = vld [vmem:[%s8094_s1 + $0x100c] ss:$16 sps:$4 sm:$0xff]  }
 0x1c9   : > { %4072 = vmatprep.mubr.bf16.mxu0 %v846_v50  ;;  %4441 = vmatprep.mubr.bf16.mxu1 %v846_v50  ;;  %v7875_v50 = vld.sshfl [vmem:[%s6392_s30 + $0x20] sm:$0x33 pattern:$0x76325410] }
 0x1cb   : > { %4043 = vmatpush1.bf16.msra.mxu0 %v6016_v51  ;;  %4412 = vmatpush1.bf16.msra.mxu1 %v6019_v52  ;;  %v6107_v51 = vld [vmem:[%s8094_s1 + $0x1000] ss:$16 sps:$4 sm:$0xff]   ;;  %v6110_v52 = vld [vmem:[%s8094_s1 + $0x1008] ss:$16 sps:$4 sm:$0xff]  }
 0x1cc   : > { %4044 = vmatprep.subr.bf16.mxu0 %v6024_v53  ;;  %4413 = vmatprep.subr.bf16.mxu1 %v6027_v39  ;;  %v6115_v53 = vld [vmem:[%s8094_s1 + $0x1024] ss:$16 sps:$4 sm:$0xff]   ;;  %v6118_v39 = vld [vmem:[%s8094_s1 + $0x102c] ss:$16 sps:$4 sm:$0xff]  }
 0x1cf   : > { %4045 = vmatpush1.bf16.msra.mxu0 %v6022_v54  ;;  %4414 = vmatpush1.bf16.msra.mxu1 %v6025_v55  ;;  %v854_v54 = vcombine.high %v7875_v50, %v7875_v50  ;;  %v6113_v55 = vld [vmem:[%s8094_s1 + $0x1020] ss:$16 sps:$4 sm:$0xff]  }
 0x1d0   : > { %4046 = vmatprep.subr.bf16.mxu0 %v6030_v56  ;;  %4415 = vmatprep.subr.bf16.mxu1 %v6033_v57  ;;  %v6116_v56 = vld [vmem:[%s8094_s1 + $0x1028] ss:$16 sps:$4 sm:$0xff]   ;;  %v6121_v57 = vld [vmem:[%s8094_s1 + $0x1044] ss:$16 sps:$4 sm:$0xff]  }
 0x1d3   : > { %4047 = vmatpush1.bf16.msra.mxu0 %v6028_v58  ;;  %4416 = vmatpush1.bf16.msra.mxu1 %v6031_v59  ;;  %v6119_v58 = vld [vmem:[%s8094_s1 + $0x1040] ss:$16 sps:$4 sm:$0xff]   ;;  %v6122_v59 = vld [vmem:[%s8094_s1 + $0x1048] ss:$16 sps:$4 sm:$0xff]  }
 0x1d4   : > { %4048 = vmatprep.subr.bf16.mxu0 %v6036_v60  ;;  %4417 = vmatprep.subr.bf16.mxu1 %v6039_v61  ;;  %v6127_v60 = vld [vmem:[%s8094_s1 + $0x1064] ss:$16 sps:$4 sm:$0xff]   ;;  %v6130_v61 = vld [vmem:[%s8094_s1 + $0x106c] ss:$16 sps:$4 sm:$0xff]  }
 0x1d7   : > { %4049 = vmatpush1.bf16.msra.mxu0 %v6034_v62  ;;  %4418 = vmatpush1.bf16.msra.mxu1 %v6037_v63  ;;  %v6125_v62 = vld [vmem:[%s8094_s1 + $0x1060] ss:$16 sps:$4 sm:$0xff]   ;;  %v6128_v63 = vld [vmem:[%s8094_s1 + $0x1068] ss:$16 sps:$4 sm:$0xff]  }
 0x1d8   : > { %4050 = vmatprep.subr.bf16.mxu0 %v6042_v0  ;;  %4419 = vmatprep.subr.bf16.mxu1 %v6045_v1  ;;  %v6133_v0 = vld [vmem:[%s8094_s1 + $0x1084] ss:$16 sps:$4 sm:$0xff]   ;;  %v6136_v1 = vld [vmem:[%s8094_s1 + $0x108c] ss:$16 sps:$4 sm:$0xff]  }
 0x1db   : > { %4051 = vmatpush1.bf16.msra.mxu0 %v6040_v2  ;;  %4420 = vmatpush1.bf16.msra.mxu1 %v6043_v3  ;;  %v6131_v2 = vld [vmem:[%s8094_s1 + $0x1080] ss:$16 sps:$4 sm:$0xff]   ;;  %v6134_v3 = vld [vmem:[%s8094_s1 + $0x1088] ss:$16 sps:$4 sm:$0xff]  }
 0x1dc   : > { %4052 = vmatprep.subr.bf16.mxu0 %v6048_v4  ;;  %4421 = vmatprep.subr.bf16.mxu1 %v6051_v5  ;;  %v6139_v4 = vld [vmem:[%s8094_s1 + $0x10a4] ss:$16 sps:$4 sm:$0xff]   ;;  %v6142_v5 = vld [vmem:[%s8094_s1 + $0x10ac] ss:$16 sps:$4 sm:$0xff]  }
 0x1df   : > { %4053 = vmatpush1.bf16.msra.mxu0 %v6046_v6  ;;  %4422 = vmatpush1.bf16.msra.mxu1 %v6049_v7  ;;  %v6137_v6 = vld [vmem:[%s8094_s1 + $0x10a0] ss:$16 sps:$4 sm:$0xff]   ;;  %v6140_v7 = vld [vmem:[%s8094_s1 + $0x10a8] ss:$16 sps:$4 sm:$0xff]  }
 0x1e0   : > { %4054 = vmatprep.subr.bf16.mxu0 %v6054_v8  ;;  %4423 = vmatprep.subr.bf16.mxu1 %v6057_v9  ;;  %v6145_v8 = vld [vmem:[%s8094_s1 + $0x10c4] ss:$16 sps:$4 sm:$0xff]   ;;  %v6148_v9 = vld [vmem:[%s8094_s1 + $0x10cc] ss:$16 sps:$4 sm:$0xff]  }
 0x1e3   : > { %4055 = vmatpush1.bf16.msra.mxu0 %v6052_v10  ;;  %4424 = vmatpush1.bf16.msra.mxu1 %v6055_v11  ;;  %v6143_v10 = vld [vmem:[%s8094_s1 + $0x10c0] ss:$16 sps:$4 sm:$0xff]   ;;  %v6146_v11 = vld [vmem:[%s8094_s1 + $0x10c8] ss:$16 sps:$4 sm:$0xff]  }
 0x1e4   : > { %4056 = vmatprep.subr.bf16.mxu0 %v6060_v13  ;;  %4425 = vmatprep.subr.bf16.mxu1 %v6063_v14  ;;  %v6151_v13 = vld [vmem:[%s8094_s1 + $0x10e4] ss:$16 sps:$4 sm:$0xff]   ;;  %v6154_v14 = vld [vmem:[%s8094_s1 + $0x10ec] ss:$16 sps:$4 sm:$0xff]  }
 0x1e7   : > { %4057 = vmatpush1.bf16.msra.mxu0 %v6058_v15  ;;  %4426 = vmatpush1.bf16.msra.mxu1 %v6061_v16  ;;  %v6149_v15 = vld [vmem:[%s8094_s1 + $0x10e0] ss:$16 sps:$4 sm:$0xff]   ;;  %v6152_v16 = vld [vmem:[%s8094_s1 + $0x10e8] ss:$16 sps:$4 sm:$0xff]  }
 0x1e8   : > { %4058 = vmatprep.subr.bf16.mxu0 %v6066_v17  ;;  %4427 = vmatprep.subr.bf16.mxu1 %v6069_v18  ;;  %v6157_v17 = vld [vmem:[%s8094_s1 + $0x1104] ss:$16 sps:$4 sm:$0xff]   ;;  %v6160_v18 = vld [vmem:[%s8094_s1 + $0x110c] ss:$16 sps:$4 sm:$0xff]  }
 0x1eb   : > { %4059 = vmatpush1.bf16.msra.mxu0 %v6064_v20  ;;  %4428 = vmatpush1.bf16.msra.mxu1 %v6067_v21  ;;  %v6155_v20 = vld [vmem:[%s8094_s1 + $0x1100] ss:$16 sps:$4 sm:$0xff]   ;;  %v6158_v21 = vld [vmem:[%s8094_s1 + $0x1108] ss:$16 sps:$4 sm:$0xff]  }
 0x1ec   : > { %4060 = vmatprep.subr.bf16.mxu0 %v6072_v23  ;;  %4429 = vmatprep.subr.bf16.mxu1 %v6075_v19  ;;  %v6163_v23 = vld [vmem:[%s8094_s1 + $0x1124] ss:$16 sps:$4 sm:$0xff]   ;;  %v6166_v19 = vld [vmem:[%s8094_s1 + $0x112c] ss:$16 sps:$4 sm:$0xff]  }
 0x1ef   : > { %4061 = vmatpush1.bf16.msra.mxu0 %v6070_v25  ;;  %4430 = vmatpush1.bf16.msra.mxu1 %v6073_v12  ;;  %v6161_v25 = vld [vmem:[%s8094_s1 + $0x1120] ss:$16 sps:$4 sm:$0xff]   ;;  %v6164_v12 = vld [vmem:[%s8094_s1 + $0x1128] ss:$16 sps:$4 sm:$0xff]  }
 0x1f0   : > { %4062 = vmatprep.subr.bf16.mxu0 %v6078_v27  ;;  %4431 = vmatprep.subr.bf16.mxu1 %v6081_v28  ;;  %v6169_v27 = vld [vmem:[%s8094_s1 + $0x1144] ss:$16 sps:$4 sm:$0xff]   ;;  %v6172_v28 = vld [vmem:[%s8094_s1 + $0x114c] ss:$16 sps:$4 sm:$0xff]  }
 0x1f3   : > { %4063 = vmatpush1.bf16.msra.mxu0 %v6076_v30  ;;  %4432 = vmatpush1.bf16.msra.mxu1 %v6079_v31  ;;  %v6167_v30 = vld [vmem:[%s8094_s1 + $0x1140] ss:$16 sps:$4 sm:$0xff]   ;;  %v6170_v31 = vld [vmem:[%s8094_s1 + $0x1148] ss:$16 sps:$4 sm:$0xff]  }
 0x1f4   : > { %4064 = vmatprep.subr.bf16.mxu0 %v6084_v22  ;;  %4433 = vmatprep.subr.bf16.mxu1 %v6087_v32  ;;  %v6175_v22 = vld [vmem:[%s8094_s1 + $0x1164] ss:$16 sps:$4 sm:$0xff]   ;;  %v6178_v32 = vld [vmem:[%s8094_s1 + $0x116c] ss:$16 sps:$4 sm:$0xff]  }
 0x1f7   : > { %4065 = vmatpush1.bf16.msra.mxu0 %v6082_v33  ;;  %4434 = vmatpush1.bf16.msra.mxu1 %v6085_v26  ;;  %v6173_v33 = vld [vmem:[%s8094_s1 + $0x1160] ss:$16 sps:$4 sm:$0xff]   ;;  %v6176_v26 = vld [vmem:[%s8094_s1 + $0x1168] ss:$16 sps:$4 sm:$0xff]  }
 0x1f8   : > { %4066 = vmatprep.subr.bf16.mxu0 %v6090_v36  ;;  %4435 = vmatprep.subr.bf16.mxu1 %v6093_v24  ;;  %v6181_v36 = vld [vmem:[%s8094_s1 + $0x1184] ss:$16 sps:$4 sm:$0xff]   ;;  %v6184_v24 = vld [vmem:[%s8094_s1 + $0x118c] ss:$16 sps:$4 sm:$0xff]  }
 0x1fb   : > { %4067 = vmatpush1.bf16.msra.mxu0 %v6088_v37  ;;  %4436 = vmatpush1.bf16.msra.mxu1 %v6091_v38  ;;  %v6179_v37 = vld [vmem:[%s8094_s1 + $0x1180] ss:$16 sps:$4 sm:$0xff]   ;;  %v6182_v38 = vld [vmem:[%s8094_s1 + $0x1188] ss:$16 sps:$4 sm:$0xff]  }
 0x1fc   : > { %4068 = vmatprep.subr.bf16.mxu0 %v6096_v40  ;;  %4437 = vmatprep.subr.bf16.mxu1 %v6099_v41  ;;  %v6187_v40 = vld [vmem:[%s8094_s1 + $0x11a4] ss:$16 sps:$4 sm:$0xff]   ;;  %v6190_v41 = vld [vmem:[%s8094_s1 + $0x11ac] ss:$16 sps:$4 sm:$0xff]  }
 0x1ff   : > { %4069 = vmatpush1.bf16.msra.mxu0 %v6094_v29  ;;  %4438 = vmatpush1.bf16.msra.mxu1 %v6097_v43  ;;  %v6185_v29 = vld [vmem:[%s8094_s1 + $0x11a0] ss:$16 sps:$4 sm:$0xff]   ;;  %v6188_v43 = vld [vmem:[%s8094_s1 + $0x11a8] ss:$16 sps:$4 sm:$0xff]  }
 0x200   : > { %4070 = vmatprep.subr.bf16.mxu0 %v6102_v44  ;;  %4439 = vmatprep.subr.bf16.mxu1 %v6105_v35  ;;  %v6193_v44 = vld [vmem:[%s8094_s1 + $0x11c4] ss:$16 sps:$4 sm:$0xff]   ;;  %v6196_v35 = vld [vmem:[%s8094_s1 + $0x11cc] ss:$16 sps:$4 sm:$0xff]  }
 0x203   : > { %4071 = vmatpush1.bf16.msra.mxu0 %v6100_v46  ;;  %4440 = vmatpush1.bf16.msra.mxu1 %v6103_v47  ;;  %v6191_v46 = vld [vmem:[%s8094_s1 + $0x11c0] ss:$16 sps:$4 sm:$0xff]   ;;  %v6194_v47 = vld [vmem:[%s8094_s1 + $0x11c8] ss:$16 sps:$4 sm:$0xff]  }
 0x204   : > { %4081 = vmatprep.subr.bf16.mxu0 %v6109_v34  ;;  %4450 = vmatprep.subr.bf16.mxu1 %v6112_v48  ;;  %v6199_v34 = vld [vmem:[%s8094_s1 + $0x11e4] ss:$16 sps:$4 sm:$0xff]   ;;  %v6202_v48 = vld [vmem:[%s8094_s1 + $0x11ec] ss:$16 sps:$4 sm:$0xff]  }
 0x206   : > { %4073 = vmatmul.mubr.bf16.vlgmr.msra.gmra.mrb[0].mxu0 %v7676_v45  ;;  %4442 = vmatmul.mubr.bf16.vlgmr.msra.gmra.mrb[0].mxu1 %v7676_v45  ;;  %v6124_v45 = vld [vmem:[%s8094_s1 + $0x104c] ss:$16 sps:$4 sm:$0xff]  }
 0x207   : > { %4082 = vmatpush1.bf16.msra.mxu0 %v6107_v51  ;;  %4451 = vmatpush1.bf16.msra.mxu1 %v6110_v52  ;;  %v6197_v51 = vld [vmem:[%s8094_s1 + $0x11e0] ss:$16 sps:$4 sm:$0xff]   ;;  %v6200_v52 = vld [vmem:[%s8094_s1 + $0x11e8] ss:$16 sps:$4 sm:$0xff]  }
 0x208   : > { %4083 = vmatprep.subr.bf16.mxu0 %v6115_v53  ;;  %4452 = vmatprep.subr.bf16.mxu1 %v6118_v39  ;;  %v756_v53 = vsub.s32 0, %v6372_v42  ;;  %v764_v39 = vsub.s32 2, %v6372_v42 }
 0x209   : > { %4113 = vmatprep.mubr.bf16.mxu0 %v854_v54  ;;  %4482 = vmatprep.mubr.bf16.mxu1 %v854_v54  ;;  %v752_v54 = vld [vmem:[%s8095_s2] sm:$0xf] }
 0x20b   : > { %4084 = vmatpush1.bf16.msra.mxu0 %v6113_v55  ;;  %4453 = vmatpush1.bf16.msra.mxu1 %v6116_v56  ;;  %v760_v55 = vsub.s32 1, %v6372_v42  ;;  %v768_v56 = vsub.s32 3, %v6372_v42 }
 0x20c   : > { %4085 = vmatprep.subr.bf16.mxu0 %v6121_v57  ;;  %4454 = vmatprep.subr.bf16.mxu1 %v6124_v45  ;;  %v757_v57 = vrot.slane %v752_v54, %v756_v53  ;;  %v765_v45 = vrot.slane %v752_v54, %v764_v39 }
 0x20f   : > { %4086 = vmatpush1.bf16.msra.mxu0 %v6119_v58  ;;  %4455 = vmatpush1.bf16.msra.mxu1 %v6122_v59  ;;  %v761_v58 = vrot.slane %v752_v54, %v760_v55  ;;  %v769_v59 = vrot.slane %v752_v54, %v768_v56 }
 0x210   : > { %4087 = vmatprep.subr.bf16.mxu0 %v6127_v60  ;;  %4456 = vmatprep.subr.bf16.mxu1 %v6130_v61 }
 0x213   : > { %4088 = vmatpush1.bf16.msra.mxu0 %v6125_v62  ;;  %4457 = vmatpush1.bf16.msra.mxu1 %v6128_v63 }
 0x214   : > { %4089 = vmatprep.subr.bf16.mxu0 %v6133_v0  ;;  %4458 = vmatprep.subr.bf16.mxu1 %v6136_v1 }
 0x217   : > { %4090 = vmatpush1.bf16.msra.mxu0 %v6131_v2  ;;  %4459 = vmatpush1.bf16.msra.mxu1 %v6134_v3 }
 0x218   : > { %4091 = vmatprep.subr.bf16.mxu0 %v6139_v4  ;;  %4460 = vmatprep.subr.bf16.mxu1 %v6142_v5 }
 0x21b   : > { %4092 = vmatpush1.bf16.msra.mxu0 %v6137_v6  ;;  %4461 = vmatpush1.bf16.msra.mxu1 %v6140_v7 }
 0x21c   : > { %4093 = vmatprep.subr.bf16.mxu0 %v6145_v8  ;;  %4462 = vmatprep.subr.bf16.mxu1 %v6148_v9 }
 0x21f   : > { %4094 = vmatpush1.bf16.msra.mxu0 %v6143_v10  ;;  %4463 = vmatpush1.bf16.msra.mxu1 %v6146_v11 }
 0x220   : > { %4095 = vmatprep.subr.bf16.mxu0 %v6151_v13  ;;  %4464 = vmatprep.subr.bf16.mxu1 %v6154_v14 }
 0x223   : > { %4096 = vmatpush1.bf16.msra.mxu0 %v6149_v15  ;;  %4465 = vmatpush1.bf16.msra.mxu1 %v6152_v16 }
 0x224   : > { %4097 = vmatprep.subr.bf16.mxu0 %v6157_v17  ;;  %4466 = vmatprep.subr.bf16.mxu1 %v6160_v18 }
 0x227   : > { %4098 = vmatpush1.bf16.msra.mxu0 %v6155_v20  ;;  %4467 = vmatpush1.bf16.msra.mxu1 %v6158_v21 }
 0x228   : > { %4099 = vmatprep.subr.bf16.mxu0 %v6163_v23  ;;  %4468 = vmatprep.subr.bf16.mxu1 %v6166_v19 }
 0x22b   : > { %4100 = vmatpush1.bf16.msra.mxu0 %v6161_v25  ;;  %4469 = vmatpush1.bf16.msra.mxu1 %v6164_v12 }
 0x22c   : > { %4101 = vmatprep.subr.bf16.mxu0 %v6169_v27  ;;  %4470 = vmatprep.subr.bf16.mxu1 %v6172_v28 }
 0x22f   : > { %4102 = vmatpush1.bf16.msra.mxu0 %v6167_v30  ;;  %4471 = vmatpush1.bf16.msra.mxu1 %v6170_v31 }
 0x230   : > { %4103 = vmatprep.subr.bf16.mxu0 %v6175_v22  ;;  %4472 = vmatprep.subr.bf16.mxu1 %v6178_v32 }
 0x233   : > { %4104 = vmatpush1.bf16.msra.mxu0 %v6173_v33  ;;  %4473 = vmatpush1.bf16.msra.mxu1 %v6176_v26 }
 0x234   : > { %4105 = vmatprep.subr.bf16.mxu0 %v6181_v36  ;;  %4474 = vmatprep.subr.bf16.mxu1 %v6184_v24 }
 0x237   : > { %4106 = vmatpush1.bf16.msra.mxu0 %v6179_v37  ;;  %4475 = vmatpush1.bf16.msra.mxu1 %v6182_v38 }
 0x238   : > { %4107 = vmatprep.subr.bf16.mxu0 %v6187_v40  ;;  %4476 = vmatprep.subr.bf16.mxu1 %v6190_v41 }
 0x23b   : > { %4108 = vmatpush1.bf16.msra.mxu0 %v6185_v29  ;;  %4477 = vmatpush1.bf16.msra.mxu1 %v6188_v43 }
 0x23c   : > { %4109 = vmatprep.subr.bf16.mxu0 %v6193_v44  ;;  %4478 = vmatprep.subr.bf16.mxu1 %v6196_v35 }
 0x23f   : > { %4110 = vmatpush1.bf16.msra.mxu0 %v6191_v46  ;;  %4479 = vmatpush1.bf16.msra.mxu1 %v6194_v47 }
 0x240   : > { %4111 = vmatprep.subr.bf16.mxu0 %v6199_v34  ;;  %4480 = vmatprep.subr.bf16.mxu1 %v6202_v48 }
 0x243   : > { %4112 = vmatpush1.bf16.msra.mxu0 %v6197_v51  ;;  %4481 = vmatpush1.bf16.msra.mxu1 %v6200_v52 }
 0x246   : > { %4114 = vmatmul.mubr.bf16.vlgmr.msra.gmra.mrb[0].mxu0 %v7875_v50  ;;  %4483 = vmatmul.mubr.bf16.vlgmr.msra.gmra.mrb[0].mxu1 %v7875_v50 }
 0x319   : > { %v4115_v60 = vpop.f32.mrb[0].mxu0  ;;  %v4484_v61 = vpop.f32.mrb[0].mxu1 }
 0x31a   : > { %v5257_v50 = vadd.f32 %v4115_v60, %v757_v57  ;;  %v5259_v62 = vadd.f32 %v4484_v61, %v765_v45  ;;  %v4117_v63 = vpop.f32.mrb[1].mxu0  ;;  %v4486_v0 = vpop.f32.mrb[1].mxu1 }
 0x31b   : > { %v5258_v1 = vadd.f32 %v4117_v63, %v761_v58  ;;  %v5260_v2 = vadd.f32 %v4486_v0, %v769_v59  ;;  %v4119_v3 = vpop.f32.mrb[2].mxu0  ;;  %v4488_v4 = vpop.f32.mrb[2].mxu1 }
 0x31c   : > { %v4492_v5 = vsel %vm4491_vm0, %v5257_v50, 0.0  ;;  %v4506_v6 = vsel %vm4491_vm0, %v5259_v62, 0.0  ;;  %v4120_v42 = vpop.f32.mrb[3].mxu0  ;;  %v4489_v7 = vpop.f32.mrb[3].mxu1 }
 0x31d   : > { %v4493_v8 = vrot.slane %v4492_v5, 4  ;;  %v4507_v9 = vrot.slane %v4506_v6, 4  ;;  %v4499_v10 = vsel %vm4491_vm0, %v5258_v1, 0.0  ;;  %v4513_v11 = vsel %vm4491_vm0, %v5260_v2, 0.0 }
 0x31e   : > { %v4500_v13 = vrot.slane %v4499_v10, 4  ;;  %v4514_v14 = vrot.slane %v4513_v11, 4 }
 0x31f   : > { %v4494_v15 = vadd.f32 %v4493_v8, %v4492_v5  ;;  %v4508_v16 = vadd.f32 %v4507_v9, %v4506_v6 }
 0x320   : > { %v4501_v17 = vadd.f32 %v4500_v13, %v4499_v10  ;;  %v4515_v18 = vadd.f32 %v4514_v14, %v4513_v11 }
 0x321   : > { %v4495_v20 = vrot.slane %v4494_v15, 2  ;;  %v4509_v21 = vrot.slane %v4508_v16, 2 }
 0x322   : > { %v4502_v23 = vrot.slane %v4501_v17, 2  ;;  %v4516_v19 = vrot.slane %v4515_v18, 2 }
 0x323   : > { %v4496_v25 = vadd.f32 %v4495_v20, %v4494_v15  ;;  %v4510_v12 = vadd.f32 %v4509_v21, %v4508_v16 }
 0x324   : > { %v4503_v27 = vadd.f32 %v4502_v23, %v4501_v17  ;;  %v4517_v28 = vadd.f32 %v4516_v19, %v4515_v18 }
 0x325   : > { %v4497_v30 = vrot.slane %v4496_v25, 1  ;;  %v4511_v31 = vrot.slane %v4510_v12, 1 }
 0x326   : > { %v4504_v22 = vrot.slane %v4503_v27, 1  ;;  %v4518_v32 = vrot.slane %v4517_v28, 1 }
 0x327   : > { %v4498_v33 = vadd.f32 %v4497_v30, %v4496_v25  ;;  %v4512_v26 = vadd.f32 %v4511_v31, %v4510_v12 }
 0x328   : > { %v4505_v36 = vadd.f32 %v4504_v22, %v4503_v27  ;;  %v4519_v24 = vadd.f32 %v4518_v32, %v4517_v28 }
 0x329   : > { %v4521_v37 = vmul.f32 0.25, %v4498_v33  ;;  %v4523_v38 = vmul.f32 0.25, %v4512_v26 }
 0x32a   : > { %v4522_v40 = vmul.f32 0.25, %v4505_v36  ;;  %v4524_v41 = vmul.f32 0.25, %v4519_v24 }
 0x32b   : > { %v4525_v29 = vsub.f32 %v5257_v50, %v4521_v37  ;;  %v4527_v43 = vsub.f32 %v5259_v62, %v4523_v38 }
 0x32c   : > { %v4526_v44 = vsub.f32 %v5258_v1, %v4522_v40  ;;  %v4528_v35 = vsub.f32 %v5260_v2, %v4524_v41 }
 0x32d   : > { %v4529_v46 = vmul.f32 %v4525_v29, %v4525_v29  ;;  %v4531_v47 = vmul.f32 %v4527_v43, %v4527_v43 }
 0x32e   : > { %v4530_v34 = vmul.f32 %v4526_v44, %v4526_v44  ;;  %v4532_v48 = vmul.f32 %v4528_v35, %v4528_v35 }
 0x32f   : > { %v4533_v51 = vsel %vm4491_vm0, %v4529_v46, 0.0  ;;  %v4547_v52 = vsel %vm4491_vm0, %v4531_v47, 0.0 }
 0x330   : > { %v4534_v53 = vrot.slane %v4533_v51, 4  ;;  %v4548_v39 = vrot.slane %v4547_v52, 4  ;;  %v4540_v54 = vsel %vm4491_vm0, %v4530_v34, 0.0  ;;  %v4554_v55 = vsel %vm4491_vm0, %v4532_v48, 0.0 }
 0x331   : > { %v4541_v56 = vrot.slane %v4540_v54, 4  ;;  %v4555_v57 = vrot.slane %v4554_v55, 4 }
 0x332   : > { %v4535_v45 = vadd.f32 %v4534_v53, %v4533_v51  ;;  %v4549_v58 = vadd.f32 %v4548_v39, %v4547_v52 }
 0x333   : > { %v4542_v59 = vadd.f32 %v4541_v56, %v4540_v54  ;;  %v4556_v60 = vadd.f32 %v4555_v57, %v4554_v55 }
 0x334   : > { %v4536_v61 = vrot.slane %v4535_v45, 2  ;;  %v4550_v50 = vrot.slane %v4549_v58, 2 }
 0x335   : > { %v4543_v62 = vrot.slane %v4542_v59, 2  ;;  %v4557_v63 = vrot.slane %v4556_v60, 2 }
 0x336   : > { %v4537_v0 = vadd.f32 %v4536_v61, %v4535_v45  ;;  %v4551_v1 = vadd.f32 %v4550_v50, %v4549_v58 }
 0x337   : > { %v4544_v2 = vadd.f32 %v4543_v62, %v4542_v59  ;;  %v4558_v3 = vadd.f32 %v4557_v63, %v4556_v60 }
 0x338   : > { %v4538_v4 = vrot.slane %v4537_v0, 1  ;;  %v4552_v5 = vrot.slane %v4551_v1, 1 }
 0x339   : > { %v4545_v6 = vrot.slane %v4544_v2, 1  ;;  %v4559_v42 = vrot.slane %v4558_v3, 1 }
 0x33a   : > { %v4539_v7 = vadd.f32 %v4538_v4, %v4537_v0  ;;  %v4553_v8 = vadd.f32 %v4552_v5, %v4551_v1 }
 0x33b   : > { %v4546_v9 = vadd.f32 %v4545_v6, %v4544_v2  ;;  %v4560_v10 = vadd.f32 %v4559_v42, %v4558_v3 }
 0x33c   : > { %v4561_v11 = vmul.f32 0.25, %v4539_v7  ;;  %v4563_v13 = vmul.f32 0.25, %v4553_v8 }
 0x33d   : > { %v4562_v14 = vmul.f32 0.25, %v4546_v9  ;;  %v4564_v15 = vmul.f32 0.25, %v4560_v10 }
 0x33e   : > { %v4565_v16 = vadd.f32 1e-05, %v4561_v11  ;;  %v4567_v17 = vadd.f32 1e-05, %v4563_v13 }
 0x33f   : > { %v4566_v18 = vadd.f32 1e-05, %v4562_v14  ;;  %v4568_v20 = vadd.f32 1e-05, %v4564_v15 }
 0x340   : > { %6203 = vrsqrt.f32 %v4565_v16 }
 0x341   : > { %6205 = vrsqrt.f32 %v4567_v17 }
 0x342   : > { %6207 = vrsqrt.f32 %v4566_v18 }
 0x343   : > { %6209 = vrsqrt.f32 %v4568_v20 }
 0x34a   : > { %v6204_v21 = vpop.eup %6203 }
 0x34b   : > { %v6206_v23 = vpop.eup %6205  ;;  %v4573_v19 = vmul.f32 %v6204_v21, %v4525_v29 }
 0x34c   : > { %v6208_v25 = vpop.eup %6207  ;;  %v4575_v12 = vmul.f32 %v6206_v23, %v4527_v43 }
 0x34d   : > { %v6210_v27 = vpop.eup %6209  ;;  %v4577_v28 = vmul.f32 0.2, %v4573_v19  ;;  %v4574_v30 = vmul.f32 %v6208_v25, %v4526_v44 }
 0x34e   : > { %v4579_v31 = vmul.f32 0.2, %v4575_v12  ;;  %v4576_v22 = vmul.f32 %v6210_v27, %v4528_v35 }
 0x34f   : > { %v4581_v32 = vmax.f32 %v4573_v19, %v4577_v28  ;;  %v4578_v33 = vmul.f32 0.2, %v4574_v30 }
 0x350   : > { %v4583_v26 = vmax.f32 %v4575_v12, %v4579_v31  ;;  %v4580_v36 = vmul.f32 0.2, %v4576_v22 }
 0x351   : > { %v4582_v24 = vmax.f32 %v4574_v30, %v4578_v33 }
 0x352   : > { %v4584_v37 = vmax.f32 %v4576_v22, %v4580_v36 }
 0x353   : > { %v5252_v38 = vpack.c.bf16 %v4582_v24, %v4581_v32 }
 0x354   : > { %v5253_v40 = vpack.c.bf16 %v4584_v37, %v4583_v26 }
 0x355   : > { %v4601_v41 = vrot.slane %v5252_v38, %v6395_v49 }
 0x356   : > { %v4608_v29 = vrot.slane %v5253_v40, %v6395_v49 }
 0x358   : > { %v4609_v43 = vcombine.low %v4601_v41, %v4608_v29 }
 0x35a   : > { %4611 = vst [vmem:[%s170_s14] sm:$0xff] %v4609_v43 }
 0x35b PF: > { %s13_s12 = sadd.s32 1, %s6217_s12  }
 0x35c   : > { %p10_p4 = scmp.ge.s32.totalorder %s13_s12, 4  }
 0x35e   :  { %12 = sbr.rel (!%p10_p4) target bundleno = 1 (0x1), region = 62 }

// kernel: discriminator_forward.11
= control target key start
LH: loop header
LB: loop body
LE: loop exit
PB: predicated region body
PF: predicated region fallthrough
CT: control target
= control target key end

     0   :  { %s4492_s12 = smov 0   ;;  %s5418_s0 = inlined_call_operand.vmem [shape: bf16[2,4,4608], index: 0, kind: input, shape index: {}]   ;;  %s5419_s1 = inlined_call_operand.vmem [shape: bf16[4608,128], index: 1, kind: input, shape index: {}]   ;;  %s5420_s2 = inlined_call_operand.vmem [shape: f32[1,128], index: 2, kind: input, shape index: {}]   ;;  %s5421_s3 = inlined_call_operand.vmem [shape: f32[2,4,128], index: 3, kind: output, shape index: {}]  }
   0x1 LB: > { %s3462_s13 = sadd.s32 4294967295, %s4469_s12   ;;  %p3466_p0 = scmp.ge.s32.totalorder %s4469_s12, 1  ;;  %s4469_s12 = sphi %s4492_s12, %s13_s12  }
   0x2   : > { %p137_p1 = scmp.lt.s32.totalorder %s4469_s12, 3 }
   0x4   : > { %p138_p2 = pnand %p3466_p0, %p137_p1 }
   0x5   : > { %v4166_v0 = vld [vmem:[%s5419_s1 + $0x40] sm:$0xff] (!%p138_p2)   ;;  %v4170_v4 = vld [vmem:[%s5419_s1 + $0x48] sm:$0xff] (!%p138_p2)   ;;  %v4174_v8 = vld [vmem:[%s5419_s1 + $0x50] sm:$0xff] (!%p138_p2)   ;;  %p160_p3 = scmp.lt.s32.totalorder (!%p138_p2), %s3462_s13, 1  ;;  %v775_v28 = vlaneseq (!%p138_p2)  ;;  %v4471_v36 = vmov (!%p138_p2), 1983009808  }
   0x6   : > { %141 = sbr.rel (%p138_p2) target bundleno = 515 (0x203), region = 32  ;;  %v4167_v1 = vld [vmem:[%s5419_s1 + $0xc0] sm:$0xff] (!%p138_p2)   ;;  %3760 = vmatprep.subr.bf16.mxu0 (!%p138_p2), %v4166_v0  ;;  %v4171_v5 = vld [vmem:[%s5419_s1 + $0xc8] sm:$0xff] (!%p138_p2)   ;;  %v4175_v9 = vld [vmem:[%s5419_s1 + $0xd0] sm:$0xff] (!%p138_p2)   ;;  %v773_v37 = vunpack.c.l.s4 (!%p138_p2), %v4471_v36 }
   0x7   : > { %v4168_v2 = vld [vmem:[%s5419_s1] sm:$0xff] (!%p138_p2)   ;;  %3782 = vmatprep.subr.bf16.mxu1 (!%p138_p2), %v4167_v1  ;;  %v4172_v6 = vld [vmem:[%s5419_s1 + $0x8] sm:$0xff] (!%p138_p2)   ;;  %v4176_v10 = vld [vmem:[%s5419_s1 + $0x10] sm:$0xff] (!%p138_p2)   ;;  %v776_v33 = vshrl.u32 (!%p138_p2), %v775_v28, 7 }
   0x8   : > { %v4169_v3 = vld [vmem:[%s5419_s1 + $0x80] sm:$0xff] (!%p138_p2)   ;;  %3761 = vmatpush3.bf16.msra.mxu0 (!%p138_p2), %v4168_v2  ;;  %v4173_v7 = vld [vmem:[%s5419_s1 + $0x88] sm:$0xff] (!%p138_p2)   ;;  %v4177_v11 = vld [vmem:[%s5419_s1 + $0x90] sm:$0xff] (!%p138_p2)   ;;  %v774_v39 = vunpack.c.0.s8 (!%p138_p2), %v773_v37 }
   0x9   : > { %3783 = vmatpush3.bf16.msra.mxu1 (!%p138_p2), %v4169_v3  ;;  %3762 = vmatprep.subr.bf16.mxu0 (!%p138_p2), %v4170_v4  ;;  %v4178_v12 = vld [vmem:[%s5419_s1 + $0x58] sm:$0xff] (!%p138_p2)   ;;  %v4182_v16 = vld [vmem:[%s5419_s1 + $0x60] sm:$0xff] (!%p138_p2)   ;;  %v4186_v20 = vld [vmem:[%s5419_s1 + $0x68] sm:$0xff] (!%p138_p2)  }
   0xa   : > { %3784 = vmatprep.subr.bf16.mxu1 (!%p138_p2), %v4171_v5  ;;  %v4179_v13 = vld [vmem:[%s5419_s1 + $0xd8] sm:$0xff] (!%p138_p2)   ;;  %v4183_v17 = vld [vmem:[%s5419_s1 + $0xe0] sm:$0xff] (!%p138_p2)   ;;  %v4187_v21 = vld [vmem:[%s5419_s1 + $0xe8] sm:$0xff] (!%p138_p2)   ;;  %v4615_v41 = vsub.s32 (!%p138_p2), %v774_v39, %v776_v33 }
   0xb   : > { %v4180_v14 = vld [vmem:[%s5419_s1 + $0x18] sm:$0xff] (!%p138_p2)   ;;  %v4184_v18 = vld [vmem:[%s5419_s1 + $0x20] sm:$0xff] (!%p138_p2)   ;;  %v4188_v22 = vld [vmem:[%s5419_s1 + $0x28] sm:$0xff] (!%p138_p2)  }
   0xc   : > { %3763 = vmatpush3.bf16.msra.mxu0 (!%p138_p2), %v4172_v6  ;;  %v4181_v15 = vld [vmem:[%s5419_s1 + $0x98] sm:$0xff] (!%p138_p2)   ;;  %v4185_v19 = vld [vmem:[%s5419_s1 + $0xa0] sm:$0xff] (!%p138_p2)   ;;  %v4189_v23 = vld [vmem:[%s5419_s1 + $0xa8] sm:$0xff] (!%p138_p2)  }
   0xd   : > { %3785 = vmatpush3.bf16.msra.mxu1 %v4173_v7  ;;  %3764 = vmatprep.subr.bf16.mxu0 %v4174_v8  ;;  %s5423_s13 = smov (!%p160_p3, %s3462_s13), 1  ;;  %v4190_v24 = vld [vmem:[%s5419_s1 + $0x70] sm:$0xff]   ;;  %v4194_v29 = vld [vmem:[%s5419_s1 + $0x78] sm:$0xff]   ;;  %v4199_v35 = vld [vmem:[%s5419_s1 + $0x140] sm:$0xff]  }
   0xe   : > { %3786 = vmatprep.subr.bf16.mxu1 %v4175_v9  ;;  %v4191_v25 = vld [vmem:[%s5419_s1 + $0xf0] sm:$0xff]   ;;  %s4156_s16 = smul.u32 72, %s5423_s13  ;;  %v4195_v30 = vld [vmem:[%s5419_s1 + $0xf8] sm:$0xff]   ;;  %v4200_v38 = vld [vmem:[%s5419_s1 + $0x1c0] sm:$0xff]  }
   0xf   : > { %v4192_v26 = vld [vmem:[%s5419_s1 + $0x30] sm:$0xff]   ;;  %v4196_v31 = vld [vmem:[%s5419_s1 + $0x38] sm:$0xff]   ;;  %v4201_v44 = vld [vmem:[%s5419_s1 + $0x100] sm:$0xff]  }
  0x10   : > { %3765 = vmatpush3.bf16.msra.mxu0 %v4176_v10  ;;  %v4193_v27 = vld [vmem:[%s5419_s1 + $0xb0] sm:$0xff]   ;;  %s4600_s27 = scalar_lea.vmem %s5418_s0, %s4156_s16  ;;  %v4197_v32 = vld [vmem:[%s5419_s1 + $0xb8] sm:$0xff]   ;;  %v4202_v45 = vld [vmem:[%s5419_s1 + $0x180] sm:$0xff]  }
  0x11   : > { %3787 = vmatpush3.bf16.msra.mxu1 %v4177_v11  ;;  %3766 = vmatprep.subr.bf16.mxu0 %v4178_v12  ;;  %v170_v34 = vld [vmem:[%s4600_s27] sm:$0xff]  ;;  %v4203_v48 = vld [vmem:[%s5419_s1 + $0x148] sm:$0xff]   ;;  %v4207_v52 = vld [vmem:[%s5419_s1 + $0x150] sm:$0xff]  }
  0x12   : > { %3788 = vmatprep.subr.bf16.mxu1 %v4179_v13  ;;  %v771_v40 = vcombine.high %v170_v34, %v170_v34  ;;  %v778_v42 = vrot.slane %v170_v34, %v4615_v41  ;;  %v4204_v49 = vld [vmem:[%s5419_s1 + $0x1c8] sm:$0xff]   ;;  %v4208_v53 = vld [vmem:[%s5419_s1 + $0x1d0] sm:$0xff]   ;;  %v4211_v56 = vld [vmem:[%s5419_s1 + $0x158] sm:$0xff]  }
  0x13   : > { %v4205_v50 = vld [vmem:[%s5419_s1 + $0x108] sm:$0xff]   ;;  %v4209_v54 = vld [vmem:[%s5419_s1 + $0x110] sm:$0xff]   ;;  %v4212_v57 = vld [vmem:[%s5419_s1 + $0x1d8] sm:$0xff]  }
  0x14   : > { %3767 = vmatpush3.bf16.msra.mxu0 %v4180_v14  ;;  %v785_v43 = vrot.slane %v771_v40, %v4615_v41  ;;  %v786_v46 = vcombine.high %v778_v42, %v778_v42  ;;  %v4206_v51 = vld [vmem:[%s5419_s1 + $0x188] sm:$0xff]   ;;  %v4210_v55 = vld [vmem:[%s5419_s1 + $0x190] sm:$0xff]   ;;  %v4213_v58 = vld [vmem:[%s5419_s1 + $0x118] sm:$0xff]  }
  0x15   : > { %3789 = vmatpush3.bf16.msra.mxu1 %v4181_v15  ;;  %3768 = vmatprep.subr.bf16.mxu0 %v4182_v16  ;;  %v4214_v59 = vld [vmem:[%s5419_s1 + $0x198] sm:$0xff]   ;;  %v4215_v60 = vld [vmem:[%s5419_s1 + $0x160] sm:$0xff]   ;;  %v4219_v0 = vld [vmem:[%s5419_s1 + $0x168] sm:$0xff]  }
  0x16   : > { %3790 = vmatprep.subr.bf16.mxu1 %v4183_v17  ;;  %v787_v47 = vcombine.high %v785_v43, %v785_v43  ;;  %2720 = vmatprep.mubr.bf16.mxu0 %v786_v46  ;;  %v4216_v61 = vld [vmem:[%s5419_s1 + $0x1e0] sm:$0xff]   ;;  %v4220_v1 = vld [vmem:[%s5419_s1 + $0x1e8] sm:$0xff]   ;;  %v4223_v4 = vld [vmem:[%s5419_s1 + $0x170] sm:$0xff]  }
  0x17   : > { %v4217_v62 = vld [vmem:[%s5419_s1 + $0x120] sm:$0xff]   ;;  %v4221_v2 = vld [vmem:[%s5419_s1 + $0x128] sm:$0xff]   ;;  %v4224_v5 = vld [vmem:[%s5419_s1 + $0x1f0] sm:$0xff]  }
  0x18   : > { %3769 = vmatpush3.bf16.msra.mxu0 %v4184_v18  ;;  %2760 = vmatprep.mubr.bf16.mxu1 %v787_v47  ;;  %v4218_v63 = vld [vmem:[%s5419_s1 + $0x1a0] sm:$0xff]   ;;  %v4222_v3 = vld [vmem:[%s5419_s1 + $0x1a8] sm:$0xff]   ;;  %v4225_v6 = vld [vmem:[%s5419_s1 + $0x130] sm:$0xff]  }
  0x19   : > { %3791 = vmatpush3.bf16.msra.mxu1 %v4185_v19  ;;  %3770 = vmatprep.subr.bf16.mxu0 %v4186_v20  ;;  %v4226_v7 = vld [vmem:[%s5419_s1 + $0x1b0] sm:$0xff]   ;;  %v171_v8 = vld [vmem:[%s4600_s27 + $0x8] sm:$0xff]  ;;  %v4227_v9 = vld [vmem:[%s5419_s1 + $0x178] sm:$0xff]  }
  0x1a   : > { %3792 = vmatprep.subr.bf16.mxu1 %v4187_v21  ;;  %v795_v10 = vrot.slane %v171_v8, %v4615_v41  ;;  %v788_v11 = vcombine.high %v171_v8, %v171_v8  ;;  %v4228_v12 = vld [vmem:[%s5419_s1 + $0x1f8] sm:$0xff]   ;;  %v4232_v18 = vld [vmem:[%s5419_s1 + $0x240] sm:$0xff]   ;;  %v4242_v28 = vld [vmem:[%s5419_s1 + $0x210] sm:$0xff]  }
  0x1b   : > { %v4229_v13 = vld [vmem:[%s5419_s1 + $0x138] sm:$0xff]   ;;  %v4233_v19 = vld [vmem:[%s5419_s1 + $0x2c0] sm:$0xff]   ;;  %v4253_v39 = vld [vmem:[%s5419_s1 + $0x2e8] sm:$0xff]  }
  0x1c   : > { %3771 = vmatpush3.bf16.msra.mxu0 %v4188_v22  ;;  %v803_v14 = vcombine.high %v795_v10, %v795_v10  ;;  %v802_v15 = vrot.slane %v788_v11, %v4615_v41  ;;  %v4230_v16 = vld [vmem:[%s5419_s1 + $0x1b8] sm:$0xff]   ;;  %v4234_v20 = vld [vmem:[%s5419_s1 + $0x200] sm:$0xff]   ;;  %v4236_v22 = vld [vmem:[%s5419_s1 + $0x248] sm:$0xff]  }
  0x1d   : > { %3793 = vmatpush3.bf16.msra.mxu1 %v4189_v23  ;;  %3772 = vmatprep.subr.bf16.mxu0 %v4190_v24  ;;  %v4235_v21 = vld [vmem:[%s5419_s1 + $0x280] sm:$0xff]   ;;  %v4237_v23 = vld [vmem:[%s5419_s1 + $0x2c8] sm:$0xff]   ;;  %v4247_v33 = vld [vmem:[%s5419_s1 + $0x298] sm:$0xff]  }
  0x1e   : > { %3794 = vmatprep.subr.bf16.mxu1 %v4191_v25  ;;  %v804_v17 = vcombine.high %v802_v15, %v802_v15  ;;  %v4238_v24 = vld [vmem:[%s5419_s1 + $0x208] sm:$0xff]   ;;  %v4248_v34 = vld [vmem:[%s5419_s1 + $0x260] sm:$0xff]   ;;  %v4259_v46 = vld [vmem:[%s5419_s1 + $0x2b0] sm:$0xff]  }
  0x1f   : > { %v4239_v25 = vld [vmem:[%s5419_s1 + $0x288] sm:$0xff]   ;;  %v4250_v36 = vld [vmem:[%s5419_s1 + $0x220] sm:$0xff]   ;;  %v172_v47 = vld [vmem:[%s4600_s27 + $0x10] sm:$0xff] }
  0x20   : > { %3773 = vmatpush3.bf16.msra.mxu0 %v4192_v26  ;;  %v4240_v26 = vld [vmem:[%s5419_s1 + $0x250] sm:$0xff]   ;;  %v4251_v37 = vld [vmem:[%s5419_s1 + $0x2a0] sm:$0xff]   ;;  %v4254_v40 = vld [vmem:[%s5419_s1 + $0x228] sm:$0xff]  }
  0x21   : > { %3795 = vmatpush3.bf16.msra.mxu1 %v4193_v27  ;;  %3774 = vmatprep.subr.bf16.mxu0 %v4194_v29  ;;  %v4241_v27 = vld [vmem:[%s5419_s1 + $0x2d0] sm:$0xff]   ;;  %v4280_v8 = vld [vmem:[%s5419_s1 + $0x398] sm:$0xff]   ;;  %v4283_v11 = vld [vmem:[%s5419_s1 + $0x320] sm:$0xff]  }
  0x22   : > { %3796 = vmatprep.subr.bf16.mxu1 %v4195_v30  ;;  %v4243_v29 = vld [vmem:[%s5419_s1 + $0x290] sm:$0xff]   ;;  %v4244_v30 = vld [vmem:[%s5419_s1 + $0x258] sm:$0xff]  }
  0x24   : > { %3775 = vmatpush3.bf16.msra.mxu0 %v4196_v31  ;;  %v4245_v31 = vld [vmem:[%s5419_s1 + $0x2d8] sm:$0xff]  }
  0x25   : > { %3797 = vmatpush3.bf16.msra.mxu1 %v4197_v32  ;;  %3804 = vmatprep.subr.bf16.mxu0 %v4199_v35  ;;  %v4246_v32 = vld [vmem:[%s5419_s1 + $0x218] sm:$0xff]   ;;  %v4249_v35 = vld [vmem:[%s5419_s1 + $0x2e0] sm:$0xff]  }
  0x26   : > { %3826 = vmatprep.subr.bf16.mxu1 %v4200_v38  ;;  %v4252_v38 = vld [vmem:[%s5419_s1 + $0x268] sm:$0xff]  }
  0x27   : > { %2721 = vmatmul.mubr.bf16.vlgmr.msra.gmra.mrb[0].mxu0 %v778_v42  ;;  %v4255_v42 = vld [vmem:[%s5419_s1 + $0x2a8] sm:$0xff]  }
  0x28   : > { %2761 = vmatmul.mubr.bf16.vlgmr.msra.gmra.mrb[0].mxu1 %v785_v43  ;;  %3805 = vmatpush3.bf16.msra.mxu0 %v4201_v44  ;;  %v4256_v43 = vld [vmem:[%s5419_s1 + $0x270] sm:$0xff]  }
  0x29   : > { %3827 = vmatpush3.bf16.msra.mxu1 %v4202_v45  ;;  %3806 = vmatprep.subr.bf16.mxu0 %v4203_v48  ;;  %v4257_v44 = vld [vmem:[%s5419_s1 + $0x2f0] sm:$0xff]   ;;  %v4260_v48 = vld [vmem:[%s5419_s1 + $0x278] sm:$0xff]  }
  0x2a   : > { %3828 = vmatprep.subr.bf16.mxu1 %v4204_v49  ;;  %2800 = vmatprep.mubr.bf16.mxu0 %v803_v14  ;;  %v4258_v45 = vld [vmem:[%s5419_s1 + $0x230] sm:$0xff]   ;;  %v812_v49 = vrot.slane %v172_v47, %v4615_v41  ;;  %v4286_v14 = vld [vmem:[%s5419_s1 + $0x3e8] sm:$0xff]  }
  0x2b   : > { %2840 = vmatprep.mubr.bf16.mxu1 %v804_v17  ;;  %v4289_v17 = vld [vmem:[%s5419_s1 + $0x370] sm:$0xff]  }
  0x2c   : > { %3807 = vmatpush3.bf16.msra.mxu0 %v4205_v50  ;;  %v805_v50 = vcombine.high %v172_v47, %v172_v47  ;;  %v4313_v47 = vld [vmem:[%s5419_s1 + $0x498] sm:$0xff]  }
  0x2d   : > { %3829 = vmatpush3.bf16.msra.mxu1 %v4206_v51  ;;  %3808 = vmatprep.subr.bf16.mxu0 %v4207_v52  ;;  %v4261_v51 = vld [vmem:[%s5419_s1 + $0x2f8] sm:$0xff]  }
  0x2e   : > { %3830 = vmatprep.subr.bf16.mxu1 %v4208_v53  ;;  %v4262_v52 = vld [vmem:[%s5419_s1 + $0x238] sm:$0xff]   ;;  %v820_v53 = vcombine.high %v812_v49, %v812_v49 }
  0x30   : > { %3809 = vmatpush3.bf16.msra.mxu0 %v4209_v54  ;;  %v819_v54 = vrot.slane %v805_v50, %v4615_v41  ;;  %v4316_v50 = vld [vmem:[%s5419_s1 + $0x420] sm:$0xff]  }
  0x31   : > { %3831 = vmatpush3.bf16.msra.mxu1 %v4210_v55  ;;  %3810 = vmatprep.subr.bf16.mxu0 %v4211_v56  ;;  %v4263_v55 = vld [vmem:[%s5419_s1 + $0x2b8] sm:$0xff]  }
  0x32   : > { %3832 = vmatprep.subr.bf16.mxu1 %v4212_v57  ;;  %v821_v56 = vcombine.high %v819_v54, %v819_v54  ;;  %v4265_v57 = vld [vmem:[%s5419_s1 + $0x340] sm:$0xff]  }
  0x34   : > { %3811 = vmatpush3.bf16.msra.mxu0 %v4213_v58  ;;  %v4266_v58 = vld [vmem:[%s5419_s1 + $0x3c0] sm:$0xff]  }
  0x35   : > { %3833 = vmatpush3.bf16.msra.mxu1 %v4214_v59  ;;  %3812 = vmatprep.subr.bf16.mxu0 %v4215_v60  ;;  %v4267_v59 = vld [vmem:[%s5419_s1 + $0x300] sm:$0xff]  }
  0x36   : > { %3834 = vmatprep.subr.bf16.mxu1 %v4216_v61  ;;  %v4268_v60 = vld [vmem:[%s5419_s1 + $0x380] sm:$0xff]   ;;  %v4269_v61 = vld [vmem:[%s5419_s1 + $0x348] sm:$0xff]  }
  0x38   : > { %3813 = vmatpush3.bf16.msra.mxu0 %v4217_v62  ;;  %v4270_v62 = vld [vmem:[%s5419_s1 + $0x3c8] sm:$0xff]  }
  0x39   : > { %3835 = vmatpush3.bf16.msra.mxu1 %v4218_v63  ;;  %3814 = vmatprep.subr.bf16.mxu0 %v4219_v0  ;;  %v4271_v63 = vld [vmem:[%s5419_s1 + $0x308] sm:$0xff]  }
  0x3a   : > { %3836 = vmatprep.subr.bf16.mxu1 %v4220_v1  ;;  %v4272_v0 = vld [vmem:[%s5419_s1 + $0x388] sm:$0xff]   ;;  %v4273_v1 = vld [vmem:[%s5419_s1 + $0x350] sm:$0xff]  }
  0x3c   : > { %3815 = vmatpush3.bf16.msra.mxu0 %v4221_v2  ;;  %v4274_v2 = vld [vmem:[%s5419_s1 + $0x3d0] sm:$0xff]  }
  0x3d   : > { %3837 = vmatpush3.bf16.msra.mxu1 %v4222_v3  ;;  %3816 = vmatprep.subr.bf16.mxu0 %v4223_v4  ;;  %v4275_v3 = vld [vmem:[%s5419_s1 + $0x310] sm:$0xff]  }
  0x3e   : > { %3838 = vmatprep.subr.bf16.mxu1 %v4224_v5  ;;  %v4276_v4 = vld [vmem:[%s5419_s1 + $0x390] sm:$0xff]   ;;  %v4277_v5 = vld [vmem:[%s5419_s1 + $0x358] sm:$0xff]  }
  0x40   : > { %3817 = vmatpush3.bf16.msra.mxu0 %v4225_v6  ;;  %v4278_v6 = vld [vmem:[%s5419_s1 + $0x3d8] sm:$0xff]  }
  0x41   : > { %3839 = vmatpush3.bf16.msra.mxu1 %v4226_v7  ;;  %3818 = vmatprep.subr.bf16.mxu0 %v4227_v9  ;;  %v4279_v7 = vld [vmem:[%s5419_s1 + $0x318] sm:$0xff]   ;;  %v4281_v9 = vld [vmem:[%s5419_s1 + $0x360] sm:$0xff]  }
  0x42   : > { %3840 = vmatprep.subr.bf16.mxu1 %v4228_v12  ;;  %v4284_v12 = vld [vmem:[%s5419_s1 + $0x3a0] sm:$0xff]  }
  0x44   : > { %3819 = vmatpush3.bf16.msra.mxu0 %v4229_v13  ;;  %v4285_v13 = vld [vmem:[%s5419_s1 + $0x368] sm:$0xff]  }
  0x45   : > { %3841 = vmatpush3.bf16.msra.mxu1 %v4230_v16  ;;  %3848 = vmatprep.subr.bf16.mxu0 %v4232_v18  ;;  %v4288_v16 = vld [vmem:[%s5419_s1 + $0x3a8] sm:$0xff]   ;;  %v4290_v18 = vld [vmem:[%s5419_s1 + $0x3f0] sm:$0xff]  }
  0x46   : > { %3870 = vmatprep.subr.bf16.mxu1 %v4233_v19  ;;  %v4291_v19 = vld [vmem:[%s5419_s1 + $0x330] sm:$0xff]  }
  0x47   : > { %2801 = vmatmul.mubr.bf16.vlgmr.msra.gmra.mrb[4].mxu0 %v795_v10  ;;  %v4282_v10 = vld [vmem:[%s5419_s1 + $0x3e0] sm:$0xff]  }
  0x48   : > { %2841 = vmatmul.mubr.bf16.vlgmr.msra.gmra.mrb[4].mxu1 %v802_v15  ;;  %3849 = vmatpush3.bf16.msra.mxu0 %v4234_v20  ;;  %v4287_v15 = vld [vmem:[%s5419_s1 + $0x328] sm:$0xff]   ;;  %v4292_v20 = vld [vmem:[%s5419_s1 + $0x3b0] sm:$0xff]  }
  0x49   : > { %3871 = vmatpush3.bf16.msra.mxu1 %v4235_v21  ;;  %3850 = vmatprep.subr.bf16.mxu0 %v4236_v22  ;;  %v4293_v21 = vld [vmem:[%s5419_s1 + $0x378] sm:$0xff]  }
  0x4a   : > { %3872 = vmatprep.subr.bf16.mxu1 %v4237_v23  ;;  %2880 = vmatprep.mubr.bf16.mxu0 %v820_v53  ;;  %v173_v22 = vld [vmem:[%s4600_s27 + $0x18] sm:$0xff]  ;;  %v4319_v53 = vld [vmem:[%s5419_s1 + $0x4e8] sm:$0xff]  }
  0x4b   : > { %2920 = vmatprep.mubr.bf16.mxu1 %v821_v56  ;;  %v4294_v23 = vld [vmem:[%s5419_s1 + $0x3f8] sm:$0xff]   ;;  %v4322_v56 = vld [vmem:[%s5419_s1 + $0x470] sm:$0xff]  }
  0x4c   : > { %3851 = vmatpush3.bf16.msra.mxu0 %v4238_v24  ;;  %v829_v24 = vrot.slane %v173_v22, %v4615_v41 }
  0x4d   : > { %3873 = vmatpush3.bf16.msra.mxu1 %v4239_v25  ;;  %3852 = vmatprep.subr.bf16.mxu0 %v4240_v26  ;;  %v822_v25 = vcombine.high %v173_v22, %v173_v22  ;;  %v4295_v26 = vld [vmem:[%s5419_s1 + $0x338] sm:$0xff]   ;;  %v4347_v22 = vld [vmem:[%s5419_s1 + $0x560] sm:$0xff]  }
  0x4e   : > { %3874 = vmatprep.subr.bf16.mxu1 %v4241_v27  ;;  %v4296_v27 = vld [vmem:[%s5419_s1 + $0x3b8] sm:$0xff]  }
  0x50   : > { %3853 = vmatpush3.bf16.msra.mxu0 %v4242_v28  ;;  %v837_v28 = vcombine.high %v829_v24, %v829_v24 }
  0x51   : > { %3875 = vmatpush3.bf16.msra.mxu1 %v4243_v29  ;;  %3854 = vmatprep.subr.bf16.mxu0 %v4244_v30  ;;  %v836_v29 = vrot.slane %v822_v25, %v4615_v41  ;;  %v4298_v30 = vld [vmem:[%s5419_s1 + $0x440] sm:$0xff]  }
  0x52   : > { %3876 = vmatprep.subr.bf16.mxu1 %v4245_v31  ;;  %v4350_v25 = vld [vmem:[%s5419_s1 + $0x5a0] sm:$0xff]  }
  0x53   : > { %v838_v31 = vcombine.high %v836_v29, %v836_v29 }
  0x54   : > { %3855 = vmatpush3.bf16.msra.mxu0 %v4246_v32  ;;  %v4299_v32 = vld [vmem:[%s5419_s1 + $0x4c0] sm:$0xff]  }
  0x55   : > { %3877 = vmatpush3.bf16.msra.mxu1 %v4247_v33  ;;  %3856 = vmatprep.subr.bf16.mxu0 %v4248_v34  ;;  %v4300_v33 = vld [vmem:[%s5419_s1 + $0x400] sm:$0xff]  }
  0x56   : > { %3878 = vmatprep.subr.bf16.mxu1 %v4249_v35  ;;  %v4301_v34 = vld [vmem:[%s5419_s1 + $0x480] sm:$0xff]   ;;  %v4302_v35 = vld [vmem:[%s5419_s1 + $0x448] sm:$0xff]  }
  0x58   : > { %3857 = vmatpush3.bf16.msra.mxu0 %v4250_v36  ;;  %v4303_v36 = vld [vmem:[%s5419_s1 + $0x4c8] sm:$0xff]  }
  0x59   : > { %3879 = vmatpush3.bf16.msra.mxu1 %v4251_v37  ;;  %3858 = vmatprep.subr.bf16.mxu0 %v4252_v38  ;;  %v4304_v37 = vld [vmem:[%s5419_s1 + $0x408] sm:$0xff]  }
  0x5a   : > { %3880 = vmatprep.subr.bf16.mxu1 %v4253_v39  ;;  %v4305_v38 = vld [vmem:[%s5419_s1 + $0x488] sm:$0xff]   ;;  %v4306_v39 = vld [vmem:[%s5419_s1 + $0x450] sm:$0xff]  }
  0x5c   : > { %3859 = vmatpush3.bf16.msra.mxu0 %v4254_v40  ;;  %v4307_v40 = vld [vmem:[%s5419_s1 + $0x4d0] sm:$0xff]  }
  0x5d   : > { %3881 = vmatpush3.bf16.msra.mxu1 %v4255_v42  ;;  %3860 = vmatprep.subr.bf16.mxu0 %v4256_v43  ;;  %v4308_v42 = vld [vmem:[%s5419_s1 + $0x410] sm:$0xff]  }
  0x5e   : > { %3882 = vmatprep.subr.bf16.mxu1 %v4257_v44  ;;  %v4309_v43 = vld [vmem:[%s5419_s1 + $0x490] sm:$0xff]   ;;  %v4310_v44 = vld [vmem:[%s5419_s1 + $0x458] sm:$0xff]  }
  0x60   : > { %3861 = vmatpush3.bf16.msra.mxu0 %v4258_v45  ;;  %v4311_v45 = vld [vmem:[%s5419_s1 + $0x4d8] sm:$0xff]  }
  0x61   : > { %3883 = vmatpush3.bf16.msra.mxu1 %v4259_v46  ;;  %3862 = vmatprep.subr.bf16.mxu0 %v4260_v48  ;;  %v4312_v46 = vld [vmem:[%s5419_s1 + $0x418] sm:$0xff]   ;;  %v4314_v48 = vld [vmem:[%s5419_s1 + $0x460] sm:$0xff]  }
  0x62   : > { %3884 = vmatprep.subr.bf16.mxu1 %v4261_v51  ;;  %v4317_v51 = vld [vmem:[%s5419_s1 + $0x4a0] sm:$0xff]  }
  0x64   : > { %3863 = vmatpush3.bf16.msra.mxu0 %v4262_v52  ;;  %v4318_v52 = vld [vmem:[%s5419_s1 + $0x468] sm:$0xff]  }
  0x65   : > { %3885 = vmatpush3.bf16.msra.mxu1 %v4263_v55  ;;  %3892 = vmatprep.subr.bf16.mxu0 %v4265_v57  ;;  %v4321_v55 = vld [vmem:[%s5419_s1 + $0x4a8] sm:$0xff]   ;;  %v4323_v57 = vld [vmem:[%s5419_s1 + $0x4f0] sm:$0xff]  }
  0x66   : > { %3914 = vmatprep.subr.bf16.mxu1 %v4266_v58  ;;  %v4324_v58 = vld [vmem:[%s5419_s1 + $0x430] sm:$0xff]  }
  0x67   : > { %2881 = vmatmul.mubr.bf16.vlgmr.msra.gmra.mrb[8].mxu0 %v812_v49  ;;  %v4315_v49 = vld [vmem:[%s5419_s1 + $0x4e0] sm:$0xff]  }
  0x68   : > { %2921 = vmatmul.mubr.bf16.vlgmr.msra.gmra.mrb[8].mxu1 %v819_v54  ;;  %3893 = vmatpush3.bf16.msra.mxu0 %v4267_v59  ;;  %v4320_v54 = vld [vmem:[%s5419_s1 + $0x428] sm:$0xff]   ;;  %v4325_v59 = vld [vmem:[%s5419_s1 + $0x4b0] sm:$0xff]  }
  0x69   : > { %3915 = vmatpush3.bf16.msra.mxu1 %v4268_v60  ;;  %3894 = vmatprep.subr.bf16.mxu0 %v4269_v61  ;;  %v4326_v60 = vld [vmem:[%s5419_s1 + $0x478] sm:$0xff]   ;;  %v174_v61 = vld [vmem:[%s4600_s27 + $0x20] sm:$0xff] }
  0x6a   : > { %3916 = vmatprep.subr.bf16.mxu1 %v4270_v62  ;;  %2960 = vmatprep.mubr.bf16.mxu0 %v837_v28  ;;  %v4327_v62 = vld [vmem:[%s5419_s1 + $0x4f8] sm:$0xff]   ;;  %v4353_v28 = vld [vmem:[%s5419_s1 + $0x528] sm:$0xff]  }
  0x6b   : > { %3000 = vmatprep.mubr.bf16.mxu1 %v838_v31  ;;  %v4356_v31 = vld [vmem:[%s5419_s1 + $0x5f0] sm:$0xff]  }
  0x6c   : > { %3895 = vmatpush3.bf16.msra.mxu0 %v4271_v63  ;;  %v846_v63 = vrot.slane %v174_v61, %v4615_v41 }
  0x6d   : > { %3917 = vmatpush3.bf16.msra.mxu1 %v4272_v0  ;;  %3896 = vmatprep.subr.bf16.mxu0 %v4273_v1  ;;  %v839_v0 = vcombine.high %v174_v61, %v174_v61  ;;  %v4328_v1 = vld [vmem:[%s5419_s1 + $0x438] sm:$0xff]   ;;  %v4380_v61 = vld [vmem:[%s5419_s1 + $0x660] sm:$0xff]  }
  0x6e   : > { %3918 = vmatprep.subr.bf16.mxu1 %v4274_v2  ;;  %v4329_v2 = vld [vmem:[%s5419_s1 + $0x4b8] sm:$0xff]  }
  0x70   : > { %3897 = vmatpush3.bf16.msra.mxu0 %v4275_v3  ;;  %v854_v3 = vcombine.high %v846_v63, %v846_v63 }
  0x71   : > { %3919 = vmatpush3.bf16.msra.mxu1 %v4276_v4  ;;  %3898 = vmatprep.subr.bf16.mxu0 %v4277_v5  ;;  %v853_v4 = vrot.slane %v839_v0, %v4615_v41  ;;  %v4331_v5 = vld [vmem:[%s5419_s1 + $0x540] sm:$0xff]  }
  0x72   : > { %3920 = vmatprep.subr.bf16.mxu1 %v4278_v6  ;;  %v4383_v0 = vld [vmem:[%s5419_s1 + $0x6a0] sm:$0xff]  }
  0x73   : > { %v855_v6 = vcombine.high %v853_v4, %v853_v4 }
  0x74   : > { %3899 = vmatpush3.bf16.msra.mxu0 %v4279_v7  ;;  %v4332_v7 = vld [vmem:[%s5419_s1 + $0x5c0] sm:$0xff]  }
  0x75   : > { %3921 = vmatpush3.bf16.msra.mxu1 %v4280_v8  ;;  %3900 = vmatprep.subr.bf16.mxu0 %v4281_v9  ;;  %v4333_v8 = vld [vmem:[%s5419_s1 + $0x500] sm:$0xff]  }
  0x76   : > { %3922 = vmatprep.subr.bf16.mxu1 %v4282_v10  ;;  %v4334_v9 = vld [vmem:[%s5419_s1 + $0x580] sm:$0xff]   ;;  %v4335_v10 = vld [vmem:[%s5419_s1 + $0x548] sm:$0xff]  }
  0x78   : > { %3901 = vmatpush3.bf16.msra.mxu0 %v4283_v11  ;;  %v4336_v11 = vld [vmem:[%s5419_s1 + $0x5c8] sm:$0xff]  }
  0x79   : > { %3923 = vmatpush3.bf16.msra.mxu1 %v4284_v12  ;;  %3902 = vmatprep.subr.bf16.mxu0 %v4285_v13  ;;  %v4337_v12 = vld [vmem:[%s5419_s1 + $0x508] sm:$0xff]  }
  0x7a   : > { %3924 = vmatprep.subr.bf16.mxu1 %v4286_v14  ;;  %v4338_v13 = vld [vmem:[%s5419_s1 + $0x588] sm:$0xff]   ;;  %v4339_v14 = vld [vmem:[%s5419_s1 + $0x550] sm:$0xff]  }
  0x7c   : > { %3903 = vmatpush3.bf16.msra.mxu0 %v4287_v15  ;;  %v4340_v15 = vld [vmem:[%s5419_s1 + $0x5d0] sm:$0xff]  }
  0x7d   : > { %3925 = vmatpush3.bf16.msra.mxu1 %v4288_v16  ;;  %3904 = vmatprep.subr.bf16.mxu0 %v4289_v17  ;;  %v4341_v16 = vld [vmem:[%s5419_s1 + $0x510] sm:$0xff]  }
  0x7e   : > { %3926 = vmatprep.subr.bf16.mxu1 %v4290_v18  ;;  %v4342_v17 = vld [vmem:[%s5419_s1 + $0x590] sm:$0xff]   ;;  %v4343_v18 = vld [vmem:[%s5419_s1 + $0x558] sm:$0xff]  }
  0x80   : > { %3905 = vmatpush3.bf16.msra.mxu0 %v4291_v19  ;;  %v4344_v19 = vld [vmem:[%s5419_s1 + $0x5d8] sm:$0xff]  }
  0x81   : > { %3927 = vmatpush3.bf16.msra.mxu1 %v4292_v20  ;;  %3906 = vmatprep.subr.bf16.mxu0 %v4293_v21  ;;  %v4345_v20 = vld [vmem:[%s5419_s1 + $0x518] sm:$0xff]  }
  0x82   : > { %3928 = vmatprep.subr.bf16.mxu1 %v4294_v23  ;;  %v4346_v21 = vld [vmem:[%s5419_s1 + $0x598] sm:$0xff]   ;;  %v4348_v23 = vld [vmem:[%s5419_s1 + $0x5e0] sm:$0xff]  }
  0x84   : > { %3907 = vmatpush3.bf16.msra.mxu0 %v4295_v26  ;;  %v4351_v26 = vld [vmem:[%s5419_s1 + $0x568] sm:$0xff]  }
  0x85   : > { %3929 = vmatpush3.bf16.msra.mxu1 %v4296_v27  ;;  %3936 = vmatprep.subr.bf16.mxu0 %v4298_v30  ;;  %v4352_v27 = vld [vmem:[%s5419_s1 + $0x5e8] sm:$0xff]   ;;  %v4355_v30 = vld [vmem:[%s5419_s1 + $0x570] sm:$0xff]  }
  0x86   : > { %3958 = vmatprep.subr.bf16.mxu1 %v4299_v32  ;;  %v4357_v32 = vld [vmem:[%s5419_s1 + $0x530] sm:$0xff]  }
  0x87   : > { %2961 = vmatmul.mubr.bf16.vlgmr.msra.gmra.mrb[12].mxu0 %v829_v24  ;;  %v4349_v24 = vld [vmem:[%s5419_s1 + $0x520] sm:$0xff]  }
  0x88   : > { %3001 = vmatmul.mubr.bf16.vlgmr.msra.gmra.mrb[12].mxu1 %v836_v29  ;;  %3937 = vmatpush3.bf16.msra.mxu0 %v4300_v33  ;;  %v4354_v29 = vld [vmem:[%s5419_s1 + $0x5a8] sm:$0xff]   ;;  %v4358_v33 = vld [vmem:[%s5419_s1 + $0x5b0] sm:$0xff]  }
  0x89   : > { %3959 = vmatpush3.bf16.msra.mxu1 %v4301_v34  ;;  %3938 = vmatprep.subr.bf16.mxu0 %v4302_v35  ;;  %v4359_v34 = vld [vmem:[%s5419_s1 + $0x578] sm:$0xff]   ;;  %v175_v35 = vld [vmem:[%s4600_s27 + $0x28] sm:$0xff] }
  0x8a   : > { %3960 = vmatprep.subr.bf16.mxu1 %v4303_v36  ;;  %3040 = vmatprep.mubr.bf16.mxu0 %v854_v3  ;;  %v4360_v36 = vld [vmem:[%s5419_s1 + $0x5f8] sm:$0xff]   ;;  %v4386_v3 = vld [vmem:[%s5419_s1 + $0x628] sm:$0xff]  }
  0x8b   : > { %3080 = vmatprep.mubr.bf16.mxu1 %v855_v6  ;;  %v4389_v6 = vld [vmem:[%s5419_s1 + $0x6f0] sm:$0xff]  }
  0x8c   : > { %3939 = vmatpush3.bf16.msra.mxu0 %v4304_v37  ;;  %v863_v37 = vrot.slane %v175_v35, %v4615_v41 }
  0x8d   : > { %3961 = vmatpush3.bf16.msra.mxu1 %v4305_v38  ;;  %3940 = vmatprep.subr.bf16.mxu0 %v4306_v39  ;;  %v856_v38 = vcombine.high %v175_v35, %v175_v35  ;;  %v4361_v39 = vld [vmem:[%s5419_s1 + $0x538] sm:$0xff]   ;;  %v4413_v35 = vld [vmem:[%s5419_s1 + $0x760] sm:$0xff]  }
  0x8e   : > { %3962 = vmatprep.subr.bf16.mxu1 %v4307_v40  ;;  %v4362_v40 = vld [vmem:[%s5419_s1 + $0x5b8] sm:$0xff]  }
  0x90   : > { %3941 = vmatpush3.bf16.msra.mxu0 %v4308_v42  ;;  %v871_v42 = vcombine.high %v863_v37, %v863_v37 }
  0x91   : > { %3963 = vmatpush3.bf16.msra.mxu1 %v4309_v43  ;;  %3942 = vmatprep.subr.bf16.mxu0 %v4310_v44  ;;  %v870_v43 = vrot.slane %v856_v38, %v4615_v41  ;;  %v4364_v44 = vld [vmem:[%s5419_s1 + $0x640] sm:$0xff]  }
  0x92   : > { %3964 = vmatprep.subr.bf16.mxu1 %v4311_v45  ;;  %v4416_v38 = vld [vmem:[%s5419_s1 + $0x7a0] sm:$0xff]  }
  0x93   : > { %v872_v45 = vcombine.high %v870_v43, %v870_v43 }
  0x94   : > { %3943 = vmatpush3.bf16.msra.mxu0 %v4312_v46  ;;  %v4365_v46 = vld [vmem:[%s5419_s1 + $0x6c0] sm:$0xff]  }
  0x95   : > { %3965 = vmatpush3.bf16.msra.mxu1 %v4313_v47  ;;  %3944 = vmatprep.subr.bf16.mxu0 %v4314_v48  ;;  %v4366_v47 = vld [vmem:[%s5419_s1 + $0x600] sm:$0xff]  }
  0x96   : > { %3966 = vmatprep.subr.bf16.mxu1 %v4315_v49  ;;  %v4367_v48 = vld [vmem:[%s5419_s1 + $0x680] sm:$0xff]   ;;  %v4368_v49 = vld [vmem:[%s5419_s1 + $0x648] sm:$0xff]  }
  0x98   : > { %3945 = vmatpush3.bf16.msra.mxu0 %v4316_v50  ;;  %v4369_v50 = vld [vmem:[%s5419_s1 + $0x6c8] sm:$0xff]  }
  0x99   : > { %3967 = vmatpush3.bf16.msra.mxu1 %v4317_v51  ;;  %3946 = vmatprep.subr.bf16.mxu0 %v4318_v52  ;;  %v4370_v51 = vld [vmem:[%s5419_s1 + $0x608] sm:$0xff]  }
  0x9a   : > { %3968 = vmatprep.subr.bf16.mxu1 %v4319_v53  ;;  %v4371_v52 = vld [vmem:[%s5419_s1 + $0x688] sm:$0xff]   ;;  %v4372_v53 = vld [vmem:[%s5419_s1 + $0x650] sm:$0xff]  }
  0x9c   : > { %3947 = vmatpush3.bf16.msra.mxu0 %v4320_v54  ;;  %v4373_v54 = vld [vmem:[%s5419_s1 + $0x6d0] sm:$0xff]  }
  0x9d   : > { %3969 = vmatpush3.bf16.msra.mxu1 %v4321_v55  ;;  %3948 = vmatprep.subr.bf16.mxu0 %v4322_v56  ;;  %v4374_v55 = vld [vmem:[%s5419_s1 + $0x610] sm:$0xff]  }
  0x9e   : > { %3970 = vmatprep.subr.bf16.mxu1 %v4323_v57  ;;  %v4375_v56 = vld [vmem:[%s5419_s1 + $0x690] sm:$0xff]   ;;  %v4376_v57 = vld [vmem:[%s5419_s1 + $0x658] sm:$0xff]  }
  0xa0   : > { %3949 = vmatpush3.bf16.msra.mxu0 %v4324_v58  ;;  %v4377_v58 = vld [vmem:[%s5419_s1 + $0x6d8] sm:$0xff]  }
  0xa1   : > { %3971 = vmatpush3.bf16.msra.mxu1 %v4325_v59  ;;  %3950 = vmatprep.subr.bf16.mxu0 %v4326_v60  ;;  %v4378_v59 = vld [vmem:[%s5419_s1 + $0x618] sm:$0xff]  }
  0xa2   : > { %3972 = vmatprep.subr.bf16.mxu1 %v4327_v62  ;;  %v4379_v60 = vld [vmem:[%s5419_s1 + $0x698] sm:$0xff]   ;;  %v4381_v62 = vld [vmem:[%s5419_s1 + $0x6e0] sm:$0xff]  }
  0xa4   : > { %3951 = vmatpush3.bf16.msra.mxu0 %v4328_v1  ;;  %v4384_v1 = vld [vmem:[%s5419_s1 + $0x668] sm:$0xff]  }
  0xa5   : > { %3973 = vmatpush3.bf16.msra.mxu1 %v4329_v2  ;;  %3980 = vmatprep.subr.bf16.mxu0 %v4331_v5  ;;  %v4385_v2 = vld [vmem:[%s5419_s1 + $0x6e8] sm:$0xff]   ;;  %v4388_v5 = vld [vmem:[%s5419_s1 + $0x670] sm:$0xff]  }
  0xa6   : > { %4002 = vmatprep.subr.bf16.mxu1 %v4332_v7  ;;  %v4390_v7 = vld [vmem:[%s5419_s1 + $0x630] sm:$0xff]  }
  0xa7   : > { %3041 = vmatmul.mubr.bf16.vlgmr.msra.gmra.mrb[16].mxu0 %v846_v63  ;;  %v4382_v63 = vld [vmem:[%s5419_s1 + $0x620] sm:$0xff]  }
  0xa8   : > { %3081 = vmatmul.mubr.bf16.vlgmr.msra.gmra.mrb[16].mxu1 %v853_v4  ;;  %3981 = vmatpush3.bf16.msra.mxu0 %v4333_v8  ;;  %v4387_v4 = vld [vmem:[%s5419_s1 + $0x6a8] sm:$0xff]   ;;  %v4391_v8 = vld [vmem:[%s5419_s1 + $0x6b0] sm:$0xff]  }
  0xa9   : > { %4003 = vmatpush3.bf16.msra.mxu1 %v4334_v9  ;;  %3982 = vmatprep.subr.bf16.mxu0 %v4335_v10  ;;  %v4392_v9 = vld [vmem:[%s5419_s1 + $0x678] sm:$0xff]  }
  0xaa   : > { %4004 = vmatprep.subr.bf16.mxu1 %v4336_v11  ;;  %3120 = vmatprep.mubr.bf16.mxu0 %v871_v42  ;;  %v4393_v10 = vld [vmem:[%s5419_s1 + $0x6f8] sm:$0xff]   ;;  %v176_v11 = vld [vmem:[%s4600_s27 + $0x30] sm:$0xff]  ;;  %v4419_v42 = vld [vmem:[%s5419_s1 + $0x728] sm:$0xff]  }
  0xab   : > { %3160 = vmatprep.mubr.bf16.mxu1 %v872_v45  ;;  %v3469_v45 = vld [vmem:[%s5420_s2] ss:$0 sm:$0xff] }
  0xac   : > { %3983 = vmatpush3.bf16.msra.mxu0 %v4337_v12  ;;  %v4394_v12 = vld [vmem:[%s5419_s1 + $0x638] sm:$0xff]  }
  0xad   : > { %4005 = vmatpush3.bf16.msra.mxu1 %v4338_v13  ;;  %3984 = vmatprep.subr.bf16.mxu0 %v4339_v14  ;;  %v880_v13 = vrot.slane %v176_v11, %v4615_v41  ;;  %v873_v14 = vcombine.high %v176_v11, %v176_v11  ;;  %v4434_v11 = vld [vmem:[%s5419_s1 + $0x848] sm:$0xff]  }
  0xae   : > { %4006 = vmatprep.subr.bf16.mxu1 %v4340_v15  ;;  %v4395_v15 = vld [vmem:[%s5419_s1 + $0x6b8] sm:$0xff]  }
  0xb0   : > { %3985 = vmatpush3.bf16.msra.mxu0 %v4341_v16  ;;  %v888_v16 = vcombine.high %v880_v13, %v880_v13 }
  0xb1   : > { %4007 = vmatpush3.bf16.msra.mxu1 %v4342_v17  ;;  %3986 = vmatprep.subr.bf16.mxu0 %v4343_v18  ;;  %v887_v17 = vrot.slane %v873_v14, %v4615_v41  ;;  %v4397_v18 = vld [vmem:[%s5419_s1 + $0x740] sm:$0xff]   ;;  %v4437_v14 = vld [vmem:[%s5419_s1 + $0x888] sm:$0xff]  }
  0xb2   : > { %4008 = vmatprep.subr.bf16.mxu1 %v4344_v19  ;;  %v4398_v19 = vld [vmem:[%s5419_s1 + $0x7c0] sm:$0xff]  }
  0xb4   : > { %3987 = vmatpush3.bf16.msra.mxu0 %v4345_v20  ;;  %v889_v20 = vcombine.high %v887_v17, %v887_v17 }
  0xb5   : > { %4009 = vmatpush3.bf16.msra.mxu1 %v4346_v21  ;;  %3988 = vmatprep.subr.bf16.mxu0 %v4347_v22  ;;  %v4399_v21 = vld [vmem:[%s5419_s1 + $0x700] sm:$0xff]  }
  0xb6   : > { %4010 = vmatprep.subr.bf16.mxu1 %v4348_v23  ;;  %v4400_v22 = vld [vmem:[%s5419_s1 + $0x780] sm:$0xff]   ;;  %v4401_v23 = vld [vmem:[%s5419_s1 + $0x748] sm:$0xff]  }
  0xb8   : > { %3989 = vmatpush3.bf16.msra.mxu0 %v4349_v24  ;;  %v4402_v24 = vld [vmem:[%s5419_s1 + $0x7c8] sm:$0xff]  }
  0xb9   : > { %4011 = vmatpush3.bf16.msra.mxu1 %v4350_v25  ;;  %3990 = vmatprep.subr.bf16.mxu0 %v4351_v26  ;;  %v4403_v25 = vld [vmem:[%s5419_s1 + $0x708] sm:$0xff]  }
  0xba   : > { %4012 = vmatprep.subr.bf16.mxu1 %v4352_v27  ;;  %v4404_v26 = vld [vmem:[%s5419_s1 + $0x788] sm:$0xff]   ;;  %v4405_v27 = vld [vmem:[%s5419_s1 + $0x750] sm:$0xff]  }
  0xbc   : > { %3991 = vmatpush3.bf16.msra.mxu0 %v4353_v28  ;;  %v4406_v28 = vld [vmem:[%s5419_s1 + $0x7d0] sm:$0xff]  }
  0xbd   : > { %4013 = vmatpush3.bf16.msra.mxu1 %v4354_v29  ;;  %3992 = vmatprep.subr.bf16.mxu0 %v4355_v30  ;;  %v4407_v29 = vld [vmem:[%s5419_s1 + $0x710] sm:$0xff]  }
  0xbe   : > { %4014 = vmatprep.subr.bf16.mxu1 %v4356_v31  ;;  %v4408_v30 = vld [vmem:[%s5419_s1 + $0x790] sm:$0xff]   ;;  %v4409_v31 = vld [vmem:[%s5419_s1 + $0x758] sm:$0xff]  }
  0xc0   : > { %3993 = vmatpush3.bf16.msra.mxu0 %v4357_v32  ;;  %v4410_v32 = vld [vmem:[%s5419_s1 + $0x7d8] sm:$0xff]  }
  0xc1   : > { %4015 = vmatpush3.bf16.msra.mxu1 %v4358_v33  ;;  %3994 = vmatprep.subr.bf16.mxu0 %v4359_v34  ;;  %v4411_v33 = vld [vmem:[%s5419_s1 + $0x718] sm:$0xff]  }
  0xc2   : > { %4016 = vmatprep.subr.bf16.mxu1 %v4360_v36  ;;  %v4412_v34 = vld [vmem:[%s5419_s1 + $0x798] sm:$0xff]   ;;  %v4414_v36 = vld [vmem:[%s5419_s1 + $0x7e0] sm:$0xff]  }
  0xc4   : > { %3995 = vmatpush3.bf16.msra.mxu0 %v4361_v39  ;;  %v4417_v39 = vld [vmem:[%s5419_s1 + $0x768] sm:$0xff]  }
  0xc5   : > { %4017 = vmatpush3.bf16.msra.mxu1 %v4362_v40  ;;  %4024 = vmatprep.subr.bf16.mxu0 %v4364_v44  ;;  %v4418_v40 = vld [vmem:[%s5419_s1 + $0x7e8] sm:$0xff]   ;;  %v4421_v44 = vld [vmem:[%s5419_s1 + $0x770] sm:$0xff]  }
  0xc6   : > { %4046 = vmatprep.subr.bf16.mxu1 %v4365_v46  ;;  %v4422_v46 = vld [vmem:[%s5419_s1 + $0x7f0] sm:$0xff]  }
  0xc7   : > { %3121 = vmatmul.mubr.bf16.vlgmr.msra.gmra.mrb[20].mxu0 %v863_v37  ;;  %v4415_v37 = vld [vmem:[%s5419_s1 + $0x720] sm:$0xff]  }
  0xc8   : > { %3161 = vmatmul.mubr.bf16.vlgmr.msra.gmra.mrb[20].mxu1 %v870_v43  ;;  %4025 = vmatpush3.bf16.msra.mxu0 %v4366_v47  ;;  %v4420_v43 = vld [vmem:[%s5419_s1 + $0x7a8] sm:$0xff]  }
  0xc9   : > { %4047 = vmatpush3.bf16.msra.mxu1 %v4367_v48  ;;  %4026 = vmatprep.subr.bf16.mxu0 %v4368_v49  ;;  %v4423_v49 = vld [vmem:[%s5419_s1 + $0x730] sm:$0xff]  }
  0xca   : > { %4048 = vmatprep.subr.bf16.mxu1 %v4369_v50  ;;  %3200 = vmatprep.mubr.bf16.mxu0 %v888_v16  ;;  %v4424_v50 = vld [vmem:[%s5419_s1 + $0x7b0] sm:$0xff]  }
  0xcb   : > { %3240 = vmatprep.mubr.bf16.mxu1 %v889_v20  ;;  %v4439_v16 = vld [vmem:[%s5419_s1 + $0x8d0] sm:$0xff]   ;;  %v4443_v20 = vld [vmem:[%s5419_s1 + $0x8d8] sm:$0xff]  }
  0xcc   : > { %4027 = vmatpush3.bf16.msra.mxu0 %v4370_v51 }
  0xcd   : > { %4049 = vmatpush3.bf16.msra.mxu1 %v4371_v52  ;;  %4028 = vmatprep.subr.bf16.mxu0 %v4372_v53 }
  0xce   : > { %4050 = vmatprep.subr.bf16.mxu1 %v4373_v54 }
  0xd0   : > { %4029 = vmatpush3.bf16.msra.mxu0 %v4374_v55 }
  0xd1   : > { %4051 = vmatpush3.bf16.msra.mxu1 %v4375_v56  ;;  %4030 = vmatprep.subr.bf16.mxu0 %v4376_v57 }
  0xd2   : > { %4052 = vmatprep.subr.bf16.mxu1 %v4377_v58 }
  0xd4   : > { %4031 = vmatpush3.bf16.msra.mxu0 %v4378_v59  ;;  %v4425_v59 = vld [vmem:[%s5419_s1 + $0x778] sm:$0xff]  }
  0xd5   : > { %4053 = vmatpush3.bf16.msra.mxu1 %v4379_v60  ;;  %4032 = vmatprep.subr.bf16.mxu0 %v4380_v61  ;;  %v4426_v60 = vld [vmem:[%s5419_s1 + $0x7f8] sm:$0xff]  }
  0xd6   : > { %4054 = vmatprep.subr.bf16.mxu1 %v4381_v62  ;;  %v4427_v62 = vld [vmem:[%s5419_s1 + $0x738] sm:$0xff]  }
  0xd8   : > { %4033 = vmatpush3.bf16.msra.mxu0 %v4382_v63  ;;  %v177_v63 = vld [vmem:[%s4600_s27 + $0x38] sm:$0xff] }
  0xd9   : > { %4055 = vmatpush3.bf16.msra.mxu1 %v4383_v0  ;;  %4034 = vmatprep.subr.bf16.mxu0 %v4384_v1  ;;  %v4428_v0 = vld [vmem:[%s5419_s1 + $0x7b8] sm:$0xff]   ;;  %v897_v1 = vrot.slane %v177_v63, %v4615_v41 }
  0xda   : > { %4056 = vmatprep.subr.bf16.mxu1 %v4385_v2  ;;  %v890_v2 = vcombine.high %v177_v63, %v177_v63 }
  0xdc   : > { %4035 = vmatpush3.bf16.msra.mxu0 %v4386_v3 }
  0xdd   : > { %4057 = vmatpush3.bf16.msra.mxu1 %v4387_v4  ;;  %4036 = vmatprep.subr.bf16.mxu0 %v4388_v5  ;;  %v4430_v4 = vld [vmem:[%s5419_s1 + $0x840] sm:$0xff]   ;;  %v905_v5 = vcombine.high %v897_v1, %v897_v1 }
  0xde   : > { %4058 = vmatprep.subr.bf16.mxu1 %v4389_v6  ;;  %v904_v6 = vrot.slane %v890_v2, %v4615_v41 }
  0xe0   : > { %4037 = vmatpush3.bf16.msra.mxu0 %v4390_v7  ;;  %v4431_v7 = vld [vmem:[%s5419_s1 + $0x8c0] sm:$0xff]  }
  0xe1   : > { %4059 = vmatpush3.bf16.msra.mxu1 %v4391_v8  ;;  %4038 = vmatprep.subr.bf16.mxu0 %v4392_v9  ;;  %v4432_v8 = vld [vmem:[%s5419_s1 + $0x800] sm:$0xff]   ;;  %v906_v9 = vcombine.high %v904_v6, %v904_v6 }
  0xe2   : > { %4060 = vmatprep.subr.bf16.mxu1 %v4393_v10  ;;  %v4433_v10 = vld [vmem:[%s5419_s1 + $0x880] sm:$0xff]  }
  0xe4   : > { %4039 = vmatpush3.bf16.msra.mxu0 %v4394_v12  ;;  %v4435_v12 = vld [vmem:[%s5419_s1 + $0x8c8] sm:$0xff]  }
  0xe5   : > { %4061 = vmatpush3.bf16.msra.mxu1 %v4395_v15  ;;  %4068 = vmatprep.subr.bf16.mxu0 %v4397_v18  ;;  %v4438_v15 = vld [vmem:[%s5419_s1 + $0x850] sm:$0xff]  }
  0xe6   : > { %4090 = vmatprep.subr.bf16.mxu1 %v4398_v19  ;;  %v4441_v18 = vld [vmem:[%s5419_s1 + $0x890] sm:$0xff]   ;;  %v4442_v19 = vld [vmem:[%s5419_s1 + $0x858] sm:$0xff]  }
  0xe7   : > { %3201 = vmatmul.mubr.bf16.vlgmr.msra.gmra.mrb[24].mxu0 %v880_v13  ;;  %v4436_v13 = vld [vmem:[%s5419_s1 + $0x808] sm:$0xff]  }
  0xe8   : > { %3241 = vmatmul.mubr.bf16.vlgmr.msra.gmra.mrb[24].mxu1 %v887_v17  ;;  %4069 = vmatpush3.bf16.msra.mxu0 %v4399_v21  ;;  %v4440_v17 = vld [vmem:[%s5419_s1 + $0x810] sm:$0xff]   ;;  %v4444_v21 = vld [vmem:[%s5419_s1 + $0x818] sm:$0xff]  }
  0xe9   : > { %4091 = vmatpush3.bf16.msra.mxu1 %v4400_v22  ;;  %4070 = vmatprep.subr.bf16.mxu0 %v4401_v23  ;;  %v4445_v22 = vld [vmem:[%s5419_s1 + $0x898] sm:$0xff]   ;;  %v4446_v23 = vld [vmem:[%s5419_s1 + $0x860] sm:$0xff]  }
  0xea   : > { %4092 = vmatprep.subr.bf16.mxu1 %v4402_v24  ;;  %3280 = vmatprep.mubr.bf16.mxu0 %v905_v5  ;;  %v4447_v24 = vld [vmem:[%s5419_s1 + $0x8e0] sm:$0xff]  }
  0xeb   : > { %3320 = vmatprep.mubr.bf16.mxu1 %v906_v9 }
  0xec   : > { %4071 = vmatpush3.bf16.msra.mxu0 %v4403_v25  ;;  %v4448_v25 = vld [vmem:[%s5419_s1 + $0x820] sm:$0xff]  }
  0xed   : > { %4093 = vmatpush3.bf16.msra.mxu1 %v4404_v26  ;;  %4072 = vmatprep.subr.bf16.mxu0 %v4405_v27  ;;  %v4449_v26 = vld [vmem:[%s5419_s1 + $0x8a0] sm:$0xff]   ;;  %v4450_v27 = vld [vmem:[%s5419_s1 + $0x868] sm:$0xff]  }
  0xee   : > { %4094 = vmatprep.subr.bf16.mxu1 %v4406_v28  ;;  %v4451_v28 = vld [vmem:[%s5419_s1 + $0x8e8] sm:$0xff]  }
  0xf0   : > { %4073 = vmatpush3.bf16.msra.mxu0 %v4407_v29  ;;  %v4452_v29 = vld [vmem:[%s5419_s1 + $0x828] sm:$0xff]  }
  0xf1   : > { %4095 = vmatpush3.bf16.msra.mxu1 %v4408_v30  ;;  %4074 = vmatprep.subr.bf16.mxu0 %v4409_v31  ;;  %v4453_v30 = vld [vmem:[%s5419_s1 + $0x8a8] sm:$0xff]   ;;  %v4454_v31 = vld [vmem:[%s5419_s1 + $0x870] sm:$0xff]  }
  0xf2   : > { %4096 = vmatprep.subr.bf16.mxu1 %v4410_v32  ;;  %v4455_v32 = vld [vmem:[%s5419_s1 + $0x8f0] sm:$0xff]  }
  0xf4   : > { %4075 = vmatpush3.bf16.msra.mxu0 %v4411_v33 }
  0xf5   : > { %4097 = vmatpush3.bf16.msra.mxu1 %v4412_v34  ;;  %4076 = vmatprep.subr.bf16.mxu0 %v4413_v35  ;;  %v4456_v35 = vld [vmem:[%s5419_s1 + $0x830] sm:$0xff]  }
  0xf6   : > { %4098 = vmatprep.subr.bf16.mxu1 %v4414_v36  ;;  %v4457_v36 = vld [vmem:[%s5419_s1 + $0x8b0] sm:$0xff]  }
  0xf8   : > { %4077 = vmatpush3.bf16.msra.mxu0 %v4415_v37 }
  0xf9   : > { %4099 = vmatpush3.bf16.msra.mxu1 %v4416_v38  ;;  %4078 = vmatprep.subr.bf16.mxu0 %v4417_v39 }
  0xfa   : > { %4100 = vmatprep.subr.bf16.mxu1 %v4418_v40  ;;  %v3776_v47 = vpop.f32.mrb[0].mxu0 }
  0xfb   : > { %v3798_v48 = vpop.f32.mrb[0].mxu1  ;;  %v3777_v51 = vpop.f32.mrb[1].mxu0 }
  0xfc   : > { %v3799_v52 = vpop.f32.mrb[1].mxu1  ;;  %v3778_v53 = vadd.f32 %v3777_v51, %v3776_v47  ;;  %v3779_v55 = vpop.f32.mrb[2].mxu0  ;;  %4079 = vmatpush3.bf16.msra.mxu0 %v4419_v42  ;;  %v4459_v47 = vld [vmem:[%s5419_s1 + $0x8f8] sm:$0xff]  }
  0xfd   : > { %v3800_v54 = vadd.f32 %v3799_v52, %v3798_v48  ;;  %v3801_v56 = vpop.f32.mrb[2].mxu1  ;;  %4101 = vmatpush3.bf16.msra.mxu1 %v4420_v43  ;;  %v3780_v57 = vpop.f32.mrb[3].mxu0  ;;  %4080 = vmatprep.subr.bf16.mxu0 %v4421_v44  ;;  %v4460_v51 = vld [vmem:[%s5419_s1 + $0x838] sm:$0xff]  }
  0xfe   : > { %v3802_v58 = vpop.f32.mrb[3].mxu1  ;;  %4102 = vmatprep.subr.bf16.mxu1 %v4422_v46  ;;  %v2723_v61 = vadd.f32 %v3778_v53, %v3469_v45  ;;  %v4458_v46 = vld [vmem:[%s5419_s1 + $0x878] sm:$0xff]  }
  0xff   : > { %v4461_v52 = vld [vmem:[%s5419_s1 + $0x8b8] sm:$0xff]  }
 0x100   : > { %v5308_v3 = vadd.f32 %v3800_v54, %v2723_v61  ;;  %4081 = vmatpush3.bf16.msra.mxu0 %v4423_v49  ;;  %v178_v49 = vld [vmem:[%s4600_s27 + $0x40] sm:$0xff]  ;;  %s3468_s27 = sshll.u32 %s5423_s13, 2 }
 0x101   : > { %4103 = vmatpush3.bf16.msra.mxu1 %v4424_v50  ;;  %4082 = vmatprep.subr.bf16.mxu0 %v4425_v59  ;;  %v914_v53 = vrot.slane %v178_v49, %v4615_v41  ;;  %v907_v54 = vcombine.high %v178_v49, %v178_v49  ;;  %s168_s19 = scalar_lea.vmem %s5421_s3, %s3468_s27 }
 0x102   : > { %4104 = vmatprep.subr.bf16.mxu1 %v4426_v60 }
 0x103   : > { %v922_v55 = vcombine.high %v914_v53, %v914_v53  ;;  %v921_v56 = vrot.slane %v907_v54, %v4615_v41 }
 0x104   : > { %4083 = vmatpush3.bf16.msra.mxu0 %v4427_v62 }
 0x105   : > { %4105 = vmatpush3.bf16.msra.mxu1 %v4428_v0  ;;  %4112 = vmatprep.subr.bf16.mxu0 %v4430_v4  ;;  %v923_v57 = vcombine.high %v921_v56, %v921_v56 }
 0x106   : > { %4134 = vmatprep.subr.bf16.mxu1 %v4431_v7 }
 0x107   : > { %3281 = vmatmul.mubr.bf16.vlgmr.msra.gmra.mrb[28].mxu0 %v897_v1 }
 0x108   : > { %3321 = vmatmul.mubr.bf16.vlgmr.msra.gmra.mrb[28].mxu1 %v904_v6  ;;  %4113 = vmatpush3.bf16.msra.mxu0 %v4432_v8 }
 0x109   : > { %4135 = vmatpush3.bf16.msra.mxu1 %v4433_v10  ;;  %4114 = vmatprep.subr.bf16.mxu0 %v4434_v11 }
 0x10a   : > { %4136 = vmatprep.subr.bf16.mxu1 %v4435_v12  ;;  %3360 = vmatprep.mubr.bf16.mxu0 %v922_v55 }
 0x10b   : > { %3400 = vmatprep.mubr.bf16.mxu1 %v923_v57 }
 0x10c   : > { %4115 = vmatpush3.bf16.msra.mxu0 %v4436_v13 }
 0x10d   : > { %4137 = vmatpush3.bf16.msra.mxu1 %v4437_v14  ;;  %4116 = vmatprep.subr.bf16.mxu0 %v4438_v15 }
 0x10e   : > { %4138 = vmatprep.subr.bf16.mxu1 %v4439_v16 }
 0x110   : > { %4117 = vmatpush3.bf16.msra.mxu0 %v4440_v17 }
 0x111   : > { %4139 = vmatpush3.bf16.msra.mxu1 %v4441_v18  ;;  %4118 = vmatprep.subr.bf16.mxu0 %v4442_v19 }
 0x112   : > { %4140 = vmatprep.subr.bf16.mxu1 %v4443_v20 }
 0x114   : > { %4119 = vmatpush3.bf16.msra.mxu0 %v4444_v21 }
 0x115   : > { %4141 = vmatpush3.bf16.msra.mxu1 %v4445_v22  ;;  %4120 = vmatprep.subr.bf16.mxu0 %v4446_v23 }
 0x116   : > { %4142 = vmatprep.subr.bf16.mxu1 %v4447_v24 }
 0x118   : > { %4121 = vmatpush3.bf16.msra.mxu0 %v4448_v25 }
 0x119   : > { %4143 = vmatpush3.bf16.msra.mxu1 %v4449_v26  ;;  %4122 = vmatprep.subr.bf16.mxu0 %v4450_v27 }
 0x11a   : > { %4144 = vmatprep.subr.bf16.mxu1 %v4451_v28  ;;  %v3820_v33 = vpop.f32.mrb[4].mxu0 }
 0x11b   : > { %v3842_v34 = vpop.f32.mrb[4].mxu1  ;;  %v3821_v37 = vpop.f32.mrb[5].mxu0 }
 0x11c   : > { %v3843_v38 = vpop.f32.mrb[5].mxu1  ;;  %v3822_v39 = vadd.f32 %v3821_v37, %v3820_v33  ;;  %v3823_v42 = vpop.f32.mrb[6].mxu0  ;;  %4123 = vmatpush3.bf16.msra.mxu0 %v4452_v29 }
 0x11d   : > { %v3844_v40 = vadd.f32 %v3843_v38, %v3842_v34  ;;  %v3845_v43 = vpop.f32.mrb[6].mxu1  ;;  %4145 = vmatpush3.bf16.msra.mxu1 %v4453_v30  ;;  %v3824_v44 = vpop.f32.mrb[7].mxu0  ;;  %4124 = vmatprep.subr.bf16.mxu0 %v4454_v31 }
 0x11e   : > { %v3846_v45 = vpop.f32.mrb[7].mxu1  ;;  %4146 = vmatprep.subr.bf16.mxu1 %v4455_v32  ;;  %v2803_v48 = vadd.f32 %v3822_v39, %v5308_v3 }
 0x120   : > { %v2843_v50 = vadd.f32 %v3844_v40, %v2803_v48  ;;  %4125 = vmatpush3.bf16.msra.mxu0 %v4456_v35 }
 0x121   : > { %4147 = vmatpush3.bf16.msra.mxu1 %v4457_v36  ;;  %4126 = vmatprep.subr.bf16.mxu0 %v4458_v46 }
 0x122   : > { %4148 = vmatprep.subr.bf16.mxu1 %v4459_v47 }
 0x124   : > { %4127 = vmatpush3.bf16.msra.mxu0 %v4460_v51 }
 0x125   : > { %4149 = vmatpush3.bf16.msra.mxu1 %v4461_v52 }
 0x127   : > { %3361 = vmatmul.mubr.bf16.vlgmr.msra.gmra.mrb[32].mxu0 %v914_v53 }
 0x128   : > { %3401 = vmatmul.mubr.bf16.vlgmr.msra.gmra.mrb[32].mxu1 %v921_v56 }
 0x13a   : > { %v3864_v58 = vpop.f32.mrb[8].mxu0 }
 0x13b   : > { %v3886_v59 = vpop.f32.mrb[8].mxu1  ;;  %v3865_v60 = vpop.f32.mrb[9].mxu0 }
 0x13c   : > { %v3887_v61 = vpop.f32.mrb[9].mxu1  ;;  %v3866_v62 = vadd.f32 %v3865_v60, %v3864_v58  ;;  %v3867_v0 = vpop.f32.mrb[10].mxu0 }
 0x13d   : > { %v3888_v63 = vadd.f32 %v3887_v61, %v3886_v59  ;;  %v3889_v1 = vpop.f32.mrb[10].mxu1  ;;  %v3868_v2 = vpop.f32.mrb[11].mxu0 }
 0x13e   : > { %v3890_v3 = vpop.f32.mrb[11].mxu1  ;;  %v2883_v4 = vadd.f32 %v3866_v62, %v2843_v50 }
 0x140   : > { %v2923_v5 = vadd.f32 %v3888_v63, %v2883_v4 }
 0x15a   : > { %v3908_v41 = vpop.f32.mrb[12].mxu0 }
 0x15b   : > { %v3930_v6 = vpop.f32.mrb[12].mxu1  ;;  %v3909_v7 = vpop.f32.mrb[13].mxu0 }
 0x15c   : > { %v3931_v8 = vpop.f32.mrb[13].mxu1  ;;  %v3910_v9 = vadd.f32 %v3909_v7, %v3908_v41  ;;  %v3911_v11 = vpop.f32.mrb[14].mxu0 }
 0x15d   : > { %v3932_v10 = vadd.f32 %v3931_v8, %v3930_v6  ;;  %v3933_v12 = vpop.f32.mrb[14].mxu1  ;;  %v3912_v13 = vpop.f32.mrb[15].mxu0 }
 0x15e   : > { %v3934_v14 = vpop.f32.mrb[15].mxu1  ;;  %v2963_v15 = vadd.f32 %v3910_v9, %v2923_v5 }
 0x160   : > { %v3003_v16 = vadd.f32 %v3932_v10, %v2963_v15 }
 0x17a   : > { %v3952_v17 = vpop.f32.mrb[16].mxu0 }
 0x17b   : > { %v3974_v18 = vpop.f32.mrb[16].mxu1  ;;  %v3953_v19 = vpop.f32.mrb[17].mxu0 }
 0x17c   : > { %v3975_v20 = vpop.f32.mrb[17].mxu1  ;;  %v3954_v21 = vadd.f32 %v3953_v19, %v3952_v17  ;;  %v3955_v23 = vpop.f32.mrb[18].mxu0 }
 0x17d   : > { %v3976_v22 = vadd.f32 %v3975_v20, %v3974_v18  ;;  %v3977_v24 = vpop.f32.mrb[18].mxu1  ;;  %v3956_v25 = vpop.f32.mrb[19].mxu0 }
 0x17e   : > { %v3978_v26 = vpop.f32.mrb[19].mxu1  ;;  %v3043_v27 = vadd.f32 %v3954_v21, %v3003_v16 }
 0x180   : > { %v3083_v28 = vadd.f32 %v3976_v22, %v3043_v27 }
 0x19a   : > { %v3996_v29 = vpop.f32.mrb[20].mxu0 }
 0x19b   : > { %v4018_v30 = vpop.f32.mrb[20].mxu1  ;;  %v3997_v31 = vpop.f32.mrb[21].mxu0 }
 0x19c   : > { %v4019_v32 = vpop.f32.mrb[21].mxu1  ;;  %v3998_v33 = vadd.f32 %v3997_v31, %v3996_v29  ;;  %v3999_v35 = vpop.f32.mrb[22].mxu0 }
 0x19d   : > { %v4020_v34 = vadd.f32 %v4019_v32, %v4018_v30  ;;  %v4021_v36 = vpop.f32.mrb[22].mxu1  ;;  %v4000_v37 = vpop.f32.mrb[23].mxu0 }
 0x19e   : > { %v4022_v38 = vpop.f32.mrb[23].mxu1  ;;  %v3123_v39 = vadd.f32 %v3998_v33, %v3083_v28 }
 0x1a0   : > { %v3163_v40 = vadd.f32 %v4020_v34, %v3123_v39 }
 0x1ba   : > { %v4040_v42 = vpop.f32.mrb[24].mxu0 }
 0x1bb   : > { %v4062_v43 = vpop.f32.mrb[24].mxu1  ;;  %v4041_v44 = vpop.f32.mrb[25].mxu0 }
 0x1bc   : > { %v4063_v45 = vpop.f32.mrb[25].mxu1  ;;  %v4042_v46 = vadd.f32 %v4041_v44, %v4040_v42  ;;  %v4043_v48 = vpop.f32.mrb[26].mxu0 }
 0x1bd   : > { %v4064_v47 = vadd.f32 %v4063_v45, %v4062_v43  ;;  %v4065_v49 = vpop.f32.mrb[26].mxu1  ;;  %v4044_v50 = vpop.f32.mrb[27].mxu0 }
 0x1be   : > { %v4066_v51 = vpop.f32.mrb[27].mxu1  ;;  %v3203_v52 = vadd.f32 %v4042_v46, %v3163_v40 }
 0x1c0   : > { %v3243_v53 = vadd.f32 %v4064_v47, %v3203_v52 }
 0x1da   : > { %v4084_v54 = vpop.f32.mrb[28].mxu0 }
 0x1db   : > { %v4106_v55 = vpop.f32.mrb[28].mxu1  ;;  %v4085_v56 = vpop.f32.mrb[29].mxu0 }
 0x1dc   : > { %v4107_v57 = vpop.f32.mrb[29].mxu1  ;;  %v4086_v58 = vadd.f32 %v4085_v56, %v4084_v54  ;;  %v4087_v60 = vpop.f32.mrb[30].mxu0 }
 0x1dd   : > { %v4108_v59 = vadd.f32 %v4107_v57, %v4106_v55  ;;  %v4109_v61 = vpop.f32.mrb[30].mxu1  ;;  %v4088_v62 = vpop.f32.mrb[31].mxu0 }
 0x1de   : > { %v4110_v63 = vpop.f32.mrb[31].mxu1  ;;  %v3283_v0 = vadd.f32 %v4086_v58, %v3243_v53 }
 0x1e0   : > { %v3323_v1 = vadd.f32 %v4108_v59, %v3283_v0 }
 0x1fa   : > { %v4128_v2 = vpop.f32.mrb[32].mxu0 }
 0x1fb   : > { %v4150_v3 = vpop.f32.mrb[32].mxu1  ;;  %v4129_v4 = vpop.f32.mrb[33].mxu0 }
 0x1fc   : > { %v4151_v5 = vpop.f32.mrb[33].mxu1  ;;  %v4130_v41 = vadd.f32 %v4129_v4, %v4128_v2  ;;  %v4131_v7 = vpop.f32.mrb[34].mxu0 }
 0x1fd   : > { %v4152_v6 = vadd.f32 %v4151_v5, %v4150_v3  ;;  %v4153_v8 = vpop.f32.mrb[34].mxu1  ;;  %v4132_v9 = vpop.f32.mrb[35].mxu0 }
 0x1fe   : > { %v4154_v10 = vpop.f32.mrb[35].mxu1  ;;  %v3363_v11 = vadd.f32 %v4130_v41, %v3323_v1 }
 0x200   : > { %v3403_v12 = vadd.f32 %v4152_v6, %v3363_v11 }
 0x202   : > { %3408 = vst [vmem:[%s168_s19] sm:$0xf] %v3403_v12 }
 0x203 PF: > { %s13_s12 = sadd.s32 1, %s4469_s12  }
 0x204   : > { %p10_p4 = scmp.ge.s32.totalorder %s13_s12, 4  }
 0x206   :  { %12 = sbr.rel (!%p10_p4) target bundleno = 1 (0x1), region = 62 }

</bundles_post_ra>
